<compile_context>
chip_gen: v7x
topology: tpu7x:2x2x1
jax: 0.10.0
libtpu: 0.0.40
codegen_flags: <defaults>
</compile_context>

<pallas_src>
import jax
import jax.numpy as jnp
from jax.experimental import pallas as pl
from jax.experimental.pallas import tpu as pltpu

EPS = 1e-5
MXU_DTYPE = jnp.bfloat16        # matmul operand dtype (accumulation stays f32)
SLAB_LANES = 256                # target contraction depth per tap-group matmul


def _round_up(x, m):
    return ((x + m - 1) // m) * m


def _choose_tile(L):
    """Largest row tile <= 512 that divides L (keeps BlockSpecs (8,128)-legal)."""
    for tl in (512, 256, 128, 64, 32, 16, 8):
        if L % tl == 0:
            return tl
    return L


# ----------------------------------------------------------------------------
# BatchNorm folding + combined-weight construction (hoisted out of the forward
# path: run once, results passed to the kernels as constants).
# ----------------------------------------------------------------------------
def _fold_bn(bn):
    gamma, beta, mean, var = bn
    scale = gamma / jnp.sqrt(var + EPS)
    shift = beta - mean * scale
    return scale, shift


def fold_module_params(p):
    convs = p["convs"]
    Kmax = max(int(w.shape[0]) for w in convs)
    assert all(int(w.shape[0]) % 2 == 1 for w in convs), \
        "branch kernel sizes must be odd for symmetric 'same' padding"
    C_mid = int(convs[0].shape[1])
    nf = int(convs[0].shape[2])
    C4 = 4 * nf
    Cin = int(p["maxconv"].shape[1])

    # Tap-group size: G taps -> G*C_mid-deep contraction (target 256 lanes).
    G = max(1, min(SLAB_LANES // max(C_mid, 1), Kmax))
    Kp = _round_up(Kmax, G)                     # taps zero-padded to multiple of G

    scale, shift = _fold_bn(p["bn"])

    # Combined, BN-folded branch-conv weight: taps centre-aligned inside Kmax,
    # extra taps [Kmax, Kp) are zero rows (so every group matmul K == G*C_mid).
    wall = jnp.zeros((Kp, C_mid, C4), jnp.float32)
    for i, w in enumerate(convs):               # w: (K_i, C_mid, nf)
        K_i = int(w.shape[0])
        off = (Kmax - K_i) // 2
        wall = wall.at[off:off + K_i, :, i * nf:(i + 1) * nf].set(
            w * scale[i * nf:(i + 1) * nf])
    wall = wall.reshape(Kp * C_mid, C4).astype(MXU_DTYPE)

    # MaxPool -> 1x1 conv weight folded into the last nf output columns.
    wmax = jnp.zeros((Cin, C4), jnp.float32)
    wmax = wmax.at[:, 3 * nf:].set(p["maxconv"][0] * scale[3 * nf:])
    wmax = wmax.astype(MXU_DTYPE)

    wb = None if p["bottleneck"] is None else p["bottleneck"][0].astype(MXU_DTYPE)

    return {"wb": wb, "wall": wall, "wmax": wmax,
            "bias": shift.reshape(1, C4).astype(jnp.float32),
            "C_mid": C_mid, "nf": nf, "Kmax": Kmax, "Kp": Kp, "G": G}


def fold_block_params(p):
    sscale, sshift = _fold_bn(p["shortcut_bn"])
    if p["shortcut_conv"] is not None:          # ConvBlock(ni, nf*4, ks=1) + BN
        sc_mode = "conv"
        scw = (p["shortcut_conv"][0] * sscale).astype(MXU_DTYPE)   # (Cres, C4)
        scb = sshift.reshape(1, -1).astype(jnp.float32)
    else:                                       # BatchNorm shortcut
        sc_mode = "affine"
        scw = sscale.reshape(1, -1).astype(jnp.float32)
        scb = sshift.reshape(1, -1).astype(jnp.float32)
    return {"modules": [fold_module_params(m) for m in p["modules"]],
            "sc_mode": sc_mode, "scw": scw, "scb": scb}


def fold_inception_time_params(params):
    return {"block1": fold_block_params(params["block1"]),
            "block2": fold_block_params(params["block2"]),
            "fc_w": params["fc_w"].astype(jnp.float32),
            "fc_b": params["fc_b"].astype(jnp.float32)}


# ----------------------------------------------------------------------------
# Fused InceptionModule kernel (bottleneck + 3 branch convs + maxpool-conv +
# concat + BN + ReLU, optionally + block shortcut + add + final ReLU).
# ----------------------------------------------------------------------------
def _make_module_kernel(L, Cin, C_mid, C4, TL, G, n_groups, base_off,
                        PAD_L, PAD_R, has_bottleneck, sc_mode):
    GC = G * C_mid

    def kernel(*refs):
        it = iter(refs)
        x_ref = next(it)                                   # (L, Cin) resident per b
        res_ref = next(it) if sc_mode is not None else None   # (TL, Cres)
        wb_ref = next(it) if has_bottleneck else None      # (Cin, C_mid) bf16
        wall_ref = next(it)                                # (Kp*C_mid, C4) bf16
        wmax_ref = next(it)                                # (Cin, C4) bf16
        bias_ref = next(it)                                # (1, C4) f32
        scw_ref = scb_ref = None
        if sc_mode is not None:
            scw_ref = next(it)
            scb_ref = next(it)
        o_ref = next(it)                                   # (TL, C4)
        ypad_ref = next(it)                                # (PAD_L+L+PAD_R, C_mid) f32
        pool_ref = next(it)                                # (L, Cin) f32

        t = pl.program_id(1)

        # Once per batch element (t == 0, inner grid axis is sequential):
        # bottleneck conv over full L into the padded scratch + maxpool over x.
        @pl.when(t == 0)
        def _per_batch_prep():
            x = x_ref[...]                                 # (L, Cin)
            if has_bottleneck:
                y = jnp.dot(x.astype(MXU_DTYPE), wb_ref[...],
                            preferred_element_type=jnp.float32)
            else:
                y = x.astype(jnp.float32)
            # Zero only the halo rows (not the whole buffer).
            ypad_ref[0:PAD_L, :] = jnp.zeros((PAD_L, C_mid), jnp.float32)
            ypad_ref[PAD_L + L:, :] = jnp.zeros((PAD_R, C_mid), jnp.float32)
            # PAD_L is a multiple of 32 -> sublane-aligned interior store.
            ypad_ref[PAD_L:PAD_L + L, :] = y

            # MaxPool1d(k=3, s=1, p=1): neighbours via sublane shifts (XLU);
            # boundary rows fall back to the centre value (== -inf padding).
            left = jnp.concatenate([x[:1], x[:L - 1]], axis=0)
            right = jnp.concatenate([x[1:], x[L - 1:]], axis=0)
            pool_ref[...] = jnp.maximum(jnp.maximum(left, x), right)

        l0 = t * TL
        if TL % 8 == 0:
            l0 = pl.multiple_of(l0, 8)

        # MaxPool -> 1x1 conv branch (weight already placed in last nf columns).
        pooled = pool_ref[pl.ds(l0, TL), :]                # (TL, Cin)
        acc = jnp.dot(pooled.astype(MXU_DTYPE), wmax_ref[...],
                      preferred_element_type=jnp.float32)  # (TL, C4) f32

        # 3 branch convs: grouped-tap im2col matmuls (K = G*C_mid per group).
        base = l0 + base_off
        for g in range(n_groups):
            pieces = [ypad_ref[pl.ds(base + g * G + j, TL), :] for j in range(G)]
            slab = jnp.concatenate(pieces, axis=-1)        # (TL, G*C_mid) lane-dense
            acc = acc + jnp.dot(slab.astype(MXU_DTYPE),
                                wall_ref[g * GC:(g + 1) * GC, :],
                                preferred_element_type=jnp.float32)

        m = jnp.maximum(acc + bias_ref[...], 0.0)          # folded BN + ReLU

        # Fused block residual shortcut + add + final ReLU (third module only).
        if sc_mode == "conv":                              # Conv1x1 + BN (folded)
            r = res_ref[...]
            sc = jnp.dot(r.astype(MXU_DTYPE), scw_ref[...],
                         preferred_element_type=jnp.float32) + scb_ref[...]
            m = jnp.maximum(m + sc, 0.0)
        elif sc_mode == "affine":                          # BatchNorm shortcut (folded)
            r = res_ref[...].astype(jnp.float32)
            m = jnp.maximum(m + r * scw_ref[...] + scb_ref[...], 0.0)

        o_ref[...] = m.astype(o_ref.dtype)

    return kernel


def inception_module_apply(x_in, fp, res=None, sc_mode=None, scw=None, scb=None):
    """One fused Pallas call: InceptionModule (+ optional block shortcut/add/ReLU)."""
    B, L, Cin = map(int, x_in.shape)
    C_mid, nf, Kmax, Kp, G = fp["C_mid"], fp["nf"], fp["Kmax"], fp["Kp"], fp["G"]
    C4 = 4 * nf
    has_bottleneck = fp["wb"] is not None

    pad = (Kmax - 1) // 2
    PAD_L = _round_up(max(pad, 1), 32)          # aligned left halo (f32/bf16/i8 safe)
    PAD_R = _round_up(max(Kp - 1 - pad, 1), 8)
    base_off = PAD_L - pad
    n_groups = Kp // G

    TL = _choose_tile(L)
    n_t = L // TL

    kernel = _make_module_kernel(L, Cin, C_mid, C4, TL, G, n_groups, base_off,
                                 PAD_L, PAD_R, has_bottleneck, sc_mode)

    inputs = [x_in]
    # Full-length x stays resident across the inner (L-tile) axis of each b.
    in_specs = [pl.BlockSpec((None, L, Cin), lambda b, t: (b, 0, 0))]
    Cres = 0
    if sc_mode is not None:
        Cres = int(res.shape[2])
        inputs.append(res)
        in_specs.append(pl.BlockSpec((None, TL, Cres), lambda b, t: (b, t, 0)))
    if has_bottleneck:
        inputs.append(fp["wb"])
        in_specs.append(pl.BlockSpec((Cin, C_mid), lambda b, t: (0, 0)))
    inputs += [fp["wall"], fp["wmax"], fp["bias"]]
    in_specs += [pl.BlockSpec((Kp * C_mid, C4), lambda b, t: (0, 0)),
                 pl.BlockSpec((Cin, C4), lambda b, t: (0, 0)),
                 pl.BlockSpec((1, C4), lambda b, t: (0, 0))]
    if sc_mode == "conv":
        inputs += [scw, scb]
        in_specs += [pl.BlockSpec((Cres, C4), lambda b, t: (0, 0)),
                     pl.BlockSpec((1, C4), lambda b, t: (0, 0))]
    elif sc_mode == "affine":
        inputs += [scw, scb]
        in_specs += [pl.BlockSpec((1, C4), lambda b, t: (0, 0)),
                     pl.BlockSpec((1, C4), lambda b, t: (0, 0))]

    scratch = [pltpu.VMEM((PAD_L + L + PAD_R, C_mid), jnp.float32),   # padded bottleneck
               pltpu.VMEM((L, Cin), jnp.float32)]                      # maxpool result

    # Rough per-step VMEM budget; only raise the scoped limit when needed and
    # keep it under v7x's 64 MiB physical VMEM.
    est = (2 * L * Cin * 4
           + 2 * TL * C4 * 4
           + (2 * TL * Cres * 4 if sc_mode is not None else 0)
           + (PAD_L + L + PAD_R) * C_mid * 4
           + L * Cin * 4
           + 2 * (Kp * C_mid + 2 * Cin + 2) * C4 * 2)
    cp_kwargs = {"dimension_semantics": ("parallel", "arbitrary")}
    if est > 12 * 1024 * 1024:
        cp_kwargs["vmem_limit_bytes"] = int(min(48 * 1024 * 1024, 2 * est))

    return pl.pallas_call(
        kernel,
        out_shape=jax.ShapeDtypeStruct((B, L, C4), x_in.dtype),
        grid=(B, n_t),
        in_specs=in_specs,
        out_specs=pl.BlockSpec((None, TL, C4), lambda b, t: (b, t, 0)),
        scratch_shapes=scratch,
        compiler_params=pltpu.CompilerParams(**cp_kwargs),
    )(*inputs)


# ----------------------------------------------------------------------------
# Head: GAP over time -> Linear -> softmax (whole batch, one call; tiny).
# ----------------------------------------------------------------------------
def _head_kernel(x_ref, w_ref, b_ref, o_ref):
    x = x_ref[...]                                         # (B, L, C)
    mean = jnp.mean(x, axis=1)                             # (B, C)
    logits = jnp.dot(mean, w_ref[...],
                     preferred_element_type=jnp.float32) + b_ref[...]
    mx = jnp.max(logits, axis=-1, keepdims=True)
    e = jnp.exp(logits - mx)
    o_ref[...] = (e / jnp.sum(e, axis=-1, keepdims=True)).astype(o_ref.dtype)


def head(x, w, b):
    B, L, C = map(int, x.shape)
    O = int(w.shape[1])
    return pl.pallas_call(
        _head_kernel,
        out_shape=jax.ShapeDtypeStruct((B, O), x.dtype),
        grid=(1,),
        in_specs=[pl.BlockSpec((B, L, C), lambda i: (0, 0, 0)),
                  pl.BlockSpec((C, O), lambda i: (0, 0)),
                  pl.BlockSpec((1, O), lambda i: (0, 0))],
        out_specs=pl.BlockSpec((B, O), lambda i: (0, 0)),
        compiler_params=pltpu.CompilerParams(dimension_semantics=("arbitrary",)),
    )(x, w, b)


# ----------------------------------------------------------------------------
# Model glue (mirrors the PyTorch module structure, uses pre-folded params).
# ----------------------------------------------------------------------------
def inception_block_apply(x, fbp):
    res = x
    x = inception_module_apply(x, fbp["modules"][0])
    x = inception_module_apply(x, fbp["modules"][1])
    return inception_module_apply(x, fbp["modules"][2], res=res,
                                  sc_mode=fbp["sc_mode"],
                                  scw=fbp["scw"], scb=fbp["scb"])


def inception_time_apply(x, fparams):
    x = inception_block_apply(x, fparams["block1"])
    x = inception_block_apply(x, fparams["block2"])
    return head(x, fparams["fc_w"], fparams["fc_b"])


# ----------------------------------------------------------------------------
# Deterministic parameter initialization (synthetic, matches module shapes).
# ----------------------------------------------------------------------------
def init_conv(key, k, cin, cout):
    # weight layout (K, Cin, Cout); cross-correlation semantics match Conv1d.
    return (jax.random.normal(key, (k, cin, cout), jnp.float32)
            / jnp.sqrt(float(k * cin)))


def init_bn(c):
    # gamma, beta, running_mean, running_var
    return (jnp.ones((c,), jnp.float32), jnp.zeros((c,), jnp.float32),
            jnp.zeros((c,), jnp.float32), jnp.ones((c,), jnp.float32))


def init_module(key, ni, nf, ks=40, bottleneck=True):
    kss = [ks // 2 ** i for i in range(3)]
    kss = [k if k % 2 != 0 else k - 1 for k in kss]        # -> [39, 19, 9]
    bottleneck = bottleneck if ni > 1 else False
    keys = jax.random.split(key, 5)
    p = {}
    if bottleneck:
        p["bottleneck"] = init_conv(keys[0], 1, ni, nf)
        cin = nf
    else:
        p["bottleneck"] = None
        cin = ni
    p["convs"] = [init_conv(keys[1 + i], k, cin, nf) for i, k in enumerate(kss)]
    p["maxconv"] = init_conv(keys[4], 1, ni, nf)
    p["bn"] = init_bn(nf * 4)
    return p


def init_block(key, ni, nf):
    keys = jax.random.split(key, 4)
    p = {"modules": [init_module(keys[0], ni, nf),
                     init_module(keys[1], nf * 4, nf),
                     init_module(keys[2], nf * 4, nf)]}
    if ni == nf * 4:
        p["shortcut_conv"] = None
        p["shortcut_bn"] = init_bn(ni)
    else:
        p["shortcut_conv"] = init_conv(keys[3], 1, ni, nf * 4)
        p["shortcut_bn"] = init_bn(nf * 4)
    return p


def init_inception_time(key, c_in, c_out, nf):
    k1, k2, k3 = jax.random.split(key, 3)
    return {
        "block1": init_block(k1, c_in, nf),
        "block2": init_block(k2, nf * 4, nf),
        "fc_w": jax.random.normal(k3, (nf * 4, c_out), jnp.float32) * 0.1,
        "fc_b": jnp.zeros((1, c_out), jnp.float32),
    }


# ----------------------------------------------------------------------------
if __name__ == "__main__":
    # nf=32 (PyTorch default) makes the module output 4*nf = 128 lanes wide.
    B, C_IN, L, NF, C_OUT = 2, 4, 16, 32, 6

    key = jax.random.PRNGKey(0)
    kp, kx = jax.random.split(key)
    params = init_inception_time(kp, C_IN, C_OUT, NF)
    # BN folding / combined weights computed once, outside the forward path.
    folded = fold_inception_time_params(params)
    folded = jax.tree_util.tree_map(
        lambda a: jax.block_until_ready(a) if isinstance(a, jax.Array) else a, folded)

    # PyTorch-style input: (B, C_in, L); transpose to kernel layout (B, L, C).
    x_ncl = jax.random.normal(kx, (B, C_IN, L), jnp.float32)
    x = jnp.transpose(x_ncl, (0, 2, 1))

    fwd = jax.jit(lambda inp: inception_time_apply(inp, folded))
    out = jax.block_until_ready(fwd(x))                    # (B, C_OUT) softmax probs
    assert out.shape == (B, C_OUT)
    assert bool(jnp.all(jnp.isfinite(out)))
    print("KERNEL_OK")
</pallas_src>

<mosaic_0001>
module attributes {stable_mosaic.version = 11 : i64} {
  func.func @kernel(%arg0: i32, %arg1: i32, %arg2: memref<1x16x128xf32, #tpu.memory_space<vmem>>, %arg3: memref<128x32xbf16, #tpu.memory_space<vmem>>, %arg4: memref<1280x128xbf16, #tpu.memory_space<vmem>>, %arg5: memref<128x128xbf16, #tpu.memory_space<vmem>>, %arg6: memref<1x128xf32, #tpu.memory_space<vmem>>, %arg7: memref<1x16x128xf32, #tpu.memory_space<vmem>>, %arg8: memref<72x32xf32, #tpu.memory_space<vmem>>, %arg9: memref<16x128xf32, #tpu.memory_space<vmem>>) attributes {dimension_semantics = [#tpu.dimension_semantics<parallel>, #tpu.dimension_semantics<arbitrary>], iteration_bounds = array<i64: 2, 1>, scalar_prefetch = 0 : i64, scratch_operands = 2 : i64, tpu.core_type = #tpu.core_type<tc>, window_params = [{transform_indices = @transform_0, window_bounds = array<i64: 1, 16, 128>}, {pipeline_mode = #tpu.pipeline_mode<synchronous>, transform_indices = @transform_1, window_bounds = array<i64: 128, 32>}, {pipeline_mode = #tpu.pipeline_mode<synchronous>, transform_indices = @transform_2, window_bounds = array<i64: 1280, 128>}, {pipeline_mode = #tpu.pipeline_mode<synchronous>, transform_indices = @transform_3, window_bounds = array<i64: 128, 128>}, {pipeline_mode = #tpu.pipeline_mode<synchronous>, transform_indices = @transform_4, window_bounds = array<i64: 1, 128>}, {transform_indices = @transform_5, window_bounds = array<i64: 1, 16, 128>}]} {
    %c0_i32 = arith.constant 0 : i32
    %0 = arith.cmpi eq, %arg1, %c0_i32 : i32
    %1 = arith.extui %0 : i1 to i32
    %c0_i32_0 = arith.constant 0 : i32
    %2 = arith.cmpi ne, %1, %c0_i32_0 : i32
    scf.if %2 {
      %c0_130 = arith.constant 0 : index
      %c0_131 = arith.constant 0 : index
      %c0_132 = arith.constant 0 : index
      %204 = vector.load %arg2[%c0_130, %c0_131, %c0_132] : memref<1x16x128xf32, #tpu.memory_space<vmem>>, vector<1x16x128xf32>
      %205 = vector.shape_cast %204 : vector<1x16x128xf32> to vector<16x128xf32>
      %206 = arith.truncf %205 : vector<16x128xf32> to vector<16x128xbf16>
      %c0_133 = arith.constant 0 : index
      %c0_134 = arith.constant 0 : index
      %207 = vector.load %arg3[%c0_133, %c0_134] : memref<128x32xbf16, #tpu.memory_space<vmem>>, vector<128x32xbf16>
      %cst_135 = arith.constant dense<0.000000e+00> : vector<16x32xf32>
      %208 = tpu.matmul %206, %207, %cst_135 {dimension_numbers = #tpu.dot_dimension_numbers<[1], [0], [0], [1], [0, 0, 1, 1], [], []>} : vector<16x128xbf16>, vector<128x32xbf16>, vector<16x32xf32> -> vector<16x32xf32>
      %cst_136 = arith.constant 0.000000e+00 : f32
      %209 = vector.broadcast %cst_136 : f32 to vector<32x32xf32>
      %c0_137 = arith.constant 0 : index
      %c0_138 = arith.constant 0 : index
      %210 = vector.load %arg8[%c0_137, %c0_138] : memref<72x32xf32, #tpu.memory_space<vmem>>, vector<32x32xf32>
      tpu.vector_store %arg8[%c0_137, %c0_138], %209 {strides = array<i32>} : memref<72x32xf32, #tpu.memory_space<vmem>>, vector<32x32xf32>,
      %cst_139 = arith.constant 0.000000e+00 : f32
      %211 = vector.broadcast %cst_139 : f32 to vector<24x32xf32>
      %c48 = arith.constant 48 : index
      %c0_140 = arith.constant 0 : index
      %212 = vector.load %arg8[%c48, %c0_140] : memref<72x32xf32, #tpu.memory_space<vmem>>, vector<24x32xf32>
      tpu.vector_store %arg8[%c48, %c0_140], %211 {strides = array<i32>} : memref<72x32xf32, #tpu.memory_space<vmem>>, vector<24x32xf32>,
      %c32 = arith.constant 32 : index
      %c0_141 = arith.constant 0 : index
      %213 = vector.load %arg8[%c32, %c0_141] : memref<72x32xf32, #tpu.memory_space<vmem>>, vector<16x32xf32>
      tpu.vector_store %arg8[%c32, %c0_141], %208 {strides = array<i32>} : memref<72x32xf32, #tpu.memory_space<vmem>>, vector<16x32xf32>,
      %214 = vector.extract_strided_slice %205 {offsets = [0, 0], sizes = [1, 128], strides = [1, 1]} : vector<16x128xf32> to vector<1x128xf32>
      %215 = vector.extract_strided_slice %205 {offsets = [0, 0], sizes = [15, 128], strides = [1, 1]} : vector<16x128xf32> to vector<15x128xf32>
      %216 = tpu.concatenate %214, %215 in 0 : vector<1x128xf32>, vector<15x128xf32> -> vector<16x128xf32>
      %217 = vector.extract_strided_slice %205 {offsets = [1, 0], sizes = [15, 128], strides = [1, 1]} : vector<16x128xf32> to vector<15x128xf32>
      %218 = vector.extract_strided_slice %205 {offsets = [15, 0], sizes = [1, 128], strides = [1, 1]} : vector<16x128xf32> to vector<1x128xf32>
      %219 = tpu.concatenate %217, %218 in 0 : vector<15x128xf32>, vector<1x128xf32> -> vector<16x128xf32>
      %220 = arith.maximumf %216, %205 : vector<16x128xf32>
      %221 = arith.maximumf %220, %219 : vector<16x128xf32>
      %c0_142 = arith.constant 0 : index
      %c0_143 = arith.constant 0 : index
      %222 = vector.load %arg9[%c0_142, %c0_143] : memref<16x128xf32, #tpu.memory_space<vmem>>, vector<16x128xf32>
      tpu.vector_store %arg9[%c0_142, %c0_143], %221 {strides = array<i32>} : memref<16x128xf32, #tpu.memory_space<vmem>>, vector<16x128xf32>,
    } else {
    }
    %c16_i32 = arith.constant 16 : i32
    %3 = arith.muli %arg1, %c16_i32 : i32
    %4 = tpu.assume_multiple %3, 8 : i32
    %5 = arith.index_cast %4 : i32 to index
    %c0 = arith.constant 0 : index
    %6 = vector.load %arg9[%5, %c0] : memref<16x128xf32, #tpu.memory_space<vmem>>, vector<16x128xf32>
    %7 = arith.truncf %6 : vector<16x128xf32> to vector<16x128xbf16>
    %c0_1 = arith.constant 0 : index
    %c0_2 = arith.constant 0 : index
    %8 = vector.load %arg5[%c0_1, %c0_2] : memref<128x128xbf16, #tpu.memory_space<vmem>>, vector<128x128xbf16>
    %cst = arith.constant dense<0.000000e+00> : vector<16x128xf32>
    %9 = tpu.matmul %7, %8, %cst {dimension_numbers = #tpu.dot_dimension_numbers<[1], [0], [0], [1], [0, 0, 1, 1], [], []>} : vector<16x128xbf16>, vector<128x128xbf16>, vector<16x128xf32> -> vector<16x128xf32>
    %c13_i32 = arith.constant 13 : i32
    %10 = arith.addi %4, %c13_i32 : i32
    %c0_i32_3 = arith.constant 0 : i32
    %11 = arith.addi %10, %c0_i32_3 : i32
    %c0_i32_4 = arith.constant 0 : i32
    %12 = arith.addi %11, %c0_i32_4 : i32
    %13 = arith.index_cast %12 : i32 to index
    %c0_5 = arith.constant 0 : index
    %14 = vector.load %arg8[%13, %c0_5] : memref<72x32xf32, #tpu.memory_space<vmem>>, vector<16x32xf32>
    %c0_i32_6 = arith.constant 0 : i32
    %15 = arith.addi %10, %c0_i32_6 : i32
    %c1_i32 = arith.constant 1 : i32
    %16 = arith.addi %15, %c1_i32 : i32
    %17 = arith.index_cast %16 : i32 to index
    %c0_7 = arith.constant 0 : index
    %18 = vector.load %arg8[%17, %c0_7] : memref<72x32xf32, #tpu.memory_space<vmem>>, vector<16x32xf32>
    %c0_i32_8 = arith.constant 0 : i32
    %19 = arith.addi %10, %c0_i32_8 : i32
    %c2_i32 = arith.constant 2 : i32
    %20 = arith.addi %19, %c2_i32 : i32
    %21 = arith.index_cast %20 : i32 to index
    %c0_9 = arith.constant 0 : index
    %22 = vector.load %arg8[%21, %c0_9] : memref<72x32xf32, #tpu.memory_space<vmem>>, vector<16x32xf32>
    %c0_i32_10 = arith.constant 0 : i32
    %23 = arith.addi %10, %c0_i32_10 : i32
    %c3_i32 = arith.constant 3 : i32
    %24 = arith.addi %23, %c3_i32 : i32
    %25 = arith.index_cast %24 : i32 to index
    %c0_11 = arith.constant 0 : index
    %26 = vector.load %arg8[%25, %c0_11] : memref<72x32xf32, #tpu.memory_space<vmem>>, vector<16x32xf32>
    %c0_i32_12 = arith.constant 0 : i32
    %27 = arith.addi %10, %c0_i32_12 : i32
    %c4_i32 = arith.constant 4 : i32
    %28 = arith.addi %27, %c4_i32 : i32
    %29 = arith.index_cast %28 : i32 to index
    %c0_13 = arith.constant 0 : index
    %30 = vector.load %arg8[%29, %c0_13] : memref<72x32xf32, #tpu.memory_space<vmem>>, vector<16x32xf32>
    %c0_i32_14 = arith.constant 0 : i32
    %31 = arith.addi %10, %c0_i32_14 : i32
    %c5_i32 = arith.constant 5 : i32
    %32 = arith.addi %31, %c5_i32 : i32
    %33 = arith.index_cast %32 : i32 to index
    %c0_15 = arith.constant 0 : index
    %34 = vector.load %arg8[%33, %c0_15] : memref<72x32xf32, #tpu.memory_space<vmem>>, vector<16x32xf32>
    %c0_i32_16 = arith.constant 0 : i32
    %35 = arith.addi %10, %c0_i32_16 : i32
    %c6_i32 = arith.constant 6 : i32
    %36 = arith.addi %35, %c6_i32 : i32
    %37 = arith.index_cast %36 : i32 to index
    %c0_17 = arith.constant 0 : index
    %38 = vector.load %arg8[%37, %c0_17] : memref<72x32xf32, #tpu.memory_space<vmem>>, vector<16x32xf32>
    %c0_i32_18 = arith.constant 0 : i32
    %39 = arith.addi %10, %c0_i32_18 : i32
    %c7_i32 = arith.constant 7 : i32
    %40 = arith.addi %39, %c7_i32 : i32
    %41 = arith.index_cast %40 : i32 to index
    %c0_19 = arith.constant 0 : index
    %42 = vector.load %arg8[%41, %c0_19] : memref<72x32xf32, #tpu.memory_space<vmem>>, vector<16x32xf32>
    %43 = tpu.concatenate %14, %18, %22, %26, %30, %34, %38, %42 in 1 : vector<16x32xf32>, vector<16x32xf32>, vector<16x32xf32>, vector<16x32xf32>, vector<16x32xf32>, vector<16x32xf32>, vector<16x32xf32>, vector<16x32xf32> -> vector<16x256xf32>
    %44 = arith.truncf %43 : vector<16x256xf32> to vector<16x256xbf16>
    %c0_20 = arith.constant 0 : index
    %c0_21 = arith.constant 0 : index
    %45 = vector.load %arg4[%c0_20, %c0_21] : memref<1280x128xbf16, #tpu.memory_space<vmem>>, vector<256x128xbf16>
    %cst_22 = arith.constant dense<0.000000e+00> : vector<16x128xf32>
    %46 = tpu.matmul %44, %45, %cst_22 {dimension_numbers = #tpu.dot_dimension_numbers<[1], [0], [0], [1], [0, 0, 1, 1], [], []>} : vector<16x256xbf16>, vector<256x128xbf16>, vector<16x128xf32> -> vector<16x128xf32>
    %47 = arith.addf %9, %46 : vector<16x128xf32>
    %c8_i32 = arith.constant 8 : i32
    %48 = arith.addi %10, %c8_i32 : i32
    %c0_i32_23 = arith.constant 0 : i32
    %49 = arith.addi %48, %c0_i32_23 : i32
    %50 = arith.index_cast %49 : i32 to index
    %c0_24 = arith.constant 0 : index
    %51 = vector.load %arg8[%50, %c0_24] : memref<72x32xf32, #tpu.memory_space<vmem>>, vector<16x32xf32>
    %c8_i32_25 = arith.constant 8 : i32
    %52 = arith.addi %10, %c8_i32_25 : i32
    %c1_i32_26 = arith.constant 1 : i32
    %53 = arith.addi %52, %c1_i32_26 : i32
    %54 = arith.index_cast %53 : i32 to index
    %c0_27 = arith.constant 0 : index
    %55 = vector.load %arg8[%54, %c0_27] : memref<72x32xf32, #tpu.memory_space<vmem>>, vector<16x32xf32>
    %c8_i32_28 = arith.constant 8 : i32
    %56 = arith.addi %10, %c8_i32_28 : i32
    %c2_i32_29 = arith.constant 2 : i32
    %57 = arith.addi %56, %c2_i32_29 : i32
    %58 = arith.index_cast %57 : i32 to index
    %c0_30 = arith.constant 0 : index
    %59 = vector.load %arg8[%58, %c0_30] : memref<72x32xf32, #tpu.memory_space<vmem>>, vector<16x32xf32>
    %c8_i32_31 = arith.constant 8 : i32
    %60 = arith.addi %10, %c8_i32_31 : i32
    %c3_i32_32 = arith.constant 3 : i32
    %61 = arith.addi %60, %c3_i32_32 : i32
    %62 = arith.index_cast %61 : i32 to index
    %c0_33 = arith.constant 0 : index
    %63 = vector.load %arg8[%62, %c0_33] : memref<72x32xf32, #tpu.memory_space<vmem>>, vector<16x32xf32>
    %c8_i32_34 = arith.constant 8 : i32
    %64 = arith.addi %10, %c8_i32_34 : i32
    %c4_i32_35 = arith.constant 4 : i32
    %65 = arith.addi %64, %c4_i32_35 : i32
    %66 = arith.index_cast %65 : i32 to index
    %c0_36 = arith.constant 0 : index
    %67 = vector.load %arg8[%66, %c0_36] : memref<72x32xf32, #tpu.memory_space<vmem>>, vector<16x32xf32>
    %c8_i32_37 = arith.constant 8 : i32
    %68 = arith.addi %10, %c8_i32_37 : i32
    %c5_i32_38 = arith.constant 5 : i32
    %69 = arith.addi %68, %c5_i32_38 : i32
    %70 = arith.index_cast %69 : i32 to index
    %c0_39 = arith.constant 0 : index
    %71 = vector.load %arg8[%70, %c0_39] : memref<72x32xf32, #tpu.memory_space<vmem>>, vector<16x32xf32>
    %c8_i32_40 = arith.constant 8 : i32
    %72 = arith.addi %10, %c8_i32_40 : i32
    %c6_i32_41 = arith.constant 6 : i32
    %73 = arith.addi %72, %c6_i32_41 : i32
    %74 = arith.index_cast %73 : i32 to index
    %c0_42 = arith.constant 0 : index
    %75 = vector.load %arg8[%74, %c0_42] : memref<72x32xf32, #tpu.memory_space<vmem>>, vector<16x32xf32>
    %c8_i32_43 = arith.constant 8 : i32
    %76 = arith.addi %10, %c8_i32_43 : i32
    %c7_i32_44 = arith.constant 7 : i32
    %77 = arith.addi %76, %c7_i32_44 : i32
    %78 = arith.index_cast %77 : i32 to index
    %c0_45 = arith.constant 0 : index
    %79 = vector.load %arg8[%78, %c0_45] : memref<72x32xf32, #tpu.memory_space<vmem>>, vector<16x32xf32>
    %80 = tpu.concatenate %51, %55, %59, %63, %67, %71, %75, %79 in 1 : vector<16x32xf32>, vector<16x32xf32>, vector<16x32xf32>, vector<16x32xf32>, vector<16x32xf32>, vector<16x32xf32>, vector<16x32xf32>, vector<16x32xf32> -> vector<16x256xf32>
    %81 = arith.truncf %80 : vector<16x256xf32> to vector<16x256xbf16>
    %c256 = arith.constant 256 : index
    %c0_46 = arith.constant 0 : index
    %82 = vector.load %arg4[%c256, %c0_46] : memref<1280x128xbf16, #tpu.memory_space<vmem>>, vector<256x128xbf16>
    %cst_47 = arith.constant dense<0.000000e+00> : vector<16x128xf32>
    %83 = tpu.matmul %81, %82, %cst_47 {dimension_numbers = #tpu.dot_dimension_numbers<[1], [0], [0], [1], [0, 0, 1, 1], [], []>} : vector<16x256xbf16>, vector<256x128xbf16>, vector<16x128xf32> -> vector<16x128xf32>
    %84 = arith.addf %47, %83 : vector<16x128xf32>
    %c16_i32_48 = arith.constant 16 : i32
    %85 = arith.addi %10, %c16_i32_48 : i32
    %c0_i32_49 = arith.constant 0 : i32
    %86 = arith.addi %85, %c0_i32_49 : i32
    %87 = arith.index_cast %86 : i32 to index
    %c0_50 = arith.constant 0 : index
    %88 = vector.load %arg8[%87, %c0_50] : memref<72x32xf32, #tpu.memory_space<vmem>>, vector<16x32xf32>
    %c16_i32_51 = arith.constant 16 : i32
    %89 = arith.addi %10, %c16_i32_51 : i32
    %c1_i32_52 = arith.constant 1 : i32
    %90 = arith.addi %89, %c1_i32_52 : i32
    %91 = arith.index_cast %90 : i32 to index
    %c0_53 = arith.constant 0 : index
    %92 = vector.load %arg8[%91, %c0_53] : memref<72x32xf32, #tpu.memory_space<vmem>>, vector<16x32xf32>
    %c16_i32_54 = arith.constant 16 : i32
    %93 = arith.addi %10, %c16_i32_54 : i32
    %c2_i32_55 = arith.constant 2 : i32
    %94 = arith.addi %93, %c2_i32_55 : i32
    %95 = arith.index_cast %94 : i32 to index
    %c0_56 = arith.constant 0 : index
    %96 = vector.load %arg8[%95, %c0_56] : memref<72x32xf32, #tpu.memory_space<vmem>>, vector<16x32xf32>
    %c16_i32_57 = arith.constant 16 : i32
    %97 = arith.addi %10, %c16_i32_57 : i32
    %c3_i32_58 = arith.constant 3 : i32
    %98 = arith.addi %97, %c3_i32_58 : i32
    %99 = arith.index_cast %98 : i32 to index
    %c0_59 = arith.constant 0 : index
    %100 = vector.load %arg8[%99, %c0_59] : memref<72x32xf32, #tpu.memory_space<vmem>>, vector<16x32xf32>
    %c16_i32_60 = arith.constant 16 : i32
    %101 = arith.addi %10, %c16_i32_60 : i32
    %c4_i32_61 = arith.constant 4 : i32
    %102 = arith.addi %101, %c4_i32_61 : i32
    %103 = arith.index_cast %102 : i32 to index
    %c0_62 = arith.constant 0 : index
    %104 = vector.load %arg8[%103, %c0_62] : memref<72x32xf32, #tpu.memory_space<vmem>>, vector<16x32xf32>
    %c16_i32_63 = arith.constant 16 : i32
    %105 = arith.addi %10, %c16_i32_63 : i32
    %c5_i32_64 = arith.constant 5 : i32
    %106 = arith.addi %105, %c5_i32_64 : i32
    %107 = arith.index_cast %106 : i32 to index
    %c0_65 = arith.constant 0 : index
    %108 = vector.load %arg8[%107, %c0_65] : memref<72x32xf32, #tpu.memory_space<vmem>>, vector<16x32xf32>
    %c16_i32_66 = arith.constant 16 : i32
    %109 = arith.addi %10, %c16_i32_66 : i32
    %c6_i32_67 = arith.constant 6 : i32
    %110 = arith.addi %109, %c6_i32_67 : i32
    %111 = arith.index_cast %110 : i32 to index
    %c0_68 = arith.constant 0 : index
    %112 = vector.load %arg8[%111, %c0_68] : memref<72x32xf32, #tpu.memory_space<vmem>>, vector<16x32xf32>
    %c16_i32_69 = arith.constant 16 : i32
    %113 = arith.addi %10, %c16_i32_69 : i32
    %c7_i32_70 = arith.constant 7 : i32
    %114 = arith.addi %113, %c7_i32_70 : i32
    %115 = arith.index_cast %114 : i32 to index
    %c0_71 = arith.constant 0 : index
    %116 = vector.load %arg8[%115, %c0_71] : memref<72x32xf32, #tpu.memory_space<vmem>>, vector<16x32xf32>
    %117 = tpu.concatenate %88, %92, %96, %100, %104, %108, %112, %116 in 1 : vector<16x32xf32>, vector<16x32xf32>, vector<16x32xf32>, vector<16x32xf32>, vector<16x32xf32>, vector<16x32xf32>, vector<16x32xf32>, vector<16x32xf32> -> vector<16x256xf32>
    %118 = arith.truncf %117 : vector<16x256xf32> to vector<16x256xbf16>
    %c512 = arith.constant 512 : index
    %c0_72 = arith.constant 0 : index
    %119 = vector.load %arg4[%c512, %c0_72] : memref<1280x128xbf16, #tpu.memory_space<vmem>>, vector<256x128xbf16>
    %cst_73 = arith.constant dense<0.000000e+00> : vector<16x128xf32>
    %120 = tpu.matmul %118, %119, %cst_73 {dimension_numbers = #tpu.dot_dimension_numbers<[1], [0], [0], [1], [0, 0, 1, 1], [], []>} : vector<16x256xbf16>, vector<256x128xbf16>, vector<16x128xf32> -> vector<16x128xf32>
    %121 = arith.addf %84, %120 : vector<16x128xf32>
    %c24_i32 = arith.constant 24 : i32
    %122 = arith.addi %10, %c24_i32 : i32
    %c0_i32_74 = arith.constant 0 : i32
    %123 = arith.addi %122, %c0_i32_74 : i32
    %124 = arith.index_cast %123 : i32 to index
    %c0_75 = arith.constant 0 : index
    %125 = vector.load %arg8[%124, %c0_75] : memref<72x32xf32, #tpu.memory_space<vmem>>, vector<16x32xf32>
    %c24_i32_76 = arith.constant 24 : i32
    %126 = arith.addi %10, %c24_i32_76 : i32
    %c1_i32_77 = arith.constant 1 : i32
    %127 = arith.addi %126, %c1_i32_77 : i32
    %128 = arith.index_cast %127 : i32 to index
    %c0_78 = arith.constant 0 : index
    %129 = vector.load %arg8[%128, %c0_78] : memref<72x32xf32, #tpu.memory_space<vmem>>, vector<16x32xf32>
    %c24_i32_79 = arith.constant 24 : i32
    %130 = arith.addi %10, %c24_i32_79 : i32
    %c2_i32_80 = arith.constant 2 : i32
    %131 = arith.addi %130, %c2_i32_80 : i32
    %132 = arith.index_cast %131 : i32 to index
    %c0_81 = arith.constant 0 : index
    %133 = vector.load %arg8[%132, %c0_81] : memref<72x32xf32, #tpu.memory_space<vmem>>, vector<16x32xf32>
    %c24_i32_82 = arith.constant 24 : i32
    %134 = arith.addi %10, %c24_i32_82 : i32
    %c3_i32_83 = arith.constant 3 : i32
    %135 = arith.addi %134, %c3_i32_83 : i32
    %136 = arith.index_cast %135 : i32 to index
    %c0_84 = arith.constant 0 : index
    %137 = vector.load %arg8[%136, %c0_84] : memref<72x32xf32, #tpu.memory_space<vmem>>, vector<16x32xf32>
    %c24_i32_85 = arith.constant 24 : i32
    %138 = arith.addi %10, %c24_i32_85 : i32
    %c4_i32_86 = arith.constant 4 : i32
    %139 = arith.addi %138, %c4_i32_86 : i32
    %140 = arith.index_cast %139 : i32 to index
    %c0_87 = arith.constant 0 : index
    %141 = vector.load %arg8[%140, %c0_87] : memref<72x32xf32, #tpu.memory_space<vmem>>, vector<16x32xf32>
    %c24_i32_88 = arith.constant 24 : i32
    %142 = arith.addi %10, %c24_i32_88 : i32
    %c5_i32_89 = arith.constant 5 : i32
    %143 = arith.addi %142, %c5_i32_89 : i32
    %144 = arith.index_cast %143 : i32 to index
    %c0_90 = arith.constant 0 : index
    %145 = vector.load %arg8[%144, %c0_90] : memref<72x32xf32, #tpu.memory_space<vmem>>, vector<16x32xf32>
    %c24_i32_91 = arith.constant 24 : i32
    %146 = arith.addi %10, %c24_i32_91 : i32
    %c6_i32_92 = arith.constant 6 : i32
    %147 = arith.addi %146, %c6_i32_92 : i32
    %148 = arith.index_cast %147 : i32 to index
    %c0_93 = arith.constant 0 : index
    %149 = vector.load %arg8[%148, %c0_93] : memref<72x32xf32, #tpu.memory_space<vmem>>, vector<16x32xf32>
    %c24_i32_94 = arith.constant 24 : i32
    %150 = arith.addi %10, %c24_i32_94 : i32
    %c7_i32_95 = arith.constant 7 : i32
    %151 = arith.addi %150, %c7_i32_95 : i32
    %152 = arith.index_cast %151 : i32 to index
    %c0_96 = arith.constant 0 : index
    %153 = vector.load %arg8[%152, %c0_96] : memref<72x32xf32, #tpu.memory_space<vmem>>, vector<16x32xf32>
    %154 = tpu.concatenate %125, %129, %133, %137, %141, %145, %149, %153 in 1 : vector<16x32xf32>, vector<16x32xf32>, vector<16x32xf32>, vector<16x32xf32>, vector<16x32xf32>, vector<16x32xf32>, vector<16x32xf32>, vector<16x32xf32> -> vector<16x256xf32>
    %155 = arith.truncf %154 : vector<16x256xf32> to vector<16x256xbf16>
    %c768 = arith.constant 768 : index
    %c0_97 = arith.constant 0 : index
    %156 = vector.load %arg4[%c768, %c0_97] : memref<1280x128xbf16, #tpu.memory_space<vmem>>, vector<256x128xbf16>
    %cst_98 = arith.constant dense<0.000000e+00> : vector<16x128xf32>
    %157 = tpu.matmul %155, %156, %cst_98 {dimension_numbers = #tpu.dot_dimension_numbers<[1], [0], [0], [1], [0, 0, 1, 1], [], []>} : vector<16x256xbf16>, vector<256x128xbf16>, vector<16x128xf32> -> vector<16x128xf32>
    %158 = arith.addf %121, %157 : vector<16x128xf32>
    %c32_i32 = arith.constant 32 : i32
    %159 = arith.addi %10, %c32_i32 : i32
    %c0_i32_99 = arith.constant 0 : i32
    %160 = arith.addi %159, %c0_i32_99 : i32
    %161 = arith.index_cast %160 : i32 to index
    %c0_100 = arith.constant 0 : index
    %162 = vector.load %arg8[%161, %c0_100] : memref<72x32xf32, #tpu.memory_space<vmem>>, vector<16x32xf32>
    %c32_i32_101 = arith.constant 32 : i32
    %163 = arith.addi %10, %c32_i32_101 : i32
    %c1_i32_102 = arith.constant 1 : i32
    %164 = arith.addi %163, %c1_i32_102 : i32
    %165 = arith.index_cast %164 : i32 to index
    %c0_103 = arith.constant 0 : index
    %166 = vector.load %arg8[%165, %c0_103] : memref<72x32xf32, #tpu.memory_space<vmem>>, vector<16x32xf32>
    %c32_i32_104 = arith.constant 32 : i32
    %167 = arith.addi %10, %c32_i32_104 : i32
    %c2_i32_105 = arith.constant 2 : i32
    %168 = arith.addi %167, %c2_i32_105 : i32
    %169 = arith.index_cast %168 : i32 to index
    %c0_106 = arith.constant 0 : index
    %170 = vector.load %arg8[%169, %c0_106] : memref<72x32xf32, #tpu.memory_space<vmem>>, vector<16x32xf32>
    %c32_i32_107 = arith.constant 32 : i32
    %171 = arith.addi %10, %c32_i32_107 : i32
    %c3_i32_108 = arith.constant 3 : i32
    %172 = arith.addi %171, %c3_i32_108 : i32
    %173 = arith.index_cast %172 : i32 to index
    %c0_109 = arith.constant 0 : index
    %174 = vector.load %arg8[%173, %c0_109] : memref<72x32xf32, #tpu.memory_space<vmem>>, vector<16x32xf32>
    %c32_i32_110 = arith.constant 32 : i32
    %175 = arith.addi %10, %c32_i32_110 : i32
    %c4_i32_111 = arith.constant 4 : i32
    %176 = arith.addi %175, %c4_i32_111 : i32
    %177 = arith.index_cast %176 : i32 to index
    %c0_112 = arith.constant 0 : index
    %178 = vector.load %arg8[%177, %c0_112] : memref<72x32xf32, #tpu.memory_space<vmem>>, vector<16x32xf32>
    %c32_i32_113 = arith.constant 32 : i32
    %179 = arith.addi %10, %c32_i32_113 : i32
    %c5_i32_114 = arith.constant 5 : i32
    %180 = arith.addi %179, %c5_i32_114 : i32
    %181 = arith.index_cast %180 : i32 to index
    %c0_115 = arith.constant 0 : index
    %182 = vector.load %arg8[%181, %c0_115] : memref<72x32xf32, #tpu.memory_space<vmem>>, vector<16x32xf32>
    %c32_i32_116 = arith.constant 32 : i32
    %183 = arith.addi %10, %c32_i32_116 : i32
    %c6_i32_117 = arith.constant 6 : i32
    %184 = arith.addi %183, %c6_i32_117 : i32
    %185 = arith.index_cast %184 : i32 to index
    %c0_118 = arith.constant 0 : index
    %186 = vector.load %arg8[%185, %c0_118] : memref<72x32xf32, #tpu.memory_space<vmem>>, vector<16x32xf32>
    %c32_i32_119 = arith.constant 32 : i32
    %187 = arith.addi %10, %c32_i32_119 : i32
    %c7_i32_120 = arith.constant 7 : i32
    %188 = arith.addi %187, %c7_i32_120 : i32
    %189 = arith.index_cast %188 : i32 to index
    %c0_121 = arith.constant 0 : index
    %190 = vector.load %arg8[%189, %c0_121] : memref<72x32xf32, #tpu.memory_space<vmem>>, vector<16x32xf32>
    %191 = tpu.concatenate %162, %166, %170, %174, %178, %182, %186, %190 in 1 : vector<16x32xf32>, vector<16x32xf32>, vector<16x32xf32>, vector<16x32xf32>, vector<16x32xf32>, vector<16x32xf32>, vector<16x32xf32>, vector<16x32xf32> -> vector<16x256xf32>
    %192 = arith.truncf %191 : vector<16x256xf32> to vector<16x256xbf16>
    %c1024 = arith.constant 1024 : index
    %c0_122 = arith.constant 0 : index
    %193 = vector.load %arg4[%c1024, %c0_122] : memref<1280x128xbf16, #tpu.memory_space<vmem>>, vector<256x128xbf16>
    %cst_123 = arith.constant dense<0.000000e+00> : vector<16x128xf32>
    %194 = tpu.matmul %192, %193, %cst_123 {dimension_numbers = #tpu.dot_dimension_numbers<[1], [0], [0], [1], [0, 0, 1, 1], [], []>} : vector<16x256xbf16>, vector<256x128xbf16>, vector<16x128xf32> -> vector<16x128xf32>
    %195 = arith.addf %158, %194 : vector<16x128xf32>
    %c0_124 = arith.constant 0 : index
    %c0_125 = arith.constant 0 : index
    %196 = vector.load %arg6[%c0_124, %c0_125] : memref<1x128xf32, #tpu.memory_space<vmem>>, vector<1x128xf32>
    %197 = vector.broadcast %196 : vector<1x128xf32> to vector<16x128xf32>
    %198 = arith.addf %195, %197 : vector<16x128xf32>
    %cst_126 = arith.constant 0.000000e+00 : f32
    %199 = vector.broadcast %cst_126 : f32 to vector<16x128xf32>
    %200 = arith.maximumf %198, %199 : vector<16x128xf32>
    %c0_127 = arith.constant 0 : index
    %c0_128 = arith.constant 0 : index
    %c0_129 = arith.constant 0 : index
    %201 = vector.load %arg7[%c0_127, %c0_128, %c0_129] : memref<1x16x128xf32, #tpu.memory_space<vmem>>, vector<1x16x128xf32>
    %202 = vector.shape_cast %201 : vector<1x16x128xf32> to vector<16x128xf32>
    %203 = vector.shape_cast %200 : vector<16x128xf32> to vector<1x16x128xf32>
    tpu.vector_store %arg7[%c0_127, %c0_128, %c0_129], %203 {strides = array<i32>} : memref<1x16x128xf32, #tpu.memory_space<vmem>>, vector<1x16x128xf32>,
    return
  }
  func.func @transform_0(%arg0: i32, %arg1: i32) -> (i32, i32, i32) {
    %c0_i32 = arith.constant 0 : i32
    %c0_i32_0 = arith.constant 0 : i32
    %c0_i32_1 = arith.constant 0 : i32
    return %arg0, %c0_i32, %c0_i32_0 : i32, i32, i32
  }
  func.func @transform_1(%arg0: i32, %arg1: i32) -> (i32, i32) {
    %c0_i32 = arith.constant 0 : i32
    %c0_i32_0 = arith.constant 0 : i32
    %c0_i32_1 = arith.constant 0 : i32
    return %c0_i32, %c0_i32_0 : i32, i32
  }
  func.func @transform_2(%arg0: i32, %arg1: i32) -> (i32, i32) {
    %c0_i32 = arith.constant 0 : i32
    %c0_i32_0 = arith.constant 0 : i32
    %c0_i32_1 = arith.constant 0 : i32
    return %c0_i32, %c0_i32_0 : i32, i32
  }
  func.func @transform_3(%arg0: i32, %arg1: i32) -> (i32, i32) {
    %c0_i32 = arith.constant 0 : i32
    %c0_i32_0 = arith.constant 0 : i32
    %c0_i32_1 = arith.constant 0 : i32
    return %c0_i32, %c0_i32_0 : i32, i32
  }
  func.func @transform_4(%arg0: i32, %arg1: i32) -> (i32, i32) {
    %c0_i32 = arith.constant 0 : i32
    %c0_i32_0 = arith.constant 0 : i32
    %c0_i32_1 = arith.constant 0 : i32
    return %c0_i32, %c0_i32_0 : i32, i32
  }
  func.func @transform_5(%arg0: i32, %arg1: i32) -> (i32, i32, i32) {
    %c0_i32 = arith.constant 0 : i32
    %c0_i32_0 = arith.constant 0 : i32
    return %arg0, %arg1, %c0_i32 : i32, i32, i32
  }
}

module attributes {stable_mosaic.version = 11 : i64} {
  func.func @kernel(%arg0: i32, %arg1: i32, %arg2: memref<1x16x4xf32, #tpu.memory_space<vmem>>, %arg3: memref<4x32xbf16, #tpu.memory_space<vmem>>, %arg4: memref<1280x128xbf16, #tpu.memory_space<vmem>>, %arg5: memref<4x128xbf16, #tpu.memory_space<vmem>>, %arg6: memref<1x128xf32, #tpu.memory_space<vmem>>, %arg7: memref<1x16x128xf32, #tpu.memory_space<vmem>>, %arg8: memref<72x32xf32, #tpu.memory_space<vmem>>, %arg9: memref<16x4xf32, #tpu.memory_space<vmem>>) attributes {dimension_semantics = [#tpu.dimension_semantics<parallel>, #tpu.dimension_semantics<arbitrary>], iteration_bounds = array<i64: 2, 1>, scalar_prefetch = 0 : i64, scratch_operands = 2 : i64, tpu.core_type = #tpu.core_type<tc>, window_params = [{transform_indices = @transform_0, window_bounds = array<i64: 1, 16, 4>}, {pipeline_mode = #tpu.pipeline_mode<synchronous>, transform_indices = @transform_1, window_bounds = array<i64: 4, 32>}, {pipeline_mode = #tpu.pipeline_mode<synchronous>, transform_indices = @transform_2, window_bounds = array<i64: 1280, 128>}, {pipeline_mode = #tpu.pipeline_mode<synchronous>, transform_indices = @transform_3, window_bounds = array<i64: 4, 128>}, {pipeline_mode = #tpu.pipeline_mode<synchronous>, transform_indices = @transform_4, window_bounds = array<i64: 1, 128>}, {transform_indices = @transform_5, window_bounds = array<i64: 1, 16, 128>}]} {
    %c0_i32 = arith.constant 0 : i32
    %0 = arith.cmpi eq, %arg1, %c0_i32 : i32
    %1 = arith.extui %0 : i1 to i32
    %c0_i32_0 = arith.constant 0 : i32
    %2 = arith.cmpi ne, %1, %c0_i32_0 : i32
    scf.if %2 {
      %c0_130 = arith.constant 0 : index
      %c0_131 = arith.constant 0 : index
      %c0_132 = arith.constant 0 : index
      %204 = vector.load %arg2[%c0_130, %c0_131, %c0_132] : memref<1x16x4xf32, #tpu.memory_space<vmem>>, vector<1x16x4xf32>
      %205 = vector.shape_cast %204 : vector<1x16x4xf32> to vector<16x4xf32>
      %206 = arith.truncf %205 : vector<16x4xf32> to vector<16x4xbf16>
      %c0_133 = arith.constant 0 : index
      %c0_134 = arith.constant 0 : index
      %207 = vector.load %arg3[%c0_133, %c0_134] : memref<4x32xbf16, #tpu.memory_space<vmem>>, vector<4x32xbf16>
      %cst_135 = arith.constant dense<0.000000e+00> : vector<16x32xf32>
      %208 = tpu.matmul %206, %207, %cst_135 {dimension_numbers = #tpu.dot_dimension_numbers<[1], [0], [0], [1], [0, 0, 1, 1], [], []>} : vector<16x4xbf16>, vector<4x32xbf16>, vector<16x32xf32> -> vector<16x32xf32>
      %cst_136 = arith.constant 0.000000e+00 : f32
      %209 = vector.broadcast %cst_136 : f32 to vector<32x32xf32>
      %c0_137 = arith.constant 0 : index
      %c0_138 = arith.constant 0 : index
      %210 = vector.load %arg8[%c0_137, %c0_138] : memref<72x32xf32, #tpu.memory_space<vmem>>, vector<32x32xf32>
      tpu.vector_store %arg8[%c0_137, %c0_138], %209 {strides = array<i32>} : memref<72x32xf32, #tpu.memory_space<vmem>>, vector<32x32xf32>,
      %cst_139 = arith.constant 0.000000e+00 : f32
      %211 = vector.broadcast %cst_139 : f32 to vector<24x32xf32>
      %c48 = arith.constant 48 : index
      %c0_140 = arith.constant 0 : index
      %212 = vector.load %arg8[%c48, %c0_140] : memref<72x32xf32, #tpu.memory_space<vmem>>, vector<24x32xf32>
      tpu.vector_store %arg8[%c48, %c0_140], %211 {strides = array<i32>} : memref<72x32xf32, #tpu.memory_space<vmem>>, vector<24x32xf32>,
      %c32 = arith.constant 32 : index
      %c0_141 = arith.constant 0 : index
      %213 = vector.load %arg8[%c32, %c0_141] : memref<72x32xf32, #tpu.memory_space<vmem>>, vector<16x32xf32>
      tpu.vector_store %arg8[%c32, %c0_141], %208 {strides = array<i32>} : memref<72x32xf32, #tpu.memory_space<vmem>>, vector<16x32xf32>,
      %214 = vector.extract_strided_slice %205 {offsets = [0, 0], sizes = [1, 4], strides = [1, 1]} : vector<16x4xf32> to vector<1x4xf32>
      %215 = vector.extract_strided_slice %205 {offsets = [0, 0], sizes = [15, 4], strides = [1, 1]} : vector<16x4xf32> to vector<15x4xf32>
      %216 = tpu.concatenate %214, %215 in 0 : vector<1x4xf32>, vector<15x4xf32> -> vector<16x4xf32>
      %217 = vector.extract_strided_slice %205 {offsets = [1, 0], sizes = [15, 4], strides = [1, 1]} : vector<16x4xf32> to vector<15x4xf32>
      %218 = vector.extract_strided_slice %205 {offsets = [15, 0], sizes = [1, 4], strides = [1, 1]} : vector<16x4xf32> to vector<1x4xf32>
      %219 = tpu.concatenate %217, %218 in 0 : vector<15x4xf32>, vector<1x4xf32> -> vector<16x4xf32>
      %220 = arith.maximumf %216, %205 : vector<16x4xf32>
      %221 = arith.maximumf %220, %219 : vector<16x4xf32>
      %c0_142 = arith.constant 0 : index
      %c0_143 = arith.constant 0 : index
      %222 = vector.load %arg9[%c0_142, %c0_143] : memref<16x4xf32, #tpu.memory_space<vmem>>, vector<16x4xf32>
      tpu.vector_store %arg9[%c0_142, %c0_143], %221 {strides = array<i32>} : memref<16x4xf32, #tpu.memory_space<vmem>>, vector<16x4xf32>,
    } else {
    }
    %c16_i32 = arith.constant 16 : i32
    %3 = arith.muli %arg1, %c16_i32 : i32
    %4 = tpu.assume_multiple %3, 8 : i32
    %5 = arith.index_cast %4 : i32 to index
    %c0 = arith.constant 0 : index
    %6 = vector.load %arg9[%5, %c0] : memref<16x4xf32, #tpu.memory_space<vmem>>, vector<16x4xf32>
    %7 = arith.truncf %6 : vector<16x4xf32> to vector<16x4xbf16>
    %c0_1 = arith.constant 0 : index
    %c0_2 = arith.constant 0 : index
    %8 = vector.load %arg5[%c0_1, %c0_2] : memref<4x128xbf16, #tpu.memory_space<vmem>>, vector<4x128xbf16>
    %cst = arith.constant dense<0.000000e+00> : vector<16x128xf32>
    %9 = tpu.matmul %7, %8, %cst {dimension_numbers = #tpu.dot_dimension_numbers<[1], [0], [0], [1], [0, 0, 1, 1], [], []>} : vector<16x4xbf16>, vector<4x128xbf16>, vector<16x128xf32> -> vector<16x128xf32>
    %c13_i32 = arith.constant 13 : i32
    %10 = arith.addi %4, %c13_i32 : i32
    %c0_i32_3 = arith.constant 0 : i32
    %11 = arith.addi %10, %c0_i32_3 : i32
    %c0_i32_4 = arith.constant 0 : i32
    %12 = arith.addi %11, %c0_i32_4 : i32
    %13 = arith.index_cast %12 : i32 to index
    %c0_5 = arith.constant 0 : index
    %14 = vector.load %arg8[%13, %c0_5] : memref<72x32xf32, #tpu.memory_space<vmem>>, vector<16x32xf32>
    %c0_i32_6 = arith.constant 0 : i32
    %15 = arith.addi %10, %c0_i32_6 : i32
    %c1_i32 = arith.constant 1 : i32
    %16 = arith.addi %15, %c1_i32 : i32
    %17 = arith.index_cast %16 : i32 to index
    %c0_7 = arith.constant 0 : index
    %18 = vector.load %arg8[%17, %c0_7] : memref<72x32xf32, #tpu.memory_space<vmem>>, vector<16x32xf32>
    %c0_i32_8 = arith.constant 0 : i32
    %19 = arith.addi %10, %c0_i32_8 : i32
    %c2_i32 = arith.constant 2 : i32
    %20 = arith.addi %19, %c2_i32 : i32
    %21 = arith.index_cast %20 : i32 to index
    %c0_9 = arith.constant 0 : index
    %22 = vector.load %arg8[%21, %c0_9] : memref<72x32xf32, #tpu.memory_space<vmem>>, vector<16x32xf32>
    %c0_i32_10 = arith.constant 0 : i32
    %23 = arith.addi %10, %c0_i32_10 : i32
    %c3_i32 = arith.constant 3 : i32
    %24 = arith.addi %23, %c3_i32 : i32
    %25 = arith.index_cast %24 : i32 to index
    %c0_11 = arith.constant 0 : index
    %26 = vector.load %arg8[%25, %c0_11] : memref<72x32xf32, #tpu.memory_space<vmem>>, vector<16x32xf32>
    %c0_i32_12 = arith.constant 0 : i32
    %27 = arith.addi %10, %c0_i32_12 : i32
    %c4_i32 = arith.constant 4 : i32
    %28 = arith.addi %27, %c4_i32 : i32
    %29 = arith.index_cast %28 : i32 to index
    %c0_13 = arith.constant 0 : index
    %30 = vector.load %arg8[%29, %c0_13] : memref<72x32xf32, #tpu.memory_space<vmem>>, vector<16x32xf32>
    %c0_i32_14 = arith.constant 0 : i32
    %31 = arith.addi %10, %c0_i32_14 : i32
    %c5_i32 = arith.constant 5 : i32
    %32 = arith.addi %31, %c5_i32 : i32
    %33 = arith.index_cast %32 : i32 to index
    %c0_15 = arith.constant 0 : index
    %34 = vector.load %arg8[%33, %c0_15] : memref<72x32xf32, #tpu.memory_space<vmem>>, vector<16x32xf32>
    %c0_i32_16 = arith.constant 0 : i32
    %35 = arith.addi %10, %c0_i32_16 : i32
    %c6_i32 = arith.constant 6 : i32
    %36 = arith.addi %35, %c6_i32 : i32
    %37 = arith.index_cast %36 : i32 to index
    %c0_17 = arith.constant 0 : index
    %38 = vector.load %arg8[%37, %c0_17] : memref<72x32xf32, #tpu.memory_space<vmem>>, vector<16x32xf32>
    %c0_i32_18 = arith.constant 0 : i32
    %39 = arith.addi %10, %c0_i32_18 : i32
    %c7_i32 = arith.constant 7 : i32
    %40 = arith.addi %39, %c7_i32 : i32
    %41 = arith.index_cast %40 : i32 to index
    %c0_19 = arith.constant 0 : index
    %42 = vector.load %arg8[%41, %c0_19] : memref<72x32xf32, #tpu.memory_space<vmem>>, vector<16x32xf32>
    %43 = tpu.concatenate %14, %18, %22, %26, %30, %34, %38, %42 in 1 : vector<16x32xf32>, vector<16x32xf32>, vector<16x32xf32>, vector<16x32xf32>, vector<16x32xf32>, vector<16x32xf32>, vector<16x32xf32>, vector<16x32xf32> -> vector<16x256xf32>
    %44 = arith.truncf %43 : vector<16x256xf32> to vector<16x256xbf16>
    %c0_20 = arith.constant 0 : index
    %c0_21 = arith.constant 0 : index
    %45 = vector.load %arg4[%c0_20, %c0_21] : memref<1280x128xbf16, #tpu.memory_space<vmem>>, vector<256x128xbf16>
    %cst_22 = arith.constant dense<0.000000e+00> : vector<16x128xf32>
    %46 = tpu.matmul %44, %45, %cst_22 {dimension_numbers = #tpu.dot_dimension_numbers<[1], [0], [0], [1], [0, 0, 1, 1], [], []>} : vector<16x256xbf16>, vector<256x128xbf16>, vector<16x128xf32> -> vector<16x128xf32>
    %47 = arith.addf %9, %46 : vector<16x128xf32>
    %c8_i32 = arith.constant 8 : i32
    %48 = arith.addi %10, %c8_i32 : i32
    %c0_i32_23 = arith.constant 0 : i32
    %49 = arith.addi %48, %c0_i32_23 : i32
    %50 = arith.index_cast %49 : i32 to index
    %c0_24 = arith.constant 0 : index
    %51 = vector.load %arg8[%50, %c0_24] : memref<72x32xf32, #tpu.memory_space<vmem>>, vector<16x32xf32>
    %c8_i32_25 = arith.constant 8 : i32
    %52 = arith.addi %10, %c8_i32_25 : i32
    %c1_i32_26 = arith.constant 1 : i32
    %53 = arith.addi %52, %c1_i32_26 : i32
    %54 = arith.index_cast %53 : i32 to index
    %c0_27 = arith.constant 0 : index
    %55 = vector.load %arg8[%54, %c0_27] : memref<72x32xf32, #tpu.memory_space<vmem>>, vector<16x32xf32>
    %c8_i32_28 = arith.constant 8 : i32
    %56 = arith.addi %10, %c8_i32_28 : i32
    %c2_i32_29 = arith.constant 2 : i32
    %57 = arith.addi %56, %c2_i32_29 : i32
    %58 = arith.index_cast %57 : i32 to index
    %c0_30 = arith.constant 0 : index
    %59 = vector.load %arg8[%58, %c0_30] : memref<72x32xf32, #tpu.memory_space<vmem>>, vector<16x32xf32>
    %c8_i32_31 = arith.constant 8 : i32
    %60 = arith.addi %10, %c8_i32_31 : i32
    %c3_i32_32 = arith.constant 3 : i32
    %61 = arith.addi %60, %c3_i32_32 : i32
    %62 = arith.index_cast %61 : i32 to index
    %c0_33 = arith.constant 0 : index
    %63 = vector.load %arg8[%62, %c0_33] : memref<72x32xf32, #tpu.memory_space<vmem>>, vector<16x32xf32>
    %c8_i32_34 = arith.constant 8 : i32
    %64 = arith.addi %10, %c8_i32_34 : i32
    %c4_i32_35 = arith.constant 4 : i32
    %65 = arith.addi %64, %c4_i32_35 : i32
    %66 = arith.index_cast %65 : i32 to index
    %c0_36 = arith.constant 0 : index
    %67 = vector.load %arg8[%66, %c0_36] : memref<72x32xf32, #tpu.memory_space<vmem>>, vector<16x32xf32>
    %c8_i32_37 = arith.constant 8 : i32
    %68 = arith.addi %10, %c8_i32_37 : i32
    %c5_i32_38 = arith.constant 5 : i32
    %69 = arith.addi %68, %c5_i32_38 : i32
    %70 = arith.index_cast %69 : i32 to index
    %c0_39 = arith.constant 0 : index
    %71 = vector.load %arg8[%70, %c0_39] : memref<72x32xf32, #tpu.memory_space<vmem>>, vector<16x32xf32>
    %c8_i32_40 = arith.constant 8 : i32
    %72 = arith.addi %10, %c8_i32_40 : i32
    %c6_i32_41 = arith.constant 6 : i32
    %73 = arith.addi %72, %c6_i32_41 : i32
    %74 = arith.index_cast %73 : i32 to index
    %c0_42 = arith.constant 0 : index
    %75 = vector.load %arg8[%74, %c0_42] : memref<72x32xf32, #tpu.memory_space<vmem>>, vector<16x32xf32>
    %c8_i32_43 = arith.constant 8 : i32
    %76 = arith.addi %10, %c8_i32_43 : i32
    %c7_i32_44 = arith.constant 7 : i32
    %77 = arith.addi %76, %c7_i32_44 : i32
    %78 = arith.index_cast %77 : i32 to index
    %c0_45 = arith.constant 0 : index
    %79 = vector.load %arg8[%78, %c0_45] : memref<72x32xf32, #tpu.memory_space<vmem>>, vector<16x32xf32>
    %80 = tpu.concatenate %51, %55, %59, %63, %67, %71, %75, %79 in 1 : vector<16x32xf32>, vector<16x32xf32>, vector<16x32xf32>, vector<16x32xf32>, vector<16x32xf32>, vector<16x32xf32>, vector<16x32xf32>, vector<16x32xf32> -> vector<16x256xf32>
    %81 = arith.truncf %80 : vector<16x256xf32> to vector<16x256xbf16>
    %c256 = arith.constant 256 : index
    %c0_46 = arith.constant 0 : index
    %82 = vector.load %arg4[%c256, %c0_46] : memref<1280x128xbf16, #tpu.memory_space<vmem>>, vector<256x128xbf16>
    %cst_47 = arith.constant dense<0.000000e+00> : vector<16x128xf32>
    %83 = tpu.matmul %81, %82, %cst_47 {dimension_numbers = #tpu.dot_dimension_numbers<[1], [0], [0], [1], [0, 0, 1, 1], [], []>} : vector<16x256xbf16>, vector<256x128xbf16>, vector<16x128xf32> -> vector<16x128xf32>
    %84 = arith.addf %47, %83 : vector<16x128xf32>
    %c16_i32_48 = arith.constant 16 : i32
    %85 = arith.addi %10, %c16_i32_48 : i32
    %c0_i32_49 = arith.constant 0 : i32
    %86 = arith.addi %85, %c0_i32_49 : i32
    %87 = arith.index_cast %86 : i32 to index
    %c0_50 = arith.constant 0 : index
    %88 = vector.load %arg8[%87, %c0_50] : memref<72x32xf32, #tpu.memory_space<vmem>>, vector<16x32xf32>
    %c16_i32_51 = arith.constant 16 : i32
    %89 = arith.addi %10, %c16_i32_51 : i32
    %c1_i32_52 = arith.constant 1 : i32
    %90 = arith.addi %89, %c1_i32_52 : i32
    %91 = arith.index_cast %90 : i32 to index
    %c0_53 = arith.constant 0 : index
    %92 = vector.load %arg8[%91, %c0_53] : memref<72x32xf32, #tpu.memory_space<vmem>>, vector<16x32xf32>
    %c16_i32_54 = arith.constant 16 : i32
    %93 = arith.addi %10, %c16_i32_54 : i32
    %c2_i32_55 = arith.constant 2 : i32
    %94 = arith.addi %93, %c2_i32_55 : i32
    %95 = arith.index_cast %94 : i32 to index
    %c0_56 = arith.constant 0 : index
    %96 = vector.load %arg8[%95, %c0_56] : memref<72x32xf32, #tpu.memory_space<vmem>>, vector<16x32xf32>
    %c16_i32_57 = arith.constant 16 : i32
    %97 = arith.addi %10, %c16_i32_57 : i32
    %c3_i32_58 = arith.constant 3 : i32
    %98 = arith.addi %97, %c3_i32_58 : i32
    %99 = arith.index_cast %98 : i32 to index
    %c0_59 = arith.constant 0 : index
    %100 = vector.load %arg8[%99, %c0_59] : memref<72x32xf32, #tpu.memory_space<vmem>>, vector<16x32xf32>
    %c16_i32_60 = arith.constant 16 : i32
    %101 = arith.addi %10, %c16_i32_60 : i32
    %c4_i32_61 = arith.constant 4 : i32
    %102 = arith.addi %101, %c4_i32_61 : i32
    %103 = arith.index_cast %102 : i32 to index
    %c0_62 = arith.constant 0 : index
    %104 = vector.load %arg8[%103, %c0_62] : memref<72x32xf32, #tpu.memory_space<vmem>>, vector<16x32xf32>
    %c16_i32_63 = arith.constant 16 : i32
    %105 = arith.addi %10, %c16_i32_63 : i32
    %c5_i32_64 = arith.constant 5 : i32
    %106 = arith.addi %105, %c5_i32_64 : i32
    %107 = arith.index_cast %106 : i32 to index
    %c0_65 = arith.constant 0 : index
    %108 = vector.load %arg8[%107, %c0_65] : memref<72x32xf32, #tpu.memory_space<vmem>>, vector<16x32xf32>
    %c16_i32_66 = arith.constant 16 : i32
    %109 = arith.addi %10, %c16_i32_66 : i32
    %c6_i32_67 = arith.constant 6 : i32
    %110 = arith.addi %109, %c6_i32_67 : i32
    %111 = arith.index_cast %110 : i32 to index
    %c0_68 = arith.constant 0 : index
    %112 = vector.load %arg8[%111, %c0_68] : memref<72x32xf32, #tpu.memory_space<vmem>>, vector<16x32xf32>
    %c16_i32_69 = arith.constant 16 : i32
    %113 = arith.addi %10, %c16_i32_69 : i32
    %c7_i32_70 = arith.constant 7 : i32
    %114 = arith.addi %113, %c7_i32_70 : i32
    %115 = arith.index_cast %114 : i32 to index
    %c0_71 = arith.constant 0 : index
    %116 = vector.load %arg8[%115, %c0_71] : memref<72x32xf32, #tpu.memory_space<vmem>>, vector<16x32xf32>
    %117 = tpu.concatenate %88, %92, %96, %100, %104, %108, %112, %116 in 1 : vector<16x32xf32>, vector<16x32xf32>, vector<16x32xf32>, vector<16x32xf32>, vector<16x32xf32>, vector<16x32xf32>, vector<16x32xf32>, vector<16x32xf32> -> vector<16x256xf32>
    %118 = arith.truncf %117 : vector<16x256xf32> to vector<16x256xbf16>
    %c512 = arith.constant 512 : index
    %c0_72 = arith.constant 0 : index
    %119 = vector.load %arg4[%c512, %c0_72] : memref<1280x128xbf16, #tpu.memory_space<vmem>>, vector<256x128xbf16>
    %cst_73 = arith.constant dense<0.000000e+00> : vector<16x128xf32>
    %120 = tpu.matmul %118, %119, %cst_73 {dimension_numbers = #tpu.dot_dimension_numbers<[1], [0], [0], [1], [0, 0, 1, 1], [], []>} : vector<16x256xbf16>, vector<256x128xbf16>, vector<16x128xf32> -> vector<16x128xf32>
    %121 = arith.addf %84, %120 : vector<16x128xf32>
    %c24_i32 = arith.constant 24 : i32
    %122 = arith.addi %10, %c24_i32 : i32
    %c0_i32_74 = arith.constant 0 : i32
    %123 = arith.addi %122, %c0_i32_74 : i32
    %124 = arith.index_cast %123 : i32 to index
    %c0_75 = arith.constant 0 : index
    %125 = vector.load %arg8[%124, %c0_75] : memref<72x32xf32, #tpu.memory_space<vmem>>, vector<16x32xf32>
    %c24_i32_76 = arith.constant 24 : i32
    %126 = arith.addi %10, %c24_i32_76 : i32
    %c1_i32_77 = arith.constant 1 : i32
    %127 = arith.addi %126, %c1_i32_77 : i32
    %128 = arith.index_cast %127 : i32 to index
    %c0_78 = arith.constant 0 : index
    %129 = vector.load %arg8[%128, %c0_78] : memref<72x32xf32, #tpu.memory_space<vmem>>, vector<16x32xf32>
    %c24_i32_79 = arith.constant 24 : i32
    %130 = arith.addi %10, %c24_i32_79 : i32
    %c2_i32_80 = arith.constant 2 : i32
    %131 = arith.addi %130, %c2_i32_80 : i32
    %132 = arith.index_cast %131 : i32 to index
    %c0_81 = arith.constant 0 : index
    %133 = vector.load %arg8[%132, %c0_81] : memref<72x32xf32, #tpu.memory_space<vmem>>, vector<16x32xf32>
    %c24_i32_82 = arith.constant 24 : i32
    %134 = arith.addi %10, %c24_i32_82 : i32
    %c3_i32_83 = arith.constant 3 : i32
    %135 = arith.addi %134, %c3_i32_83 : i32
    %136 = arith.index_cast %135 : i32 to index
    %c0_84 = arith.constant 0 : index
    %137 = vector.load %arg8[%136, %c0_84] : memref<72x32xf32, #tpu.memory_space<vmem>>, vector<16x32xf32>
    %c24_i32_85 = arith.constant 24 : i32
    %138 = arith.addi %10, %c24_i32_85 : i32
    %c4_i32_86 = arith.constant 4 : i32
    %139 = arith.addi %138, %c4_i32_86 : i32
    %140 = arith.index_cast %139 : i32 to index
    %c0_87 = arith.constant 0 : index
    %141 = vector.load %arg8[%140, %c0_87] : memref<72x32xf32, #tpu.memory_space<vmem>>, vector<16x32xf32>
    %c24_i32_88 = arith.constant 24 : i32
    %142 = arith.addi %10, %c24_i32_88 : i32
    %c5_i32_89 = arith.constant 5 : i32
    %143 = arith.addi %142, %c5_i32_89 : i32
    %144 = arith.index_cast %143 : i32 to index
    %c0_90 = arith.constant 0 : index
    %145 = vector.load %arg8[%144, %c0_90] : memref<72x32xf32, #tpu.memory_space<vmem>>, vector<16x32xf32>
    %c24_i32_91 = arith.constant 24 : i32
    %146 = arith.addi %10, %c24_i32_91 : i32
    %c6_i32_92 = arith.constant 6 : i32
    %147 = arith.addi %146, %c6_i32_92 : i32
    %148 = arith.index_cast %147 : i32 to index
    %c0_93 = arith.constant 0 : index
    %149 = vector.load %arg8[%148, %c0_93] : memref<72x32xf32, #tpu.memory_space<vmem>>, vector<16x32xf32>
    %c24_i32_94 = arith.constant 24 : i32
    %150 = arith.addi %10, %c24_i32_94 : i32
    %c7_i32_95 = arith.constant 7 : i32
    %151 = arith.addi %150, %c7_i32_95 : i32
    %152 = arith.index_cast %151 : i32 to index
    %c0_96 = arith.constant 0 : index
    %153 = vector.load %arg8[%152, %c0_96] : memref<72x32xf32, #tpu.memory_space<vmem>>, vector<16x32xf32>
    %154 = tpu.concatenate %125, %129, %133, %137, %141, %145, %149, %153 in 1 : vector<16x32xf32>, vector<16x32xf32>, vector<16x32xf32>, vector<16x32xf32>, vector<16x32xf32>, vector<16x32xf32>, vector<16x32xf32>, vector<16x32xf32> -> vector<16x256xf32>
    %155 = arith.truncf %154 : vector<16x256xf32> to vector<16x256xbf16>
    %c768 = arith.constant 768 : index
    %c0_97 = arith.constant 0 : index
    %156 = vector.load %arg4[%c768, %c0_97] : memref<1280x128xbf16, #tpu.memory_space<vmem>>, vector<256x128xbf16>
    %cst_98 = arith.constant dense<0.000000e+00> : vector<16x128xf32>
    %157 = tpu.matmul %155, %156, %cst_98 {dimension_numbers = #tpu.dot_dimension_numbers<[1], [0], [0], [1], [0, 0, 1, 1], [], []>} : vector<16x256xbf16>, vector<256x128xbf16>, vector<16x128xf32> -> vector<16x128xf32>
    %158 = arith.addf %121, %157 : vector<16x128xf32>
    %c32_i32 = arith.constant 32 : i32
    %159 = arith.addi %10, %c32_i32 : i32
    %c0_i32_99 = arith.constant 0 : i32
    %160 = arith.addi %159, %c0_i32_99 : i32
    %161 = arith.index_cast %160 : i32 to index
    %c0_100 = arith.constant 0 : index
    %162 = vector.load %arg8[%161, %c0_100] : memref<72x32xf32, #tpu.memory_space<vmem>>, vector<16x32xf32>
    %c32_i32_101 = arith.constant 32 : i32
    %163 = arith.addi %10, %c32_i32_101 : i32
    %c1_i32_102 = arith.constant 1 : i32
    %164 = arith.addi %163, %c1_i32_102 : i32
    %165 = arith.index_cast %164 : i32 to index
    %c0_103 = arith.constant 0 : index
    %166 = vector.load %arg8[%165, %c0_103] : memref<72x32xf32, #tpu.memory_space<vmem>>, vector<16x32xf32>
    %c32_i32_104 = arith.constant 32 : i32
    %167 = arith.addi %10, %c32_i32_104 : i32
    %c2_i32_105 = arith.constant 2 : i32
    %168 = arith.addi %167, %c2_i32_105 : i32
    %169 = arith.index_cast %168 : i32 to index
    %c0_106 = arith.constant 0 : index
    %170 = vector.load %arg8[%169, %c0_106] : memref<72x32xf32, #tpu.memory_space<vmem>>, vector<16x32xf32>
    %c32_i32_107 = arith.constant 32 : i32
    %171 = arith.addi %10, %c32_i32_107 : i32
    %c3_i32_108 = arith.constant 3 : i32
    %172 = arith.addi %171, %c3_i32_108 : i32
    %173 = arith.index_cast %172 : i32 to index
    %c0_109 = arith.constant 0 : index
    %174 = vector.load %arg8[%173, %c0_109] : memref<72x32xf32, #tpu.memory_space<vmem>>, vector<16x32xf32>
    %c32_i32_110 = arith.constant 32 : i32
    %175 = arith.addi %10, %c32_i32_110 : i32
    %c4_i32_111 = arith.constant 4 : i32
    %176 = arith.addi %175, %c4_i32_111 : i32
    %177 = arith.index_cast %176 : i32 to index
    %c0_112 = arith.constant 0 : index
    %178 = vector.load %arg8[%177, %c0_112] : memref<72x32xf32, #tpu.memory_space<vmem>>, vector<16x32xf32>
    %c32_i32_113 = arith.constant 32 : i32
    %179 = arith.addi %10, %c32_i32_113 : i32
    %c5_i32_114 = arith.constant 5 : i32
    %180 = arith.addi %179, %c5_i32_114 : i32
    %181 = arith.index_cast %180 : i32 to index
    %c0_115 = arith.constant 0 : index
    %182 = vector.load %arg8[%181, %c0_115] : memref<72x32xf32, #tpu.memory_space<vmem>>, vector<16x32xf32>
    %c32_i32_116 = arith.constant 32 : i32
    %183 = arith.addi %10, %c32_i32_116 : i32
    %c6_i32_117 = arith.constant 6 : i32
    %184 = arith.addi %183, %c6_i32_117 : i32
    %185 = arith.index_cast %184 : i32 to index
    %c0_118 = arith.constant 0 : index
    %186 = vector.load %arg8[%185, %c0_118] : memref<72x32xf32, #tpu.memory_space<vmem>>, vector<16x32xf32>
    %c32_i32_119 = arith.constant 32 : i32
    %187 = arith.addi %10, %c32_i32_119 : i32
    %c7_i32_120 = arith.constant 7 : i32
    %188 = arith.addi %187, %c7_i32_120 : i32
    %189 = arith.index_cast %188 : i32 to index
    %c0_121 = arith.constant 0 : index
    %190 = vector.load %arg8[%189, %c0_121] : memref<72x32xf32, #tpu.memory_space<vmem>>, vector<16x32xf32>
    %191 = tpu.concatenate %162, %166, %170, %174, %178, %182, %186, %190 in 1 : vector<16x32xf32>, vector<16x32xf32>, vector<16x32xf32>, vector<16x32xf32>, vector<16x32xf32>, vector<16x32xf32>, vector<16x32xf32>, vector<16x32xf32> -> vector<16x256xf32>
    %192 = arith.truncf %191 : vector<16x256xf32> to vector<16x256xbf16>
    %c1024 = arith.constant 1024 : index
    %c0_122 = arith.constant 0 : index
    %193 = vector.load %arg4[%c1024, %c0_122] : memref<1280x128xbf16, #tpu.memory_space<vmem>>, vector<256x128xbf16>
    %cst_123 = arith.constant dense<0.000000e+00> : vector<16x128xf32>
    %194 = tpu.matmul %192, %193, %cst_123 {dimension_numbers = #tpu.dot_dimension_numbers<[1], [0], [0], [1], [0, 0, 1, 1], [], []>} : vector<16x256xbf16>, vector<256x128xbf16>, vector<16x128xf32> -> vector<16x128xf32>
    %195 = arith.addf %158, %194 : vector<16x128xf32>
    %c0_124 = arith.constant 0 : index
    %c0_125 = arith.constant 0 : index
    %196 = vector.load %arg6[%c0_124, %c0_125] : memref<1x128xf32, #tpu.memory_space<vmem>>, vector<1x128xf32>
    %197 = vector.broadcast %196 : vector<1x128xf32> to vector<16x128xf32>
    %198 = arith.addf %195, %197 : vector<16x128xf32>
    %cst_126 = arith.constant 0.000000e+00 : f32
    %199 = vector.broadcast %cst_126 : f32 to vector<16x128xf32>
    %200 = arith.maximumf %198, %199 : vector<16x128xf32>
    %c0_127 = arith.constant 0 : index
    %c0_128 = arith.constant 0 : index
    %c0_129 = arith.constant 0 : index
    %201 = vector.load %arg7[%c0_127, %c0_128, %c0_129] : memref<1x16x128xf32, #tpu.memory_space<vmem>>, vector<1x16x128xf32>
    %202 = vector.shape_cast %201 : vector<1x16x128xf32> to vector<16x128xf32>
    %203 = vector.shape_cast %200 : vector<16x128xf32> to vector<1x16x128xf32>
    tpu.vector_store %arg7[%c0_127, %c0_128, %c0_129], %203 {strides = array<i32>} : memref<1x16x128xf32, #tpu.memory_space<vmem>>, vector<1x16x128xf32>,
    return
  }
  func.func @transform_0(%arg0: i32, %arg1: i32) -> (i32, i32, i32) {
    %c0_i32 = arith.constant 0 : i32
    %c0_i32_0 = arith.constant 0 : i32
    %c0_i32_1 = arith.constant 0 : i32
    return %arg0, %c0_i32, %c0_i32_0 : i32, i32, i32
  }
  func.func @transform_1(%arg0: i32, %arg1: i32) -> (i32, i32) {
    %c0_i32 = arith.constant 0 : i32
    %c0_i32_0 = arith.constant 0 : i32
    %c0_i32_1 = arith.constant 0 : i32
    return %c0_i32, %c0_i32_0 : i32, i32
  }
  func.func @transform_2(%arg0: i32, %arg1: i32) -> (i32, i32) {
    %c0_i32 = arith.constant 0 : i32
    %c0_i32_0 = arith.constant 0 : i32
    %c0_i32_1 = arith.constant 0 : i32
    return %c0_i32, %c0_i32_0 : i32, i32
  }
  func.func @transform_3(%arg0: i32, %arg1: i32) -> (i32, i32) {
    %c0_i32 = arith.constant 0 : i32
    %c0_i32_0 = arith.constant 0 : i32
    %c0_i32_1 = arith.constant 0 : i32
    return %c0_i32, %c0_i32_0 : i32, i32
  }
  func.func @transform_4(%arg0: i32, %arg1: i32) -> (i32, i32) {
    %c0_i32 = arith.constant 0 : i32
    %c0_i32_0 = arith.constant 0 : i32
    %c0_i32_1 = arith.constant 0 : i32
    return %c0_i32, %c0_i32_0 : i32, i32
  }
  func.func @transform_5(%arg0: i32, %arg1: i32) -> (i32, i32, i32) {
    %c0_i32 = arith.constant 0 : i32
    %c0_i32_0 = arith.constant 0 : i32
    return %arg0, %arg1, %c0_i32 : i32, i32, i32
  }
}

module attributes {stable_mosaic.version = 11 : i64} {
  func.func @kernel(%arg0: i32, %arg1: i32, %arg2: memref<1x16x128xf32, #tpu.memory_space<vmem>>, %arg3: memref<1x16x4xf32, #tpu.memory_space<vmem>>, %arg4: memref<128x32xbf16, #tpu.memory_space<vmem>>, %arg5: memref<1280x128xbf16, #tpu.memory_space<vmem>>, %arg6: memref<128x128xbf16, #tpu.memory_space<vmem>>, %arg7: memref<1x128xf32, #tpu.memory_space<vmem>>, %arg8: memref<4x128xbf16, #tpu.memory_space<vmem>>, %arg9: memref<1x128xf32, #tpu.memory_space<vmem>>, %arg10: memref<1x16x128xf32, #tpu.memory_space<vmem>>, %arg11: memref<72x32xf32, #tpu.memory_space<vmem>>, %arg12: memref<16x128xf32, #tpu.memory_space<vmem>>) attributes {dimension_semantics = [#tpu.dimension_semantics<parallel>, #tpu.dimension_semantics<arbitrary>], iteration_bounds = array<i64: 2, 1>, scalar_prefetch = 0 : i64, scratch_operands = 2 : i64, tpu.core_type = #tpu.core_type<tc>, window_params = [{transform_indices = @transform_0, window_bounds = array<i64: 1, 16, 128>}, {transform_indices = @transform_1, window_bounds = array<i64: 1, 16, 4>}, {pipeline_mode = #tpu.pipeline_mode<synchronous>, transform_indices = @transform_2, window_bounds = array<i64: 128, 32>}, {pipeline_mode = #tpu.pipeline_mode<synchronous>, transform_indices = @transform_3, window_bounds = array<i64: 1280, 128>}, {pipeline_mode = #tpu.pipeline_mode<synchronous>, transform_indices = @transform_4, window_bounds = array<i64: 128, 128>}, {pipeline_mode = #tpu.pipeline_mode<synchronous>, transform_indices = @transform_5, window_bounds = array<i64: 1, 128>}, {pipeline_mode = #tpu.pipeline_mode<synchronous>, transform_indices = @transform_6, window_bounds = array<i64: 4, 128>}, {pipeline_mode = #tpu.pipeline_mode<synchronous>, transform_indices = @transform_7, window_bounds = array<i64: 1, 128>}, {transform_indices = @transform_8, window_bounds = array<i64: 1, 16, 128>}]} {
    %c0_i32 = arith.constant 0 : i32
    %0 = arith.cmpi eq, %arg1, %c0_i32 : i32
    %1 = arith.extui %0 : i1 to i32
    %c0_i32_0 = arith.constant 0 : i32
    %2 = arith.cmpi ne, %1, %c0_i32_0 : i32
    scf.if %2 {
      %c0_139 = arith.constant 0 : index
      %c0_140 = arith.constant 0 : index
      %c0_141 = arith.constant 0 : index
      %215 = vector.load %arg2[%c0_139, %c0_140, %c0_141] : memref<1x16x128xf32, #tpu.memory_space<vmem>>, vector<1x16x128xf32>
      %216 = vector.shape_cast %215 : vector<1x16x128xf32> to vector<16x128xf32>
      %217 = arith.truncf %216 : vector<16x128xf32> to vector<16x128xbf16>
      %c0_142 = arith.constant 0 : index
      %c0_143 = arith.constant 0 : index
      %218 = vector.load %arg4[%c0_142, %c0_143] : memref<128x32xbf16, #tpu.memory_space<vmem>>, vector<128x32xbf16>
      %cst_144 = arith.constant dense<0.000000e+00> : vector<16x32xf32>
      %219 = tpu.matmul %217, %218, %cst_144 {dimension_numbers = #tpu.dot_dimension_numbers<[1], [0], [0], [1], [0, 0, 1, 1], [], []>} : vector<16x128xbf16>, vector<128x32xbf16>, vector<16x32xf32> -> vector<16x32xf32>
      %cst_145 = arith.constant 0.000000e+00 : f32
      %220 = vector.broadcast %cst_145 : f32 to vector<32x32xf32>
      %c0_146 = arith.constant 0 : index
      %c0_147 = arith.constant 0 : index
      %221 = vector.load %arg11[%c0_146, %c0_147] : memref<72x32xf32, #tpu.memory_space<vmem>>, vector<32x32xf32>
      tpu.vector_store %arg11[%c0_146, %c0_147], %220 {strides = array<i32>} : memref<72x32xf32, #tpu.memory_space<vmem>>, vector<32x32xf32>,
      %cst_148 = arith.constant 0.000000e+00 : f32
      %222 = vector.broadcast %cst_148 : f32 to vector<24x32xf32>
      %c48 = arith.constant 48 : index
      %c0_149 = arith.constant 0 : index
      %223 = vector.load %arg11[%c48, %c0_149] : memref<72x32xf32, #tpu.memory_space<vmem>>, vector<24x32xf32>
      tpu.vector_store %arg11[%c48, %c0_149], %222 {strides = array<i32>} : memref<72x32xf32, #tpu.memory_space<vmem>>, vector<24x32xf32>,
      %c32 = arith.constant 32 : index
      %c0_150 = arith.constant 0 : index
      %224 = vector.load %arg11[%c32, %c0_150] : memref<72x32xf32, #tpu.memory_space<vmem>>, vector<16x32xf32>
      tpu.vector_store %arg11[%c32, %c0_150], %219 {strides = array<i32>} : memref<72x32xf32, #tpu.memory_space<vmem>>, vector<16x32xf32>,
      %225 = vector.extract_strided_slice %216 {offsets = [0, 0], sizes = [1, 128], strides = [1, 1]} : vector<16x128xf32> to vector<1x128xf32>
      %226 = vector.extract_strided_slice %216 {offsets = [0, 0], sizes = [15, 128], strides = [1, 1]} : vector<16x128xf32> to vector<15x128xf32>
      %227 = tpu.concatenate %225, %226 in 0 : vector<1x128xf32>, vector<15x128xf32> -> vector<16x128xf32>
      %228 = vector.extract_strided_slice %216 {offsets = [1, 0], sizes = [15, 128], strides = [1, 1]} : vector<16x128xf32> to vector<15x128xf32>
      %229 = vector.extract_strided_slice %216 {offsets = [15, 0], sizes = [1, 128], strides = [1, 1]} : vector<16x128xf32> to vector<1x128xf32>
      %230 = tpu.concatenate %228, %229 in 0 : vector<15x128xf32>, vector<1x128xf32> -> vector<16x128xf32>
      %231 = arith.maximumf %227, %216 : vector<16x128xf32>
      %232 = arith.maximumf %231, %230 : vector<16x128xf32>
      %c0_151 = arith.constant 0 : index
      %c0_152 = arith.constant 0 : index
      %233 = vector.load %arg12[%c0_151, %c0_152] : memref<16x128xf32, #tpu.memory_space<vmem>>, vector<16x128xf32>
      tpu.vector_store %arg12[%c0_151, %c0_152], %232 {strides = array<i32>} : memref<16x128xf32, #tpu.memory_space<vmem>>, vector<16x128xf32>,
    } else {
    }
    %c16_i32 = arith.constant 16 : i32
    %3 = arith.muli %arg1, %c16_i32 : i32
    %4 = tpu.assume_multiple %3, 8 : i32
    %5 = arith.index_cast %4 : i32 to index
    %c0 = arith.constant 0 : index
    %6 = vector.load %arg12[%5, %c0] : memref<16x128xf32, #tpu.memory_space<vmem>>, vector<16x128xf32>
    %7 = arith.truncf %6 : vector<16x128xf32> to vector<16x128xbf16>
    %c0_1 = arith.constant 0 : index
    %c0_2 = arith.constant 0 : index
    %8 = vector.load %arg6[%c0_1, %c0_2] : memref<128x128xbf16, #tpu.memory_space<vmem>>, vector<128x128xbf16>
    %cst = arith.constant dense<0.000000e+00> : vector<16x128xf32>
    %9 = tpu.matmul %7, %8, %cst {dimension_numbers = #tpu.dot_dimension_numbers<[1], [0], [0], [1], [0, 0, 1, 1], [], []>} : vector<16x128xbf16>, vector<128x128xbf16>, vector<16x128xf32> -> vector<16x128xf32>
    %c13_i32 = arith.constant 13 : i32
    %10 = arith.addi %4, %c13_i32 : i32
    %c0_i32_3 = arith.constant 0 : i32
    %11 = arith.addi %10, %c0_i32_3 : i32
    %c0_i32_4 = arith.constant 0 : i32
    %12 = arith.addi %11, %c0_i32_4 : i32
    %13 = arith.index_cast %12 : i32 to index
    %c0_5 = arith.constant 0 : index
    %14 = vector.load %arg11[%13, %c0_5] : memref<72x32xf32, #tpu.memory_space<vmem>>, vector<16x32xf32>
    %c0_i32_6 = arith.constant 0 : i32
    %15 = arith.addi %10, %c0_i32_6 : i32
    %c1_i32 = arith.constant 1 : i32
    %16 = arith.addi %15, %c1_i32 : i32
    %17 = arith.index_cast %16 : i32 to index
    %c0_7 = arith.constant 0 : index
    %18 = vector.load %arg11[%17, %c0_7] : memref<72x32xf32, #tpu.memory_space<vmem>>, vector<16x32xf32>
    %c0_i32_8 = arith.constant 0 : i32
    %19 = arith.addi %10, %c0_i32_8 : i32
    %c2_i32 = arith.constant 2 : i32
    %20 = arith.addi %19, %c2_i32 : i32
    %21 = arith.index_cast %20 : i32 to index
    %c0_9 = arith.constant 0 : index
    %22 = vector.load %arg11[%21, %c0_9] : memref<72x32xf32, #tpu.memory_space<vmem>>, vector<16x32xf32>
    %c0_i32_10 = arith.constant 0 : i32
    %23 = arith.addi %10, %c0_i32_10 : i32
    %c3_i32 = arith.constant 3 : i32
    %24 = arith.addi %23, %c3_i32 : i32
    %25 = arith.index_cast %24 : i32 to index
    %c0_11 = arith.constant 0 : index
    %26 = vector.load %arg11[%25, %c0_11] : memref<72x32xf32, #tpu.memory_space<vmem>>, vector<16x32xf32>
    %c0_i32_12 = arith.constant 0 : i32
    %27 = arith.addi %10, %c0_i32_12 : i32
    %c4_i32 = arith.constant 4 : i32
    %28 = arith.addi %27, %c4_i32 : i32
    %29 = arith.index_cast %28 : i32 to index
    %c0_13 = arith.constant 0 : index
    %30 = vector.load %arg11[%29, %c0_13] : memref<72x32xf32, #tpu.memory_space<vmem>>, vector<16x32xf32>
    %c0_i32_14 = arith.constant 0 : i32
    %31 = arith.addi %10, %c0_i32_14 : i32
    %c5_i32 = arith.constant 5 : i32
    %32 = arith.addi %31, %c5_i32 : i32
    %33 = arith.index_cast %32 : i32 to index
    %c0_15 = arith.constant 0 : index
    %34 = vector.load %arg11[%33, %c0_15] : memref<72x32xf32, #tpu.memory_space<vmem>>, vector<16x32xf32>
    %c0_i32_16 = arith.constant 0 : i32
    %35 = arith.addi %10, %c0_i32_16 : i32
    %c6_i32 = arith.constant 6 : i32
    %36 = arith.addi %35, %c6_i32 : i32
    %37 = arith.index_cast %36 : i32 to index
    %c0_17 = arith.constant 0 : index
    %38 = vector.load %arg11[%37, %c0_17] : memref<72x32xf32, #tpu.memory_space<vmem>>, vector<16x32xf32>
    %c0_i32_18 = arith.constant 0 : i32
    %39 = arith.addi %10, %c0_i32_18 : i32
    %c7_i32 = arith.constant 7 : i32
    %40 = arith.addi %39, %c7_i32 : i32
    %41 = arith.index_cast %40 : i32 to index
    %c0_19 = arith.constant 0 : index
    %42 = vector.load %arg11[%41, %c0_19] : memref<72x32xf32, #tpu.memory_space<vmem>>, vector<16x32xf32>
    %43 = tpu.concatenate %14, %18, %22, %26, %30, %34, %38, %42 in 1 : vector<16x32xf32>, vector<16x32xf32>, vector<16x32xf32>, vector<16x32xf32>, vector<16x32xf32>, vector<16x32xf32>, vector<16x32xf32>, vector<16x32xf32> -> vector<16x256xf32>
    %44 = arith.truncf %43 : vector<16x256xf32> to vector<16x256xbf16>
    %c0_20 = arith.constant 0 : index
    %c0_21 = arith.constant 0 : index
    %45 = vector.load %arg5[%c0_20, %c0_21] : memref<1280x128xbf16, #tpu.memory_space<vmem>>, vector<256x128xbf16>
    %cst_22 = arith.constant dense<0.000000e+00> : vector<16x128xf32>
    %46 = tpu.matmul %44, %45, %cst_22 {dimension_numbers = #tpu.dot_dimension_numbers<[1], [0], [0], [1], [0, 0, 1, 1], [], []>} : vector<16x256xbf16>, vector<256x128xbf16>, vector<16x128xf32> -> vector<16x128xf32>
    %47 = arith.addf %9, %46 : vector<16x128xf32>
    %c8_i32 = arith.constant 8 : i32
    %48 = arith.addi %10, %c8_i32 : i32
    %c0_i32_23 = arith.constant 0 : i32
    %49 = arith.addi %48, %c0_i32_23 : i32
    %50 = arith.index_cast %49 : i32 to index
    %c0_24 = arith.constant 0 : index
    %51 = vector.load %arg11[%50, %c0_24] : memref<72x32xf32, #tpu.memory_space<vmem>>, vector<16x32xf32>
    %c8_i32_25 = arith.constant 8 : i32
    %52 = arith.addi %10, %c8_i32_25 : i32
    %c1_i32_26 = arith.constant 1 : i32
    %53 = arith.addi %52, %c1_i32_26 : i32
    %54 = arith.index_cast %53 : i32 to index
    %c0_27 = arith.constant 0 : index
    %55 = vector.load %arg11[%54, %c0_27] : memref<72x32xf32, #tpu.memory_space<vmem>>, vector<16x32xf32>
    %c8_i32_28 = arith.constant 8 : i32
    %56 = arith.addi %10, %c8_i32_28 : i32
    %c2_i32_29 = arith.constant 2 : i32
    %57 = arith.addi %56, %c2_i32_29 : i32
    %58 = arith.index_cast %57 : i32 to index
    %c0_30 = arith.constant 0 : index
    %59 = vector.load %arg11[%58, %c0_30] : memref<72x32xf32, #tpu.memory_space<vmem>>, vector<16x32xf32>
    %c8_i32_31 = arith.constant 8 : i32
    %60 = arith.addi %10, %c8_i32_31 : i32
    %c3_i32_32 = arith.constant 3 : i32
    %61 = arith.addi %60, %c3_i32_32 : i32
    %62 = arith.index_cast %61 : i32 to index
    %c0_33 = arith.constant 0 : index
    %63 = vector.load %arg11[%62, %c0_33] : memref<72x32xf32, #tpu.memory_space<vmem>>, vector<16x32xf32>
    %c8_i32_34 = arith.constant 8 : i32
    %64 = arith.addi %10, %c8_i32_34 : i32
    %c4_i32_35 = arith.constant 4 : i32
    %65 = arith.addi %64, %c4_i32_35 : i32
    %66 = arith.index_cast %65 : i32 to index
    %c0_36 = arith.constant 0 : index
    %67 = vector.load %arg11[%66, %c0_36] : memref<72x32xf32, #tpu.memory_space<vmem>>, vector<16x32xf32>
    %c8_i32_37 = arith.constant 8 : i32
    %68 = arith.addi %10, %c8_i32_37 : i32
    %c5_i32_38 = arith.constant 5 : i32
    %69 = arith.addi %68, %c5_i32_38 : i32
    %70 = arith.index_cast %69 : i32 to index
    %c0_39 = arith.constant 0 : index
    %71 = vector.load %arg11[%70, %c0_39] : memref<72x32xf32, #tpu.memory_space<vmem>>, vector<16x32xf32>
    %c8_i32_40 = arith.constant 8 : i32
    %72 = arith.addi %10, %c8_i32_40 : i32
    %c6_i32_41 = arith.constant 6 : i32
    %73 = arith.addi %72, %c6_i32_41 : i32
    %74 = arith.index_cast %73 : i32 to index
    %c0_42 = arith.constant 0 : index
    %75 = vector.load %arg11[%74, %c0_42] : memref<72x32xf32, #tpu.memory_space<vmem>>, vector<16x32xf32>
    %c8_i32_43 = arith.constant 8 : i32
    %76 = arith.addi %10, %c8_i32_43 : i32
    %c7_i32_44 = arith.constant 7 : i32
    %77 = arith.addi %76, %c7_i32_44 : i32
    %78 = arith.index_cast %77 : i32 to index
    %c0_45 = arith.constant 0 : index
    %79 = vector.load %arg11[%78, %c0_45] : memref<72x32xf32, #tpu.memory_space<vmem>>, vector<16x32xf32>
    %80 = tpu.concatenate %51, %55, %59, %63, %67, %71, %75, %79 in 1 : vector<16x32xf32>, vector<16x32xf32>, vector<16x32xf32>, vector<16x32xf32>, vector<16x32xf32>, vector<16x32xf32>, vector<16x32xf32>, vector<16x32xf32> -> vector<16x256xf32>
    %81 = arith.truncf %80 : vector<16x256xf32> to vector<16x256xbf16>
    %c256 = arith.constant 256 : index
    %c0_46 = arith.constant 0 : index
    %82 = vector.load %arg5[%c256, %c0_46] : memref<1280x128xbf16, #tpu.memory_space<vmem>>, vector<256x128xbf16>
    %cst_47 = arith.constant dense<0.000000e+00> : vector<16x128xf32>
    %83 = tpu.matmul %81, %82, %cst_47 {dimension_numbers = #tpu.dot_dimension_numbers<[1], [0], [0], [1], [0, 0, 1, 1], [], []>} : vector<16x256xbf16>, vector<256x128xbf16>, vector<16x128xf32> -> vector<16x128xf32>
    %84 = arith.addf %47, %83 : vector<16x128xf32>
    %c16_i32_48 = arith.constant 16 : i32
    %85 = arith.addi %10, %c16_i32_48 : i32
    %c0_i32_49 = arith.constant 0 : i32
    %86 = arith.addi %85, %c0_i32_49 : i32
    %87 = arith.index_cast %86 : i32 to index
    %c0_50 = arith.constant 0 : index
    %88 = vector.load %arg11[%87, %c0_50] : memref<72x32xf32, #tpu.memory_space<vmem>>, vector<16x32xf32>
    %c16_i32_51 = arith.constant 16 : i32
    %89 = arith.addi %10, %c16_i32_51 : i32
    %c1_i32_52 = arith.constant 1 : i32
    %90 = arith.addi %89, %c1_i32_52 : i32
    %91 = arith.index_cast %90 : i32 to index
    %c0_53 = arith.constant 0 : index
    %92 = vector.load %arg11[%91, %c0_53] : memref<72x32xf32, #tpu.memory_space<vmem>>, vector<16x32xf32>
    %c16_i32_54 = arith.constant 16 : i32
    %93 = arith.addi %10, %c16_i32_54 : i32
    %c2_i32_55 = arith.constant 2 : i32
    %94 = arith.addi %93, %c2_i32_55 : i32
    %95 = arith.index_cast %94 : i32 to index
    %c0_56 = arith.constant 0 : index
    %96 = vector.load %arg11[%95, %c0_56] : memref<72x32xf32, #tpu.memory_space<vmem>>, vector<16x32xf32>
    %c16_i32_57 = arith.constant 16 : i32
    %97 = arith.addi %10, %c16_i32_57 : i32
    %c3_i32_58 = arith.constant 3 : i32
    %98 = arith.addi %97, %c3_i32_58 : i32
    %99 = arith.index_cast %98 : i32 to index
    %c0_59 = arith.constant 0 : index
    %100 = vector.load %arg11[%99, %c0_59] : memref<72x32xf32, #tpu.memory_space<vmem>>, vector<16x32xf32>
    %c16_i32_60 = arith.constant 16 : i32
    %101 = arith.addi %10, %c16_i32_60 : i32
    %c4_i32_61 = arith.constant 4 : i32
    %102 = arith.addi %101, %c4_i32_61 : i32
    %103 = arith.index_cast %102 : i32 to index
    %c0_62 = arith.constant 0 : index
    %104 = vector.load %arg11[%103, %c0_62] : memref<72x32xf32, #tpu.memory_space<vmem>>, vector<16x32xf32>
    %c16_i32_63 = arith.constant 16 : i32
    %105 = arith.addi %10, %c16_i32_63 : i32
    %c5_i32_64 = arith.constant 5 : i32
    %106 = arith.addi %105, %c5_i32_64 : i32
    %107 = arith.index_cast %106 : i32 to index
    %c0_65 = arith.constant 0 : index
    %108 = vector.load %arg11[%107, %c0_65] : memref<72x32xf32, #tpu.memory_space<vmem>>, vector<16x32xf32>
    %c16_i32_66 = arith.constant 16 : i32
    %109 = arith.addi %10, %c16_i32_66 : i32
    %c6_i32_67 = arith.constant 6 : i32
    %110 = arith.addi %109, %c6_i32_67 : i32
    %111 = arith.index_cast %110 : i32 to index
    %c0_68 = arith.constant 0 : index
    %112 = vector.load %arg11[%111, %c0_68] : memref<72x32xf32, #tpu.memory_space<vmem>>, vector<16x32xf32>
    %c16_i32_69 = arith.constant 16 : i32
    %113 = arith.addi %10, %c16_i32_69 : i32
    %c7_i32_70 = arith.constant 7 : i32
    %114 = arith.addi %113, %c7_i32_70 : i32
    %115 = arith.index_cast %114 : i32 to index
    %c0_71 = arith.constant 0 : index
    %116 = vector.load %arg11[%115, %c0_71] : memref<72x32xf32, #tpu.memory_space<vmem>>, vector<16x32xf32>
    %117 = tpu.concatenate %88, %92, %96, %100, %104, %108, %112, %116 in 1 : vector<16x32xf32>, vector<16x32xf32>, vector<16x32xf32>, vector<16x32xf32>, vector<16x32xf32>, vector<16x32xf32>, vector<16x32xf32>, vector<16x32xf32> -> vector<16x256xf32>
    %118 = arith.truncf %117 : vector<16x256xf32> to vector<16x256xbf16>
    %c512 = arith.constant 512 : index
    %c0_72 = arith.constant 0 : index
    %119 = vector.load %arg5[%c512, %c0_72] : memref<1280x128xbf16, #tpu.memory_space<vmem>>, vector<256x128xbf16>
    %cst_73 = arith.constant dense<0.000000e+00> : vector<16x128xf32>
    %120 = tpu.matmul %118, %119, %cst_73 {dimension_numbers = #tpu.dot_dimension_numbers<[1], [0], [0], [1], [0, 0, 1, 1], [], []>} : vector<16x256xbf16>, vector<256x128xbf16>, vector<16x128xf32> -> vector<16x128xf32>
    %121 = arith.addf %84, %120 : vector<16x128xf32>
    %c24_i32 = arith.constant 24 : i32
    %122 = arith.addi %10, %c24_i32 : i32
    %c0_i32_74 = arith.constant 0 : i32
    %123 = arith.addi %122, %c0_i32_74 : i32
    %124 = arith.index_cast %123 : i32 to index
    %c0_75 = arith.constant 0 : index
    %125 = vector.load %arg11[%124, %c0_75] : memref<72x32xf32, #tpu.memory_space<vmem>>, vector<16x32xf32>
    %c24_i32_76 = arith.constant 24 : i32
    %126 = arith.addi %10, %c24_i32_76 : i32
    %c1_i32_77 = arith.constant 1 : i32
    %127 = arith.addi %126, %c1_i32_77 : i32
    %128 = arith.index_cast %127 : i32 to index
    %c0_78 = arith.constant 0 : index
    %129 = vector.load %arg11[%128, %c0_78] : memref<72x32xf32, #tpu.memory_space<vmem>>, vector<16x32xf32>
    %c24_i32_79 = arith.constant 24 : i32
    %130 = arith.addi %10, %c24_i32_79 : i32
    %c2_i32_80 = arith.constant 2 : i32
    %131 = arith.addi %130, %c2_i32_80 : i32
    %132 = arith.index_cast %131 : i32 to index
    %c0_81 = arith.constant 0 : index
    %133 = vector.load %arg11[%132, %c0_81] : memref<72x32xf32, #tpu.memory_space<vmem>>, vector<16x32xf32>
    %c24_i32_82 = arith.constant 24 : i32
    %134 = arith.addi %10, %c24_i32_82 : i32
    %c3_i32_83 = arith.constant 3 : i32
    %135 = arith.addi %134, %c3_i32_83 : i32
    %136 = arith.index_cast %135 : i32 to index
    %c0_84 = arith.constant 0 : index
    %137 = vector.load %arg11[%136, %c0_84] : memref<72x32xf32, #tpu.memory_space<vmem>>, vector<16x32xf32>
    %c24_i32_85 = arith.constant 24 : i32
    %138 = arith.addi %10, %c24_i32_85 : i32
    %c4_i32_86 = arith.constant 4 : i32
    %139 = arith.addi %138, %c4_i32_86 : i32
    %140 = arith.index_cast %139 : i32 to index
    %c0_87 = arith.constant 0 : index
    %141 = vector.load %arg11[%140, %c0_87] : memref<72x32xf32, #tpu.memory_space<vmem>>, vector<16x32xf32>
    %c24_i32_88 = arith.constant 24 : i32
    %142 = arith.addi %10, %c24_i32_88 : i32
    %c5_i32_89 = arith.constant 5 : i32
    %143 = arith.addi %142, %c5_i32_89 : i32
    %144 = arith.index_cast %143 : i32 to index
    %c0_90 = arith.constant 0 : index
    %145 = vector.load %arg11[%144, %c0_90] : memref<72x32xf32, #tpu.memory_space<vmem>>, vector<16x32xf32>
    %c24_i32_91 = arith.constant 24 : i32
    %146 = arith.addi %10, %c24_i32_91 : i32
    %c6_i32_92 = arith.constant 6 : i32
    %147 = arith.addi %146, %c6_i32_92 : i32
    %148 = arith.index_cast %147 : i32 to index
    %c0_93 = arith.constant 0 : index
    %149 = vector.load %arg11[%148, %c0_93] : memref<72x32xf32, #tpu.memory_space<vmem>>, vector<16x32xf32>
    %c24_i32_94 = arith.constant 24 : i32
    %150 = arith.addi %10, %c24_i32_94 : i32
    %c7_i32_95 = arith.constant 7 : i32
    %151 = arith.addi %150, %c7_i32_95 : i32
    %152 = arith.index_cast %151 : i32 to index
    %c0_96 = arith.constant 0 : index
    %153 = vector.load %arg11[%152, %c0_96] : memref<72x32xf32, #tpu.memory_space<vmem>>, vector<16x32xf32>
    %154 = tpu.concatenate %125, %129, %133, %137, %141, %145, %149, %153 in 1 : vector<16x32xf32>, vector<16x32xf32>, vector<16x32xf32>, vector<16x32xf32>, vector<16x32xf32>, vector<16x32xf32>, vector<16x32xf32>, vector<16x32xf32> -> vector<16x256xf32>
    %155 = arith.truncf %154 : vector<16x256xf32> to vector<16x256xbf16>
    %c768 = arith.constant 768 : index
    %c0_97 = arith.constant 0 : index
    %156 = vector.load %arg5[%c768, %c0_97] : memref<1280x128xbf16, #tpu.memory_space<vmem>>, vector<256x128xbf16>
    %cst_98 = arith.constant dense<0.000000e+00> : vector<16x128xf32>
    %157 = tpu.matmul %155, %156, %cst_98 {dimension_numbers = #tpu.dot_dimension_numbers<[1], [0], [0], [1], [0, 0, 1, 1], [], []>} : vector<16x256xbf16>, vector<256x128xbf16>, vector<16x128xf32> -> vector<16x128xf32>
    %158 = arith.addf %121, %157 : vector<16x128xf32>
    %c32_i32 = arith.constant 32 : i32
    %159 = arith.addi %10, %c32_i32 : i32
    %c0_i32_99 = arith.constant 0 : i32
    %160 = arith.addi %159, %c0_i32_99 : i32
    %161 = arith.index_cast %160 : i32 to index
    %c0_100 = arith.constant 0 : index
    %162 = vector.load %arg11[%161, %c0_100] : memref<72x32xf32, #tpu.memory_space<vmem>>, vector<16x32xf32>
    %c32_i32_101 = arith.constant 32 : i32
    %163 = arith.addi %10, %c32_i32_101 : i32
    %c1_i32_102 = arith.constant 1 : i32
    %164 = arith.addi %163, %c1_i32_102 : i32
    %165 = arith.index_cast %164 : i32 to index
    %c0_103 = arith.constant 0 : index
    %166 = vector.load %arg11[%165, %c0_103] : memref<72x32xf32, #tpu.memory_space<vmem>>, vector<16x32xf32>
    %c32_i32_104 = arith.constant 32 : i32
    %167 = arith.addi %10, %c32_i32_104 : i32
    %c2_i32_105 = arith.constant 2 : i32
    %168 = arith.addi %167, %c2_i32_105 : i32
    %169 = arith.index_cast %168 : i32 to index
    %c0_106 = arith.constant 0 : index
    %170 = vector.load %arg11[%169, %c0_106] : memref<72x32xf32, #tpu.memory_space<vmem>>, vector<16x32xf32>
    %c32_i32_107 = arith.constant 32 : i32
    %171 = arith.addi %10, %c32_i32_107 : i32
    %c3_i32_108 = arith.constant 3 : i32
    %172 = arith.addi %171, %c3_i32_108 : i32
    %173 = arith.index_cast %172 : i32 to index
    %c0_109 = arith.constant 0 : index
    %174 = vector.load %arg11[%173, %c0_109] : memref<72x32xf32, #tpu.memory_space<vmem>>, vector<16x32xf32>
    %c32_i32_110 = arith.constant 32 : i32
    %175 = arith.addi %10, %c32_i32_110 : i32
    %c4_i32_111 = arith.constant 4 : i32
    %176 = arith.addi %175, %c4_i32_111 : i32
    %177 = arith.index_cast %176 : i32 to index
    %c0_112 = arith.constant 0 : index
    %178 = vector.load %arg11[%177, %c0_112] : memref<72x32xf32, #tpu.memory_space<vmem>>, vector<16x32xf32>
    %c32_i32_113 = arith.constant 32 : i32
    %179 = arith.addi %10, %c32_i32_113 : i32
    %c5_i32_114 = arith.constant 5 : i32
    %180 = arith.addi %179, %c5_i32_114 : i32
    %181 = arith.index_cast %180 : i32 to index
    %c0_115 = arith.constant 0 : index
    %182 = vector.load %arg11[%181, %c0_115] : memref<72x32xf32, #tpu.memory_space<vmem>>, vector<16x32xf32>
    %c32_i32_116 = arith.constant 32 : i32
    %183 = arith.addi %10, %c32_i32_116 : i32
    %c6_i32_117 = arith.constant 6 : i32
    %184 = arith.addi %183, %c6_i32_117 : i32
    %185 = arith.index_cast %184 : i32 to index
    %c0_118 = arith.constant 0 : index
    %186 = vector.load %arg11[%185, %c0_118] : memref<72x32xf32, #tpu.memory_space<vmem>>, vector<16x32xf32>
    %c32_i32_119 = arith.constant 32 : i32
    %187 = arith.addi %10, %c32_i32_119 : i32
    %c7_i32_120 = arith.constant 7 : i32
    %188 = arith.addi %187, %c7_i32_120 : i32
    %189 = arith.index_cast %188 : i32 to index
    %c0_121 = arith.constant 0 : index
    %190 = vector.load %arg11[%189, %c0_121] : memref<72x32xf32, #tpu.memory_space<vmem>>, vector<16x32xf32>
    %191 = tpu.concatenate %162, %166, %170, %174, %178, %182, %186, %190 in 1 : vector<16x32xf32>, vector<16x32xf32>, vector<16x32xf32>, vector<16x32xf32>, vector<16x32xf32>, vector<16x32xf32>, vector<16x32xf32>, vector<16x32xf32> -> vector<16x256xf32>
    %192 = arith.truncf %191 : vector<16x256xf32> to vector<16x256xbf16>
    %c1024 = arith.constant 1024 : index
    %c0_122 = arith.constant 0 : index
    %193 = vector.load %arg5[%c1024, %c0_122] : memref<1280x128xbf16, #tpu.memory_space<vmem>>, vector<256x128xbf16>
    %cst_123 = arith.constant dense<0.000000e+00> : vector<16x128xf32>
    %194 = tpu.matmul %192, %193, %cst_123 {dimension_numbers = #tpu.dot_dimension_numbers<[1], [0], [0], [1], [0, 0, 1, 1], [], []>} : vector<16x256xbf16>, vector<256x128xbf16>, vector<16x128xf32> -> vector<16x128xf32>
    %195 = arith.addf %158, %194 : vector<16x128xf32>
    %c0_124 = arith.constant 0 : index
    %c0_125 = arith.constant 0 : index
    %196 = vector.load %arg7[%c0_124, %c0_125] : memref<1x128xf32, #tpu.memory_space<vmem>>, vector<1x128xf32>
    %197 = vector.broadcast %196 : vector<1x128xf32> to vector<16x128xf32>
    %198 = arith.addf %195, %197 : vector<16x128xf32>
    %cst_126 = arith.constant 0.000000e+00 : f32
    %199 = vector.broadcast %cst_126 : f32 to vector<16x128xf32>
    %200 = arith.maximumf %198, %199 : vector<16x128xf32>
    %c0_127 = arith.constant 0 : index
    %c0_128 = arith.constant 0 : index
    %c0_129 = arith.constant 0 : index
    %201 = vector.load %arg3[%c0_127, %c0_128, %c0_129] : memref<1x16x4xf32, #tpu.memory_space<vmem>>, vector<1x16x4xf32>
    %202 = vector.shape_cast %201 : vector<1x16x4xf32> to vector<16x4xf32>
    %203 = arith.truncf %202 : vector<16x4xf32> to vector<16x4xbf16>
    %c0_130 = arith.constant 0 : index
    %c0_131 = arith.constant 0 : index
    %204 = vector.load %arg8[%c0_130, %c0_131] : memref<4x128xbf16, #tpu.memory_space<vmem>>, vector<4x128xbf16>
    %cst_132 = arith.constant dense<0.000000e+00> : vector<16x128xf32>
    %205 = tpu.matmul %203, %204, %cst_132 {dimension_numbers = #tpu.dot_dimension_numbers<[1], [0], [0], [1], [0, 0, 1, 1], [], []>} : vector<16x4xbf16>, vector<4x128xbf16>, vector<16x128xf32> -> vector<16x128xf32>
    %c0_133 = arith.constant 0 : index
    %c0_134 = arith.constant 0 : index
    %206 = vector.load %arg9[%c0_133, %c0_134] : memref<1x128xf32, #tpu.memory_space<vmem>>, vector<1x128xf32>
    %207 = vector.broadcast %206 : vector<1x128xf32> to vector<16x128xf32>
    %208 = arith.addf %205, %207 : vector<16x128xf32>
    %209 = arith.addf %200, %208 : vector<16x128xf32>
    %cst_135 = arith.constant 0.000000e+00 : f32
    %210 = vector.broadcast %cst_135 : f32 to vector<16x128xf32>
    %211 = arith.maximumf %209, %210 : vector<16x128xf32>
    %c0_136 = arith.constant 0 : index
    %c0_137 = arith.constant 0 : index
    %c0_138 = arith.constant 0 : index
    %212 = vector.load %arg10[%c0_136, %c0_137, %c0_138] : memref<1x16x128xf32, #tpu.memory_space<vmem>>, vector<1x16x128xf32>
    %213 = vector.shape_cast %212 : vector<1x16x128xf32> to vector<16x128xf32>
    %214 = vector.shape_cast %211 : vector<16x128xf32> to vector<1x16x128xf32>
    tpu.vector_store %arg10[%c0_136, %c0_137, %c0_138], %214 {strides = array<i32>} : memref<1x16x128xf32, #tpu.memory_space<vmem>>, vector<1x16x128xf32>,
    return
  }
  func.func @transform_0(%arg0: i32, %arg1: i32) -> (i32, i32, i32) {
    %c0_i32 = arith.constant 0 : i32
    %c0_i32_0 = arith.constant 0 : i32
    %c0_i32_1 = arith.constant 0 : i32
    return %arg0, %c0_i32, %c0_i32_0 : i32, i32, i32
  }
  func.func @transform_1(%arg0: i32, %arg1: i32) -> (i32, i32, i32) {
    %c0_i32 = arith.constant 0 : i32
    %c0_i32_0 = arith.constant 0 : i32
    return %arg0, %arg1, %c0_i32 : i32, i32, i32
  }
  func.func @transform_2(%arg0: i32, %arg1: i32) -> (i32, i32) {
    %c0_i32 = arith.constant 0 : i32
    %c0_i32_0 = arith.constant 0 : i32
    %c0_i32_1 = arith.constant 0 : i32
    return %c0_i32, %c0_i32_0 : i32, i32
  }
  func.func @transform_3(%arg0: i32, %arg1: i32) -> (i32, i32) {
    %c0_i32 = arith.constant 0 : i32
    %c0_i32_0 = arith.constant 0 : i32
    %c0_i32_1 = arith.constant 0 : i32
    return %c0_i32, %c0_i32_0 : i32, i32
  }
  func.func @transform_4(%arg0: i32, %arg1: i32) -> (i32, i32) {
    %c0_i32 = arith.constant 0 : i32
    %c0_i32_0 = arith.constant 0 : i32
    %c0_i32_1 = arith.constant 0 : i32
    return %c0_i32, %c0_i32_0 : i32, i32
  }
  func.func @transform_5(%arg0: i32, %arg1: i32) -> (i32, i32) {
    %c0_i32 = arith.constant 0 : i32
    %c0_i32_0 = arith.constant 0 : i32
    %c0_i32_1 = arith.constant 0 : i32
    return %c0_i32, %c0_i32_0 : i32, i32
  }
  func.func @transform_6(%arg0: i32, %arg1: i32) -> (i32, i32) {
    %c0_i32 = arith.constant 0 : i32
    %c0_i32_0 = arith.constant 0 : i32
    %c0_i32_1 = arith.constant 0 : i32
    return %c0_i32, %c0_i32_0 : i32, i32
  }
  func.func @transform_7(%arg0: i32, %arg1: i32) -> (i32, i32) {
    %c0_i32 = arith.constant 0 : i32
    %c0_i32_0 = arith.constant 0 : i32
    %c0_i32_1 = arith.constant 0 : i32
    return %c0_i32, %c0_i32_0 : i32, i32
  }
  func.func @transform_8(%arg0: i32, %arg1: i32) -> (i32, i32, i32) {
    %c0_i32 = arith.constant 0 : i32
    %c0_i32_0 = arith.constant 0 : i32
    return %arg0, %arg1, %c0_i32 : i32, i32, i32
  }
}

module attributes {stable_mosaic.version = 11 : i64} {
  func.func @kernel(%arg0: i32, %arg1: i32, %arg2: memref<1x16x128xf32, #tpu.memory_space<vmem>>, %arg3: memref<1x16x128xf32, #tpu.memory_space<vmem>>, %arg4: memref<128x32xbf16, #tpu.memory_space<vmem>>, %arg5: memref<1280x128xbf16, #tpu.memory_space<vmem>>, %arg6: memref<128x128xbf16, #tpu.memory_space<vmem>>, %arg7: memref<1x128xf32, #tpu.memory_space<vmem>>, %arg8: memref<1x128xf32, #tpu.memory_space<vmem>>, %arg9: memref<1x128xf32, #tpu.memory_space<vmem>>, %arg10: memref<1x16x128xf32, #tpu.memory_space<vmem>>, %arg11: memref<72x32xf32, #tpu.memory_space<vmem>>, %arg12: memref<16x128xf32, #tpu.memory_space<vmem>>) attributes {dimension_semantics = [#tpu.dimension_semantics<parallel>, #tpu.dimension_semantics<arbitrary>], iteration_bounds = array<i64: 2, 1>, scalar_prefetch = 0 : i64, scratch_operands = 2 : i64, tpu.core_type = #tpu.core_type<tc>, window_params = [{transform_indices = @transform_0, window_bounds = array<i64: 1, 16, 128>}, {transform_indices = @transform_1, window_bounds = array<i64: 1, 16, 128>}, {pipeline_mode = #tpu.pipeline_mode<synchronous>, transform_indices = @transform_2, window_bounds = array<i64: 128, 32>}, {pipeline_mode = #tpu.pipeline_mode<synchronous>, transform_indices = @transform_3, window_bounds = array<i64: 1280, 128>}, {pipeline_mode = #tpu.pipeline_mode<synchronous>, transform_indices = @transform_4, window_bounds = array<i64: 128, 128>}, {pipeline_mode = #tpu.pipeline_mode<synchronous>, transform_indices = @transform_5, window_bounds = array<i64: 1, 128>}, {pipeline_mode = #tpu.pipeline_mode<synchronous>, transform_indices = @transform_6, window_bounds = array<i64: 1, 128>}, {pipeline_mode = #tpu.pipeline_mode<synchronous>, transform_indices = @transform_7, window_bounds = array<i64: 1, 128>}, {transform_indices = @transform_8, window_bounds = array<i64: 1, 16, 128>}]} {
    %c0_i32 = arith.constant 0 : i32
    %0 = arith.cmpi eq, %arg1, %c0_i32 : i32
    %1 = arith.extui %0 : i1 to i32
    %c0_i32_0 = arith.constant 0 : i32
    %2 = arith.cmpi ne, %1, %c0_i32_0 : i32
    scf.if %2 {
      %c0_138 = arith.constant 0 : index
      %c0_139 = arith.constant 0 : index
      %c0_140 = arith.constant 0 : index
      %215 = vector.load %arg2[%c0_138, %c0_139, %c0_140] : memref<1x16x128xf32, #tpu.memory_space<vmem>>, vector<1x16x128xf32>
      %216 = vector.shape_cast %215 : vector<1x16x128xf32> to vector<16x128xf32>
      %217 = arith.truncf %216 : vector<16x128xf32> to vector<16x128xbf16>
      %c0_141 = arith.constant 0 : index
      %c0_142 = arith.constant 0 : index
      %218 = vector.load %arg4[%c0_141, %c0_142] : memref<128x32xbf16, #tpu.memory_space<vmem>>, vector<128x32xbf16>
      %cst_143 = arith.constant dense<0.000000e+00> : vector<16x32xf32>
      %219 = tpu.matmul %217, %218, %cst_143 {dimension_numbers = #tpu.dot_dimension_numbers<[1], [0], [0], [1], [0, 0, 1, 1], [], []>} : vector<16x128xbf16>, vector<128x32xbf16>, vector<16x32xf32> -> vector<16x32xf32>
      %cst_144 = arith.constant 0.000000e+00 : f32
      %220 = vector.broadcast %cst_144 : f32 to vector<32x32xf32>
      %c0_145 = arith.constant 0 : index
      %c0_146 = arith.constant 0 : index
      %221 = vector.load %arg11[%c0_145, %c0_146] : memref<72x32xf32, #tpu.memory_space<vmem>>, vector<32x32xf32>
      tpu.vector_store %arg11[%c0_145, %c0_146], %220 {strides = array<i32>} : memref<72x32xf32, #tpu.memory_space<vmem>>, vector<32x32xf32>,
      %cst_147 = arith.constant 0.000000e+00 : f32
      %222 = vector.broadcast %cst_147 : f32 to vector<24x32xf32>
      %c48 = arith.constant 48 : index
      %c0_148 = arith.constant 0 : index
      %223 = vector.load %arg11[%c48, %c0_148] : memref<72x32xf32, #tpu.memory_space<vmem>>, vector<24x32xf32>
      tpu.vector_store %arg11[%c48, %c0_148], %222 {strides = array<i32>} : memref<72x32xf32, #tpu.memory_space<vmem>>, vector<24x32xf32>,
      %c32 = arith.constant 32 : index
      %c0_149 = arith.constant 0 : index
      %224 = vector.load %arg11[%c32, %c0_149] : memref<72x32xf32, #tpu.memory_space<vmem>>, vector<16x32xf32>
      tpu.vector_store %arg11[%c32, %c0_149], %219 {strides = array<i32>} : memref<72x32xf32, #tpu.memory_space<vmem>>, vector<16x32xf32>,
      %225 = vector.extract_strided_slice %216 {offsets = [0, 0], sizes = [1, 128], strides = [1, 1]} : vector<16x128xf32> to vector<1x128xf32>
      %226 = vector.extract_strided_slice %216 {offsets = [0, 0], sizes = [15, 128], strides = [1, 1]} : vector<16x128xf32> to vector<15x128xf32>
      %227 = tpu.concatenate %225, %226 in 0 : vector<1x128xf32>, vector<15x128xf32> -> vector<16x128xf32>
      %228 = vector.extract_strided_slice %216 {offsets = [1, 0], sizes = [15, 128], strides = [1, 1]} : vector<16x128xf32> to vector<15x128xf32>
      %229 = vector.extract_strided_slice %216 {offsets = [15, 0], sizes = [1, 128], strides = [1, 1]} : vector<16x128xf32> to vector<1x128xf32>
      %230 = tpu.concatenate %228, %229 in 0 : vector<15x128xf32>, vector<1x128xf32> -> vector<16x128xf32>
      %231 = arith.maximumf %227, %216 : vector<16x128xf32>
      %232 = arith.maximumf %231, %230 : vector<16x128xf32>
      %c0_150 = arith.constant 0 : index
      %c0_151 = arith.constant 0 : index
      %233 = vector.load %arg12[%c0_150, %c0_151] : memref<16x128xf32, #tpu.memory_space<vmem>>, vector<16x128xf32>
      tpu.vector_store %arg12[%c0_150, %c0_151], %232 {strides = array<i32>} : memref<16x128xf32, #tpu.memory_space<vmem>>, vector<16x128xf32>,
    } else {
    }
    %c16_i32 = arith.constant 16 : i32
    %3 = arith.muli %arg1, %c16_i32 : i32
    %4 = tpu.assume_multiple %3, 8 : i32
    %5 = arith.index_cast %4 : i32 to index
    %c0 = arith.constant 0 : index
    %6 = vector.load %arg12[%5, %c0] : memref<16x128xf32, #tpu.memory_space<vmem>>, vector<16x128xf32>
    %7 = arith.truncf %6 : vector<16x128xf32> to vector<16x128xbf16>
    %c0_1 = arith.constant 0 : index
    %c0_2 = arith.constant 0 : index
    %8 = vector.load %arg6[%c0_1, %c0_2] : memref<128x128xbf16, #tpu.memory_space<vmem>>, vector<128x128xbf16>
    %cst = arith.constant dense<0.000000e+00> : vector<16x128xf32>
    %9 = tpu.matmul %7, %8, %cst {dimension_numbers = #tpu.dot_dimension_numbers<[1], [0], [0], [1], [0, 0, 1, 1], [], []>} : vector<16x128xbf16>, vector<128x128xbf16>, vector<16x128xf32> -> vector<16x128xf32>
    %c13_i32 = arith.constant 13 : i32
    %10 = arith.addi %4, %c13_i32 : i32
    %c0_i32_3 = arith.constant 0 : i32
    %11 = arith.addi %10, %c0_i32_3 : i32
    %c0_i32_4 = arith.constant 0 : i32
    %12 = arith.addi %11, %c0_i32_4 : i32
    %13 = arith.index_cast %12 : i32 to index
    %c0_5 = arith.constant 0 : index
    %14 = vector.load %arg11[%13, %c0_5] : memref<72x32xf32, #tpu.memory_space<vmem>>, vector<16x32xf32>
    %c0_i32_6 = arith.constant 0 : i32
    %15 = arith.addi %10, %c0_i32_6 : i32
    %c1_i32 = arith.constant 1 : i32
    %16 = arith.addi %15, %c1_i32 : i32
    %17 = arith.index_cast %16 : i32 to index
    %c0_7 = arith.constant 0 : index
    %18 = vector.load %arg11[%17, %c0_7] : memref<72x32xf32, #tpu.memory_space<vmem>>, vector<16x32xf32>
    %c0_i32_8 = arith.constant 0 : i32
    %19 = arith.addi %10, %c0_i32_8 : i32
    %c2_i32 = arith.constant 2 : i32
    %20 = arith.addi %19, %c2_i32 : i32
    %21 = arith.index_cast %20 : i32 to index
    %c0_9 = arith.constant 0 : index
    %22 = vector.load %arg11[%21, %c0_9] : memref<72x32xf32, #tpu.memory_space<vmem>>, vector<16x32xf32>
    %c0_i32_10 = arith.constant 0 : i32
    %23 = arith.addi %10, %c0_i32_10 : i32
    %c3_i32 = arith.constant 3 : i32
    %24 = arith.addi %23, %c3_i32 : i32
    %25 = arith.index_cast %24 : i32 to index
    %c0_11 = arith.constant 0 : index
    %26 = vector.load %arg11[%25, %c0_11] : memref<72x32xf32, #tpu.memory_space<vmem>>, vector<16x32xf32>
    %c0_i32_12 = arith.constant 0 : i32
    %27 = arith.addi %10, %c0_i32_12 : i32
    %c4_i32 = arith.constant 4 : i32
    %28 = arith.addi %27, %c4_i32 : i32
    %29 = arith.index_cast %28 : i32 to index
    %c0_13 = arith.constant 0 : index
    %30 = vector.load %arg11[%29, %c0_13] : memref<72x32xf32, #tpu.memory_space<vmem>>, vector<16x32xf32>
    %c0_i32_14 = arith.constant 0 : i32
    %31 = arith.addi %10, %c0_i32_14 : i32
    %c5_i32 = arith.constant 5 : i32
    %32 = arith.addi %31, %c5_i32 : i32
    %33 = arith.index_cast %32 : i32 to index
    %c0_15 = arith.constant 0 : index
    %34 = vector.load %arg11[%33, %c0_15] : memref<72x32xf32, #tpu.memory_space<vmem>>, vector<16x32xf32>
    %c0_i32_16 = arith.constant 0 : i32
    %35 = arith.addi %10, %c0_i32_16 : i32
    %c6_i32 = arith.constant 6 : i32
    %36 = arith.addi %35, %c6_i32 : i32
    %37 = arith.index_cast %36 : i32 to index
    %c0_17 = arith.constant 0 : index
    %38 = vector.load %arg11[%37, %c0_17] : memref<72x32xf32, #tpu.memory_space<vmem>>, vector<16x32xf32>
    %c0_i32_18 = arith.constant 0 : i32
    %39 = arith.addi %10, %c0_i32_18 : i32
    %c7_i32 = arith.constant 7 : i32
    %40 = arith.addi %39, %c7_i32 : i32
    %41 = arith.index_cast %40 : i32 to index
    %c0_19 = arith.constant 0 : index
    %42 = vector.load %arg11[%41, %c0_19] : memref<72x32xf32, #tpu.memory_space<vmem>>, vector<16x32xf32>
    %43 = tpu.concatenate %14, %18, %22, %26, %30, %34, %38, %42 in 1 : vector<16x32xf32>, vector<16x32xf32>, vector<16x32xf32>, vector<16x32xf32>, vector<16x32xf32>, vector<16x32xf32>, vector<16x32xf32>, vector<16x32xf32> -> vector<16x256xf32>
    %44 = arith.truncf %43 : vector<16x256xf32> to vector<16x256xbf16>
    %c0_20 = arith.constant 0 : index
    %c0_21 = arith.constant 0 : index
    %45 = vector.load %arg5[%c0_20, %c0_21] : memref<1280x128xbf16, #tpu.memory_space<vmem>>, vector<256x128xbf16>
    %cst_22 = arith.constant dense<0.000000e+00> : vector<16x128xf32>
    %46 = tpu.matmul %44, %45, %cst_22 {dimension_numbers = #tpu.dot_dimension_numbers<[1], [0], [0], [1], [0, 0, 1, 1], [], []>} : vector<16x256xbf16>, vector<256x128xbf16>, vector<16x128xf32> -> vector<16x128xf32>
    %47 = arith.addf %9, %46 : vector<16x128xf32>
    %c8_i32 = arith.constant 8 : i32
    %48 = arith.addi %10, %c8_i32 : i32
    %c0_i32_23 = arith.constant 0 : i32
    %49 = arith.addi %48, %c0_i32_23 : i32
    %50 = arith.index_cast %49 : i32 to index
    %c0_24 = arith.constant 0 : index
    %51 = vector.load %arg11[%50, %c0_24] : memref<72x32xf32, #tpu.memory_space<vmem>>, vector<16x32xf32>
    %c8_i32_25 = arith.constant 8 : i32
    %52 = arith.addi %10, %c8_i32_25 : i32
    %c1_i32_26 = arith.constant 1 : i32
    %53 = arith.addi %52, %c1_i32_26 : i32
    %54 = arith.index_cast %53 : i32 to index
    %c0_27 = arith.constant 0 : index
    %55 = vector.load %arg11[%54, %c0_27] : memref<72x32xf32, #tpu.memory_space<vmem>>, vector<16x32xf32>
    %c8_i32_28 = arith.constant 8 : i32
    %56 = arith.addi %10, %c8_i32_28 : i32
    %c2_i32_29 = arith.constant 2 : i32
    %57 = arith.addi %56, %c2_i32_29 : i32
    %58 = arith.index_cast %57 : i32 to index
    %c0_30 = arith.constant 0 : index
    %59 = vector.load %arg11[%58, %c0_30] : memref<72x32xf32, #tpu.memory_space<vmem>>, vector<16x32xf32>
    %c8_i32_31 = arith.constant 8 : i32
    %60 = arith.addi %10, %c8_i32_31 : i32
    %c3_i32_32 = arith.constant 3 : i32
    %61 = arith.addi %60, %c3_i32_32 : i32
    %62 = arith.index_cast %61 : i32 to index
    %c0_33 = arith.constant 0 : index
    %63 = vector.load %arg11[%62, %c0_33] : memref<72x32xf32, #tpu.memory_space<vmem>>, vector<16x32xf32>
    %c8_i32_34 = arith.constant 8 : i32
    %64 = arith.addi %10, %c8_i32_34 : i32
    %c4_i32_35 = arith.constant 4 : i32
    %65 = arith.addi %64, %c4_i32_35 : i32
    %66 = arith.index_cast %65 : i32 to index
    %c0_36 = arith.constant 0 : index
    %67 = vector.load %arg11[%66, %c0_36] : memref<72x32xf32, #tpu.memory_space<vmem>>, vector<16x32xf32>
    %c8_i32_37 = arith.constant 8 : i32
    %68 = arith.addi %10, %c8_i32_37 : i32
    %c5_i32_38 = arith.constant 5 : i32
    %69 = arith.addi %68, %c5_i32_38 : i32
    %70 = arith.index_cast %69 : i32 to index
    %c0_39 = arith.constant 0 : index
    %71 = vector.load %arg11[%70, %c0_39] : memref<72x32xf32, #tpu.memory_space<vmem>>, vector<16x32xf32>
    %c8_i32_40 = arith.constant 8 : i32
    %72 = arith.addi %10, %c8_i32_40 : i32
    %c6_i32_41 = arith.constant 6 : i32
    %73 = arith.addi %72, %c6_i32_41 : i32
    %74 = arith.index_cast %73 : i32 to index
    %c0_42 = arith.constant 0 : index
    %75 = vector.load %arg11[%74, %c0_42] : memref<72x32xf32, #tpu.memory_space<vmem>>, vector<16x32xf32>
    %c8_i32_43 = arith.constant 8 : i32
    %76 = arith.addi %10, %c8_i32_43 : i32
    %c7_i32_44 = arith.constant 7 : i32
    %77 = arith.addi %76, %c7_i32_44 : i32
    %78 = arith.index_cast %77 : i32 to index
    %c0_45 = arith.constant 0 : index
    %79 = vector.load %arg11[%78, %c0_45] : memref<72x32xf32, #tpu.memory_space<vmem>>, vector<16x32xf32>
    %80 = tpu.concatenate %51, %55, %59, %63, %67, %71, %75, %79 in 1 : vector<16x32xf32>, vector<16x32xf32>, vector<16x32xf32>, vector<16x32xf32>, vector<16x32xf32>, vector<16x32xf32>, vector<16x32xf32>, vector<16x32xf32> -> vector<16x256xf32>
    %81 = arith.truncf %80 : vector<16x256xf32> to vector<16x256xbf16>
    %c256 = arith.constant 256 : index
    %c0_46 = arith.constant 0 : index
    %82 = vector.load %arg5[%c256, %c0_46] : memref<1280x128xbf16, #tpu.memory_space<vmem>>, vector<256x128xbf16>
    %cst_47 = arith.constant dense<0.000000e+00> : vector<16x128xf32>
    %83 = tpu.matmul %81, %82, %cst_47 {dimension_numbers = #tpu.dot_dimension_numbers<[1], [0], [0], [1], [0, 0, 1, 1], [], []>} : vector<16x256xbf16>, vector<256x128xbf16>, vector<16x128xf32> -> vector<16x128xf32>
    %84 = arith.addf %47, %83 : vector<16x128xf32>
    %c16_i32_48 = arith.constant 16 : i32
    %85 = arith.addi %10, %c16_i32_48 : i32
    %c0_i32_49 = arith.constant 0 : i32
    %86 = arith.addi %85, %c0_i32_49 : i32
    %87 = arith.index_cast %86 : i32 to index
    %c0_50 = arith.constant 0 : index
    %88 = vector.load %arg11[%87, %c0_50] : memref<72x32xf32, #tpu.memory_space<vmem>>, vector<16x32xf32>
    %c16_i32_51 = arith.constant 16 : i32
    %89 = arith.addi %10, %c16_i32_51 : i32
    %c1_i32_52 = arith.constant 1 : i32
    %90 = arith.addi %89, %c1_i32_52 : i32
    %91 = arith.index_cast %90 : i32 to index
    %c0_53 = arith.constant 0 : index
    %92 = vector.load %arg11[%91, %c0_53] : memref<72x32xf32, #tpu.memory_space<vmem>>, vector<16x32xf32>
    %c16_i32_54 = arith.constant 16 : i32
    %93 = arith.addi %10, %c16_i32_54 : i32
    %c2_i32_55 = arith.constant 2 : i32
    %94 = arith.addi %93, %c2_i32_55 : i32
    %95 = arith.index_cast %94 : i32 to index
    %c0_56 = arith.constant 0 : index
    %96 = vector.load %arg11[%95, %c0_56] : memref<72x32xf32, #tpu.memory_space<vmem>>, vector<16x32xf32>
    %c16_i32_57 = arith.constant 16 : i32
    %97 = arith.addi %10, %c16_i32_57 : i32
    %c3_i32_58 = arith.constant 3 : i32
    %98 = arith.addi %97, %c3_i32_58 : i32
    %99 = arith.index_cast %98 : i32 to index
    %c0_59 = arith.constant 0 : index
    %100 = vector.load %arg11[%99, %c0_59] : memref<72x32xf32, #tpu.memory_space<vmem>>, vector<16x32xf32>
    %c16_i32_60 = arith.constant 16 : i32
    %101 = arith.addi %10, %c16_i32_60 : i32
    %c4_i32_61 = arith.constant 4 : i32
    %102 = arith.addi %101, %c4_i32_61 : i32
    %103 = arith.index_cast %102 : i32 to index
    %c0_62 = arith.constant 0 : index
    %104 = vector.load %arg11[%103, %c0_62] : memref<72x32xf32, #tpu.memory_space<vmem>>, vector<16x32xf32>
    %c16_i32_63 = arith.constant 16 : i32
    %105 = arith.addi %10, %c16_i32_63 : i32
    %c5_i32_64 = arith.constant 5 : i32
    %106 = arith.addi %105, %c5_i32_64 : i32
    %107 = arith.index_cast %106 : i32 to index
    %c0_65 = arith.constant 0 : index
    %108 = vector.load %arg11[%107, %c0_65] : memref<72x32xf32, #tpu.memory_space<vmem>>, vector<16x32xf32>
    %c16_i32_66 = arith.constant 16 : i32
    %109 = arith.addi %10, %c16_i32_66 : i32
    %c6_i32_67 = arith.constant 6 : i32
    %110 = arith.addi %109, %c6_i32_67 : i32
    %111 = arith.index_cast %110 : i32 to index
    %c0_68 = arith.constant 0 : index
    %112 = vector.load %arg11[%111, %c0_68] : memref<72x32xf32, #tpu.memory_space<vmem>>, vector<16x32xf32>
    %c16_i32_69 = arith.constant 16 : i32
    %113 = arith.addi %10, %c16_i32_69 : i32
    %c7_i32_70 = arith.constant 7 : i32
    %114 = arith.addi %113, %c7_i32_70 : i32
    %115 = arith.index_cast %114 : i32 to index
    %c0_71 = arith.constant 0 : index
    %116 = vector.load %arg11[%115, %c0_71] : memref<72x32xf32, #tpu.memory_space<vmem>>, vector<16x32xf32>
    %117 = tpu.concatenate %88, %92, %96, %100, %104, %108, %112, %116 in 1 : vector<16x32xf32>, vector<16x32xf32>, vector<16x32xf32>, vector<16x32xf32>, vector<16x32xf32>, vector<16x32xf32>, vector<16x32xf32>, vector<16x32xf32> -> vector<16x256xf32>
    %118 = arith.truncf %117 : vector<16x256xf32> to vector<16x256xbf16>
    %c512 = arith.constant 512 : index
    %c0_72 = arith.constant 0 : index
    %119 = vector.load %arg5[%c512, %c0_72] : memref<1280x128xbf16, #tpu.memory_space<vmem>>, vector<256x128xbf16>
    %cst_73 = arith.constant dense<0.000000e+00> : vector<16x128xf32>
    %120 = tpu.matmul %118, %119, %cst_73 {dimension_numbers = #tpu.dot_dimension_numbers<[1], [0], [0], [1], [0, 0, 1, 1], [], []>} : vector<16x256xbf16>, vector<256x128xbf16>, vector<16x128xf32> -> vector<16x128xf32>
    %121 = arith.addf %84, %120 : vector<16x128xf32>
    %c24_i32 = arith.constant 24 : i32
    %122 = arith.addi %10, %c24_i32 : i32
    %c0_i32_74 = arith.constant 0 : i32
    %123 = arith.addi %122, %c0_i32_74 : i32
    %124 = arith.index_cast %123 : i32 to index
    %c0_75 = arith.constant 0 : index
    %125 = vector.load %arg11[%124, %c0_75] : memref<72x32xf32, #tpu.memory_space<vmem>>, vector<16x32xf32>
    %c24_i32_76 = arith.constant 24 : i32
    %126 = arith.addi %10, %c24_i32_76 : i32
    %c1_i32_77 = arith.constant 1 : i32
    %127 = arith.addi %126, %c1_i32_77 : i32
    %128 = arith.index_cast %127 : i32 to index
    %c0_78 = arith.constant 0 : index
    %129 = vector.load %arg11[%128, %c0_78] : memref<72x32xf32, #tpu.memory_space<vmem>>, vector<16x32xf32>
    %c24_i32_79 = arith.constant 24 : i32
    %130 = arith.addi %10, %c24_i32_79 : i32
    %c2_i32_80 = arith.constant 2 : i32
    %131 = arith.addi %130, %c2_i32_80 : i32
    %132 = arith.index_cast %131 : i32 to index
    %c0_81 = arith.constant 0 : index
    %133 = vector.load %arg11[%132, %c0_81] : memref<72x32xf32, #tpu.memory_space<vmem>>, vector<16x32xf32>
    %c24_i32_82 = arith.constant 24 : i32
    %134 = arith.addi %10, %c24_i32_82 : i32
    %c3_i32_83 = arith.constant 3 : i32
    %135 = arith.addi %134, %c3_i32_83 : i32
    %136 = arith.index_cast %135 : i32 to index
    %c0_84 = arith.constant 0 : index
    %137 = vector.load %arg11[%136, %c0_84] : memref<72x32xf32, #tpu.memory_space<vmem>>, vector<16x32xf32>
    %c24_i32_85 = arith.constant 24 : i32
    %138 = arith.addi %10, %c24_i32_85 : i32
    %c4_i32_86 = arith.constant 4 : i32
    %139 = arith.addi %138, %c4_i32_86 : i32
    %140 = arith.index_cast %139 : i32 to index
    %c0_87 = arith.constant 0 : index
    %141 = vector.load %arg11[%140, %c0_87] : memref<72x32xf32, #tpu.memory_space<vmem>>, vector<16x32xf32>
    %c24_i32_88 = arith.constant 24 : i32
    %142 = arith.addi %10, %c24_i32_88 : i32
    %c5_i32_89 = arith.constant 5 : i32
    %143 = arith.addi %142, %c5_i32_89 : i32
    %144 = arith.index_cast %143 : i32 to index
    %c0_90 = arith.constant 0 : index
    %145 = vector.load %arg11[%144, %c0_90] : memref<72x32xf32, #tpu.memory_space<vmem>>, vector<16x32xf32>
    %c24_i32_91 = arith.constant 24 : i32
    %146 = arith.addi %10, %c24_i32_91 : i32
    %c6_i32_92 = arith.constant 6 : i32
    %147 = arith.addi %146, %c6_i32_92 : i32
    %148 = arith.index_cast %147 : i32 to index
    %c0_93 = arith.constant 0 : index
    %149 = vector.load %arg11[%148, %c0_93] : memref<72x32xf32, #tpu.memory_space<vmem>>, vector<16x32xf32>
    %c24_i32_94 = arith.constant 24 : i32
    %150 = arith.addi %10, %c24_i32_94 : i32
    %c7_i32_95 = arith.constant 7 : i32
    %151 = arith.addi %150, %c7_i32_95 : i32
    %152 = arith.index_cast %151 : i32 to index
    %c0_96 = arith.constant 0 : index
    %153 = vector.load %arg11[%152, %c0_96] : memref<72x32xf32, #tpu.memory_space<vmem>>, vector<16x32xf32>
    %154 = tpu.concatenate %125, %129, %133, %137, %141, %145, %149, %153 in 1 : vector<16x32xf32>, vector<16x32xf32>, vector<16x32xf32>, vector<16x32xf32>, vector<16x32xf32>, vector<16x32xf32>, vector<16x32xf32>, vector<16x32xf32> -> vector<16x256xf32>
    %155 = arith.truncf %154 : vector<16x256xf32> to vector<16x256xbf16>
    %c768 = arith.constant 768 : index
    %c0_97 = arith.constant 0 : index
    %156 = vector.load %arg5[%c768, %c0_97] : memref<1280x128xbf16, #tpu.memory_space<vmem>>, vector<256x128xbf16>
    %cst_98 = arith.constant dense<0.000000e+00> : vector<16x128xf32>
    %157 = tpu.matmul %155, %156, %cst_98 {dimension_numbers = #tpu.dot_dimension_numbers<[1], [0], [0], [1], [0, 0, 1, 1], [], []>} : vector<16x256xbf16>, vector<256x128xbf16>, vector<16x128xf32> -> vector<16x128xf32>
    %158 = arith.addf %121, %157 : vector<16x128xf32>
    %c32_i32 = arith.constant 32 : i32
    %159 = arith.addi %10, %c32_i32 : i32
    %c0_i32_99 = arith.constant 0 : i32
    %160 = arith.addi %159, %c0_i32_99 : i32
    %161 = arith.index_cast %160 : i32 to index
    %c0_100 = arith.constant 0 : index
    %162 = vector.load %arg11[%161, %c0_100] : memref<72x32xf32, #tpu.memory_space<vmem>>, vector<16x32xf32>
    %c32_i32_101 = arith.constant 32 : i32
    %163 = arith.addi %10, %c32_i32_101 : i32
    %c1_i32_102 = arith.constant 1 : i32
    %164 = arith.addi %163, %c1_i32_102 : i32
    %165 = arith.index_cast %164 : i32 to index
    %c0_103 = arith.constant 0 : index
    %166 = vector.load %arg11[%165, %c0_103] : memref<72x32xf32, #tpu.memory_space<vmem>>, vector<16x32xf32>
    %c32_i32_104 = arith.constant 32 : i32
    %167 = arith.addi %10, %c32_i32_104 : i32
    %c2_i32_105 = arith.constant 2 : i32
    %168 = arith.addi %167, %c2_i32_105 : i32
    %169 = arith.index_cast %168 : i32 to index
    %c0_106 = arith.constant 0 : index
    %170 = vector.load %arg11[%169, %c0_106] : memref<72x32xf32, #tpu.memory_space<vmem>>, vector<16x32xf32>
    %c32_i32_107 = arith.constant 32 : i32
    %171 = arith.addi %10, %c32_i32_107 : i32
    %c3_i32_108 = arith.constant 3 : i32
    %172 = arith.addi %171, %c3_i32_108 : i32
    %173 = arith.index_cast %172 : i32 to index
    %c0_109 = arith.constant 0 : index
    %174 = vector.load %arg11[%173, %c0_109] : memref<72x32xf32, #tpu.memory_space<vmem>>, vector<16x32xf32>
    %c32_i32_110 = arith.constant 32 : i32
    %175 = arith.addi %10, %c32_i32_110 : i32
    %c4_i32_111 = arith.constant 4 : i32
    %176 = arith.addi %175, %c4_i32_111 : i32
    %177 = arith.index_cast %176 : i32 to index
    %c0_112 = arith.constant 0 : index
    %178 = vector.load %arg11[%177, %c0_112] : memref<72x32xf32, #tpu.memory_space<vmem>>, vector<16x32xf32>
    %c32_i32_113 = arith.constant 32 : i32
    %179 = arith.addi %10, %c32_i32_113 : i32
    %c5_i32_114 = arith.constant 5 : i32
    %180 = arith.addi %179, %c5_i32_114 : i32
    %181 = arith.index_cast %180 : i32 to index
    %c0_115 = arith.constant 0 : index
    %182 = vector.load %arg11[%181, %c0_115] : memref<72x32xf32, #tpu.memory_space<vmem>>, vector<16x32xf32>
    %c32_i32_116 = arith.constant 32 : i32
    %183 = arith.addi %10, %c32_i32_116 : i32
    %c6_i32_117 = arith.constant 6 : i32
    %184 = arith.addi %183, %c6_i32_117 : i32
    %185 = arith.index_cast %184 : i32 to index
    %c0_118 = arith.constant 0 : index
    %186 = vector.load %arg11[%185, %c0_118] : memref<72x32xf32, #tpu.memory_space<vmem>>, vector<16x32xf32>
    %c32_i32_119 = arith.constant 32 : i32
    %187 = arith.addi %10, %c32_i32_119 : i32
    %c7_i32_120 = arith.constant 7 : i32
    %188 = arith.addi %187, %c7_i32_120 : i32
    %189 = arith.index_cast %188 : i32 to index
    %c0_121 = arith.constant 0 : index
    %190 = vector.load %arg11[%189, %c0_121] : memref<72x32xf32, #tpu.memory_space<vmem>>, vector<16x32xf32>
    %191 = tpu.concatenate %162, %166, %170, %174, %178, %182, %186, %190 in 1 : vector<16x32xf32>, vector<16x32xf32>, vector<16x32xf32>, vector<16x32xf32>, vector<16x32xf32>, vector<16x32xf32>, vector<16x32xf32>, vector<16x32xf32> -> vector<16x256xf32>
    %192 = arith.truncf %191 : vector<16x256xf32> to vector<16x256xbf16>
    %c1024 = arith.constant 1024 : index
    %c0_122 = arith.constant 0 : index
    %193 = vector.load %arg5[%c1024, %c0_122] : memref<1280x128xbf16, #tpu.memory_space<vmem>>, vector<256x128xbf16>
    %cst_123 = arith.constant dense<0.000000e+00> : vector<16x128xf32>
    %194 = tpu.matmul %192, %193, %cst_123 {dimension_numbers = #tpu.dot_dimension_numbers<[1], [0], [0], [1], [0, 0, 1, 1], [], []>} : vector<16x256xbf16>, vector<256x128xbf16>, vector<16x128xf32> -> vector<16x128xf32>
    %195 = arith.addf %158, %194 : vector<16x128xf32>
    %c0_124 = arith.constant 0 : index
    %c0_125 = arith.constant 0 : index
    %196 = vector.load %arg7[%c0_124, %c0_125] : memref<1x128xf32, #tpu.memory_space<vmem>>, vector<1x128xf32>
    %197 = vector.broadcast %196 : vector<1x128xf32> to vector<16x128xf32>
    %198 = arith.addf %195, %197 : vector<16x128xf32>
    %cst_126 = arith.constant 0.000000e+00 : f32
    %199 = vector.broadcast %cst_126 : f32 to vector<16x128xf32>
    %200 = arith.maximumf %198, %199 : vector<16x128xf32>
    %c0_127 = arith.constant 0 : index
    %c0_128 = arith.constant 0 : index
    %c0_129 = arith.constant 0 : index
    %201 = vector.load %arg3[%c0_127, %c0_128, %c0_129] : memref<1x16x128xf32, #tpu.memory_space<vmem>>, vector<1x16x128xf32>
    %202 = vector.shape_cast %201 : vector<1x16x128xf32> to vector<16x128xf32>
    %c0_130 = arith.constant 0 : index
    %c0_131 = arith.constant 0 : index
    %203 = vector.load %arg8[%c0_130, %c0_131] : memref<1x128xf32, #tpu.memory_space<vmem>>, vector<1x128xf32>
    %204 = vector.broadcast %203 : vector<1x128xf32> to vector<16x128xf32>
    %205 = arith.mulf %202, %204 : vector<16x128xf32>
    %206 = arith.addf %200, %205 : vector<16x128xf32>
    %c0_132 = arith.constant 0 : index
    %c0_133 = arith.constant 0 : index
    %207 = vector.load %arg9[%c0_132, %c0_133] : memref<1x128xf32, #tpu.memory_space<vmem>>, vector<1x128xf32>
    %208 = vector.broadcast %207 : vector<1x128xf32> to vector<16x128xf32>
    %209 = arith.addf %206, %208 : vector<16x128xf32>
    %cst_134 = arith.constant 0.000000e+00 : f32
    %210 = vector.broadcast %cst_134 : f32 to vector<16x128xf32>
    %211 = arith.maximumf %209, %210 : vector<16x128xf32>
    %c0_135 = arith.constant 0 : index
    %c0_136 = arith.constant 0 : index
    %c0_137 = arith.constant 0 : index
    %212 = vector.load %arg10[%c0_135, %c0_136, %c0_137] : memref<1x16x128xf32, #tpu.memory_space<vmem>>, vector<1x16x128xf32>
    %213 = vector.shape_cast %212 : vector<1x16x128xf32> to vector<16x128xf32>
    %214 = vector.shape_cast %211 : vector<16x128xf32> to vector<1x16x128xf32>
    tpu.vector_store %arg10[%c0_135, %c0_136, %c0_137], %214 {strides = array<i32>} : memref<1x16x128xf32, #tpu.memory_space<vmem>>, vector<1x16x128xf32>,
    return
  }
  func.func @transform_0(%arg0: i32, %arg1: i32) -> (i32, i32, i32) {
    %c0_i32 = arith.constant 0 : i32
    %c0_i32_0 = arith.constant 0 : i32
    %c0_i32_1 = arith.constant 0 : i32
    return %arg0, %c0_i32, %c0_i32_0 : i32, i32, i32
  }
  func.func @transform_1(%arg0: i32, %arg1: i32) -> (i32, i32, i32) {
    %c0_i32 = arith.constant 0 : i32
    %c0_i32_0 = arith.constant 0 : i32
    return %arg0, %arg1, %c0_i32 : i32, i32, i32
  }
  func.func @transform_2(%arg0: i32, %arg1: i32) -> (i32, i32) {
    %c0_i32 = arith.constant 0 : i32
    %c0_i32_0 = arith.constant 0 : i32
    %c0_i32_1 = arith.constant 0 : i32
    return %c0_i32, %c0_i32_0 : i32, i32
  }
  func.func @transform_3(%arg0: i32, %arg1: i32) -> (i32, i32) {
    %c0_i32 = arith.constant 0 : i32
    %c0_i32_0 = arith.constant 0 : i32
    %c0_i32_1 = arith.constant 0 : i32
    return %c0_i32, %c0_i32_0 : i32, i32
  }
  func.func @transform_4(%arg0: i32, %arg1: i32) -> (i32, i32) {
    %c0_i32 = arith.constant 0 : i32
    %c0_i32_0 = arith.constant 0 : i32
    %c0_i32_1 = arith.constant 0 : i32
    return %c0_i32, %c0_i32_0 : i32, i32
  }
  func.func @transform_5(%arg0: i32, %arg1: i32) -> (i32, i32) {
    %c0_i32 = arith.constant 0 : i32
    %c0_i32_0 = arith.constant 0 : i32
    %c0_i32_1 = arith.constant 0 : i32
    return %c0_i32, %c0_i32_0 : i32, i32
  }
  func.func @transform_6(%arg0: i32, %arg1: i32) -> (i32, i32) {
    %c0_i32 = arith.constant 0 : i32
    %c0_i32_0 = arith.constant 0 : i32
    %c0_i32_1 = arith.constant 0 : i32
    return %c0_i32, %c0_i32_0 : i32, i32
  }
  func.func @transform_7(%arg0: i32, %arg1: i32) -> (i32, i32) {
    %c0_i32 = arith.constant 0 : i32
    %c0_i32_0 = arith.constant 0 : i32
    %c0_i32_1 = arith.constant 0 : i32
    return %c0_i32, %c0_i32_0 : i32, i32
  }
  func.func @transform_8(%arg0: i32, %arg1: i32) -> (i32, i32, i32) {
    %c0_i32 = arith.constant 0 : i32
    %c0_i32_0 = arith.constant 0 : i32
    return %arg0, %arg1, %c0_i32 : i32, i32, i32
  }
}

module attributes {stable_mosaic.version = 11 : i64} {
  func.func @_head_kernel(%arg0: i32, %arg1: memref<2x16x128xf32, #tpu.memory_space<vmem>>, %arg2: memref<128x6xf32, #tpu.memory_space<vmem>>, %arg3: memref<1x6xf32, #tpu.memory_space<vmem>>, %arg4: memref<2x6xf32, #tpu.memory_space<vmem>>) attributes {dimension_semantics = [#tpu.dimension_semantics<arbitrary>], iteration_bounds = array<i64: 1>, scalar_prefetch = 0 : i64, scratch_operands = 0 : i64, tpu.core_type = #tpu.core_type<tc>, window_params = [{pipeline_mode = #tpu.pipeline_mode<synchronous>, transform_indices = @transform_0, window_bounds = array<i64: 2, 16, 128>}, {pipeline_mode = #tpu.pipeline_mode<synchronous>, transform_indices = @transform_1, window_bounds = array<i64: 128, 6>}, {pipeline_mode = #tpu.pipeline_mode<synchronous>, transform_indices = @transform_2, window_bounds = array<i64: 1, 6>}, {pipeline_mode = #tpu.pipeline_mode<synchronous>, transform_indices = @transform_3, window_bounds = array<i64: 2, 6>}]} {
    %c0 = arith.constant 0 : index
    %c0_0 = arith.constant 0 : index
    %c0_1 = arith.constant 0 : index
    %0 = vector.load %arg1[%c0, %c0_0, %c0_1] : memref<2x16x128xf32, #tpu.memory_space<vmem>>, vector<2x16x128xf32>
    %cst = arith.constant dense<0.000000e+00> : vector<2x128xf32>
    %1 = vector.multi_reduction <add>, %0, %cst [1] : vector<2x16x128xf32> to vector<2x128xf32>
    %cst_2 = arith.constant 1.600000e+01 : f32
    %2 = vector.broadcast %cst_2 : f32 to vector<2x128xf32>
    %3 = arith.divf %1, %2 : vector<2x128xf32>
    %c0_3 = arith.constant 0 : index
    %c0_4 = arith.constant 0 : index
    %4 = vector.load %arg2[%c0_3, %c0_4] : memref<128x6xf32, #tpu.memory_space<vmem>>, vector<128x6xf32>
    %cst_5 = arith.constant dense<0.000000e+00> : vector<2x6xf32>
    %5 = tpu.matmul %3, %4, %cst_5 {dimension_numbers = #tpu.dot_dimension_numbers<[1], [0], [0], [1], [0, 0, 1, 1], [], []>} : vector<2x128xf32>, vector<128x6xf32>, vector<2x6xf32> -> vector<2x6xf32>
    %c0_6 = arith.constant 0 : index
    %c0_7 = arith.constant 0 : index
    %6 = vector.load %arg3[%c0_6, %c0_7] : memref<1x6xf32, #tpu.memory_space<vmem>>, vector<1x6xf32>
    %7 = vector.broadcast %6 : vector<1x6xf32> to vector<2x6xf32>
    %8 = arith.addf %5, %7 : vector<2x6xf32>
    %cst_8 = arith.constant dense<0xFF800000> : vector<2xf32>
    %9 = vector.multi_reduction <maximumf>, %8, %cst_8 [1] : vector<2x6xf32> to vector<2xf32>
    %10 = vector.shape_cast %9 : vector<2xf32> to vector<2x1xf32>
    %11 = vector.broadcast %10 : vector<2x1xf32> to vector<2x6xf32>
    %12 = arith.subf %8, %11 : vector<2x6xf32>
    %13 = math.exp %12 : vector<2x6xf32>
    %cst_9 = arith.constant dense<0.000000e+00> : vector<2xf32>
    %14 = vector.multi_reduction <add>, %13, %cst_9 [1] : vector<2x6xf32> to vector<2xf32>
    %15 = vector.shape_cast %14 : vector<2xf32> to vector<2x1xf32>
    %16 = vector.broadcast %15 : vector<2x1xf32> to vector<2x6xf32>
    %17 = arith.divf %13, %16 : vector<2x6xf32>
    %c0_10 = arith.constant 0 : index
    %c0_11 = arith.constant 0 : index
    %18 = vector.load %arg4[%c0_10, %c0_11] : memref<2x6xf32, #tpu.memory_space<vmem>>, vector<2x6xf32>
    tpu.vector_store %arg4[%c0_10, %c0_11], %17 {strides = array<i32>} : memref<2x6xf32, #tpu.memory_space<vmem>>, vector<2x6xf32>,
    return
  }
  func.func @transform_0(%arg0: i32) -> (i32, i32, i32) {
    %c0_i32 = arith.constant 0 : i32
    %c0_i32_0 = arith.constant 0 : i32
    %c0_i32_1 = arith.constant 0 : i32
    %c0_i32_2 = arith.constant 0 : i32
    return %c0_i32, %c0_i32_0, %c0_i32_1 : i32, i32, i32
  }
  func.func @transform_1(%arg0: i32) -> (i32, i32) {
    %c0_i32 = arith.constant 0 : i32
    %c0_i32_0 = arith.constant 0 : i32
    %c0_i32_1 = arith.constant 0 : i32
    return %c0_i32, %c0_i32_0 : i32, i32
  }
  func.func @transform_2(%arg0: i32) -> (i32, i32) {
    %c0_i32 = arith.constant 0 : i32
    %c0_i32_0 = arith.constant 0 : i32
    %c0_i32_1 = arith.constant 0 : i32
    return %c0_i32, %c0_i32_0 : i32, i32
  }
  func.func @transform_3(%arg0: i32) -> (i32, i32) {
    %c0_i32 = arith.constant 0 : i32
    %c0_i32_0 = arith.constant 0 : i32
    %c0_i32_1 = arith.constant 0 : i32
    return %c0_i32, %c0_i32_0 : i32, i32
  }
}

</mosaic_0001>

<bundles_post_ra>
// kernel: _lambda_.7
= control target key start
LH: loop header
LB: loop body
LE: loop exit
PB: predicated region body
PF: predicated region fallthrough
CT: control target
= control target key end

     0   :  { %10 = vsyncpa [#allocation5], 0  ;;  %s2632_s18 = smov 0   ;;  %s2634_s19 = smov 0   ;;  %s2876_s0 = inlined_call_operand.vmem [shape: f32[2,16,4], index: 0, kind: input, shape index: {}]   ;;  %s2877_s1 = inlined_call_operand.vmem [shape: bf16[4,32], index: 1, kind: input, shape index: {}]   ;;  %s2878_s2 = inlined_call_operand.hbm [shape: bf16[1280,128], index: 2, kind: input, shape index: {}]   ;;  %s2879_s3 = inlined_call_operand.vmem [shape: bf16[4,128], index: 3, kind: input, shape index: {}]   ;;  %s2880_s4 = inlined_call_operand.vmem [shape: f32[1,128], index: 4, kind: input, shape index: {}]   ;;  %s2881_s5 = inlined_call_operand.vmem [shape: f32[2,16,128], index: 5, kind: output, shape index: {}]  }
   0x1   :  { %s2636_s20 = smov 0  }
   0x2 LB: > { %s1962_s21 = sadd.s32 4294967295, %s2592_s20   ;;  %s28_s22 = sadd.s32 1, %s2588_s19  ;;  %s2592_s20 = sphi %s2636_s20, %s16_s20   ;;  %s2588_s19 = sphi %s2634_s19, %s2891_s19   ;;  %s2584_s18 = sphi %s2632_s18, %s2890_s18  }
   0x3   : > { %p30_p0 = scmp.ge.s32.totalorder %s28_s22, 2  ;;  %p1964_p1 = scmp.ge.s32.totalorder %s2592_s20, 1 }
   0x4   : > { %p171_p2 = scmp.lt.s32.totalorder %s2592_s20, 3  ;;  %p2657_p4 = scmp.eq.s32.totalorder %s1962_s21, 0 }
   0x5   : > { %s2893_s22 = smov (%p30_p0, %s28_s22), 0  ;;  %s2594_s25 = smov [#allocation4]  }
   0x6   : > { %p2653_p3 = pnand %p1964_p1, %p171_p2  ;;  %s186_s26 = sshll.u32 %s2594_s25, 4  ;;  %s187_s26 = int_to_ptr.vmem [resolvable:$true] %s186_s26 }
   0x7   : > { %s2886_s24 = scalar_select %p2657_p4, 1, 0 }
   0x8   : > { %s2885_s23 = scalar_select %p2653_p3, 1, 0 }
   0x9   : > { %p2270_p5 = pneg %p2653_p3  ;;  %s2538_s30 = scalar_lea.hbm %s2878_s2, 10240 }
   0xa   : > { %p2539_p7 = scmp.ne.s32.totalorder %s2878_s2, %s2538_s30  ;;  %p2545_p11 = scmp.lt.u32.totalorder %s2538_s30, %s2878_s2 }
   0xb   : > { %p2665_p6 = pnand %p2657_p4, %p2270_p5 }
   0xd   : > { %p2540_p8 = pneg %p2665_p6 }
   0xf   : > { %p2541_p9 = pnand %p2540_p8, %p2539_p7 }
  0x11   : > { %p2542_p10 = pneg %p2541_p9 }
  0x13   : > { %p2547_p12 = pnand %p2545_p11, %p2542_p10 }
  0x15   : > { %2550 = shalt.err (!%p2547_p12)
}
  0x16   : > { %s2551_s10 = scalar_lea.vmem %s187_s26, 10240  ;;  %p2559_p2 = scmp.lt.s32.totalorder %s187_s26, %s187_s26 }
  0x17   : > { %p2552_p13 = scmp.ne.s32.totalorder %s187_s26, %s2551_s10  ;;  %p2560_p5 = scmp.lt.s32.totalorder %s2551_s10, %s2551_s10 }
  0x19   : > { %p2554_p0 = pnand %p2552_p13, %p2540_p8  ;;  %p2561_p4 = por %p2560_p5, %p2559_p2 }
  0x1b   : > { %p2555_p1 = pneg %p2554_p0 }
  0x1d   : > { %p2562_p3 = pnand %p2561_p4, %p2555_p1 }
  0x1f   : > { %2565 = shalt.err (!%p2562_p3)
}
  0x20   : > { %s2595_s11 = smov 64   ;;  %s2596_s12 = smov 4  }
  0x21   : > { %2273 = dma.hbm_to_vmem [thread:$0]  (!%p2665_p6), %s2878_s2, 10240, %s187_s26, [#allocation5], %s2595_s11, %s2595_s11, %s2596_s12  }
  0x22   : > { %p2888_p7 = scmp.ne.s32.totalorder %s2885_s23, 0 }
  0x23   : > { %p2889_p9 = scmp.ne.s32.totalorder (!%p2888_p7), %s2886_s24, 0 }
  0x24   : > { %216 = sbr.rel (%p2888_p7) target bundleno = 688 (0x2b0), region = 40 }
  0x2b   : > { %2579 = dma.done.wait (%p2889_p9), [#allocation5], 10240  }
  0x2c   : > { %2581 = vsyncadd (%p2889_p9), [#allocation5], 4294957056  ;;  %vm321_vm0 = vcmask 261120   ;;  %v2597_v0 = vmov 0.0   ;;  %vm2598_vm1 = vmmov 0   ;;  %p248_p3 = scmp.lt.s32.totalorder %s2584_s18, 1 }
  0x2d   : > { %2254 = vmatprep.subr.bf16.mxu0 %v2597_v0  ;;  %323 = vst.msk [vmem:[#allocation2 + $0x8] sm:$0xff] %vm321_vm0, %v2597_v0  ;;  %324 = vst.msk [vmem:[#allocation2 + $0x10] sm:$0xff] %vm321_vm0, %v2597_v0  ;;  %2256 = vmatprep.mubr.msk.bf16.mxu0 %vm2598_vm1, %v2597_v0  ;;  %vm276_vm2 = vcmask 1041408   ;;  %vm272_vm3 = vcmask 31744   ;;  %vm333_vm4 = vcmask 1040384   ;;  %vm340_vm5 = vcmask 1046528  }
  0x2e   : > { %325 = vst.msk [vmem:[#allocation2 + $0x18] sm:$0xff] %vm321_vm0, %v2597_v0  ;;  %326 = vst.msk [vmem:[#allocation2 + $0x30] sm:$0xff] %vm321_vm0, %v2597_v0  ;;  %s2895_s18 = smov (!%p248_p3, %s2584_s18), 1  ;;  %v271_v1 = vld [vmem:[%s2877_s1] sm:$0x3]  ;;  %s2599_s27 = smov 64  }
  0x2f   : > { %327 = vst.msk [vmem:[#allocation2 + $0x38] sm:$0xff] %vm321_vm0, %v2597_v0  ;;  %328 = vst.msk [vmem:[#allocation2 + $0x40] sm:$0xff] %vm321_vm0, %v2597_v0  ;;  %s2138_s15 = sshll.u32 %s2895_s18, 4  ;;  %v358_v2 = vld [vmem:[%s2879_s3] sm:$0x3]  ;;  %v278_v4 = vsel %vm276_vm2, %v271_v1, 0 }
  0x30   : > { %s252_s21 = scalar_lea.vmem %s2876_s0, %s2138_s15  ;;  %v631_v5 = vsel %vm276_vm2, %v358_v2, 0  ;;  %2255 = vmatpush3.bf16.msra.mxu0 %v278_v4  ;;  %s2600_s28 = smov 32   ;;  %v2458_v26 = vld [vmem:[#allocation4 + $0x40] sm:$0xff]   ;;  %v2460_v28 = vld [vmem:[#allocation4 + $0x48] sm:$0xff]   ;;  %v2462_v30 = vld [vmem:[#allocation4 + $0x50] sm:$0xff]   ;;  %vm442_vm6 = vcmask 523264  }
  0x31   : > { %v268_v3 = vld [vmem:[%s252_s21] sm:$0xff]  ;;  %v269_v6 = vld [vmem:[%s252_s21 + $0x8] sm:$0xff]  ;;  %2260 = vmatprep.subr.bf16.mxu0 %v2597_v0  ;;  %v2459_v27 = vld [vmem:[#allocation4] sm:$0xff]   ;;  %2142 = vmatprep.subr.bf16.mxu1 %v2458_v26  ;;  %s2601_s29 = smov 96   ;;  %vm445_vm7 = vcmask 785408   ;;  %s261_s9 = scalar_lea.vmem %s2881_s5, %s2138_s15 }
  0x32   : > { %v334_v7 = vrot.slane %v268_v3, 7  ;;  %v341_v8 = vrot.slane %v268_v3, 1  ;;  %v270_v9 = vpack.c.bf16 %v269_v6, %v268_v3  ;;  %v335_v10 = vrot.slane %v269_v6, 7  ;;  %2143 = vmatpush3.bf16.msra.mxu1 %v2459_v27  ;;  %v2461_v29 = vld [vmem:[#allocation4 + $0x8] sm:$0xff]   ;;  %v2467_v31 = vld [vmem:[#allocation4 + $0xc0] sm:$0xff]   ;;  %v2463_v37 = vld [vmem:[#allocation4 + $0x10] sm:$0xff]  }
  0x33   : > { %v342_v11 = vrot.slane %v269_v6, 1  ;;  %2144 = vmatprep.subr.bf16.mxu1 %v2460_v28  ;;  %v2469_v34 = vld [vmem:[#allocation4 + $0x80] sm:$0xff]   ;;  %v2471_v36 = vld [vmem:[#allocation4 + $0xc8] sm:$0xff]   ;;  %v2464_v38 = vld [vmem:[#allocation4 + $0x58] sm:$0xff]  }
  0x34   : > { %v339_v12 = vsel %vm333_vm4, %v268_v3, %v334_v7  ;;  %v336_v13 = vsel %vm333_vm4, %v334_v7, %v335_v10  ;;  %2257 = vmatmul.mubr.msk.bf16.vlgmr.msra.gmra.mrb[0].mxu0 %vm272_vm3, %v270_v9  ;;  %v1978_v20 = vld [vmem:[#allocation2 + $0xf] sm:$0xff]  ;;  %v2473_v39 = vld [vmem:[#allocation4 + $0x88] sm:$0xff]   ;;  %v2466_v41 = vld [vmem:[#allocation4 + $0x60] sm:$0xff]  }
  0x35   : > { %v343_v14 = vsel %vm340_vm5, %v341_v8, %v342_v11  ;;  %v346_v15 = vsel %vm340_vm5, %v342_v11, %v269_v6  ;;  %v347_v16 = vmax.f32 %v339_v12, %v268_v3  ;;  %v348_v17 = vmax.f32 %v336_v13, %v269_v6  ;;  %2261 = vmatpush3.bf16.msra.mxu0 %v631_v5  ;;  %v2720_v21 = vld [vmem:[#allocation2 + $0x17] sm:$0xff]  ;;  %v1976_v22 = vld [vmem:[#allocation2 + $0xe] sm:$0xff]  ;;  %v2470_v43 = vld [vmem:[#allocation4 + $0x68] sm:$0xff]  }
  0x36   : > { %2262 = vmatprep.mubr.msk.bf16.mxu0 %vm2598_vm1, %v2597_v0  ;;  %v2313_v23 = vpack.i.bf16 %v2720_v21, %v1978_v20  ;;  %v2723_v24 = vld [vmem:[#allocation2 + $0x16] sm:$0xff]  ;;  %2166 = vmatprep.subr.bf16.mxu0 %v2467_v31  ;;  %v2472_v44 = vld [vmem:[#allocation4 + $0x28] sm:$0xff]   ;;  %v2474_v45 = vld [vmem:[#allocation4 + $0x70] sm:$0xff]  }
  0x37   : > { %v349_v18 = vmax.f32 %v347_v16, %v343_v14  ;;  %v350_v19 = vmax.f32 %v348_v17, %v346_v15  ;;  %v2308_v25 = vpack.i.bf16 %v2723_v24, %v1976_v22  ;;  %2145 = vmatpush3.bf16.msra.mxu1 %v2461_v29  ;;  %v2465_v40 = vld [vmem:[#allocation4 + $0x18] sm:$0xff]   ;;  %v2468_v42 = vld [vmem:[#allocation4 + $0x20] sm:$0xff]   ;;  %v2475_v46 = vld [vmem:[#allocation4 + $0xd0] sm:$0xff]  }
  0x38   : > { %2314 = vrot.lane.b32.xlu1 %v2313_v23, %s2599_s27  ;;  %2146 = vmatprep.subr.bf16.mxu1 %v2462_v30  ;;  %v2476_v47 = vld [vmem:[#allocation4 + $0x30] sm:$0xff]   ;;  %v2478_v52 = vld [vmem:[#allocation4 + $0x78] sm:$0xff]   ;;  %v1981_v0 = vld [vmem:[#allocation2 + $0x18] sm:$0xff] }
  0x39   : > { %351 = vst.msk [vmem:[#allocation3] sm:$0xff] %vm272_vm3, %v349_v18  ;;  %352 = vst.msk [vmem:[#allocation3 + $0x8] sm:$0xff] %vm272_vm3, %v350_v19  ;;  %2309 = vrot.lane.b32.xlu0 %v2308_v25, %s2600_s28  ;;  %v2477_v48 = vld [vmem:[#allocation4 + $0x90] sm:$0xff]   ;;  %v2479_v53 = vld [vmem:[#allocation4 + $0xd8] sm:$0xff]  }
  0x3a   : > { %v2480_v54 = vld [vmem:[#allocation4 + $0x38] sm:$0xff]   ;;  %v2482_v7 = vld [vmem:[#allocation4 + $0xe0] sm:$0xff]   ;;  %v2486_v10 = vld [vmem:[#allocation4 + $0xe8] sm:$0xff]  }
  0x3b   : > { %2147 = vmatpush3.bf16.msra.mxu1 %v2463_v37  ;;  %v2481_v56 = vld [vmem:[#allocation4 + $0x98] sm:$0xff]   ;;  %v2483_v8 = vld [vmem:[#allocation4 + $0x140] sm:$0xff]   ;;  %v2488_v13 = vld [vmem:[#allocation4 + $0xa8] sm:$0xff]  }
  0x3c   : > { %2148 = vmatprep.subr.bf16.mxu1 %v2464_v38  ;;  %v1986_v57 = vld [vmem:[#allocation2 + $0x13] sm:$0xff]  ;;  %v2490_v16 = vld [vmem:[#allocation4 + $0xf0] sm:$0xff]   ;;  %v2116_v38 = vld [vmem:[#allocation2 + $0x3b] sm:$0xff] }
  0x3d   : > { %v1984_v58 = vld [vmem:[#allocation2 + $0x12] sm:$0xff]  ;;  %v2492_v19 = vld [vmem:[#allocation4 + $0xb0] sm:$0xff]   ;;  %v2114_v37 = vld [vmem:[#allocation2 + $0x3a] sm:$0xff] }
  0x3e   : > { %v1980_v61 = vld [vmem:[#allocation2 + $0x10] sm:$0xff]  ;;  %v2484_v9 = vld [vmem:[#allocation4 + $0xa0] sm:$0xff]  }
  0x3f   : > { %2149 = vmatpush3.bf16.msra.mxu1 %v2465_v40  ;;  %v1988_v1 = vld [vmem:[#allocation2 + $0x14] sm:$0xff]  ;;  %v2333_v3 = vpack.i.bf16 %v1981_v0, %v1980_v61 }
  0x40   : > { %v355_v32 = vld [vmem:[#allocation3] sm:$0xff]  ;;  %v356_v33 = vld [vmem:[#allocation3 + $0x8] sm:$0xff]  ;;  %2150 = vmatprep.subr.bf16.mxu1 %v2466_v41  ;;  %v2499_v29 = vld [vmem:[#allocation4 + $0x1c0] sm:$0xff]  }
  0x41   : > { %v357_v35 = vpack.c.bf16 %v356_v33, %v355_v32  ;;  %v2494_v23 = vld [vmem:[#allocation4 + $0xf8] sm:$0xff]  }
  0x42   : > { %v2496_v26 = vld [vmem:[#allocation4 + $0xb8] sm:$0xff]  }
  0x43   : > { %2263 = vmatmul.mubr.msk.bf16.vlgmr.msra.gmra.mrb[4].mxu0 %vm272_vm3, %v357_v35  ;;  %2151 = vmatpush3.bf16.msra.mxu1 %v2468_v42  ;;  %v2113_v41 = vld [vmem:[#allocation2 + $0x32] sm:$0xff] }
  0x44   : > { %2167 = vmatpush3.bf16.msra.mxu0 %v2469_v34  ;;  %2152 = vmatprep.subr.bf16.mxu1 %v2470_v43  ;;  %v2115_v42 = vld [vmem:[#allocation2 + $0x33] sm:$0xff]  ;;  %v2398_v43 = vpack.i.bf16 %v2114_v37, %v2113_v41 }
  0x45   : > { %2168 = vmatprep.subr.bf16.mxu0 %v2471_v36  ;;  %v2485_v37 = vld [vmem:[#allocation4 + $0x100] sm:$0xff]  }
  0x47   : > { %2153 = vmatpush3.bf16.msra.mxu1 %v2472_v44  ;;  %v2403_v44 = vpack.i.bf16 %v2116_v38, %v2115_v42  ;;  %v2487_v38 = vld [vmem:[#allocation4 + $0x148] sm:$0xff]  }
  0x48   : > { %2169 = vmatpush3.bf16.msra.mxu0 %v2473_v39  ;;  %2154 = vmatprep.subr.bf16.mxu1 %v2474_v45 }
  0x49   : > { %2170 = vmatprep.subr.bf16.mxu0 %v2475_v46 }
  0x4b   : > { %2155 = vmatpush3.bf16.msra.mxu1 %v2476_v47 }
  0x4c   : > { %2171 = vmatpush3.bf16.msra.mxu0 %v2477_v48  ;;  %2156 = vmatprep.subr.bf16.mxu1 %v2478_v52  ;;  %v2086_v52 = vld [vmem:[#allocation2 + $0x34] sm:$0xff] }
  0x4d   : > { %2172 = vmatprep.subr.bf16.mxu0 %v2479_v53 }
  0x4f   : > { %2157 = vmatpush3.bf16.msra.mxu1 %v2480_v54 }
  0x50   : > { %2173 = vmatpush3.bf16.msra.mxu0 %v2481_v56  ;;  %2188 = vmatprep.subr.bf16.mxu1 %v2483_v8  ;;  %v2078_v56 = vld [vmem:[#allocation2 + $0x30] sm:$0xff] }
  0x51   : > { %2174 = vmatprep.subr.bf16.mxu0 %v2482_v7  ;;  %v1982_v7 = vld [vmem:[#allocation2 + $0x11] sm:$0xff] }
  0x54   : > { %2175 = vmatpush3.bf16.msra.mxu0 %v2484_v9 }
  0x55   : > { %2176 = vmatprep.subr.bf16.mxu0 %v2486_v10 }
  0x58   : > { %2177 = vmatpush3.bf16.msra.mxu0 %v2488_v13 }
  0x59   : > { %2178 = vmatprep.subr.bf16.mxu0 %v2490_v16 }
  0x5c   : > { %2179 = vmatpush3.bf16.msra.mxu0 %v2492_v19 }
  0x5d   : > { %2180 = vmatprep.subr.bf16.mxu0 %v2494_v23 }
  0x60   : > { %2181 = vmatpush3.bf16.msra.mxu0 %v2496_v26 }
  0x61   : > { %2210 = vmatprep.subr.bf16.mxu0 %v2499_v29 }
 0x107   : > { %v314_v49 = vpop.f32.mrb[0].mxu0 }
 0x108   : > { %329 = vst.msk [vmem:[#allocation2 + $0x20] sm:$0xff] %vm321_vm0, %v314_v49  ;;  %v2258_v50 = vpop.f32.mrb[1].mxu0 }
 0x109   : > { %v317_v51 = vpop.f32.mrb[2].mxu0 }
 0x10a   : > { %330 = vst.msk [vmem:[#allocation2 + $0x28] sm:$0xff] %vm321_vm0, %v317_v51  ;;  %v2259_v55 = vpop.f32.mrb[3].mxu0  ;;  %v2106_v51 = vld [vmem:[#allocation2 + $0x36] sm:$0xff] }
 0x10b   : > { %v2108_v55 = vld [vmem:[#allocation2 + $0x37] sm:$0xff] }
 0x10f   : > { %v1987_v59 = vld [vmem:[#allocation2 + $0x1b] sm:$0xff] }
 0x110   : > { %v1985_v60 = vld [vmem:[#allocation2 + $0x1a] sm:$0xff]  ;;  %v2323_v62 = vpack.i.bf16 %v1987_v59, %v1986_v57 }
 0x111   : > { %v2318_v63 = vpack.i.bf16 %v1985_v60, %v1984_v58  ;;  %v1989_v2 = vld [vmem:[#allocation2 + $0x1c] sm:$0xff]  ;;  %v2050_v20 = vld [vmem:[#allocation2 + $0x2a] sm:$0xff] }
 0x112   : > { %2324 = vrot.lane.b32.xlu1 %v2323_v62, %s2599_s27  ;;  %v2328_v4 = vpack.i.bf16 %v1989_v2, %v1988_v1  ;;  %v2010_v5 = vld [vmem:[#allocation2 + $0x1e] sm:$0xff]  ;;  %v2042_v27 = vld [vmem:[#allocation2 + $0x26] sm:$0xff]  ;;  %v2074_v45 = vld [vmem:[#allocation2 + $0x2e] sm:$0xff]  ;;  %v2408_v47 = vpack.i.bf16 %v2113_v41, %v2050_v20 }
 0x113   : > { %2319 = vrot.lane.b32.xlu0 %v2318_v63, %s2600_s28  ;;  %v2014_v6 = vld [vmem:[#allocation2 + $0x20] sm:$0xff]  ;;  %v2338_v11 = vpack.i.bf16 %v2010_v5, %v2723_v24  ;;  %v2052_v32 = vld [vmem:[#allocation2 + $0x2b] sm:$0xff]  ;;  %v2413_v46 = vpack.i.bf16 %v2074_v45, %v2042_v27  ;;  %v2438_v53 = vpack.i.bf16 %v2106_v51, %v2074_v45  ;;  %v2110_v57 = vld [vmem:[#allocation2 + $0x38] sm:$0xff]  ;;  %v2315_v63 = vpop.permute.xlu1 %2314 }
 0x114   : > { %v2348_v12 = vpack.i.bf16 %v2014_v6, %v1981_v0  ;;  %v2012_v14 = vld [vmem:[#allocation2 + $0x1f] sm:$0xff]  ;;  %v2044_v31 = vld [vmem:[#allocation2 + $0x27] sm:$0xff]  ;;  %v2076_v48 = vld [vmem:[#allocation2 + $0x2f] sm:$0xff]  ;;  %v2418_v50 = vpack.i.bf16 %v2115_v42, %v2052_v32  ;;  %v2453_v61 = vpack.i.bf16 %v2110_v57, %v2078_v56  ;;  %v2310_v0 = vpop.permute.xlu0 %2309  ;;  %v2317_v8 = vunpack.i.h.bf16 %v2315_v63 }
 0x115   : > { %v2018_v15 = vld [vmem:[#allocation2 + $0x22] sm:$0xff]  ;;  %v2343_v17 = vpack.i.bf16 %v2012_v14, %v2720_v21  ;;  %v2373_v21 = vpack.i.bf16 %v2042_v27, %v2010_v5  ;;  %v2383_v33 = vpack.i.bf16 %v2044_v31, %v2012_v14  ;;  %v2054_v36 = vld [vmem:[#allocation2 + $0x2c] sm:$0xff]  ;;  %v2423_v49 = vpack.i.bf16 %v2076_v48, %v2044_v31 }
 0x116   : > { %2334 = vrot.lane.b32.xlu1 %v2333_v3, %s2601_s29  ;;  %v2353_v18 = vpack.i.bf16 %v2018_v15, %v1985_v60  ;;  %v2020_v22 = vld [vmem:[#allocation2 + $0x23] sm:$0xff]  ;;  %v2368_v24 = vpack.i.bf16 %v2050_v20, %v2018_v15  ;;  %v2428_v54 = vpack.i.bf16 %v2086_v52, %v2054_v36  ;;  %v2312_v1 = vunpack.i.h.bf16 %v2310_v0  ;;  %v1983_v15 = vld [vmem:[#allocation2 + $0x19] sm:$0xff] }
 0x117   : > { %2329 = vrot.lane.b32.xlu0 %v2328_v4, %s2601_s29  ;;  %v2358_v25 = vpack.i.bf16 %v2020_v22, %v1987_v59  ;;  %v2022_v28 = vld [vmem:[#allocation2 + $0x24] sm:$0xff]  ;;  %v2378_v34 = vpack.i.bf16 %v2052_v32, %v2020_v22  ;;  %v2118_v58 = vld [vmem:[#allocation2 + $0x3c] sm:$0xff]  ;;  %v2443_v59 = vpack.i.bf16 %v2108_v55, %v2076_v48  ;;  %v2311_v3 = vunpack.i.l.bf16 %v2310_v0  ;;  %v1974_v4 = vld [vmem:[#allocation2 + $0xd] sm:$0xff] }
 0x118   : > { %v2363_v30 = vpack.i.bf16 %v2022_v28, %v1989_v2  ;;  %v2046_v35 = vld [vmem:[#allocation2 + $0x28] sm:$0xff]  ;;  %v2388_v40 = vpack.i.bf16 %v2054_v36, %v2022_v28  ;;  %v2448_v62 = vpack.i.bf16 %v2118_v58, %v2086_v52  ;;  %v1975_v2 = vld [vmem:[#allocation2 + $0x15] sm:$0xff]  ;;  %v2489_v41 = vld [vmem:[#allocation4 + $0x108] sm:$0xff]  }
 0x119   : > { %v2393_v39 = vpack.i.bf16 %v2046_v35, %v2014_v6  ;;  %v2433_v60 = vpack.i.bf16 %v2078_v56, %v2046_v35  ;;  %v440_v16 = vsel %vm321_vm0, %v1974_v4, %v2311_v3  ;;  %v2491_v42 = vld [vmem:[#allocation4 + $0x150] sm:$0xff]  }
 0x11a   : > { %2339 = vrot.lane.b32.xlu1 %v2338_v11, %s2600_s28  ;;  %v2316_v11 = vunpack.i.l.bf16 %v2315_v63 }
 0x11b   : > { %2349 = vrot.lane.b32.xlu0 %v2348_v12, %s2601_s29  ;;  %v441_v12 = vsel %vm321_vm0, %v1975_v2, %v2312_v1  ;;  %v2497_v1 = vld [vmem:[#allocation4 + $0x118] sm:$0xff]  }
 0x11c   : > { %v443_v28 = vsel %vm442_vm6, %v440_v16, %v2316_v11  ;;  %v444_v29 = vsel %vm442_vm6, %v441_v12, %v2317_v8  ;;  %v2500_v16 = vld [vmem:[#allocation4 + $0x120] sm:$0xff]  }
 0x11e   : > { %2344 = vrot.lane.b32.xlu1 %v2343_v17, %s2599_s27 }
 0x11f   : > { %2354 = vrot.lane.b32.xlu0 %v2353_v18, %s2600_s28 }
 0x122   : > { %2369 = vrot.lane.b32.xlu1 %v2368_v24, %s2600_s28 }
 0x123   : > { %2359 = vrot.lane.b32.xlu0 %v2358_v25, %s2599_s27 }
 0x126   : > { %2374 = vrot.lane.b32.xlu1 %v2373_v21, %s2600_s28 }
 0x127   : > { %2364 = vrot.lane.b32.xlu0 %v2363_v30, %s2601_s29 }
 0x12a   : > { %2384 = vrot.lane.b32.xlu1 %v2383_v33, %s2599_s27 }
 0x12b   : > { %2379 = vrot.lane.b32.xlu0 %v2378_v34, %s2599_s27 }
 0x12e   : > { %2394 = vrot.lane.b32.xlu1 %v2393_v39, %s2601_s29 }
 0x12f   : > { %2389 = vrot.lane.b32.xlu0 %v2388_v40, %s2601_s29 }
 0x132   : > { %2399 = vrot.lane.b32.xlu1 %v2398_v43, %s2600_s28 }
 0x133   : > { %2404 = vrot.lane.b32.xlu0 %v2403_v44, %s2599_s27 }
 0x136   : > { %2414 = vrot.lane.b32.xlu1 %v2413_v46, %s2600_s28 }
 0x137   : > { %2409 = vrot.lane.b32.xlu0 %v2408_v47, %s2600_s28 }
 0x13a   : > { %2424 = vrot.lane.b32.xlu1 %v2423_v49, %s2599_s27  ;;  %v2493_v49 = vld [vmem:[#allocation4 + $0x110] sm:$0xff]  }
 0x13b   : > { %2419 = vrot.lane.b32.xlu0 %v2418_v50, %s2599_s27  ;;  %v2773_v50 = vld [vmem:[#allocation2 + $0x1d] sm:$0xff] }
 0x13e   : > { %2439 = vrot.lane.b32.xlu1 %v2438_v53, %s2600_s28  ;;  %v2495_v53 = vld [vmem:[#allocation4 + $0x158] sm:$0xff]  }
 0x13f   : > { %2429 = vrot.lane.b32.xlu0 %v2428_v54, %s2601_s29 }
 0x142   : > { %2444 = vrot.lane.b32.xlu1 %v2443_v59, %s2599_s27 }
 0x143   : > { %2434 = vrot.lane.b32.xlu0 %v2433_v60, %s2601_s29 }
 0x146   : > { %2454 = vrot.lane.b32.xlu1 %v2453_v61, %s2601_s29 }
 0x147   : > { %2449 = vrot.lane.b32.xlu0 %v2448_v62, %s2601_s29  ;;  %v2016_v62 = vld [vmem:[#allocation2 + $0x21] sm:$0xff] }
 0x184   : > { %v2325_v5 = vpop.permute.xlu1 %2324 }
 0x185   : > { %v2320_v6 = vpop.permute.xlu0 %2319  ;;  %v2327_v13 = vunpack.i.h.bf16 %v2325_v5  ;;  %v2326_v14 = vunpack.i.l.bf16 %v2325_v5 }
 0x186   : > { %v2322_v9 = vunpack.i.h.bf16 %v2320_v6  ;;  %v2321_v10 = vunpack.i.l.bf16 %v2320_v6  ;;  %v2498_v6 = vld [vmem:[#allocation4 + $0x160] sm:$0xff]  }
 0x188   : > { %v448_v17 = vsel %vm321_vm0, %v1982_v7, %v2321_v10  ;;  %v449_v18 = vsel %vm321_vm0, %v1983_v15, %v2322_v9  ;;  %v2335_v19 = vpop.permute.xlu1 %2334 }
 0x189   : > { %v2330_v20 = vpop.permute.xlu0 %2329  ;;  %v2337_v22 = vunpack.i.h.bf16 %v2335_v19  ;;  %v2336_v23 = vunpack.i.l.bf16 %v2335_v19  ;;  %v450_v26 = vsel %vm442_vm6, %v448_v17, %v2326_v14  ;;  %v451_v27 = vsel %vm442_vm6, %v449_v18, %v2327_v13  ;;  %v2501_v17 = vld [vmem:[#allocation4 + $0x180] sm:$0xff]  }
 0x18a   : > { %v2332_v24 = vunpack.i.h.bf16 %v2330_v20  ;;  %v2331_v25 = vunpack.i.l.bf16 %v2330_v20 }
 0x18b   : > { %v446_v31 = vsel %vm445_vm7, %v443_v28, %v2336_v23  ;;  %v447_v32 = vsel %vm445_vm7, %v444_v29, %v2337_v22  ;;  %v2502_v22 = vld [vmem:[#allocation4 + $0x168] sm:$0xff]  }
 0x18c   : > { %v452_v21 = vsel %vm445_vm7, %v450_v26, %v2331_v25  ;;  %v453_v30 = vsel %vm445_vm7, %v451_v27, %v2332_v24  ;;  %v2340_v33 = vpop.permute.xlu1 %2339  ;;  %v454_v36 = vpack.c.bf16 %v447_v32, %v446_v31  ;;  %v2503_v23 = vld [vmem:[#allocation4 + $0x1c8] sm:$0xff]   ;;  %v2792_v26 = vld [vmem:[#allocation2 + $0x29] sm:$0xff] }
 0x18d   : > { %v2350_v34 = vpop.permute.xlu0 %2349  ;;  %v455_v35 = vpack.c.bf16 %v453_v30, %v452_v21  ;;  %v2342_v43 = vunpack.i.h.bf16 %v2340_v33  ;;  %v2341_v44 = vunpack.i.l.bf16 %v2340_v33  ;;  %v2504_v29 = vld [vmem:[#allocation4 + $0x128] sm:$0xff]  }
 0x18e   : > { %v2352_v60 = vunpack.i.h.bf16 %v2350_v34  ;;  %v2351_v61 = vunpack.i.l.bf16 %v2350_v34  ;;  %v2505_v21 = vld [vmem:[#allocation4 + $0x188] sm:$0xff]   ;;  %v2506_v34 = vld [vmem:[#allocation4 + $0x170] sm:$0xff]  }
 0x18f   : > { %616 = vmatprep.mubr.bf16.mxu1 %v455_v35  ;;  %v755_v54 = vsel %vm321_vm0, %v2773_v50, %v2342_v43  ;;  %v754_v55 = vsel %vm321_vm0, %v1975_v2, %v2341_v44  ;;  %v2507_v35 = vld [vmem:[#allocation4 + $0x1d0] sm:$0xff]  }
 0x190   : > { %617 = vmatmul.mubr.bf16.vlgmr.msra.gmra.mrb[0].mxu1 %v454_v36  ;;  %v2345_v39 = vpop.permute.xlu1 %2344  ;;  %v2797_v36 = vpop.f32.mrb[4].mxu0 }
 0x191   : > { %2189 = vmatpush3.bf16.msra.mxu1 %v2485_v37  ;;  %v2355_v40 = vpop.permute.xlu0 %2354  ;;  %v2347_v45 = vunpack.i.h.bf16 %v2345_v39  ;;  %v2346_v46 = vunpack.i.l.bf16 %v2345_v39  ;;  %v2264_v39 = vpop.f32.mrb[5].mxu0 }
 0x192   : > { %2190 = vmatprep.subr.bf16.mxu1 %v2487_v38  ;;  %v2357_v51 = vunpack.i.h.bf16 %v2355_v40  ;;  %v2356_v52 = vunpack.i.l.bf16 %v2355_v40  ;;  %v2524_v39 = vld [vmem:[#allocation4 + $0x1b0] sm:$0xff]  }
 0x193   : > { %v756_v58 = vsel %vm442_vm6, %v754_v55, %v2346_v46  ;;  %v757_v59 = vsel %vm442_vm6, %v755_v54, %v2347_v45  ;;  %v2511_v54 = vld [vmem:[#allocation4 + $0x1d8] sm:$0xff]  }
 0x194   : > { %v2370_v47 = vpop.permute.xlu1 %2369  ;;  %v760_v3 = vsel %vm321_vm0, %v1983_v15, %v2356_v52  ;;  %v761_v4 = vsel %vm321_vm0, %v2016_v62, %v2357_v51  ;;  %v758_v9 = vsel %vm445_vm7, %v756_v58, %v2351_v61  ;;  %v759_v10 = vsel %vm445_vm7, %v757_v59, %v2352_v60  ;;  %v2813_v58 = vld [vmem:[#allocation2 + $0x25] sm:$0xff] }
 0x195   : > { %2191 = vmatpush3.bf16.msra.mxu1 %v2489_v41  ;;  %v2360_v48 = vpop.permute.xlu0 %2359  ;;  %v2372_v18 = vunpack.i.h.bf16 %v2370_v47  ;;  %v2371_v19 = vunpack.i.l.bf16 %v2370_v47  ;;  %v766_v20 = vpack.c.bf16 %v759_v10, %v758_v9  ;;  %v2508_v47 = vld [vmem:[#allocation4 + $0x130] sm:$0xff]  }
 0x196   : > { %2192 = vmatprep.subr.bf16.mxu1 %v2491_v42  ;;  %v2362_v56 = vunpack.i.h.bf16 %v2360_v48  ;;  %v2361_v57 = vunpack.i.l.bf16 %v2360_v48  ;;  %v2803_v42 = vpop.f32.mrb[6].mxu0  ;;  %v2509_v48 = vld [vmem:[#allocation4 + $0x190] sm:$0xff]  }
 0x197   : > { %v1025_v30 = vsel %vm321_vm0, %v2016_v62, %v2371_v19  ;;  %v1026_v31 = vsel %vm321_vm0, %v2792_v26, %v2372_v18  ;;  %v2265_v55 = vpop.f32.mrb[7].mxu0  ;;  %v2512_v62 = vld [vmem:[#allocation4 + $0x138] sm:$0xff]   ;;  %v2520_v18 = vld [vmem:[#allocation4 + $0x1a8] sm:$0xff]  }
 0x198   : > { %v2780_v63 = vpop.permute.xlu1 %2374  ;;  %v762_v7 = vsel %vm442_vm6, %v760_v3, %v2361_v57  ;;  %v763_v8 = vsel %vm442_vm6, %v761_v4, %v2362_v56  ;;  %v2514_v3 = vld [vmem:[#allocation4 + $0x1e0] sm:$0xff]   ;;  %v2521_v19 = vld [vmem:[#allocation4 + $0x208] sm:$0xff]  }
 0x199   : > { %2193 = vmatpush3.bf16.msra.mxu1 %v2493_v49  ;;  %v2365_v0 = vpop.permute.xlu0 %2364  ;;  %v2377_v43 = vunpack.i.h.bf16 %v2780_v63  ;;  %v2376_v44 = vunpack.i.l.bf16 %v2780_v63  ;;  %v2513_v63 = vld [vmem:[#allocation4 + $0x198] sm:$0xff]   ;;  %v2515_v4 = vld [vmem:[#allocation4 + $0x240] sm:$0xff]  }
 0x19a   : > { %v2367_v5 = vunpack.i.h.bf16 %v2365_v0  ;;  %v2366_v2 = vunpack.i.l.bf16 %v2365_v0  ;;  %2194 = vmatprep.subr.bf16.mxu1 %v2495_v53  ;;  %v2510_v53 = vld [vmem:[#allocation4 + $0x178] sm:$0xff]  }
 0x19b   : > { %v1019_v59 = vsel %vm321_vm0, %v2773_v50, %v2376_v44  ;;  %v1020_v60 = vsel %vm321_vm0, %v2813_v58, %v2377_v43  ;;  %v2526_v44 = vld [vmem:[#allocation4 + $0x1f8] sm:$0xff]  }
 0x19c   : > { %v764_v11 = vsel %vm445_vm7, %v762_v7, %v2366_v2  ;;  %v765_v12 = vsel %vm445_vm7, %v763_v8, %v2367_v5  ;;  %v2790_v13 = vpop.permute.xlu1 %2384  ;;  %v2516_v7 = vld [vmem:[#allocation4 + $0x1a0] sm:$0xff]  }
 0x19d   : > { %2195 = vmatpush3.bf16.msra.mxu1 %v2497_v1  ;;  %v2380_v14 = vpop.permute.xlu0 %2379  ;;  %v767_v15 = vpack.c.bf16 %v765_v12, %v764_v11  ;;  %v2387_v49 = vunpack.i.h.bf16 %v2790_v13  ;;  %v2386_v51 = vunpack.i.l.bf16 %v2790_v13  ;;  %v2517_v8 = vld [vmem:[#allocation4 + $0x200] sm:$0xff]   ;;  %v2518_v12 = vld [vmem:[#allocation4 + $0x1e8] sm:$0xff]  }
 0x19e   : > { %2196 = vmatprep.subr.bf16.mxu1 %v2498_v6  ;;  %v2382_v24 = vunpack.i.h.bf16 %v2380_v14  ;;  %v2381_v25 = vunpack.i.l.bf16 %v2380_v14  ;;  %v2519_v13 = vld [vmem:[#allocation4 + $0x248] sm:$0xff]   ;;  %v2111_v14 = vld [vmem:[#allocation2 + $0x31] sm:$0xff] }
 0x19f   : > { %928 = vmatprep.mubr.bf16.mxu0 %v767_v15  ;;  %v1021_v0 = vsel %vm442_vm6, %v1019_v59, %v2386_v51  ;;  %v1022_v1 = vsel %vm442_vm6, %v1020_v60, %v2387_v49  ;;  %v2528_v60 = vld [vmem:[#allocation4 + $0x1b8] sm:$0xff]  }
 0x1a0   : > { %929 = vmatmul.mubr.bf16.vlgmr.msra.gmra.mrb[8].mxu0 %v766_v20  ;;  %v2395_v27 = vpop.permute.xlu1 %2394  ;;  %v1028_v37 = vsel %vm442_vm6, %v1026_v31, %v2382_v24  ;;  %v1027_v38 = vsel %vm442_vm6, %v1025_v30, %v2381_v25 }
 0x1a1   : > { %2197 = vmatpush3.bf16.msra.mxu1 %v2500_v16  ;;  %2211 = vmatpush3.bf16.msra.mxu0 %v2501_v17  ;;  %v2390_v28 = vpop.permute.xlu0 %2389  ;;  %v2397_v56 = vunpack.i.h.bf16 %v2395_v27  ;;  %v2396_v57 = vunpack.i.l.bf16 %v2395_v27  ;;  %v2522_v27 = vld [vmem:[#allocation4 + $0x1f0] sm:$0xff]  }
 0x1a2   : > { %v2392_v32 = vunpack.i.h.bf16 %v2390_v28  ;;  %v2391_v33 = vunpack.i.l.bf16 %v2390_v28  ;;  %2198 = vmatprep.subr.bf16.mxu1 %v2502_v22  ;;  %2212 = vmatprep.subr.bf16.mxu0 %v2503_v23  ;;  %v2523_v28 = vld [vmem:[#allocation4 + $0x250] sm:$0xff]  }
 0x1a3   : > { %v1023_v5 = vsel %vm445_vm7, %v1021_v0, %v2396_v57  ;;  %v1024_v50 = vsel %vm445_vm7, %v1022_v1, %v2397_v56  ;;  %v2530_v1 = vld [vmem:[#allocation4 + $0x260] sm:$0xff]  }
 0x1a4   : > { %v1029_v40 = vsel %vm445_vm7, %v1027_v38, %v2391_v33  ;;  %v1030_v41 = vsel %vm445_vm7, %v1028_v37, %v2392_v32  ;;  %v2811_v52 = vpop.permute.xlu1 %2399  ;;  %v1031_v9 = vpack.c.bf16 %v1024_v50, %v1023_v5 }
 0x1a5   : > { %2199 = vmatpush3.bf16.msra.mxu1 %v2504_v29  ;;  %2213 = vmatpush3.bf16.msra.mxu0 %v2505_v21  ;;  %v2807_v45 = vpop.permute.xlu0 %2404  ;;  %v1032_v46 = vpack.c.bf16 %v1030_v41, %v1029_v40  ;;  %v2402_v30 = vunpack.i.h.bf16 %v2811_v52  ;;  %v2401_v31 = vunpack.i.l.bf16 %v2811_v52  ;;  %v2525_v40 = vld [vmem:[#allocation4 + $0x210] sm:$0xff]  }
 0x1a6   : > { %2200 = vmatprep.subr.bf16.mxu1 %v2506_v34  ;;  %2214 = vmatprep.subr.bf16.mxu0 %v2507_v35 }
 0x1a7   : > { %1193 = vmatprep.mubr.bf16.mxu1 %v1032_v46  ;;  %v2527_v46 = vld [vmem:[#allocation4 + $0x258] sm:$0xff]  }
 0x1a8   : > { %v2823_v2 = vpop.permute.xlu1 %2414 }
 0x1a9   : > { %2201 = vmatpush3.bf16.msra.mxu1 %v2508_v47  ;;  %2215 = vmatpush3.bf16.msra.mxu0 %v2509_v48  ;;  %v2410_v61 = vpop.permute.xlu0 %2409  ;;  %v2417_v34 = vunpack.i.h.bf16 %v2823_v2  ;;  %v2416_v35 = vunpack.i.l.bf16 %v2823_v2  ;;  %v2407_v47 = vunpack.i.h.bf16 %v2807_v45  ;;  %v2406_v48 = vunpack.i.l.bf16 %v2807_v45 }
 0x1aa   : > { %2202 = vmatprep.subr.bf16.mxu1 %v2510_v53  ;;  %2216 = vmatprep.subr.bf16.mxu0 %v2511_v54  ;;  %v2412_v10 = vunpack.i.h.bf16 %v2410_v61  ;;  %v2411_v11 = vunpack.i.l.bf16 %v2410_v61  ;;  %v1555_v53 = vsel %vm321_vm0, %v2111_v14, %v2401_v31  ;;  %v2072_v54 = vld [vmem:[#allocation2 + $0x2d] sm:$0xff] }
 0x1ab   : > { %v1285_v56 = vsel %vm321_vm0, %v2072_v54, %v2417_v34  ;;  %v1284_v57 = vsel %vm321_vm0, %v2813_v58, %v2416_v35  ;;  %v2529_v61 = vld [vmem:[#allocation4 + $0x218] sm:$0xff]  }
 0x1ac   : > { %v1291_v20 = vsel %vm321_vm0, %v2111_v14, %v2412_v10  ;;  %v1290_v22 = vsel %vm321_vm0, %v2792_v26, %v2411_v11  ;;  %v2425_v23 = vpop.permute.xlu1 %2424  ;;  %v2112_v26 = vld [vmem:[#allocation2 + $0x39] sm:$0xff] }
 0x1ad   : > { %2203 = vmatpush3.bf16.msra.mxu1 %v2512_v62  ;;  %2217 = vmatpush3.bf16.msra.mxu0 %v2513_v63  ;;  %v2420_v6 = vpop.permute.xlu0 %2419  ;;  %v2427_v41 = vunpack.i.h.bf16 %v2425_v23  ;;  %v2426_v43 = vunpack.i.l.bf16 %v2425_v23  ;;  %v1556_v52 = vsel %vm321_vm0, %v2112_v26, %v2402_v30  ;;  %v2532_v10 = vld [vmem:[#allocation4 + $0x268] sm:$0xff]  }
 0x1ae   : > { %2218 = vmatprep.subr.bf16.mxu0 %v2514_v3  ;;  %2232 = vmatprep.subr.bf16.mxu1 %v2515_v4  ;;  %v2422_v15 = vunpack.i.h.bf16 %v2420_v6  ;;  %v2421_v16 = vunpack.i.l.bf16 %v2420_v6  ;;  %v1558_v3 = vsel %vm442_vm6, %v1556_v52, %v2407_v47  ;;  %v1557_v4 = vsel %vm442_vm6, %v1555_v53, %v2406_v48  ;;  %v2533_v11 = vld [vmem:[#allocation4 + $0x228] sm:$0xff]  }
 0x1af   : > { %v1286_v45 = vsel %vm442_vm6, %v1284_v57, %v2426_v43  ;;  %v1287_v62 = vsel %vm442_vm6, %v1285_v56, %v2427_v41 }
 0x1b0   : > { %1194 = vmatmul.mubr.bf16.vlgmr.msra.gmra.mrb[4].mxu1 %v1031_v9  ;;  %v1292_v29 = vsel %vm442_vm6, %v1290_v22, %v2421_v16  ;;  %v1293_v21 = vsel %vm442_vm6, %v1291_v20, %v2422_v15  ;;  %v2440_v55 = vpop.permute.xlu1 %2439  ;;  %v2535_v16 = vld [vmem:[#allocation4 + $0x230] sm:$0xff]   ;;  %v2536_v20 = vld [vmem:[#allocation4 + $0x278] sm:$0xff]  }
 0x1b1   : > { %2219 = vmatpush3.bf16.msra.mxu0 %v2516_v7  ;;  %2233 = vmatpush3.bf16.msra.mxu1 %v2517_v8  ;;  %v2430_v17 = vpop.permute.xlu0 %2429  ;;  %v2531_v7 = vld [vmem:[#allocation4 + $0x220] sm:$0xff]   ;;  %v2442_v14 = vunpack.i.h.bf16 %v2440_v55  ;;  %v2441_v15 = vunpack.i.l.bf16 %v2440_v55 }
 0x1b2   : > { %v2432_v24 = vunpack.i.h.bf16 %v2430_v17  ;;  %v2431_v25 = vunpack.i.l.bf16 %v2430_v17  ;;  %2220 = vmatprep.subr.bf16.mxu0 %v2518_v12  ;;  %2234 = vmatprep.subr.bf16.mxu1 %v2519_v13  ;;  %v2534_v12 = vld [vmem:[#allocation4 + $0x270] sm:$0xff]   ;;  %v2104_v17 = vld [vmem:[#allocation2 + $0x35] sm:$0xff] }
 0x1b4   : > { %v1294_v32 = vsel %vm445_vm7, %v1292_v29, %v2431_v25  ;;  %v1295_v33 = vsel %vm445_vm7, %v1293_v21, %v2432_v24  ;;  %v2445_v8 = vpop.permute.xlu1 %2444  ;;  %v1550_v24 = vsel %vm321_vm0, %v2104_v17, %v2442_v14  ;;  %v1549_v25 = vsel %vm321_vm0, %v2072_v54, %v2441_v15 }
 0x1b5   : > { %2221 = vmatpush3.bf16.msra.mxu0 %v2520_v18  ;;  %2235 = vmatpush3.bf16.msra.mxu1 %v2521_v19  ;;  %v2435_v37 = vpop.permute.xlu0 %2434  ;;  %v1297_v38 = vpack.c.bf16 %v1295_v33, %v1294_v32  ;;  %v2447_v18 = vunpack.i.h.bf16 %v2445_v8  ;;  %v2446_v19 = vunpack.i.l.bf16 %v2445_v8 }
 0x1b6   : > { %2222 = vmatprep.subr.bf16.mxu0 %v2522_v27  ;;  %2236 = vmatprep.subr.bf16.mxu1 %v2523_v28  ;;  %v2437_v49 = vunpack.i.h.bf16 %v2435_v37  ;;  %v2436_v51 = vunpack.i.l.bf16 %v2435_v37  ;;  %v2537_v27 = vld [vmem:[#allocation4 + $0x238] sm:$0xff]  }
 0x1b7   : > { %1458 = vmatprep.mubr.bf16.mxu0 %v1297_v38  ;;  %v1551_v28 = vsel %vm442_vm6, %v1549_v25, %v2446_v19  ;;  %v1552_v29 = vsel %vm442_vm6, %v1550_v24, %v2447_v18 }
 0x1b8   : > { %v1289_v58 = vsel %vm445_vm7, %v1287_v62, %v2437_v49  ;;  %v1288_v5 = vsel %vm445_vm7, %v1286_v45, %v2436_v51  ;;  %v2455_v13 = vpop.permute.xlu1 %2454 }
 0x1b9   : > { %2223 = vmatpush3.bf16.msra.mxu0 %v2524_v39  ;;  %2237 = vmatpush3.bf16.msra.mxu1 %v2525_v40  ;;  %v2450_v59 = vpop.permute.xlu0 %2449  ;;  %v1296_v9 = vpack.c.bf16 %v1289_v58, %v1288_v5  ;;  %v2457_v22 = vunpack.i.h.bf16 %v2455_v13  ;;  %v2456_v23 = vunpack.i.l.bf16 %v2455_v13  ;;  %v2135_v5 = vld [vmem:[%s2880_s4] ss:$0 sm:$0xff] }
 0x1ba   : > { %v2452_v63 = vunpack.i.h.bf16 %v2450_v59  ;;  %v2451_v0 = vunpack.i.l.bf16 %v2450_v59  ;;  %2224 = vmatprep.subr.bf16.mxu0 %v2526_v44  ;;  %2238 = vmatprep.subr.bf16.mxu1 %v2527_v46 }
 0x1bb   : > { %v1553_v21 = vsel %vm445_vm7, %v1551_v28, %v2456_v23  ;;  %v1554_v30 = vsel %vm445_vm7, %v1552_v29, %v2457_v22 }
 0x1bc   : > { %v1559_v50 = vsel %vm445_vm7, %v1557_v4, %v2451_v0  ;;  %v1560_v2 = vsel %vm445_vm7, %v1558_v3, %v2452_v63  ;;  %v1561_v31 = vpack.c.bf16 %v1554_v30, %v1553_v21 }
 0x1bd   : > { %2225 = vmatpush3.bf16.msra.mxu0 %v2528_v60  ;;  %2239 = vmatpush3.bf16.msra.mxu1 %v2529_v61  ;;  %v1562_v6 = vpack.c.bf16 %v1560_v2, %v1559_v50 }
 0x1be   : > { %2240 = vmatprep.subr.bf16.mxu1 %v2530_v1 }
 0x1bf   : > { %1723 = vmatprep.mubr.bf16.mxu1 %v1562_v6 }
 0x1c0   : > { %1459 = vmatmul.mubr.bf16.vlgmr.msra.gmra.mrb[12].mxu0 %v1296_v9 }
 0x1c1   : > { %2241 = vmatpush3.bf16.msra.mxu1 %v2531_v7 }
 0x1c2   : > { %2242 = vmatprep.subr.bf16.mxu1 %v2532_v10 }
 0x1c5   : > { %2243 = vmatpush3.bf16.msra.mxu1 %v2533_v11 }
 0x1c6   : > { %2244 = vmatprep.subr.bf16.mxu1 %v2534_v12 }
 0x1c9   : > { %2245 = vmatpush3.bf16.msra.mxu1 %v2535_v16 }
 0x1ca   : > { %2246 = vmatprep.subr.bf16.mxu1 %v2536_v20 }
 0x1cd   : > { %2247 = vmatpush3.bf16.msra.mxu1 %v2537_v27 }
 0x1d0   : > { %1724 = vmatmul.mubr.bf16.vlgmr.msra.gmra.mrb[8].mxu1 %v1561_v31 }
 0x263   : > { %v2158_v32 = vpop.f32.mrb[0].mxu1 }
 0x264   : > { %v2159_v33 = vpop.f32.mrb[1].mxu1 }
 0x265   : > { %v2160_v26 = vadd.f32 %v2159_v33, %v2158_v32  ;;  %v2161_v34 = vpop.f32.mrb[2].mxu1 }
 0x266   : > { %v2162_v35 = vpop.f32.mrb[3].mxu1 }
 0x267   : > { %v668_v37 = vadd.f32 %v2160_v26, %v2797_v36  ;;  %v2163_v38 = vadd.f32 %v2162_v35, %v2161_v34 }
 0x269   : > { %v671_v39 = vadd.f32 %v2163_v38, %v2803_v42 }
 0x273   : > { %v2182_v40 = vpop.f32.mrb[8].mxu0 }
 0x274   : > { %v2183_v41 = vpop.f32.mrb[9].mxu0 }
 0x275   : > { %v2184_v43 = vadd.f32 %v2183_v41, %v2182_v40  ;;  %v2185_v44 = vpop.f32.mrb[10].mxu0 }
 0x276   : > { %v2186_v46 = vpop.f32.mrb[11].mxu0 }
 0x277   : > { %v937_v47 = vadd.f32 %v2184_v43, %v668_v37  ;;  %v2187_v48 = vadd.f32 %v2186_v46, %v2185_v44 }
 0x279   : > { %v938_v49 = vadd.f32 %v2187_v48, %v671_v39 }
 0x283   : > { %v2204_v51 = vpop.f32.mrb[4].mxu1 }
 0x284   : > { %v2205_v52 = vpop.f32.mrb[5].mxu1 }
 0x285   : > { %v2206_v53 = vadd.f32 %v2205_v52, %v2204_v51  ;;  %v2207_v54 = vpop.f32.mrb[6].mxu1 }
 0x286   : > { %v2208_v55 = vpop.f32.mrb[7].mxu1 }
 0x287   : > { %v1202_v56 = vadd.f32 %v2206_v53, %v937_v47  ;;  %v2209_v57 = vadd.f32 %v2208_v55, %v2207_v54 }
 0x289   : > { %v1203_v59 = vadd.f32 %v2209_v57, %v938_v49 }
 0x293   : > { %v2226_v36 = vpop.f32.mrb[12].mxu0 }
 0x294   : > { %v2227_v60 = vpop.f32.mrb[13].mxu0 }
 0x295   : > { %v2228_v61 = vadd.f32 %v2227_v60, %v2226_v36  ;;  %v2229_v42 = vpop.f32.mrb[14].mxu0 }
 0x296   : > { %v2230_v45 = vpop.f32.mrb[15].mxu0 }
 0x297   : > { %v1467_v62 = vadd.f32 %v2228_v61, %v1202_v56  ;;  %v2231_v63 = vadd.f32 %v2230_v45, %v2229_v42 }
 0x299   : > { %v1468_v0 = vadd.f32 %v2231_v63, %v1203_v59 }
 0x2a3   : > { %v2248_v1 = vpop.f32.mrb[8].mxu1 }
 0x2a4   : > { %v2249_v3 = vpop.f32.mrb[9].mxu1 }
 0x2a5   : > { %v2250_v4 = vadd.f32 %v2249_v3, %v2248_v1  ;;  %v2251_v58 = vpop.f32.mrb[10].mxu1 }
 0x2a6   : > { %v2252_v50 = vpop.f32.mrb[11].mxu1 }
 0x2a7   : > { %v1732_v2 = vadd.f32 %v2250_v4, %v1467_v62  ;;  %v2253_v6 = vadd.f32 %v2252_v50, %v2251_v58 }
 0x2a9   : > { %v1741_v7 = vadd.f32 %v2135_v5, %v1732_v2  ;;  %v1733_v8 = vadd.f32 %v2253_v6, %v1468_v0 }
 0x2ab   : > { %v1743_v9 = vmax.f32 %v1741_v7, 0.0  ;;  %v1742_v10 = vadd.f32 %v2135_v5, %v1733_v8 }
 0x2ad   : > { %1745 = vst [vmem:[%s261_s9] sm:$0xff] %v1743_v9  ;;  %v1744_v11 = vmax.f32 %v1742_v10, 0.0 }
 0x2af   : > { %1746 = vst [vmem:[%s261_s9 + $0x8] sm:$0xff] %v1744_v11 }
 0x2b0 PF: > { %s16_s20 = sadd.s32 1, %s2592_s20   ;;  %s2890_s18 = smov %s2588_s19 }
 0x2b1   : > { %p13_p4 = scmp.ge.s32.totalorder %s16_s20, 4   ;;  %s2891_s19 = smov %s2893_s22 }
 0x2b3   :  { %15 = sbr.rel (!%p13_p4) target bundleno = 2 (0x2), region = 120 }
 0x2ba   :  { %1777 = vsyncpa [#allocation5], 1 }
 0x2bb   :  { %1779 = vsyncpa [#allocation5 + $0x1], 1 }

// kernel: _lambda_.8
= control target key start
LH: loop header
LB: loop body
LE: loop exit
PB: predicated region body
PF: predicated region fallthrough
CT: control target
= control target key end

     0   :  { %s2737_s18 = smov 0   ;;  %s2739_s19 = smov 0   ;;  %s3266_s0 = inlined_call_operand.vmem [shape: f32[2,16,128], index: 0, kind: input, shape index: {}]   ;;  %s3267_s1 = inlined_call_operand.vmem [shape: bf16[128,32], index: 1, kind: input, shape index: {}]   ;;  %s3268_s2 = inlined_call_operand.vmem [shape: bf16[1280,128], index: 2, kind: input, shape index: {}]   ;;  %s3269_s3 = inlined_call_operand.vmem [shape: bf16[128,128], index: 3, kind: input, shape index: {}]   ;;  %s3270_s4 = inlined_call_operand.vmem [shape: f32[1,128], index: 4, kind: input, shape index: {}]   ;;  %s3271_s5 = inlined_call_operand.vmem [shape: f32[2,16,128], index: 5, kind: output, shape index: {}]  }
   0x1   :  { %s2741_s20 = smov 0  }
   0x2 LB: > { %s27_s21 = sadd.s32 1, %s2696_s19  ;;  %p2049_p0 = scmp.ge.s32.totalorder %s2700_s20, 1  ;;  %s2700_s20 = sphi %s2741_s20, %s15_s20   ;;  %s2696_s19 = sphi %s2739_s19, %s3273_s19   ;;  %s2692_s18 = sphi %s2737_s18, %s3272_s18  }
   0x3   : > { %p29_p1 = scmp.ge.s32.totalorder %s27_s21, 2  ;;  %p201_p2 = scmp.lt.s32.totalorder %s2700_s20, 3 }
   0x5   : > { %s3275_s21 = smov (%p29_p1, %s27_s21), 0  ;;  %p202_p3 = pnand %p2049_p0, %p201_p2 }
   0x6   : > { %vm361_vm0 = vcmask (!%p202_p3), 261120   ;;  %v2702_v0 = vmov (!%p202_p3), 0.0   ;;  %v2582_v1 = vld [vmem:[%s3267_s1] sm:$0xff] (!%p202_p3)   ;;  %vm2703_vm1 = vmmov (!%p202_p3), 0   ;;  %p233_p4 = scmp.lt.s32.totalorder (!%p202_p3), %s2692_s18, 1  ;;  %v2583_v2 = vld [vmem:[%s3267_s1 + $0x8] sm:$0xff] (!%p202_p3)  }
   0x7   : > { %205 = sbr.rel (%p202_p3) target bundleno = 677 (0x2a5), region = 40  ;;  %2363 = vmatprep.subr.bf16.mxu0 (!%p202_p3), %v2702_v0  ;;  %363 = vst.msk [vmem:[#allocation2 + $0x8] sm:$0xff] (!%p202_p3), %vm361_vm0, %v2702_v0  ;;  %364 = vst.msk [vmem:[#allocation2 + $0x10] sm:$0xff] (!%p202_p3), %vm361_vm0, %v2702_v0  ;;  %2379 = vmatprep.mubr.msk.bf16.mxu0 (!%p202_p3), %vm2703_vm1, %v2702_v0  ;;  %v2584_v3 = vld [vmem:[%s3267_s1 + $0x10] sm:$0xff] (!%p202_p3)   ;;  %v2585_v4 = vld [vmem:[%s3267_s1 + $0x18] sm:$0xff] (!%p202_p3)   ;;  %s2704_s17 = smov (!%p202_p3), 64  }
   0x8   : > { %365 = vst.msk [vmem:[#allocation2 + $0x18] sm:$0xff] (!%p202_p3), %vm361_vm0, %v2702_v0  ;;  %366 = vst.msk [vmem:[#allocation2 + $0x30] sm:$0xff] (!%p202_p3), %vm361_vm0, %v2702_v0  ;;  %2364 = vmatpush3.bf16.msra.mxu0 (!%p202_p3), %v2582_v1  ;;  %v2586_v5 = vld [vmem:[%s3267_s1 + $0x20] sm:$0xff] (!%p202_p3)   ;;  %v2587_v6 = vld [vmem:[%s3267_s1 + $0x28] sm:$0xff] (!%p202_p3)   ;;  %s2705_s22 = smov (!%p202_p3), 32   ;;  %vm373_vm2 = vcmask (!%p202_p3), 1040384  }
   0x9   : > { %367 = vst.msk [vmem:[#allocation2 + $0x38] sm:$0xff] (!%p202_p3), %vm361_vm0, %v2702_v0  ;;  %368 = vst.msk [vmem:[#allocation2 + $0x40] sm:$0xff] (!%p202_p3), %vm361_vm0, %v2702_v0  ;;  %2365 = vmatprep.subr.bf16.mxu0 (!%p202_p3), %v2702_v0  ;;  %v2588_v7 = vld [vmem:[%s3267_s1 + $0x30] sm:$0xff] (!%p202_p3)   ;;  %v2589_v8 = vld [vmem:[%s3267_s1 + $0x38] sm:$0xff] (!%p202_p3)   ;;  %vm380_vm3 = vcmask (!%p202_p3), 1046528   ;;  %s2706_s29 = smov (!%p202_p3), 96  }
   0xa   : > { %v2590_v18 = vld [vmem:[%s3269_s3] sm:$0xff] (!%p202_p3)   ;;  %v2591_v21 = vld [vmem:[%s3269_s3 + $0x8] sm:$0xff] (!%p202_p3)   ;;  %v2598_v24 = vld [vmem:[%s3268_s2 + $0x50] sm:$0xff] (!%p202_p3)   ;;  %vm497_vm4 = vcmask (!%p202_p3), 523264   ;;  %vm500_vm5 = vcmask (!%p202_p3), 785408  }
   0xb   : > { %v2592_v19 = vld [vmem:[%s3268_s2 + $0x40] sm:$0xff] (!%p202_p3)   ;;  %v2595_v22 = vld [vmem:[%s3268_s2 + $0x48] sm:$0xff] (!%p202_p3)   ;;  %v2594_v25 = vld [vmem:[%s3269_s3 + $0x10] sm:$0xff] (!%p202_p3)  }
   0xc   : > { %2366 = vmatpush3.bf16.msra.mxu0 (!%p202_p3), %v2583_v2  ;;  %v2593_v20 = vld [vmem:[%s3268_s2] sm:$0xff] (!%p202_p3)   ;;  %2244 = vmatprep.subr.bf16.mxu1 (!%p202_p3), %v2592_v19  ;;  %v2596_v23 = vld [vmem:[%s3268_s2 + $0x8] sm:$0xff] (!%p202_p3)   ;;  %v2599_v26 = vld [vmem:[%s3268_s2 + $0x10] sm:$0xff] (!%p202_p3)  }
   0xd   : > { %2367 = vmatprep.subr.bf16.mxu0 (!%p202_p3), %v2702_v0  ;;  %2245 = vmatpush3.bf16.msra.mxu1 (!%p202_p3), %v2593_v20  ;;  %v2601_v27 = vld [vmem:[%s3268_s2 + $0x58] sm:$0xff] (!%p202_p3)   ;;  %v2604_v30 = vld [vmem:[%s3268_s2 + $0x60] sm:$0xff] (!%p202_p3)   ;;  %v2607_v33 = vld [vmem:[%s3268_s2 + $0x68] sm:$0xff] (!%p202_p3)  }
   0xe   : > { %s3277_s18 = smov (!%p233_p4, %s2692_s18), 1  ;;  %v2066_v12 = vld [vmem:[#allocation2 + $0xf] sm:$0xff]  ;;  %2246 = vmatprep.subr.bf16.mxu1 %v2595_v22  ;;  %v2597_v28 = vld [vmem:[%s3269_s3 + $0x18] sm:$0xff]   ;;  %v2600_v31 = vld [vmem:[%s3269_s3 + $0x20] sm:$0xff]  }
   0xf   : > { %s2233_s30 = sshll.u32 %s3277_s18, 4  ;;  %v2818_v13 = vld [vmem:[#allocation2 + $0x17] sm:$0xff]  ;;  %v2064_v14 = vld [vmem:[#allocation2 + $0xe] sm:$0xff]  ;;  %v2605_v32 = vld [vmem:[%s3268_s2 + $0x20] sm:$0xff]  }
  0x10   : > { %2368 = vmatpush3.bf16.msra.mxu0 %v2584_v3  ;;  %s237_s14 = scalar_lea.vmem %s3266_s0, %s2233_s30  ;;  %v2437_v15 = vpack.i.bf16 %v2818_v13, %v2066_v12  ;;  %v2821_v16 = vld [vmem:[#allocation2 + $0x16] sm:$0xff]  ;;  %v2603_v34 = vld [vmem:[%s3269_s3 + $0x28] sm:$0xff]   ;;  %v2611_v45 = vld [vmem:[%s3268_s2 + $0x140] sm:$0xff]   ;;  %s246_s9 = scalar_lea.vmem %s3271_s5, %s2233_s30 }
  0x11   : > { %2369 = vmatprep.subr.bf16.mxu0 %v2702_v0  ;;  %v2808_v9 = vld [vmem:[%s237_s14] sm:$0xff]  ;;  %v2810_v10 = vld [vmem:[%s237_s14 + $0x8] sm:$0xff]  ;;  %v2432_v17 = vpack.i.bf16 %v2821_v16, %v2064_v14  ;;  %2247 = vmatpush3.bf16.msra.mxu1 %v2596_v23  ;;  %v2602_v29 = vld [vmem:[%s3268_s2 + $0x18] sm:$0xff]  }
  0x12   : > { %v255_v11 = vpack.c.bf16 %v2810_v10, %v2808_v9  ;;  %2438 = vrot.lane.b32.xlu1 %v2437_v15, %s2704_s17  ;;  %2248 = vmatprep.subr.bf16.mxu1 %v2598_v24  ;;  %v2608_v35 = vld [vmem:[%s3268_s2 + $0x28] sm:$0xff]   ;;  %v2606_v36 = vld [vmem:[%s3269_s3 + $0x30] sm:$0xff]   ;;  %v2609_v37 = vld [vmem:[%s3269_s3 + $0x38] sm:$0xff]   ;;  %v374_v38 = vrot.slane %v2808_v9, 7  ;;  %v375_v39 = vrot.slane %v2810_v10, 7  ;;  %v381_v42 = vrot.slane %v2808_v9, 1 }
  0x13   : > { %2433 = vrot.lane.b32.xlu0 %v2432_v17, %s2705_s22  ;;  %v382_v43 = vrot.slane %v2810_v10, 1  ;;  %v2610_v44 = vld [vmem:[%s3268_s2 + $0x70] sm:$0xff]   ;;  %v2613_v55 = vld [vmem:[%s3268_s2 + $0x100] sm:$0xff]   ;;  %v2614_v58 = vld [vmem:[%s3268_s2 + $0x78] sm:$0xff]  }
  0x14   : > { %2370 = vmatpush3.bf16.msra.mxu0 %v2585_v4  ;;  %v376_v40 = vsel %vm373_vm2, %v374_v38, %v375_v39  ;;  %v379_v41 = vsel %vm373_vm2, %v2808_v9, %v374_v38  ;;  %v2612_v46 = vld [vmem:[%s3268_s2 + $0x30] sm:$0xff]   ;;  %v2615_v59 = vld [vmem:[%s3268_s2 + $0x148] sm:$0xff]   ;;  %v2616_v60 = vld [vmem:[%s3268_s2 + $0x38] sm:$0xff]  }
  0x15   : > { %2371 = vmatprep.subr.bf16.mxu0 %v2702_v0  ;;  %2249 = vmatpush3.bf16.msra.mxu1 %v2599_v26  ;;  %v387_v47 = vmax.f32 %v379_v41, %v2808_v9  ;;  %v388_v48 = vmax.f32 %v376_v40, %v2810_v10  ;;  %v383_v49 = vsel %vm380_vm3, %v381_v42, %v382_v43  ;;  %v2617_v62 = vld [vmem:[%s3268_s2 + $0x108] sm:$0xff]   ;;  %v2074_v63 = vld [vmem:[#allocation2 + $0x13] sm:$0xff]  ;;  %v2618_v14 = vld [vmem:[%s3268_s2 + $0xc0] sm:$0xff]  }
  0x16   : > { %2250 = vmatprep.subr.bf16.mxu1 %v2601_v27  ;;  %v386_v50 = vsel %vm380_vm3, %v382_v43, %v2810_v10  ;;  %v2068_v3 = vld [vmem:[#allocation2 + $0x10] sm:$0xff]  ;;  %v2627_v24 = vld [vmem:[%s3268_s2 + $0x160] sm:$0xff]   ;;  %v2639_v40 = vld [vmem:[%s3268_s2 + $0x178] sm:$0xff]  }
  0x17   : > { %v389_v52 = vmax.f32 %v387_v47, %v383_v49  ;;  %v390_v53 = vmax.f32 %v388_v48, %v386_v50  ;;  %v2619_v15 = vld [vmem:[%s3268_s2 + $0x150] sm:$0xff]   ;;  %v2629_v26 = vld [vmem:[%s3268_s2 + $0x120] sm:$0xff]   ;;  %v2641_v43 = vld [vmem:[%s3268_s2 + $0x138] sm:$0xff]  }
  0x18   : > { %2372 = vmatpush3.bf16.msra.mxu0 %v2586_v5  ;;  %v2621_v17 = vld [vmem:[%s3268_s2 + $0x110] sm:$0xff]   ;;  %v2209_v47 = vld [vmem:[#allocation2 + $0x3a] sm:$0xff] }
  0x19   : > { %2373 = vmatprep.subr.bf16.mxu0 %v2702_v0  ;;  %2251 = vmatpush3.bf16.msra.mxu1 %v2602_v29  ;;  %v397_v57 = vpack.c.bf16 %v390_v53, %v389_v52  ;;  %v2631_v29 = vld [vmem:[%s3268_s2 + $0x168] sm:$0xff]   ;;  %v2211_v48 = vld [vmem:[#allocation2 + $0x3b] sm:$0xff]  ;;  %v2210_v52 = vld [vmem:[#allocation2 + $0x33] sm:$0xff] }
  0x1a   : > { %2252 = vmatprep.subr.bf16.mxu1 %v2604_v30 }
  0x1c   : > { %2374 = vmatpush3.bf16.msra.mxu0 %v2587_v6  ;;  %v2069_v6 = vld [vmem:[#allocation2 + $0x18] sm:$0xff] }
  0x1d   : > { %2375 = vmatprep.subr.bf16.mxu0 %v2702_v0  ;;  %2253 = vmatpush3.bf16.msra.mxu1 %v2605_v32  ;;  %v2457_v9 = vpack.i.bf16 %v2069_v6, %v2068_v3  ;;  %v2205_v3 = vld [vmem:[#allocation2 + $0x38] sm:$0xff] }
  0x1e   : > { %2254 = vmatprep.subr.bf16.mxu1 %v2607_v33 }
  0x20   : > { %2376 = vmatpush3.bf16.msra.mxu0 %v2588_v7  ;;  %v2076_v7 = vld [vmem:[#allocation2 + $0x14] sm:$0xff] }
  0x21   : > { %2377 = vmatprep.subr.bf16.mxu0 %v2702_v0  ;;  %2255 = vmatpush3.bf16.msra.mxu1 %v2608_v35 }
  0x22   : > { %2256 = vmatprep.subr.bf16.mxu1 %v2610_v44 }
  0x24   : > { %2378 = vmatpush3.bf16.msra.mxu0 %v2589_v8 }
  0x25   : > { %2383 = vmatprep.subr.bf16.mxu0 %v2702_v0  ;;  %2257 = vmatpush3.bf16.msra.mxu1 %v2612_v46  ;;  %v2643_v46 = vld [vmem:[%s3268_s2 + $0x240] sm:$0xff]  }
  0x26   : > { %2258 = vmatprep.subr.bf16.mxu1 %v2614_v58 }
  0x27   : > { %2380 = vmatmul.mubr.bf16.vlgmr.msra.gmra.mrb[0].mxu0 %v255_v11 }
  0x28   : > { %2399 = vmatprep.mubr.msk.bf16.mxu0 %vm2703_vm1, %v2702_v0  ;;  %2384 = vmatpush3.bf16.msra.mxu0 %v2590_v18  ;;  %v2623_v18 = vld [vmem:[%s3268_s2 + $0x158] sm:$0xff]  }
  0x29   : > { %2385 = vmatprep.subr.bf16.mxu0 %v2702_v0  ;;  %2259 = vmatpush3.bf16.msra.mxu1 %v2616_v60 }
  0x2a   : > { %2275 = vmatprep.subr.bf16.mxu1 %v2618_v14 }
  0x2c   : > { %2386 = vmatpush3.bf16.msra.mxu0 %v2591_v21  ;;  %v2625_v21 = vld [vmem:[%s3268_s2 + $0x118] sm:$0xff]  }
  0x2d   : > { %2387 = vmatprep.subr.bf16.mxu0 %v2702_v0 }
  0x30   : > { %2388 = vmatpush3.bf16.msra.mxu0 %v2594_v25 }
  0x31   : > { %2389 = vmatprep.subr.bf16.mxu0 %v2702_v0 }
  0x34   : > { %2390 = vmatpush3.bf16.msra.mxu0 %v2597_v28 }
  0x35   : > { %2391 = vmatprep.subr.bf16.mxu0 %v2702_v0 }
  0x38   : > { %2392 = vmatpush3.bf16.msra.mxu0 %v2600_v31 }
  0x39   : > { %2393 = vmatprep.subr.bf16.mxu0 %v2702_v0 }
  0x3c   : > { %2394 = vmatpush3.bf16.msra.mxu0 %v2603_v34  ;;  %v2635_v34 = vld [vmem:[%s3268_s2 + $0x170] sm:$0xff]  }
  0x3d   : > { %2395 = vmatprep.subr.bf16.mxu0 %v2702_v0 }
  0x40   : > { %2396 = vmatpush3.bf16.msra.mxu0 %v2606_v36 }
  0x41   : > { %2397 = vmatprep.subr.bf16.mxu0 %v2702_v0  ;;  %v2072_v0 = vld [vmem:[#allocation2 + $0x12] sm:$0xff] }
  0x44   : > { %2398 = vmatpush3.bf16.msra.mxu0 %v2609_v37  ;;  %v2637_v37 = vld [vmem:[%s3268_s2 + $0x130] sm:$0xff]  }
  0x45   : > { %2297 = vmatprep.subr.bf16.mxu0 %v2611_v45 }
  0x47   : > { %2400 = vmatmul.mubr.bf16.vlgmr.msra.gmra.mrb[4].mxu0 %v397_v57 }
  0x48   : > { %2298 = vmatpush3.bf16.msra.mxu0 %v2613_v55 }
  0x49   : > { %2299 = vmatprep.subr.bf16.mxu0 %v2615_v59 }
  0x4c   : > { %2300 = vmatpush3.bf16.msra.mxu0 %v2617_v62  ;;  %v2181_v62 = vld [vmem:[#allocation2 + $0x34] sm:$0xff] }
  0x4d   : > { %2301 = vmatprep.subr.bf16.mxu0 %v2619_v15  ;;  %v2062_v15 = vld [vmem:[#allocation2 + $0xd] sm:$0xff] }
  0x50   : > { %2302 = vmatpush3.bf16.msra.mxu0 %v2621_v17 }
  0x51   : > { %2303 = vmatprep.subr.bf16.mxu0 %v2623_v18 }
  0x54   : > { %2304 = vmatpush3.bf16.msra.mxu0 %v2625_v21 }
  0x55   : > { %2305 = vmatprep.subr.bf16.mxu0 %v2627_v24 }
  0x58   : > { %2306 = vmatpush3.bf16.msra.mxu0 %v2629_v26 }
  0x59   : > { %2307 = vmatprep.subr.bf16.mxu0 %v2631_v29 }
  0xfa   : > { %v354_v51 = vpop.f32.mrb[0].mxu0 }
  0xfb   : > { %369 = vst.msk [vmem:[#allocation2 + $0x20] sm:$0xff] %vm361_vm0, %v354_v51  ;;  %v2381_v54 = vpop.f32.mrb[1].mxu0  ;;  %v2208_v51 = vld [vmem:[#allocation2 + $0x32] sm:$0xff] }
  0xfc   : > { %v357_v56 = vpop.f32.mrb[2].mxu0  ;;  %v2522_v53 = vpack.i.bf16 %v2209_v47, %v2208_v51  ;;  %v2527_v54 = vpack.i.bf16 %v2211_v48, %v2210_v52  ;;  %v2620_v47 = vld [vmem:[%s3268_s2 + $0x80] sm:$0xff]   ;;  %v2622_v48 = vld [vmem:[%s3268_s2 + $0xc8] sm:$0xff]  }
  0xfd   : > { %370 = vst.msk [vmem:[#allocation2 + $0x28] sm:$0xff] %vm361_vm0, %v357_v56  ;;  %v2382_v61 = vpop.f32.mrb[3].mxu0 }
  0xfe   : > { %v2201_v61 = vld [vmem:[#allocation2 + $0x36] sm:$0xff] }
 0x102   : > { %v2075_v1 = vld [vmem:[#allocation2 + $0x1b] sm:$0xff] }
 0x103   : > { %v2073_v2 = vld [vmem:[#allocation2 + $0x1a] sm:$0xff]  ;;  %v2447_v4 = vpack.i.bf16 %v2075_v1, %v2074_v63 }
 0x104   : > { %v2442_v5 = vpack.i.bf16 %v2073_v2, %v2072_v0  ;;  %v2077_v8 = vld [vmem:[#allocation2 + $0x1c] sm:$0xff]  ;;  %v2145_v27 = vld [vmem:[#allocation2 + $0x2a] sm:$0xff] }
 0x105   : > { %2448 = vrot.lane.b32.xlu1 %v2447_v4, %s2704_s17  ;;  %v2452_v10 = vpack.i.bf16 %v2077_v8, %v2076_v7  ;;  %v2105_v11 = vld [vmem:[#allocation2 + $0x1e] sm:$0xff]  ;;  %v2137_v32 = vld [vmem:[#allocation2 + $0x26] sm:$0xff]  ;;  %v2169_v55 = vld [vmem:[#allocation2 + $0x2e] sm:$0xff]  ;;  %v2532_v57 = vpack.i.bf16 %v2208_v51, %v2145_v27 }
 0x106   : > { %2443 = vrot.lane.b32.xlu0 %v2442_v5, %s2705_s22  ;;  %v2929_v12 = vld [vmem:[#allocation2 + $0x20] sm:$0xff]  ;;  %v2462_v19 = vpack.i.bf16 %v2105_v11, %v2821_v16  ;;  %v2497_v35 = vpack.i.bf16 %v2137_v32, %v2105_v11  ;;  %v2147_v39 = vld [vmem:[#allocation2 + $0x2b] sm:$0xff]  ;;  %v2537_v56 = vpack.i.bf16 %v2169_v55, %v2137_v32  ;;  %v2562_v63 = vpack.i.bf16 %v2201_v61, %v2169_v55 }
 0x107   : > { %v2472_v20 = vpack.i.bf16 %v2929_v12, %v2069_v6  ;;  %v2107_v22 = vld [vmem:[#allocation2 + $0x1f] sm:$0xff]  ;;  %v2139_v38 = vld [vmem:[#allocation2 + $0x27] sm:$0xff]  ;;  %v2171_v58 = vld [vmem:[#allocation2 + $0x2f] sm:$0xff]  ;;  %v2542_v60 = vpack.i.bf16 %v2210_v52, %v2147_v39 }
 0x108   : > { %v2113_v23 = vld [vmem:[#allocation2 + $0x22] sm:$0xff]  ;;  %v2467_v16 = vpack.i.bf16 %v2107_v22, %v2818_v13  ;;  %v2507_v41 = vpack.i.bf16 %v2139_v38, %v2107_v22  ;;  %v2149_v45 = vld [vmem:[#allocation2 + $0x2c] sm:$0xff]  ;;  %v2547_v59 = vpack.i.bf16 %v2171_v58, %v2139_v38  ;;  %v2071_v26 = vld [vmem:[#allocation2 + $0x19] sm:$0xff] }
 0x109   : > { %2458 = vrot.lane.b32.xlu1 %v2457_v9, %s2706_s29  ;;  %v2477_v25 = vpack.i.bf16 %v2113_v23, %v2073_v2  ;;  %v2115_v28 = vld [vmem:[#allocation2 + $0x23] sm:$0xff]  ;;  %v2492_v30 = vpack.i.bf16 %v2145_v27, %v2113_v23  ;;  %v2552_v0 = vpack.i.bf16 %v2181_v62, %v2149_v45  ;;  %v2173_v2 = vld [vmem:[#allocation2 + $0x30] sm:$0xff]  ;;  %v2439_v9 = vpop.permute.xlu1 %2438 }
 0x10a   : > { %2453 = vrot.lane.b32.xlu0 %v2452_v10, %s2706_s29  ;;  %v2482_v31 = vpack.i.bf16 %v2115_v28, %v2075_v1  ;;  %v2633_v13 = vld [vmem:[%s3268_s2 + $0x128] sm:$0xff]   ;;  %v2502_v42 = vpack.i.bf16 %v2147_v39, %v2115_v28  ;;  %v2203_v1 = vld [vmem:[#allocation2 + $0x37] sm:$0xff]  ;;  %v2577_v7 = vpack.i.bf16 %v2205_v3, %v2173_v2  ;;  %v2434_v10 = vpop.permute.xlu0 %2433  ;;  %v2440_v23 = vunpack.i.l.bf16 %v2439_v9 }
 0x10b   : > { %v2117_v33 = vld [vmem:[#allocation2 + $0x24] sm:$0xff]  ;;  %2308 = vmatpush3.bf16.msra.mxu0 %v2633_v13  ;;  %v2213_v4 = vld [vmem:[#allocation2 + $0x3c] sm:$0xff]  ;;  %v2567_v5 = vpack.i.bf16 %v2203_v1, %v2171_v58  ;;  %v2436_v11 = vunpack.i.h.bf16 %v2434_v10  ;;  %v2435_v14 = vunpack.i.l.bf16 %v2434_v10  ;;  %v2626_v52 = vld [vmem:[%s3268_s2 + $0xd0] sm:$0xff]  }
 0x10c   : > { %v2487_v36 = vpack.i.bf16 %v2117_v33, %v2077_v8  ;;  %2309 = vmatprep.subr.bf16.mxu0 %v2635_v34  ;;  %v2141_v44 = vld [vmem:[#allocation2 + $0x28] sm:$0xff]  ;;  %v2512_v50 = vpack.i.bf16 %v2149_v45, %v2117_v33  ;;  %v2572_v8 = vpack.i.bf16 %v2213_v4, %v2181_v62  ;;  %v2628_v55 = vld [vmem:[%s3268_s2 + $0x90] sm:$0xff]   ;;  %v2630_v58 = vld [vmem:[%s3268_s2 + $0xd8] sm:$0xff]  }
 0x10d   : > { %2463 = vrot.lane.b32.xlu1 %v2462_v19, %s2705_s22  ;;  %v2517_v49 = vpack.i.bf16 %v2141_v44, %v2929_v12  ;;  %v2557_v6 = vpack.i.bf16 %v2173_v2, %v2141_v44  ;;  %v3003_v12 = vld [vmem:[#allocation2 + $0x15] sm:$0xff]  ;;  %v495_v27 = vsel %vm361_vm0, %v2062_v15, %v2435_v14  ;;  %v2624_v51 = vld [vmem:[%s3268_s2 + $0x88] sm:$0xff]  }
 0x10e   : > { %2473 = vrot.lane.b32.xlu0 %v2472_v20, %s2706_s29  ;;  %v2070_v19 = vld [vmem:[#allocation2 + $0x11] sm:$0xff]  ;;  %v2441_v20 = vunpack.i.h.bf16 %v2439_v9  ;;  %v496_v24 = vsel %vm361_vm0, %v3003_v12, %v2436_v11  ;;  %v2111_v61 = vld [vmem:[#allocation2 + $0x21] sm:$0xff] }
 0x10f   : > { %2310 = vmatpush3.bf16.msra.mxu0 %v2637_v37  ;;  %v498_v37 = vsel %vm497_vm4, %v495_v27, %v2440_v23 }
 0x110   : > { %2311 = vmatprep.subr.bf16.mxu0 %v2639_v40  ;;  %v499_v38 = vsel %vm497_vm4, %v496_v24, %v2441_v20  ;;  %v2636_v20 = vld [vmem:[%s3268_s2 + $0xa0] sm:$0xff]  }
 0x111   : > { %2468 = vrot.lane.b32.xlu1 %v2467_v16, %s2704_s17 }
 0x112   : > { %2478 = vrot.lane.b32.xlu0 %v2477_v25, %s2705_s22 }
 0x113   : > { %2312 = vmatpush3.bf16.msra.mxu0 %v2641_v43 }
 0x114   : > { %2341 = vmatprep.subr.bf16.mxu0 %v2643_v46 }
 0x115   : > { %2493 = vrot.lane.b32.xlu1 %v2492_v30, %s2705_s22 }
 0x116   : > { %2483 = vrot.lane.b32.xlu0 %v2482_v31, %s2704_s17 }
 0x119   : > { %2498 = vrot.lane.b32.xlu1 %v2497_v35, %s2705_s22 }
 0x11a   : > { %2488 = vrot.lane.b32.xlu0 %v2487_v36, %s2706_s29 }
 0x11d   : > { %2508 = vrot.lane.b32.xlu1 %v2507_v41, %s2704_s17 }
 0x11e   : > { %2503 = vrot.lane.b32.xlu0 %v2502_v42, %s2704_s17 }
 0x121   : > { %2518 = vrot.lane.b32.xlu1 %v2517_v49, %s2706_s29 }
 0x122   : > { %2513 = vrot.lane.b32.xlu0 %v2512_v50, %s2706_s29 }
 0x125   : > { %2523 = vrot.lane.b32.xlu1 %v2522_v53, %s2705_s22 }
 0x126   : > { %2528 = vrot.lane.b32.xlu0 %v2527_v54, %s2704_s17 }
 0x129   : > { %2538 = vrot.lane.b32.xlu1 %v2537_v56, %s2705_s22 }
 0x12a   : > { %2533 = vrot.lane.b32.xlu0 %v2532_v57, %s2705_s22 }
 0x12d   : > { %2548 = vrot.lane.b32.xlu1 %v2547_v59, %s2704_s17 }
 0x12e   : > { %2543 = vrot.lane.b32.xlu0 %v2542_v60, %s2704_s17 }
 0x131   : > { %2563 = vrot.lane.b32.xlu1 %v2562_v63, %s2705_s22 }
 0x132   : > { %2553 = vrot.lane.b32.xlu0 %v2552_v0, %s2706_s29  ;;  %v2632_v0 = vld [vmem:[%s3268_s2 + $0x98] sm:$0xff]  }
 0x135   : > { %2568 = vrot.lane.b32.xlu1 %v2567_v5, %s2704_s17  ;;  %v2634_v5 = vld [vmem:[%s3268_s2 + $0xe0] sm:$0xff]  }
 0x136   : > { %2558 = vrot.lane.b32.xlu0 %v2557_v6, %s2706_s29 }
 0x139   : > { %2578 = vrot.lane.b32.xlu1 %v2577_v7, %s2706_s29 }
 0x13a   : > { %2573 = vrot.lane.b32.xlu0 %v2572_v8, %s2706_s29 }
 0x177   : > { %v2449_v17 = vpop.permute.xlu1 %2448 }
 0x178   : > { %v2444_v18 = vpop.permute.xlu0 %2443  ;;  %v2451_v16 = vunpack.i.h.bf16 %v2449_v17  ;;  %v2450_v25 = vunpack.i.l.bf16 %v2449_v17 }
 0x179   : > { %v2446_v21 = vunpack.i.h.bf16 %v2444_v18  ;;  %v2445_v22 = vunpack.i.l.bf16 %v2444_v18 }
 0x17b   : > { %v503_v28 = vsel %vm361_vm0, %v2070_v19, %v2445_v22  ;;  %v504_v29 = vsel %vm361_vm0, %v2071_v26, %v2446_v21  ;;  %v2459_v30 = vpop.permute.xlu1 %2458  ;;  %v2638_v21 = vld [vmem:[%s3268_s2 + $0xe8] sm:$0xff]  }
 0x17c   : > { %v2454_v31 = vpop.permute.xlu0 %2453  ;;  %v2461_v13 = vunpack.i.h.bf16 %v2459_v30  ;;  %v2460_v32 = vunpack.i.l.bf16 %v2459_v30  ;;  %v505_v35 = vsel %vm497_vm4, %v503_v28, %v2450_v25  ;;  %v506_v36 = vsel %vm497_vm4, %v504_v29, %v2451_v16  ;;  %v2103_v25 = vld [vmem:[#allocation2 + $0x1d] sm:$0xff]  ;;  %v3064_v30 = vld [vmem:[#allocation2 + $0x29] sm:$0xff] }
 0x17d   : > { %v2456_v33 = vunpack.i.h.bf16 %v2454_v31  ;;  %v2455_v34 = vunpack.i.l.bf16 %v2454_v31  ;;  %v3066_v31 = vld [vmem:[#allocation2 + $0x25] sm:$0xff] }
 0x17e   : > { %v501_v41 = vsel %vm500_vm5, %v498_v37, %v2460_v32  ;;  %v502_v42 = vsel %vm500_vm5, %v499_v38, %v2461_v13  ;;  %v2640_v37 = vld [vmem:[%s3268_s2 + $0xa8] sm:$0xff]  }
 0x17f   : > { %v507_v39 = vsel %vm500_vm5, %v505_v35, %v2455_v34  ;;  %v508_v40 = vsel %vm500_vm5, %v506_v36, %v2456_v33  ;;  %v3018_v43 = vpop.permute.xlu1 %2463  ;;  %v509_v46 = vpack.c.bf16 %v502_v42, %v501_v41  ;;  %v2642_v42 = vld [vmem:[%s3268_s2 + $0xf0] sm:$0xff]  }
 0x180   : > { %v3020_v44 = vpop.permute.xlu0 %2473  ;;  %v510_v45 = vpack.c.bf16 %v508_v40, %v507_v39  ;;  %v2465_v27 = vunpack.i.l.bf16 %v3018_v43 }
 0x182   : > { %671 = vmatprep.mubr.bf16.mxu1 %v510_v45 }
 0x183   : > { %672 = vmatmul.mubr.bf16.vlgmr.msra.gmra.mrb[0].mxu1 %v509_v46  ;;  %v3028_v49 = vpop.permute.xlu1 %2468 }
 0x184   : > { %2276 = vmatpush3.bf16.msra.mxu1 %v2620_v47  ;;  %v2479_v50 = vpop.permute.xlu0 %2478  ;;  %v2471_v28 = vunpack.i.h.bf16 %v3028_v49  ;;  %v2470_v29 = vunpack.i.l.bf16 %v3028_v49 }
 0x185   : > { %2277 = vmatprep.subr.bf16.mxu1 %v2622_v48  ;;  %v2481_v56 = vunpack.i.h.bf16 %v2479_v50  ;;  %v2480_v57 = vunpack.i.l.bf16 %v2479_v50 }
 0x187   : > { %v2494_v53 = vpop.permute.xlu1 %2493  ;;  %v855_v1 = vsel %vm361_vm0, %v2071_v26, %v2480_v57  ;;  %v856_v2 = vsel %vm361_vm0, %v2111_v61, %v2481_v56  ;;  %v2466_v26 = vunpack.i.h.bf16 %v3018_v43  ;;  %v2644_v56 = vld [vmem:[%s3268_s2 + $0xb0] sm:$0xff]   ;;  %v2645_v57 = vld [vmem:[%s3268_s2 + $0x200] sm:$0xff]  }
 0x188   : > { %2278 = vmatpush3.bf16.msra.mxu1 %v2624_v51  ;;  %v2484_v54 = vpop.permute.xlu0 %2483  ;;  %v2496_v8 = vunpack.i.h.bf16 %v2494_v53  ;;  %v2495_v11 = vunpack.i.l.bf16 %v2494_v53 }
 0x189   : > { %2279 = vmatprep.subr.bf16.mxu1 %v2626_v52  ;;  %v2486_v59 = vunpack.i.h.bf16 %v2484_v54  ;;  %v2485_v60 = vunpack.i.l.bf16 %v2484_v54 }
 0x18a   : > { %v1120_v13 = vsel %vm361_vm0, %v2111_v61, %v2495_v11  ;;  %v1121_v32 = vsel %vm361_vm0, %v3064_v30, %v2496_v8  ;;  %v849_v61 = vsel %vm361_vm0, %v3003_v12, %v2465_v27  ;;  %v2649_v12 = vld [vmem:[%s3268_s2 + $0x208] sm:$0xff]   ;;  %v2653_v11 = vld [vmem:[%s3268_s2 + $0x210] sm:$0xff]  }
 0x18b   : > { %v2499_v62 = vpop.permute.xlu1 %2498  ;;  %v857_v6 = vsel %vm497_vm4, %v855_v1, %v2485_v60  ;;  %v858_v7 = vsel %vm497_vm4, %v856_v2, %v2486_v59  ;;  %v2647_v59 = vld [vmem:[%s3268_s2 + $0x248] sm:$0xff]   ;;  %v850_v60 = vsel %vm361_vm0, %v2103_v25, %v2466_v26  ;;  %v2475_v1 = vunpack.i.l.bf16 %v3020_v44 }
 0x18c   : > { %2280 = vmatpush3.bf16.msra.mxu1 %v2628_v55  ;;  %v2489_v63 = vpop.permute.xlu0 %2488  ;;  %v2501_v14 = vunpack.i.h.bf16 %v2499_v62  ;;  %v2500_v15 = vunpack.i.l.bf16 %v2499_v62  ;;  %v851_v62 = vsel %vm497_vm4, %v849_v61, %v2470_v29 }
 0x18d   : > { %v2491_v3 = vunpack.i.h.bf16 %v2489_v63  ;;  %v2490_v4 = vunpack.i.l.bf16 %v2489_v63  ;;  %2281 = vmatprep.subr.bf16.mxu1 %v2630_v58  ;;  %v2646_v58 = vld [vmem:[%s3268_s2 + $0xf8] sm:$0xff]   ;;  %v852_v63 = vsel %vm497_vm4, %v850_v60, %v2471_v28 }
 0x18e   : > { %v1114_v33 = vsel %vm361_vm0, %v2103_v25, %v2500_v15  ;;  %v1115_v34 = vsel %vm361_vm0, %v3066_v31, %v2501_v14  ;;  %v2657_v25 = vld [vmem:[%s3268_s2 + $0x218] sm:$0xff]  }
 0x18f   : > { %v859_v9 = vsel %vm500_vm5, %v857_v6, %v2490_v4  ;;  %v860_v10 = vsel %vm500_vm5, %v858_v7, %v2491_v3  ;;  %v2509_v17 = vpop.permute.xlu1 %2508  ;;  %v2648_v4 = vld [vmem:[%s3268_s2 + $0xb8] sm:$0xff]   ;;  %v853_v6 = vsel %vm500_vm5, %v851_v62, %v2475_v1 }
 0x190   : > { %2282 = vmatpush3.bf16.msra.mxu1 %v2632_v0  ;;  %v2504_v18 = vpop.permute.xlu0 %2503  ;;  %v862_v19 = vpack.c.bf16 %v860_v10, %v859_v9  ;;  %v2511_v22 = vunpack.i.h.bf16 %v2509_v17  ;;  %v2510_v23 = vunpack.i.l.bf16 %v2509_v17  ;;  %v2476_v0 = vunpack.i.h.bf16 %v3020_v44  ;;  %v2651_v44 = vld [vmem:[%s3268_s2 + $0x250] sm:$0xff]   ;;  %v2652_v10 = vld [vmem:[%s3268_s2 + $0x180] sm:$0xff]  }
 0x191   : > { %2283 = vmatprep.subr.bf16.mxu1 %v2634_v5  ;;  %v2506_v24 = vunpack.i.h.bf16 %v2504_v18  ;;  %v2505_v16 = vunpack.i.l.bf16 %v2504_v18  ;;  %v2650_v5 = vld [vmem:[%s3268_s2 + $0x1c0] sm:$0xff]   ;;  %v2654_v18 = vld [vmem:[%s3268_s2 + $0x1c8] sm:$0xff]  }
 0x192   : > { %1023 = vmatprep.mubr.bf16.mxu1 %v862_v19  ;;  %v1116_v43 = vsel %vm497_vm4, %v1114_v33, %v2510_v23  ;;  %v1117_v45 = vsel %vm497_vm4, %v1115_v34, %v2511_v22  ;;  %v854_v7 = vsel %vm500_vm5, %v852_v63, %v2476_v0  ;;  %v2655_v19 = vld [vmem:[%s3268_s2 + $0x258] sm:$0xff]  }
 0x193   : > { %v2519_v35 = vpop.permute.xlu1 %2518  ;;  %v1123_v46 = vsel %vm497_vm4, %v1121_v32, %v2506_v24  ;;  %v1122_v47 = vsel %vm497_vm4, %v1120_v13, %v2505_v16  ;;  %v861_v17 = vpack.c.bf16 %v854_v7, %v853_v6  ;;  %v2656_v16 = vld [vmem:[%s3268_s2 + $0x188] sm:$0xff]   ;;  %v2658_v13 = vld [vmem:[%s3268_s2 + $0x1d0] sm:$0xff]   ;;  %v2659_v32 = vld [vmem:[%s3268_s2 + $0x260] sm:$0xff]  }
 0x194   : > { %2284 = vmatpush3.bf16.msra.mxu1 %v2636_v20  ;;  %v2514_v36 = vpop.permute.xlu0 %2513  ;;  %v2521_v38 = vunpack.i.h.bf16 %v2519_v35  ;;  %v2520_v39 = vunpack.i.l.bf16 %v2519_v35  ;;  %v2206_v20 = vld [vmem:[#allocation2 + $0x31] sm:$0xff]  ;;  %v2670_v6 = vld [vmem:[%s3268_s2 + $0x1e8] sm:$0xff]  }
 0x195   : > { %v2516_v40 = vunpack.i.h.bf16 %v2514_v36  ;;  %v2515_v41 = vunpack.i.l.bf16 %v2514_v36  ;;  %2285 = vmatprep.subr.bf16.mxu1 %v2638_v21  ;;  %v2671_v7 = vld [vmem:[%s3268_s2 + $0x278] sm:$0xff]  }
 0x196   : > { %v1118_v48 = vsel %vm500_vm5, %v1116_v43, %v2520_v39  ;;  %v1119_v49 = vsel %vm500_vm5, %v1117_v45, %v2521_v38  ;;  %v2207_v38 = vld [vmem:[#allocation2 + $0x39] sm:$0xff] }
 0x197   : > { %v1124_v50 = vsel %vm500_vm5, %v1122_v47, %v2515_v41  ;;  %v1125_v51 = vsel %vm500_vm5, %v1123_v46, %v2516_v40  ;;  %v1126_v52 = vpack.c.bf16 %v1119_v49, %v1118_v48  ;;  %v3088_v53 = vpop.permute.xlu1 %2523  ;;  %v2660_v41 = vld [vmem:[%s3268_s2 + $0x190] sm:$0xff]   ;;  %v2662_v45 = vld [vmem:[%s3268_s2 + $0x1d8] sm:$0xff]   ;;  %v2663_v46 = vld [vmem:[%s3268_s2 + $0x268] sm:$0xff]  }
 0x198   : > { %2286 = vmatpush3.bf16.msra.mxu1 %v2640_v37  ;;  %v3090_v54 = vpop.permute.xlu0 %2528  ;;  %v1127_v55 = vpack.c.bf16 %v1125_v51, %v1124_v50  ;;  %v2526_v35 = vunpack.i.h.bf16 %v3088_v53 }
 0x199   : > { %2287 = vmatprep.subr.bf16.mxu1 %v2642_v42  ;;  %v2661_v42 = vld [vmem:[%s3268_s2 + $0x220] sm:$0xff]   ;;  %v2531_v47 = vunpack.i.h.bf16 %v3090_v54  ;;  %v2530_v48 = vunpack.i.l.bf16 %v3090_v54 }
 0x19a   : > { %1288 = vmatprep.mubr.bf16.mxu0 %v1127_v55  ;;  %v1651_v49 = vsel %vm361_vm0, %v2207_v38, %v2526_v35  ;;  %v2666_v54 = vld [vmem:[%s3268_s2 + $0x1e0] sm:$0xff]   ;;  %v762_v38 = vpop.f32.mrb[4].mxu0 }
 0x19b   : > { %1289 = vmatmul.mubr.bf16.vlgmr.msra.gmra.mrb[8].mxu0 %v1126_v52  ;;  %v3111_v2 = vpop.permute.xlu1 %2538  ;;  %v2664_v52 = vld [vmem:[%s3268_s2 + $0x198] sm:$0xff]  }
 0x19c   : > { %2288 = vmatpush3.bf16.msra.mxu1 %v2644_v56  ;;  %2342 = vmatpush3.bf16.msra.mxu0 %v2645_v57  ;;  %v2534_v3 = vpop.permute.xlu0 %2533  ;;  %v2667_v57 = vld [vmem:[%s3268_s2 + $0x270] sm:$0xff]  }
 0x19d   : > { %2289 = vmatprep.subr.bf16.mxu1 %v2646_v58  ;;  %2343 = vmatprep.subr.bf16.mxu0 %v2647_v59  ;;  %v2536_v14 = vunpack.i.h.bf16 %v2534_v3  ;;  %v2535_v15 = vunpack.i.l.bf16 %v2534_v3  ;;  %v1653_v58 = vsel %vm497_vm4, %v1651_v49, %v2531_v47  ;;  %v2668_v3 = vld [vmem:[%s3268_s2 + $0x1a0] sm:$0xff]  }
 0x19f   : > { %v3127_v8 = vpop.permute.xlu1 %2548  ;;  %v1386_v26 = vsel %vm361_vm0, %v2206_v20, %v2536_v14  ;;  %v1385_v27 = vsel %vm361_vm0, %v3064_v30, %v2535_v15  ;;  %v2525_v30 = vunpack.i.l.bf16 %v3088_v53  ;;  %v2665_v53 = vld [vmem:[%s3268_s2 + $0x228] sm:$0xff]  }
 0x1a0   : > { %2290 = vmatpush3.bf16.msra.mxu1 %v2648_v4  ;;  %2344 = vmatpush3.bf16.msra.mxu0 %v2649_v12  ;;  %v2544_v9 = vpop.permute.xlu0 %2543  ;;  %v2669_v4 = vld [vmem:[%s3268_s2 + $0x230] sm:$0xff]  }
 0x1a1   : > { %2319 = vmatprep.subr.bf16.mxu1 %v2650_v5  ;;  %2345 = vmatprep.subr.bf16.mxu0 %v2651_v44  ;;  %v2546_v21 = vunpack.i.h.bf16 %v2544_v9  ;;  %v2545_v22 = vunpack.i.l.bf16 %v2544_v9  ;;  %v1650_v50 = vsel %vm361_vm0, %v2206_v20, %v2525_v30  ;;  %v2199_v12 = vld [vmem:[#allocation2 + $0x35] sm:$0xff] }
 0x1a2   : > { %v1652_v59 = vsel %vm497_vm4, %v1650_v50, %v2530_v48 }
 0x1a3   : > { %1024 = vmatmul.mubr.bf16.vlgmr.msra.gmra.mrb[4].mxu1 %v861_v17  ;;  %v3141_v23 = vpop.permute.xlu1 %2563  ;;  %v1387_v33 = vsel %vm497_vm4, %v1385_v27, %v2545_v22  ;;  %v1388_v34 = vsel %vm497_vm4, %v1386_v26, %v2546_v21  ;;  %v2672_v17 = vld [vmem:[%s3268_s2 + $0x1a8] sm:$0xff]   ;;  %v2674_v21 = vld [vmem:[%s3268_s2 + $0x1f0] sm:$0xff]   ;;  %v2551_v26 = vunpack.i.h.bf16 %v3127_v8  ;;  %v2550_v27 = vunpack.i.l.bf16 %v3127_v8  ;;  %v2677_v8 = vld [vmem:[%s3268_s2 + $0x1b8] sm:$0xff]  }
 0x1a4   : > { %2320 = vmatpush3.bf16.msra.mxu1 %v2652_v10  ;;  %2346 = vmatpush3.bf16.msra.mxu0 %v2653_v11  ;;  %v2554_v24 = vpop.permute.xlu0 %2553  ;;  %v2566_v63 = vunpack.i.h.bf16 %v3141_v23  ;;  %v2565_v0 = vunpack.i.l.bf16 %v3141_v23  ;;  %v2167_v11 = vld [vmem:[#allocation2 + $0x2d] sm:$0xff] }
 0x1a5   : > { %v2556_v28 = vunpack.i.h.bf16 %v2554_v24  ;;  %v2555_v29 = vunpack.i.l.bf16 %v2554_v24  ;;  %2321 = vmatprep.subr.bf16.mxu1 %v2654_v18  ;;  %2347 = vmatprep.subr.bf16.mxu0 %v2655_v19  ;;  %v2673_v18 = vld [vmem:[%s3268_s2 + $0x238] sm:$0xff]   ;;  %v2541_v24 = vunpack.i.h.bf16 %v3111_v2 }
 0x1a6   : > { %v1645_v14 = vsel %vm361_vm0, %v2199_v12, %v2566_v63  ;;  %v1644_v15 = vsel %vm361_vm0, %v2167_v11, %v2565_v0 }
 0x1a7   : > { %v1389_v36 = vsel %vm500_vm5, %v1387_v33, %v2555_v29  ;;  %v1390_v37 = vsel %vm500_vm5, %v1388_v34, %v2556_v28  ;;  %v2569_v43 = vpop.permute.xlu1 %2568  ;;  %v2676_v29 = vld [vmem:[%s3268_s2 + $0x1f8] sm:$0xff]  }
 0x1a8   : > { %2322 = vmatpush3.bf16.msra.mxu1 %v2656_v16  ;;  %2348 = vmatpush3.bf16.msra.mxu0 %v2657_v25  ;;  %v3164_v39 = vpop.permute.xlu0 %2558  ;;  %v1392_v40 = vpack.c.bf16 %v1390_v37, %v1389_v36  ;;  %v2571_v5 = vunpack.i.h.bf16 %v2569_v43  ;;  %v2570_v44 = vunpack.i.l.bf16 %v2569_v43  ;;  %v2540_v16 = vunpack.i.l.bf16 %v3111_v2  ;;  %v2675_v25 = vld [vmem:[%s3268_s2 + $0x1b0] sm:$0xff]  }
 0x1a9   : > { %2323 = vmatprep.subr.bf16.mxu1 %v2658_v13  ;;  %2349 = vmatprep.subr.bf16.mxu0 %v2659_v32  ;;  %v2561_v13 = vunpack.i.h.bf16 %v3164_v39  ;;  %v2560_v2 = vunpack.i.l.bf16 %v3164_v39  ;;  %v1380_v32 = vsel %vm361_vm0, %v2167_v11, %v2541_v24  ;;  %v2401_v39 = vpop.f32.mrb[5].mxu0 }
 0x1aa   : > { %1553 = vmatprep.mubr.bf16.mxu1 %v1392_v40  ;;  %v1646_v19 = vsel %vm497_vm4, %v1644_v15, %v2570_v44  ;;  %v1647_v20 = vsel %vm497_vm4, %v1645_v14, %v2571_v5  ;;  %v1379_v33 = vsel %vm361_vm0, %v3066_v31, %v2540_v16  ;;  %v1382_v35 = vsel %vm497_vm4, %v1380_v32, %v2551_v26  ;;  %v765_v31 = vpop.f32.mrb[6].mxu0 }
 0x1ab   : > { %v2579_v60 = vpop.permute.xlu1 %2578  ;;  %v1381_v34 = vsel %vm497_vm4, %v1379_v33, %v2550_v27  ;;  %v1384_v30 = vsel %vm500_vm5, %v1382_v35, %v2561_v13  ;;  %v2402_v40 = vpop.f32.mrb[7].mxu0 }
 0x1ac   : > { %2324 = vmatpush3.bf16.msra.mxu1 %v2660_v41  ;;  %2350 = vmatpush3.bf16.msra.mxu0 %v2661_v42  ;;  %v2574_v51 = vpop.permute.xlu0 %2573  ;;  %v2581_v9 = vunpack.i.h.bf16 %v2579_v60  ;;  %v2580_v10 = vunpack.i.l.bf16 %v2579_v60  ;;  %v1383_v36 = vsel %vm500_vm5, %v1381_v34, %v2560_v2 }
 0x1ad   : > { %v2576_v55 = vunpack.i.h.bf16 %v2574_v51  ;;  %v2575_v56 = vunpack.i.l.bf16 %v2574_v51  ;;  %2325 = vmatprep.subr.bf16.mxu1 %v2662_v45  ;;  %2351 = vmatprep.subr.bf16.mxu0 %v2663_v46  ;;  %v1391_v37 = vpack.c.bf16 %v1384_v30, %v1383_v36 }
 0x1ae   : > { %v1648_v22 = vsel %vm500_vm5, %v1646_v19, %v2580_v10  ;;  %v1649_v23 = vsel %vm500_vm5, %v1647_v20, %v2581_v9 }
 0x1af   : > { %v1654_v61 = vsel %vm500_vm5, %v1652_v59, %v2575_v56  ;;  %v1655_v62 = vsel %vm500_vm5, %v1653_v58, %v2576_v55  ;;  %v1656_v28 = vpack.c.bf16 %v1649_v23, %v1648_v22 }
 0x1b0   : > { %2326 = vmatpush3.bf16.msra.mxu1 %v2664_v52  ;;  %2352 = vmatpush3.bf16.msra.mxu0 %v2665_v53  ;;  %v1657_v1 = vpack.c.bf16 %v1655_v62, %v1654_v61 }
 0x1b1   : > { %2327 = vmatprep.subr.bf16.mxu1 %v2666_v54  ;;  %2353 = vmatprep.subr.bf16.mxu0 %v2667_v57 }
 0x1b2   : > { %1818 = vmatprep.mubr.bf16.mxu0 %v1657_v1 }
 0x1b4   : > { %2328 = vmatpush3.bf16.msra.mxu1 %v2668_v3  ;;  %2354 = vmatpush3.bf16.msra.mxu0 %v2669_v4 }
 0x1b5   : > { %2329 = vmatprep.subr.bf16.mxu1 %v2670_v6  ;;  %2355 = vmatprep.subr.bf16.mxu0 %v2671_v7 }
 0x1b8   : > { %2330 = vmatpush3.bf16.msra.mxu1 %v2672_v17  ;;  %2356 = vmatpush3.bf16.msra.mxu0 %v2673_v18  ;;  %v2230_v18 = vld [vmem:[%s3270_s4] ss:$0 sm:$0xff] }
 0x1b9   : > { %2331 = vmatprep.subr.bf16.mxu1 %v2674_v21 }
 0x1bb   : > { %1819 = vmatmul.mubr.bf16.vlgmr.msra.gmra.mrb[12].mxu0 %v1656_v28 }
 0x1bc   : > { %2332 = vmatpush3.bf16.msra.mxu1 %v2675_v25 }
 0x1bd   : > { %2333 = vmatprep.subr.bf16.mxu1 %v2676_v29 }
 0x1c0   : > { %2334 = vmatpush3.bf16.msra.mxu1 %v2677_v8 }
 0x1c3   : > { %1554 = vmatmul.mubr.bf16.vlgmr.msra.gmra.mrb[8].mxu1 %v1391_v37 }
 0x256   : > { %v2260_v41 = vpop.f32.mrb[0].mxu1 }
 0x257   : > { %v2261_v42 = vpop.f32.mrb[1].mxu1 }
 0x258   : > { %v2262_v43 = vadd.f32 %v2261_v42, %v2260_v41  ;;  %v2263_v45 = vpop.f32.mrb[2].mxu1 }
 0x259   : > { %v2264_v46 = vpop.f32.mrb[3].mxu1 }
 0x25a   : > { %v763_v47 = vadd.f32 %v2262_v43, %v762_v38  ;;  %v2265_v48 = vadd.f32 %v2264_v46, %v2263_v45 }
 0x25c   : > { %v766_v49 = vadd.f32 %v2265_v48, %v765_v31 }
 0x26e   : > { %v2313_v50 = vpop.f32.mrb[8].mxu0 }
 0x26f   : > { %v2314_v51 = vpop.f32.mrb[9].mxu0 }
 0x270   : > { %v2315_v52 = vadd.f32 %v2314_v51, %v2313_v50  ;;  %v2316_v53 = vpop.f32.mrb[10].mxu0 }
 0x271   : > { %v2317_v55 = vpop.f32.mrb[11].mxu0 }
 0x272   : > { %v2318_v56 = vadd.f32 %v2317_v55, %v2316_v53 }
 0x276   : > { %v2291_v54 = vpop.f32.mrb[4].mxu1 }
 0x277   : > { %v2292_v57 = vpop.f32.mrb[5].mxu1 }
 0x278   : > { %v2293_v58 = vadd.f32 %v2292_v57, %v2291_v54  ;;  %v2294_v59 = vpop.f32.mrb[6].mxu1 }
 0x279   : > { %v2295_v60 = vpop.f32.mrb[7].mxu1 }
 0x27a   : > { %v1032_v61 = vadd.f32 %v2293_v58, %v763_v47  ;;  %v2296_v62 = vadd.f32 %v2295_v60, %v2294_v59 }
 0x27c   : > { %v1033_v63 = vadd.f32 %v2296_v62, %v766_v49  ;;  %v1297_v0 = vadd.f32 %v2315_v52, %v1032_v61 }
 0x27e   : > { %v1298_v1 = vadd.f32 %v2318_v56, %v1033_v63 }
 0x28e   : > { %v2357_v3 = vpop.f32.mrb[12].mxu0 }
 0x28f   : > { %v2358_v4 = vpop.f32.mrb[13].mxu0 }
 0x290   : > { %v2359_v12 = vadd.f32 %v2358_v4, %v2357_v3  ;;  %v2360_v5 = vpop.f32.mrb[14].mxu0 }
 0x291   : > { %v2361_v44 = vpop.f32.mrb[15].mxu0 }
 0x292   : > { %v2362_v6 = vadd.f32 %v2361_v44, %v2360_v5 }
 0x296   : > { %v2335_v7 = vpop.f32.mrb[8].mxu1 }
 0x297   : > { %v2336_v9 = vpop.f32.mrb[9].mxu1 }
 0x298   : > { %v2337_v10 = vadd.f32 %v2336_v9, %v2335_v7  ;;  %v2338_v11 = vpop.f32.mrb[10].mxu1 }
 0x299   : > { %v2339_v14 = vpop.f32.mrb[11].mxu1 }
 0x29a   : > { %v1562_v15 = vadd.f32 %v2337_v10, %v1297_v0  ;;  %v2340_v17 = vadd.f32 %v2339_v14, %v2338_v11 }
 0x29c   : > { %v1827_v19 = vadd.f32 %v2359_v12, %v1562_v15  ;;  %v1563_v20 = vadd.f32 %v2340_v17, %v1298_v1 }
 0x29e   : > { %v1836_v21 = vadd.f32 %v2230_v18, %v1827_v19  ;;  %v1828_v22 = vadd.f32 %v2362_v6, %v1563_v20 }
 0x2a0   : > { %v1838_v23 = vmax.f32 %v1836_v21, 0.0  ;;  %v1837_v24 = vadd.f32 %v2230_v18, %v1828_v22 }
 0x2a2   : > { %1840 = vst [vmem:[%s246_s9] sm:$0xff] %v1838_v23  ;;  %v1839_v16 = vmax.f32 %v1837_v24, 0.0 }
 0x2a4   : > { %1841 = vst [vmem:[%s246_s9 + $0x8] sm:$0xff] %v1839_v16 }
 0x2a5 PF: > { %s15_s20 = sadd.s32 1, %s2700_s20   ;;  %s3272_s18 = smov %s2696_s19 }
 0x2a6   : > { %p12_p5 = scmp.ge.s32.totalorder %s15_s20, 4   ;;  %s3273_s19 = smov %s3275_s21 }
 0x2a8   :  { %14 = sbr.rel (!%p12_p5) target bundleno = 2 (0x2), region = 115 }

// kernel: _lambda_.12
= control target key start
LH: loop header
LB: loop body
LE: loop exit
PB: predicated region body
PF: predicated region fallthrough
CT: control target
= control target key end

     0   :  { %s2916_s27 = smov 0   ;;  %s2918_s28 = smov 0   ;;  %s3452_s0 = inlined_call_operand.vmem [shape: f32[2,16,128], index: 0, kind: input, shape index: {}]   ;;  %s3453_s1 = inlined_call_operand.vmem [shape: f32[2,16,128], index: 1, kind: input, shape index: {}]   ;;  %s3454_s2 = inlined_call_operand.vmem [shape: bf16[128,32], index: 2, kind: input, shape index: {}]   ;;  %s3455_s3 = inlined_call_operand.vmem [shape: bf16[1280,128], index: 3, kind: input, shape index: {}]   ;;  %s3456_s4 = inlined_call_operand.vmem [shape: bf16[128,128], index: 4, kind: input, shape index: {}]   ;;  %s3457_s5 = inlined_call_operand.vmem [shape: f32[1,128], index: 5, kind: input, shape index: {}, may-alias: {5,7}]   ;;  %s3458_s6 = inlined_call_operand.vmem [shape: f32[1,128], index: 6, kind: input, shape index: {}]   ;;  %s3459_s7 = inlined_call_operand.vmem [shape: f32[1,128], index: 7, kind: input, shape index: {}, may-alias: {5,7}]   ;;  %s3460_s8 = inlined_call_operand.vmem [shape: f32[2,16,128], index: 8, kind: output, shape index: {}]  }
   0x1   :  { %s2920_s29 = smov 0  }
   0x2 LB: > { %s30_s30 = sadd.s32 1, %s2860_s28  ;;  %p2208_p0 = scmp.ge.s32.totalorder %s2864_s29, 1  ;;  %s2864_s29 = sphi %s2920_s29, %s18_s29   ;;  %s2860_s28 = sphi %s2918_s28, %s3462_s28   ;;  %s2856_s27 = sphi %s2916_s27, %s3461_s27  }
   0x3   : > { %p32_p1 = scmp.ge.s32.totalorder %s30_s30, 2  ;;  %p293_p2 = scmp.lt.s32.totalorder %s2864_s29, 3 }
   0x5   : > { %s3464_s30 = smov (%p32_p1, %s30_s30), 0  ;;  %p294_p3 = pnand %p2208_p0, %p293_p2 }
   0x6   : > { %vm478_vm0 = vcmask (!%p294_p3), 261120   ;;  %v2866_v0 = vmov (!%p294_p3), 0.0   ;;  %v2746_v1 = vld [vmem:[%s3454_s2] sm:$0xff] (!%p294_p3)   ;;  %vm2867_vm1 = vmmov (!%p294_p3), 0   ;;  %p340_p4 = scmp.lt.s32.totalorder (!%p294_p3), %s2856_s27, 1  ;;  %v2747_v2 = vld [vmem:[%s3454_s2 + $0x8] sm:$0xff] (!%p294_p3)  }
   0x7   : > { %297 = sbr.rel (%p294_p3) target bundleno = 683 (0x2ab), region = 52  ;;  %2527 = vmatprep.subr.bf16.mxu0 (!%p294_p3), %v2866_v0  ;;  %480 = vst.msk [vmem:[#allocation2 + $0x8] sm:$0xff] (!%p294_p3), %vm478_vm0, %v2866_v0  ;;  %481 = vst.msk [vmem:[#allocation2 + $0x10] sm:$0xff] (!%p294_p3), %vm478_vm0, %v2866_v0  ;;  %2543 = vmatprep.mubr.msk.bf16.mxu0 (!%p294_p3), %vm2867_vm1, %v2866_v0  ;;  %v2748_v3 = vld [vmem:[%s3454_s2 + $0x10] sm:$0xff] (!%p294_p3)   ;;  %v2749_v4 = vld [vmem:[%s3454_s2 + $0x18] sm:$0xff] (!%p294_p3)   ;;  %s2868_s10 = smov (!%p294_p3), 64  }
   0x8   : > { %482 = vst.msk [vmem:[#allocation2 + $0x18] sm:$0xff] (!%p294_p3), %vm478_vm0, %v2866_v0  ;;  %483 = vst.msk [vmem:[#allocation2 + $0x30] sm:$0xff] (!%p294_p3), %vm478_vm0, %v2866_v0  ;;  %2528 = vmatpush3.bf16.msra.mxu0 (!%p294_p3), %v2746_v1  ;;  %v2750_v5 = vld [vmem:[%s3454_s2 + $0x20] sm:$0xff] (!%p294_p3)   ;;  %v2751_v6 = vld [vmem:[%s3454_s2 + $0x28] sm:$0xff] (!%p294_p3)   ;;  %s2869_s11 = smov (!%p294_p3), 32   ;;  %vm490_vm2 = vcmask (!%p294_p3), 1040384  }
   0x9   : > { %484 = vst.msk [vmem:[#allocation2 + $0x38] sm:$0xff] (!%p294_p3), %vm478_vm0, %v2866_v0  ;;  %485 = vst.msk [vmem:[#allocation2 + $0x40] sm:$0xff] (!%p294_p3), %vm478_vm0, %v2866_v0  ;;  %2529 = vmatprep.subr.bf16.mxu0 (!%p294_p3), %v2866_v0  ;;  %v2752_v7 = vld [vmem:[%s3454_s2 + $0x30] sm:$0xff] (!%p294_p3)   ;;  %v2753_v8 = vld [vmem:[%s3454_s2 + $0x38] sm:$0xff] (!%p294_p3)   ;;  %vm497_vm3 = vcmask (!%p294_p3), 1046528   ;;  %s2870_s25 = smov (!%p294_p3), 96  }
   0xa   : > { %v2754_v18 = vld [vmem:[%s3456_s4] sm:$0xff] (!%p294_p3)   ;;  %v2755_v21 = vld [vmem:[%s3456_s4 + $0x8] sm:$0xff] (!%p294_p3)   ;;  %v2762_v24 = vld [vmem:[%s3455_s3 + $0x50] sm:$0xff] (!%p294_p3)   ;;  %vm614_vm4 = vcmask (!%p294_p3), 523264   ;;  %vm617_vm5 = vcmask (!%p294_p3), 785408  }
   0xb   : > { %v2756_v19 = vld [vmem:[%s3455_s3 + $0x40] sm:$0xff] (!%p294_p3)   ;;  %v2759_v22 = vld [vmem:[%s3455_s3 + $0x48] sm:$0xff] (!%p294_p3)   ;;  %v2758_v25 = vld [vmem:[%s3456_s4 + $0x10] sm:$0xff] (!%p294_p3)  }
   0xc   : > { %2530 = vmatpush3.bf16.msra.mxu0 (!%p294_p3), %v2747_v2  ;;  %v2757_v20 = vld [vmem:[%s3455_s3] sm:$0xff] (!%p294_p3)   ;;  %2408 = vmatprep.subr.bf16.mxu1 (!%p294_p3), %v2756_v19  ;;  %v2760_v23 = vld [vmem:[%s3455_s3 + $0x8] sm:$0xff] (!%p294_p3)   ;;  %v2763_v26 = vld [vmem:[%s3455_s3 + $0x10] sm:$0xff] (!%p294_p3)  }
   0xd   : > { %2531 = vmatprep.subr.bf16.mxu0 (!%p294_p3), %v2866_v0  ;;  %2409 = vmatpush3.bf16.msra.mxu1 (!%p294_p3), %v2757_v20  ;;  %v2765_v27 = vld [vmem:[%s3455_s3 + $0x58] sm:$0xff] (!%p294_p3)   ;;  %v2768_v30 = vld [vmem:[%s3455_s3 + $0x60] sm:$0xff] (!%p294_p3)   ;;  %v2771_v33 = vld [vmem:[%s3455_s3 + $0x68] sm:$0xff] (!%p294_p3)  }
   0xe   : > { %s3466_s27 = smov (!%p340_p4, %s2856_s27), 1  ;;  %v2227_v12 = vld [vmem:[#allocation2 + $0xf] sm:$0xff]  ;;  %2410 = vmatprep.subr.bf16.mxu1 %v2759_v22  ;;  %v2761_v28 = vld [vmem:[%s3456_s4 + $0x18] sm:$0xff]   ;;  %v2764_v31 = vld [vmem:[%s3456_s4 + $0x20] sm:$0xff]  }
   0xf   : > { %s2963_s17 = sshll.u32 %s3466_s27, 4  ;;  %v2995_v13 = vld [vmem:[#allocation2 + $0x17] sm:$0xff]  ;;  %v2225_v14 = vld [vmem:[#allocation2 + $0xe] sm:$0xff]  ;;  %v2769_v32 = vld [vmem:[%s3455_s3 + $0x20] sm:$0xff]  }
  0x10   : > { %2532 = vmatpush3.bf16.msra.mxu0 %v2748_v3  ;;  %s344_s26 = scalar_lea.vmem %s3452_s0, %s2963_s17  ;;  %v2601_v15 = vpack.i.bf16 %v2995_v13, %v2227_v12  ;;  %v2998_v16 = vld [vmem:[#allocation2 + $0x16] sm:$0xff]  ;;  %v2767_v34 = vld [vmem:[%s3456_s4 + $0x28] sm:$0xff]   ;;  %v2775_v45 = vld [vmem:[%s3455_s3 + $0x140] sm:$0xff]   ;;  %s353_s20 = scalar_lea.vmem %s3453_s1, %s2963_s17 }
  0x11   : > { %2533 = vmatprep.subr.bf16.mxu0 %v2866_v0  ;;  %v2985_v9 = vld [vmem:[%s344_s26] sm:$0xff]  ;;  %v2987_v10 = vld [vmem:[%s344_s26 + $0x8] sm:$0xff]  ;;  %v2596_v17 = vpack.i.bf16 %v2998_v16, %v2225_v14  ;;  %2411 = vmatpush3.bf16.msra.mxu1 %v2760_v23  ;;  %v2766_v29 = vld [vmem:[%s3455_s3 + $0x18] sm:$0xff]   ;;  %s363_s13 = scalar_lea.vmem %s3460_s8, %s2963_s17 }
  0x12   : > { %v372_v11 = vpack.c.bf16 %v2987_v10, %v2985_v9  ;;  %2602 = vrot.lane.b32.xlu1 %v2601_v15, %s2868_s10  ;;  %2412 = vmatprep.subr.bf16.mxu1 %v2762_v24  ;;  %v2772_v35 = vld [vmem:[%s3455_s3 + $0x28] sm:$0xff]   ;;  %v2770_v36 = vld [vmem:[%s3456_s4 + $0x30] sm:$0xff]   ;;  %v2773_v37 = vld [vmem:[%s3456_s4 + $0x38] sm:$0xff]   ;;  %v491_v38 = vrot.slane %v2985_v9, 7  ;;  %v492_v39 = vrot.slane %v2987_v10, 7  ;;  %v498_v42 = vrot.slane %v2985_v9, 1 }
  0x13   : > { %2597 = vrot.lane.b32.xlu0 %v2596_v17, %s2869_s11  ;;  %v499_v43 = vrot.slane %v2987_v10, 1  ;;  %v2774_v44 = vld [vmem:[%s3455_s3 + $0x70] sm:$0xff]   ;;  %v2777_v55 = vld [vmem:[%s3455_s3 + $0x100] sm:$0xff]   ;;  %v2778_v58 = vld [vmem:[%s3455_s3 + $0x78] sm:$0xff]  }
  0x14   : > { %2534 = vmatpush3.bf16.msra.mxu0 %v2749_v4  ;;  %v493_v40 = vsel %vm490_vm2, %v491_v38, %v492_v39  ;;  %v496_v41 = vsel %vm490_vm2, %v2985_v9, %v491_v38  ;;  %v2776_v46 = vld [vmem:[%s3455_s3 + $0x30] sm:$0xff]   ;;  %v2779_v59 = vld [vmem:[%s3455_s3 + $0x148] sm:$0xff]   ;;  %v2780_v60 = vld [vmem:[%s3455_s3 + $0x38] sm:$0xff]  }
  0x15   : > { %2535 = vmatprep.subr.bf16.mxu0 %v2866_v0  ;;  %2413 = vmatpush3.bf16.msra.mxu1 %v2763_v26  ;;  %v504_v47 = vmax.f32 %v496_v41, %v2985_v9  ;;  %v505_v48 = vmax.f32 %v493_v40, %v2987_v10  ;;  %v500_v49 = vsel %vm497_vm3, %v498_v42, %v499_v43  ;;  %v2781_v62 = vld [vmem:[%s3455_s3 + $0x108] sm:$0xff]   ;;  %v2235_v63 = vld [vmem:[#allocation2 + $0x13] sm:$0xff]  ;;  %v2782_v14 = vld [vmem:[%s3455_s3 + $0xc0] sm:$0xff]  }
  0x16   : > { %2414 = vmatprep.subr.bf16.mxu1 %v2765_v27  ;;  %v503_v50 = vsel %vm497_vm3, %v499_v43, %v2987_v10  ;;  %v2229_v3 = vld [vmem:[#allocation2 + $0x10] sm:$0xff]  ;;  %v2791_v24 = vld [vmem:[%s3455_s3 + $0x160] sm:$0xff]   ;;  %v2803_v40 = vld [vmem:[%s3455_s3 + $0x178] sm:$0xff]  }
  0x17   : > { %v506_v52 = vmax.f32 %v504_v47, %v500_v49  ;;  %v507_v53 = vmax.f32 %v505_v48, %v503_v50  ;;  %v2783_v15 = vld [vmem:[%s3455_s3 + $0x150] sm:$0xff]   ;;  %v2793_v26 = vld [vmem:[%s3455_s3 + $0x120] sm:$0xff]   ;;  %v2805_v43 = vld [vmem:[%s3455_s3 + $0x138] sm:$0xff]  }
  0x18   : > { %2536 = vmatpush3.bf16.msra.mxu0 %v2750_v5  ;;  %v2785_v17 = vld [vmem:[%s3455_s3 + $0x110] sm:$0xff]   ;;  %v2370_v47 = vld [vmem:[#allocation2 + $0x3a] sm:$0xff] }
  0x19   : > { %2537 = vmatprep.subr.bf16.mxu0 %v2866_v0  ;;  %2415 = vmatpush3.bf16.msra.mxu1 %v2766_v29  ;;  %v514_v57 = vpack.c.bf16 %v507_v53, %v506_v52  ;;  %v2795_v29 = vld [vmem:[%s3455_s3 + $0x168] sm:$0xff]   ;;  %v2372_v48 = vld [vmem:[#allocation2 + $0x3b] sm:$0xff]  ;;  %v2371_v52 = vld [vmem:[#allocation2 + $0x33] sm:$0xff] }
  0x1a   : > { %2416 = vmatprep.subr.bf16.mxu1 %v2768_v30 }
  0x1c   : > { %2538 = vmatpush3.bf16.msra.mxu0 %v2751_v6  ;;  %v2230_v6 = vld [vmem:[#allocation2 + $0x18] sm:$0xff] }
  0x1d   : > { %2539 = vmatprep.subr.bf16.mxu0 %v2866_v0  ;;  %2417 = vmatpush3.bf16.msra.mxu1 %v2769_v32  ;;  %v2621_v9 = vpack.i.bf16 %v2230_v6, %v2229_v3  ;;  %v2366_v3 = vld [vmem:[#allocation2 + $0x38] sm:$0xff] }
  0x1e   : > { %2418 = vmatprep.subr.bf16.mxu1 %v2771_v33 }
  0x20   : > { %2540 = vmatpush3.bf16.msra.mxu0 %v2752_v7  ;;  %v2237_v7 = vld [vmem:[#allocation2 + $0x14] sm:$0xff] }
  0x21   : > { %2541 = vmatprep.subr.bf16.mxu0 %v2866_v0  ;;  %2419 = vmatpush3.bf16.msra.mxu1 %v2772_v35 }
  0x22   : > { %2420 = vmatprep.subr.bf16.mxu1 %v2774_v44 }
  0x24   : > { %2542 = vmatpush3.bf16.msra.mxu0 %v2753_v8 }
  0x25   : > { %2547 = vmatprep.subr.bf16.mxu0 %v2866_v0  ;;  %2421 = vmatpush3.bf16.msra.mxu1 %v2776_v46  ;;  %v2807_v46 = vld [vmem:[%s3455_s3 + $0x240] sm:$0xff]  }
  0x26   : > { %2422 = vmatprep.subr.bf16.mxu1 %v2778_v58 }
  0x27   : > { %2544 = vmatmul.mubr.bf16.vlgmr.msra.gmra.mrb[0].mxu0 %v372_v11 }
  0x28   : > { %2563 = vmatprep.mubr.msk.bf16.mxu0 %vm2867_vm1, %v2866_v0  ;;  %2548 = vmatpush3.bf16.msra.mxu0 %v2754_v18  ;;  %v2787_v18 = vld [vmem:[%s3455_s3 + $0x158] sm:$0xff]  }
  0x29   : > { %2549 = vmatprep.subr.bf16.mxu0 %v2866_v0  ;;  %2423 = vmatpush3.bf16.msra.mxu1 %v2780_v60 }
  0x2a   : > { %2439 = vmatprep.subr.bf16.mxu1 %v2782_v14 }
  0x2c   : > { %2550 = vmatpush3.bf16.msra.mxu0 %v2755_v21  ;;  %v2789_v21 = vld [vmem:[%s3455_s3 + $0x118] sm:$0xff]  }
  0x2d   : > { %2551 = vmatprep.subr.bf16.mxu0 %v2866_v0 }
  0x30   : > { %2552 = vmatpush3.bf16.msra.mxu0 %v2758_v25 }
  0x31   : > { %2553 = vmatprep.subr.bf16.mxu0 %v2866_v0 }
  0x34   : > { %2554 = vmatpush3.bf16.msra.mxu0 %v2761_v28 }
  0x35   : > { %2555 = vmatprep.subr.bf16.mxu0 %v2866_v0 }
  0x38   : > { %2556 = vmatpush3.bf16.msra.mxu0 %v2764_v31 }
  0x39   : > { %2557 = vmatprep.subr.bf16.mxu0 %v2866_v0 }
  0x3c   : > { %2558 = vmatpush3.bf16.msra.mxu0 %v2767_v34  ;;  %v2799_v34 = vld [vmem:[%s3455_s3 + $0x170] sm:$0xff]  }
  0x3d   : > { %2559 = vmatprep.subr.bf16.mxu0 %v2866_v0 }
  0x40   : > { %2560 = vmatpush3.bf16.msra.mxu0 %v2770_v36 }
  0x41   : > { %2561 = vmatprep.subr.bf16.mxu0 %v2866_v0  ;;  %v2233_v0 = vld [vmem:[#allocation2 + $0x12] sm:$0xff] }
  0x44   : > { %2562 = vmatpush3.bf16.msra.mxu0 %v2773_v37  ;;  %v2801_v37 = vld [vmem:[%s3455_s3 + $0x130] sm:$0xff]  }
  0x45   : > { %2461 = vmatprep.subr.bf16.mxu0 %v2775_v45 }
  0x47   : > { %2564 = vmatmul.mubr.bf16.vlgmr.msra.gmra.mrb[4].mxu0 %v514_v57 }
  0x48   : > { %2462 = vmatpush3.bf16.msra.mxu0 %v2777_v55 }
  0x49   : > { %2463 = vmatprep.subr.bf16.mxu0 %v2779_v59 }
  0x4c   : > { %2464 = vmatpush3.bf16.msra.mxu0 %v2781_v62  ;;  %v2342_v62 = vld [vmem:[#allocation2 + $0x34] sm:$0xff] }
  0x4d   : > { %2465 = vmatprep.subr.bf16.mxu0 %v2783_v15  ;;  %v2223_v15 = vld [vmem:[#allocation2 + $0xd] sm:$0xff] }
  0x50   : > { %2466 = vmatpush3.bf16.msra.mxu0 %v2785_v17 }
  0x51   : > { %2467 = vmatprep.subr.bf16.mxu0 %v2787_v18 }
  0x54   : > { %2468 = vmatpush3.bf16.msra.mxu0 %v2789_v21 }
  0x55   : > { %2469 = vmatprep.subr.bf16.mxu0 %v2791_v24 }
  0x58   : > { %2470 = vmatpush3.bf16.msra.mxu0 %v2793_v26 }
  0x59   : > { %2471 = vmatprep.subr.bf16.mxu0 %v2795_v29 }
  0xfa   : > { %v471_v51 = vpop.f32.mrb[0].mxu0 }
  0xfb   : > { %486 = vst.msk [vmem:[#allocation2 + $0x20] sm:$0xff] %vm478_vm0, %v471_v51  ;;  %v2545_v54 = vpop.f32.mrb[1].mxu0  ;;  %v2369_v51 = vld [vmem:[#allocation2 + $0x32] sm:$0xff] }
  0xfc   : > { %v474_v56 = vpop.f32.mrb[2].mxu0  ;;  %v2686_v53 = vpack.i.bf16 %v2370_v47, %v2369_v51  ;;  %v2691_v54 = vpack.i.bf16 %v2372_v48, %v2371_v52  ;;  %v2784_v47 = vld [vmem:[%s3455_s3 + $0x80] sm:$0xff]   ;;  %v2786_v48 = vld [vmem:[%s3455_s3 + $0xc8] sm:$0xff]  }
  0xfd   : > { %487 = vst.msk [vmem:[#allocation2 + $0x28] sm:$0xff] %vm478_vm0, %v474_v56  ;;  %v2546_v61 = vpop.f32.mrb[3].mxu0 }
  0xfe   : > { %v2362_v61 = vld [vmem:[#allocation2 + $0x36] sm:$0xff] }
 0x102   : > { %v2236_v1 = vld [vmem:[#allocation2 + $0x1b] sm:$0xff] }
 0x103   : > { %v2234_v2 = vld [vmem:[#allocation2 + $0x1a] sm:$0xff]  ;;  %v2611_v4 = vpack.i.bf16 %v2236_v1, %v2235_v63 }
 0x104   : > { %v2606_v5 = vpack.i.bf16 %v2234_v2, %v2233_v0  ;;  %v2238_v8 = vld [vmem:[#allocation2 + $0x1c] sm:$0xff]  ;;  %v2306_v27 = vld [vmem:[#allocation2 + $0x2a] sm:$0xff] }
 0x105   : > { %2612 = vrot.lane.b32.xlu1 %v2611_v4, %s2868_s10  ;;  %v2616_v10 = vpack.i.bf16 %v2238_v8, %v2237_v7  ;;  %v2266_v11 = vld [vmem:[#allocation2 + $0x1e] sm:$0xff]  ;;  %v2298_v32 = vld [vmem:[#allocation2 + $0x26] sm:$0xff]  ;;  %v2330_v55 = vld [vmem:[#allocation2 + $0x2e] sm:$0xff]  ;;  %v2696_v57 = vpack.i.bf16 %v2369_v51, %v2306_v27 }
 0x106   : > { %2607 = vrot.lane.b32.xlu0 %v2606_v5, %s2869_s11  ;;  %v3106_v12 = vld [vmem:[#allocation2 + $0x20] sm:$0xff]  ;;  %v2626_v19 = vpack.i.bf16 %v2266_v11, %v2998_v16  ;;  %v2661_v35 = vpack.i.bf16 %v2298_v32, %v2266_v11  ;;  %v2308_v39 = vld [vmem:[#allocation2 + $0x2b] sm:$0xff]  ;;  %v2701_v56 = vpack.i.bf16 %v2330_v55, %v2298_v32  ;;  %v2726_v63 = vpack.i.bf16 %v2362_v61, %v2330_v55 }
 0x107   : > { %v2636_v20 = vpack.i.bf16 %v3106_v12, %v2230_v6  ;;  %v2268_v22 = vld [vmem:[#allocation2 + $0x1f] sm:$0xff]  ;;  %v2300_v38 = vld [vmem:[#allocation2 + $0x27] sm:$0xff]  ;;  %v2332_v58 = vld [vmem:[#allocation2 + $0x2f] sm:$0xff]  ;;  %v2706_v60 = vpack.i.bf16 %v2371_v52, %v2308_v39 }
 0x108   : > { %v2274_v23 = vld [vmem:[#allocation2 + $0x22] sm:$0xff]  ;;  %v2631_v16 = vpack.i.bf16 %v2268_v22, %v2995_v13  ;;  %v2671_v41 = vpack.i.bf16 %v2300_v38, %v2268_v22  ;;  %v2310_v45 = vld [vmem:[#allocation2 + $0x2c] sm:$0xff]  ;;  %v2711_v59 = vpack.i.bf16 %v2332_v58, %v2300_v38  ;;  %v2232_v26 = vld [vmem:[#allocation2 + $0x19] sm:$0xff] }
 0x109   : > { %2622 = vrot.lane.b32.xlu1 %v2621_v9, %s2870_s25  ;;  %v2641_v25 = vpack.i.bf16 %v2274_v23, %v2234_v2  ;;  %v2276_v28 = vld [vmem:[#allocation2 + $0x23] sm:$0xff]  ;;  %v2656_v30 = vpack.i.bf16 %v2306_v27, %v2274_v23  ;;  %v2716_v0 = vpack.i.bf16 %v2342_v62, %v2310_v45  ;;  %v2334_v2 = vld [vmem:[#allocation2 + $0x30] sm:$0xff]  ;;  %v2603_v9 = vpop.permute.xlu1 %2602 }
 0x10a   : > { %2617 = vrot.lane.b32.xlu0 %v2616_v10, %s2870_s25  ;;  %v2646_v31 = vpack.i.bf16 %v2276_v28, %v2236_v1  ;;  %v2797_v13 = vld [vmem:[%s3455_s3 + $0x128] sm:$0xff]   ;;  %v2666_v42 = vpack.i.bf16 %v2308_v39, %v2276_v28  ;;  %v2364_v1 = vld [vmem:[#allocation2 + $0x37] sm:$0xff]  ;;  %v2741_v7 = vpack.i.bf16 %v2366_v3, %v2334_v2  ;;  %v2598_v10 = vpop.permute.xlu0 %2597  ;;  %v2604_v23 = vunpack.i.l.bf16 %v2603_v9 }
 0x10b   : > { %v2278_v33 = vld [vmem:[#allocation2 + $0x24] sm:$0xff]  ;;  %2472 = vmatpush3.bf16.msra.mxu0 %v2797_v13  ;;  %v2374_v4 = vld [vmem:[#allocation2 + $0x3c] sm:$0xff]  ;;  %v2731_v5 = vpack.i.bf16 %v2364_v1, %v2332_v58  ;;  %v2600_v11 = vunpack.i.h.bf16 %v2598_v10  ;;  %v2599_v14 = vunpack.i.l.bf16 %v2598_v10  ;;  %v2790_v52 = vld [vmem:[%s3455_s3 + $0xd0] sm:$0xff]  }
 0x10c   : > { %v2651_v36 = vpack.i.bf16 %v2278_v33, %v2238_v8  ;;  %2473 = vmatprep.subr.bf16.mxu0 %v2799_v34  ;;  %v2302_v44 = vld [vmem:[#allocation2 + $0x28] sm:$0xff]  ;;  %v2676_v50 = vpack.i.bf16 %v2310_v45, %v2278_v33  ;;  %v2736_v8 = vpack.i.bf16 %v2374_v4, %v2342_v62  ;;  %v2792_v55 = vld [vmem:[%s3455_s3 + $0x90] sm:$0xff]   ;;  %v2794_v58 = vld [vmem:[%s3455_s3 + $0xd8] sm:$0xff]  }
 0x10d   : > { %2627 = vrot.lane.b32.xlu1 %v2626_v19, %s2869_s11  ;;  %v2681_v49 = vpack.i.bf16 %v2302_v44, %v3106_v12  ;;  %v2721_v6 = vpack.i.bf16 %v2334_v2, %v2302_v44  ;;  %v3180_v12 = vld [vmem:[#allocation2 + $0x15] sm:$0xff]  ;;  %v612_v27 = vsel %vm478_vm0, %v2223_v15, %v2599_v14  ;;  %v2788_v51 = vld [vmem:[%s3455_s3 + $0x88] sm:$0xff]  }
 0x10e   : > { %2637 = vrot.lane.b32.xlu0 %v2636_v20, %s2870_s25  ;;  %v2231_v19 = vld [vmem:[#allocation2 + $0x11] sm:$0xff]  ;;  %v2605_v20 = vunpack.i.h.bf16 %v2603_v9  ;;  %v613_v24 = vsel %vm478_vm0, %v3180_v12, %v2600_v11  ;;  %v2272_v61 = vld [vmem:[#allocation2 + $0x21] sm:$0xff] }
 0x10f   : > { %2474 = vmatpush3.bf16.msra.mxu0 %v2801_v37  ;;  %v615_v37 = vsel %vm614_vm4, %v612_v27, %v2604_v23 }
 0x110   : > { %2475 = vmatprep.subr.bf16.mxu0 %v2803_v40  ;;  %v616_v38 = vsel %vm614_vm4, %v613_v24, %v2605_v20  ;;  %v2800_v20 = vld [vmem:[%s3455_s3 + $0xa0] sm:$0xff]  }
 0x111   : > { %2632 = vrot.lane.b32.xlu1 %v2631_v16, %s2868_s10 }
 0x112   : > { %2642 = vrot.lane.b32.xlu0 %v2641_v25, %s2869_s11 }
 0x113   : > { %2476 = vmatpush3.bf16.msra.mxu0 %v2805_v43 }
 0x114   : > { %2505 = vmatprep.subr.bf16.mxu0 %v2807_v46 }
 0x115   : > { %2657 = vrot.lane.b32.xlu1 %v2656_v30, %s2869_s11 }
 0x116   : > { %2647 = vrot.lane.b32.xlu0 %v2646_v31, %s2868_s10 }
 0x119   : > { %2662 = vrot.lane.b32.xlu1 %v2661_v35, %s2869_s11 }
 0x11a   : > { %2652 = vrot.lane.b32.xlu0 %v2651_v36, %s2870_s25 }
 0x11d   : > { %2672 = vrot.lane.b32.xlu1 %v2671_v41, %s2868_s10 }
 0x11e   : > { %2667 = vrot.lane.b32.xlu0 %v2666_v42, %s2868_s10 }
 0x121   : > { %2682 = vrot.lane.b32.xlu1 %v2681_v49, %s2870_s25 }
 0x122   : > { %2677 = vrot.lane.b32.xlu0 %v2676_v50, %s2870_s25 }
 0x125   : > { %2687 = vrot.lane.b32.xlu1 %v2686_v53, %s2869_s11 }
 0x126   : > { %2692 = vrot.lane.b32.xlu0 %v2691_v54, %s2868_s10 }
 0x129   : > { %2702 = vrot.lane.b32.xlu1 %v2701_v56, %s2869_s11 }
 0x12a   : > { %2697 = vrot.lane.b32.xlu0 %v2696_v57, %s2869_s11 }
 0x12d   : > { %2712 = vrot.lane.b32.xlu1 %v2711_v59, %s2868_s10 }
 0x12e   : > { %2707 = vrot.lane.b32.xlu0 %v2706_v60, %s2868_s10 }
 0x131   : > { %2727 = vrot.lane.b32.xlu1 %v2726_v63, %s2869_s11 }
 0x132   : > { %2717 = vrot.lane.b32.xlu0 %v2716_v0, %s2870_s25  ;;  %v2796_v0 = vld [vmem:[%s3455_s3 + $0x98] sm:$0xff]  }
 0x135   : > { %2732 = vrot.lane.b32.xlu1 %v2731_v5, %s2868_s10  ;;  %v2798_v5 = vld [vmem:[%s3455_s3 + $0xe0] sm:$0xff]  }
 0x136   : > { %2722 = vrot.lane.b32.xlu0 %v2721_v6, %s2870_s25 }
 0x139   : > { %2742 = vrot.lane.b32.xlu1 %v2741_v7, %s2870_s25 }
 0x13a   : > { %2737 = vrot.lane.b32.xlu0 %v2736_v8, %s2870_s25 }
 0x177   : > { %v2613_v17 = vpop.permute.xlu1 %2612 }
 0x178   : > { %v2608_v18 = vpop.permute.xlu0 %2607  ;;  %v2615_v16 = vunpack.i.h.bf16 %v2613_v17  ;;  %v2614_v25 = vunpack.i.l.bf16 %v2613_v17 }
 0x179   : > { %v2610_v21 = vunpack.i.h.bf16 %v2608_v18  ;;  %v2609_v22 = vunpack.i.l.bf16 %v2608_v18 }
 0x17b   : > { %v620_v28 = vsel %vm478_vm0, %v2231_v19, %v2609_v22  ;;  %v621_v29 = vsel %vm478_vm0, %v2232_v26, %v2610_v21  ;;  %v2623_v30 = vpop.permute.xlu1 %2622  ;;  %v2802_v21 = vld [vmem:[%s3455_s3 + $0xe8] sm:$0xff]  }
 0x17c   : > { %v2618_v31 = vpop.permute.xlu0 %2617  ;;  %v2625_v13 = vunpack.i.h.bf16 %v2623_v30  ;;  %v2624_v32 = vunpack.i.l.bf16 %v2623_v30  ;;  %v622_v35 = vsel %vm614_vm4, %v620_v28, %v2614_v25  ;;  %v623_v36 = vsel %vm614_vm4, %v621_v29, %v2615_v16  ;;  %v2264_v25 = vld [vmem:[#allocation2 + $0x1d] sm:$0xff]  ;;  %v3241_v30 = vld [vmem:[#allocation2 + $0x29] sm:$0xff] }
 0x17d   : > { %v2620_v33 = vunpack.i.h.bf16 %v2618_v31  ;;  %v2619_v34 = vunpack.i.l.bf16 %v2618_v31  ;;  %v3243_v31 = vld [vmem:[#allocation2 + $0x25] sm:$0xff] }
 0x17e   : > { %v618_v41 = vsel %vm617_vm5, %v615_v37, %v2624_v32  ;;  %v619_v42 = vsel %vm617_vm5, %v616_v38, %v2625_v13  ;;  %v2804_v37 = vld [vmem:[%s3455_s3 + $0xa8] sm:$0xff]  }
 0x17f   : > { %v624_v39 = vsel %vm617_vm5, %v622_v35, %v2619_v34  ;;  %v625_v40 = vsel %vm617_vm5, %v623_v36, %v2620_v33  ;;  %v3195_v43 = vpop.permute.xlu1 %2627  ;;  %v626_v46 = vpack.c.bf16 %v619_v42, %v618_v41  ;;  %v2806_v42 = vld [vmem:[%s3455_s3 + $0xf0] sm:$0xff]  }
 0x180   : > { %v3197_v44 = vpop.permute.xlu0 %2637  ;;  %v627_v45 = vpack.c.bf16 %v625_v40, %v624_v39  ;;  %v2629_v27 = vunpack.i.l.bf16 %v3195_v43 }
 0x182   : > { %788 = vmatprep.mubr.bf16.mxu1 %v627_v45 }
 0x183   : > { %789 = vmatmul.mubr.bf16.vlgmr.msra.gmra.mrb[0].mxu1 %v626_v46  ;;  %v3205_v49 = vpop.permute.xlu1 %2632 }
 0x184   : > { %2440 = vmatpush3.bf16.msra.mxu1 %v2784_v47  ;;  %v2643_v50 = vpop.permute.xlu0 %2642  ;;  %v2635_v28 = vunpack.i.h.bf16 %v3205_v49  ;;  %v2634_v29 = vunpack.i.l.bf16 %v3205_v49 }
 0x185   : > { %2441 = vmatprep.subr.bf16.mxu1 %v2786_v48  ;;  %v2645_v56 = vunpack.i.h.bf16 %v2643_v50  ;;  %v2644_v57 = vunpack.i.l.bf16 %v2643_v50 }
 0x187   : > { %v2658_v53 = vpop.permute.xlu1 %2657  ;;  %v972_v1 = vsel %vm478_vm0, %v2232_v26, %v2644_v57  ;;  %v973_v2 = vsel %vm478_vm0, %v2272_v61, %v2645_v56  ;;  %v2630_v26 = vunpack.i.h.bf16 %v3195_v43  ;;  %v2808_v56 = vld [vmem:[%s3455_s3 + $0xb0] sm:$0xff]   ;;  %v2809_v57 = vld [vmem:[%s3455_s3 + $0x200] sm:$0xff]  }
 0x188   : > { %2442 = vmatpush3.bf16.msra.mxu1 %v2788_v51  ;;  %v2648_v54 = vpop.permute.xlu0 %2647  ;;  %v2660_v8 = vunpack.i.h.bf16 %v2658_v53  ;;  %v2659_v11 = vunpack.i.l.bf16 %v2658_v53 }
 0x189   : > { %2443 = vmatprep.subr.bf16.mxu1 %v2790_v52  ;;  %v2650_v59 = vunpack.i.h.bf16 %v2648_v54  ;;  %v2649_v60 = vunpack.i.l.bf16 %v2648_v54 }
 0x18a   : > { %v1237_v13 = vsel %vm478_vm0, %v2272_v61, %v2659_v11  ;;  %v1238_v32 = vsel %vm478_vm0, %v3241_v30, %v2660_v8  ;;  %v966_v61 = vsel %vm478_vm0, %v3180_v12, %v2629_v27  ;;  %v2813_v12 = vld [vmem:[%s3455_s3 + $0x208] sm:$0xff]   ;;  %v2817_v11 = vld [vmem:[%s3455_s3 + $0x210] sm:$0xff]  }
 0x18b   : > { %v2663_v62 = vpop.permute.xlu1 %2662  ;;  %v974_v6 = vsel %vm614_vm4, %v972_v1, %v2649_v60  ;;  %v975_v7 = vsel %vm614_vm4, %v973_v2, %v2650_v59  ;;  %v2811_v59 = vld [vmem:[%s3455_s3 + $0x248] sm:$0xff]   ;;  %v967_v60 = vsel %vm478_vm0, %v2264_v25, %v2630_v26  ;;  %v2639_v1 = vunpack.i.l.bf16 %v3197_v44 }
 0x18c   : > { %2444 = vmatpush3.bf16.msra.mxu1 %v2792_v55  ;;  %v2653_v63 = vpop.permute.xlu0 %2652  ;;  %v2665_v14 = vunpack.i.h.bf16 %v2663_v62  ;;  %v2664_v15 = vunpack.i.l.bf16 %v2663_v62  ;;  %v968_v62 = vsel %vm614_vm4, %v966_v61, %v2634_v29 }
 0x18d   : > { %v2655_v3 = vunpack.i.h.bf16 %v2653_v63  ;;  %v2654_v4 = vunpack.i.l.bf16 %v2653_v63  ;;  %2445 = vmatprep.subr.bf16.mxu1 %v2794_v58  ;;  %v2810_v58 = vld [vmem:[%s3455_s3 + $0xf8] sm:$0xff]   ;;  %v969_v63 = vsel %vm614_vm4, %v967_v60, %v2635_v28 }
 0x18e   : > { %v1231_v33 = vsel %vm478_vm0, %v2264_v25, %v2664_v15  ;;  %v1232_v34 = vsel %vm478_vm0, %v3243_v31, %v2665_v14  ;;  %v2821_v25 = vld [vmem:[%s3455_s3 + $0x218] sm:$0xff]  }
 0x18f   : > { %v976_v9 = vsel %vm617_vm5, %v974_v6, %v2654_v4  ;;  %v977_v10 = vsel %vm617_vm5, %v975_v7, %v2655_v3  ;;  %v2673_v17 = vpop.permute.xlu1 %2672  ;;  %v2812_v4 = vld [vmem:[%s3455_s3 + $0xb8] sm:$0xff]   ;;  %v970_v6 = vsel %vm617_vm5, %v968_v62, %v2639_v1 }
 0x190   : > { %2446 = vmatpush3.bf16.msra.mxu1 %v2796_v0  ;;  %v2668_v18 = vpop.permute.xlu0 %2667  ;;  %v979_v19 = vpack.c.bf16 %v977_v10, %v976_v9  ;;  %v2675_v22 = vunpack.i.h.bf16 %v2673_v17  ;;  %v2674_v23 = vunpack.i.l.bf16 %v2673_v17  ;;  %v2640_v0 = vunpack.i.h.bf16 %v3197_v44  ;;  %v2815_v44 = vld [vmem:[%s3455_s3 + $0x250] sm:$0xff]   ;;  %v2816_v10 = vld [vmem:[%s3455_s3 + $0x180] sm:$0xff]  }
 0x191   : > { %2447 = vmatprep.subr.bf16.mxu1 %v2798_v5  ;;  %v2670_v24 = vunpack.i.h.bf16 %v2668_v18  ;;  %v2669_v16 = vunpack.i.l.bf16 %v2668_v18  ;;  %v2814_v5 = vld [vmem:[%s3455_s3 + $0x1c0] sm:$0xff]   ;;  %v2818_v18 = vld [vmem:[%s3455_s3 + $0x1c8] sm:$0xff]  }
 0x192   : > { %1140 = vmatprep.mubr.bf16.mxu1 %v979_v19  ;;  %v1233_v43 = vsel %vm614_vm4, %v1231_v33, %v2674_v23  ;;  %v1234_v45 = vsel %vm614_vm4, %v1232_v34, %v2675_v22  ;;  %v971_v7 = vsel %vm617_vm5, %v969_v63, %v2640_v0  ;;  %v2819_v19 = vld [vmem:[%s3455_s3 + $0x258] sm:$0xff]  }
 0x193   : > { %v2683_v35 = vpop.permute.xlu1 %2682  ;;  %v1240_v46 = vsel %vm614_vm4, %v1238_v32, %v2670_v24  ;;  %v1239_v47 = vsel %vm614_vm4, %v1237_v13, %v2669_v16  ;;  %v978_v17 = vpack.c.bf16 %v971_v7, %v970_v6  ;;  %v2820_v16 = vld [vmem:[%s3455_s3 + $0x188] sm:$0xff]   ;;  %v2822_v13 = vld [vmem:[%s3455_s3 + $0x1d0] sm:$0xff]   ;;  %v2823_v32 = vld [vmem:[%s3455_s3 + $0x260] sm:$0xff]  }
 0x194   : > { %2448 = vmatpush3.bf16.msra.mxu1 %v2800_v20  ;;  %v2678_v36 = vpop.permute.xlu0 %2677  ;;  %v2685_v38 = vunpack.i.h.bf16 %v2683_v35  ;;  %v2684_v39 = vunpack.i.l.bf16 %v2683_v35  ;;  %v2367_v20 = vld [vmem:[#allocation2 + $0x31] sm:$0xff]  ;;  %v2834_v6 = vld [vmem:[%s3455_s3 + $0x1e8] sm:$0xff]  }
 0x195   : > { %v2680_v40 = vunpack.i.h.bf16 %v2678_v36  ;;  %v2679_v41 = vunpack.i.l.bf16 %v2678_v36  ;;  %2449 = vmatprep.subr.bf16.mxu1 %v2802_v21  ;;  %v2835_v7 = vld [vmem:[%s3455_s3 + $0x278] sm:$0xff]  }
 0x196   : > { %v1235_v48 = vsel %vm617_vm5, %v1233_v43, %v2684_v39  ;;  %v1236_v49 = vsel %vm617_vm5, %v1234_v45, %v2685_v38  ;;  %v2368_v38 = vld [vmem:[#allocation2 + $0x39] sm:$0xff] }
 0x197   : > { %v1241_v50 = vsel %vm617_vm5, %v1239_v47, %v2679_v41  ;;  %v1242_v51 = vsel %vm617_vm5, %v1240_v46, %v2680_v40  ;;  %v1243_v52 = vpack.c.bf16 %v1236_v49, %v1235_v48  ;;  %v3265_v53 = vpop.permute.xlu1 %2687  ;;  %v2824_v41 = vld [vmem:[%s3455_s3 + $0x190] sm:$0xff]   ;;  %v2826_v45 = vld [vmem:[%s3455_s3 + $0x1d8] sm:$0xff]   ;;  %v2827_v46 = vld [vmem:[%s3455_s3 + $0x268] sm:$0xff]  }
 0x198   : > { %2450 = vmatpush3.bf16.msra.mxu1 %v2804_v37  ;;  %v3267_v54 = vpop.permute.xlu0 %2692  ;;  %v1244_v55 = vpack.c.bf16 %v1242_v51, %v1241_v50  ;;  %v2690_v35 = vunpack.i.h.bf16 %v3265_v53 }
 0x199   : > { %2451 = vmatprep.subr.bf16.mxu1 %v2806_v42  ;;  %v2825_v42 = vld [vmem:[%s3455_s3 + $0x220] sm:$0xff]   ;;  %v2695_v47 = vunpack.i.h.bf16 %v3267_v54  ;;  %v2694_v48 = vunpack.i.l.bf16 %v3267_v54 }
 0x19a   : > { %1405 = vmatprep.mubr.bf16.mxu0 %v1244_v55  ;;  %v1768_v49 = vsel %vm478_vm0, %v2368_v38, %v2690_v35  ;;  %v2830_v54 = vld [vmem:[%s3455_s3 + $0x1e0] sm:$0xff]   ;;  %v879_v38 = vpop.f32.mrb[4].mxu0 }
 0x19b   : > { %1406 = vmatmul.mubr.bf16.vlgmr.msra.gmra.mrb[8].mxu0 %v1243_v52  ;;  %v3288_v2 = vpop.permute.xlu1 %2702  ;;  %v2828_v52 = vld [vmem:[%s3455_s3 + $0x198] sm:$0xff]  }
 0x19c   : > { %2452 = vmatpush3.bf16.msra.mxu1 %v2808_v56  ;;  %2506 = vmatpush3.bf16.msra.mxu0 %v2809_v57  ;;  %v2698_v3 = vpop.permute.xlu0 %2697  ;;  %v2831_v57 = vld [vmem:[%s3455_s3 + $0x270] sm:$0xff]  }
 0x19d   : > { %2453 = vmatprep.subr.bf16.mxu1 %v2810_v58  ;;  %2507 = vmatprep.subr.bf16.mxu0 %v2811_v59  ;;  %v2700_v14 = vunpack.i.h.bf16 %v2698_v3  ;;  %v2699_v15 = vunpack.i.l.bf16 %v2698_v3  ;;  %v1770_v58 = vsel %vm614_vm4, %v1768_v49, %v2695_v47  ;;  %v2832_v3 = vld [vmem:[%s3455_s3 + $0x1a0] sm:$0xff]  }
 0x19f   : > { %v3304_v8 = vpop.permute.xlu1 %2712  ;;  %v1503_v26 = vsel %vm478_vm0, %v2367_v20, %v2700_v14  ;;  %v1502_v27 = vsel %vm478_vm0, %v3241_v30, %v2699_v15  ;;  %v2689_v30 = vunpack.i.l.bf16 %v3265_v53  ;;  %v2829_v53 = vld [vmem:[%s3455_s3 + $0x228] sm:$0xff]  }
 0x1a0   : > { %2454 = vmatpush3.bf16.msra.mxu1 %v2812_v4  ;;  %2508 = vmatpush3.bf16.msra.mxu0 %v2813_v12  ;;  %v2708_v9 = vpop.permute.xlu0 %2707  ;;  %v2833_v4 = vld [vmem:[%s3455_s3 + $0x230] sm:$0xff]  }
 0x1a1   : > { %2483 = vmatprep.subr.bf16.mxu1 %v2814_v5  ;;  %2509 = vmatprep.subr.bf16.mxu0 %v2815_v44  ;;  %v2710_v21 = vunpack.i.h.bf16 %v2708_v9  ;;  %v2709_v22 = vunpack.i.l.bf16 %v2708_v9  ;;  %v1767_v50 = vsel %vm478_vm0, %v2367_v20, %v2689_v30  ;;  %v2360_v12 = vld [vmem:[#allocation2 + $0x35] sm:$0xff] }
 0x1a2   : > { %v1769_v59 = vsel %vm614_vm4, %v1767_v50, %v2694_v48 }
 0x1a3   : > { %1141 = vmatmul.mubr.bf16.vlgmr.msra.gmra.mrb[4].mxu1 %v978_v17  ;;  %v3318_v23 = vpop.permute.xlu1 %2727  ;;  %v1504_v33 = vsel %vm614_vm4, %v1502_v27, %v2709_v22  ;;  %v1505_v34 = vsel %vm614_vm4, %v1503_v26, %v2710_v21  ;;  %v2836_v17 = vld [vmem:[%s3455_s3 + $0x1a8] sm:$0xff]   ;;  %v2838_v21 = vld [vmem:[%s3455_s3 + $0x1f0] sm:$0xff]   ;;  %v2715_v26 = vunpack.i.h.bf16 %v3304_v8  ;;  %v2714_v27 = vunpack.i.l.bf16 %v3304_v8  ;;  %v2841_v8 = vld [vmem:[%s3455_s3 + $0x1b8] sm:$0xff]  }
 0x1a4   : > { %2484 = vmatpush3.bf16.msra.mxu1 %v2816_v10  ;;  %2510 = vmatpush3.bf16.msra.mxu0 %v2817_v11  ;;  %v2718_v24 = vpop.permute.xlu0 %2717  ;;  %v2730_v63 = vunpack.i.h.bf16 %v3318_v23  ;;  %v2729_v0 = vunpack.i.l.bf16 %v3318_v23  ;;  %v2328_v11 = vld [vmem:[#allocation2 + $0x2d] sm:$0xff] }
 0x1a5   : > { %v2720_v28 = vunpack.i.h.bf16 %v2718_v24  ;;  %v2719_v29 = vunpack.i.l.bf16 %v2718_v24  ;;  %2485 = vmatprep.subr.bf16.mxu1 %v2818_v18  ;;  %2511 = vmatprep.subr.bf16.mxu0 %v2819_v19  ;;  %v2837_v18 = vld [vmem:[%s3455_s3 + $0x238] sm:$0xff]   ;;  %v2705_v24 = vunpack.i.h.bf16 %v3288_v2 }
 0x1a6   : > { %v1762_v14 = vsel %vm478_vm0, %v2360_v12, %v2730_v63  ;;  %v1761_v15 = vsel %vm478_vm0, %v2328_v11, %v2729_v0 }
 0x1a7   : > { %v1506_v36 = vsel %vm617_vm5, %v1504_v33, %v2719_v29  ;;  %v1507_v37 = vsel %vm617_vm5, %v1505_v34, %v2720_v28  ;;  %v2733_v43 = vpop.permute.xlu1 %2732  ;;  %v2840_v29 = vld [vmem:[%s3455_s3 + $0x1f8] sm:$0xff]  }
 0x1a8   : > { %2486 = vmatpush3.bf16.msra.mxu1 %v2820_v16  ;;  %2512 = vmatpush3.bf16.msra.mxu0 %v2821_v25  ;;  %v3341_v39 = vpop.permute.xlu0 %2722  ;;  %v1509_v40 = vpack.c.bf16 %v1507_v37, %v1506_v36  ;;  %v2735_v5 = vunpack.i.h.bf16 %v2733_v43  ;;  %v2734_v44 = vunpack.i.l.bf16 %v2733_v43  ;;  %v2704_v16 = vunpack.i.l.bf16 %v3288_v2  ;;  %v2839_v25 = vld [vmem:[%s3455_s3 + $0x1b0] sm:$0xff]  }
 0x1a9   : > { %2487 = vmatprep.subr.bf16.mxu1 %v2822_v13  ;;  %2513 = vmatprep.subr.bf16.mxu0 %v2823_v32  ;;  %v2725_v13 = vunpack.i.h.bf16 %v3341_v39  ;;  %v2724_v2 = vunpack.i.l.bf16 %v3341_v39  ;;  %v1497_v32 = vsel %vm478_vm0, %v2328_v11, %v2705_v24  ;;  %v2565_v39 = vpop.f32.mrb[5].mxu0 }
 0x1aa   : > { %1670 = vmatprep.mubr.bf16.mxu1 %v1509_v40  ;;  %v1763_v19 = vsel %vm614_vm4, %v1761_v15, %v2734_v44  ;;  %v1764_v20 = vsel %vm614_vm4, %v1762_v14, %v2735_v5  ;;  %v1496_v33 = vsel %vm478_vm0, %v3243_v31, %v2704_v16  ;;  %v1499_v35 = vsel %vm614_vm4, %v1497_v32, %v2715_v26  ;;  %v882_v31 = vpop.f32.mrb[6].mxu0 }
 0x1ab   : > { %v2743_v60 = vpop.permute.xlu1 %2742  ;;  %v1498_v34 = vsel %vm614_vm4, %v1496_v33, %v2714_v27  ;;  %v1501_v30 = vsel %vm617_vm5, %v1499_v35, %v2725_v13  ;;  %v2566_v40 = vpop.f32.mrb[7].mxu0 }
 0x1ac   : > { %2488 = vmatpush3.bf16.msra.mxu1 %v2824_v41  ;;  %2514 = vmatpush3.bf16.msra.mxu0 %v2825_v42  ;;  %v2738_v51 = vpop.permute.xlu0 %2737  ;;  %v2745_v9 = vunpack.i.h.bf16 %v2743_v60  ;;  %v2744_v10 = vunpack.i.l.bf16 %v2743_v60  ;;  %v1500_v36 = vsel %vm617_vm5, %v1498_v34, %v2724_v2 }
 0x1ad   : > { %v2740_v55 = vunpack.i.h.bf16 %v2738_v51  ;;  %v2739_v56 = vunpack.i.l.bf16 %v2738_v51  ;;  %2489 = vmatprep.subr.bf16.mxu1 %v2826_v45  ;;  %2515 = vmatprep.subr.bf16.mxu0 %v2827_v46  ;;  %v1508_v37 = vpack.c.bf16 %v1501_v30, %v1500_v36 }
 0x1ae   : > { %v1765_v22 = vsel %vm617_vm5, %v1763_v19, %v2744_v10  ;;  %v1766_v23 = vsel %vm617_vm5, %v1764_v20, %v2745_v9  ;;  %v1957_v19 = vld [vmem:[%s353_s20] sm:$0xff] }
 0x1af   : > { %v1771_v61 = vsel %vm617_vm5, %v1769_v59, %v2739_v56  ;;  %v1772_v62 = vsel %vm617_vm5, %v1770_v58, %v2740_v55  ;;  %v1773_v28 = vpack.c.bf16 %v1766_v23, %v1765_v22  ;;  %v2392_v20 = vld [vmem:[%s3458_s6] ss:$0 sm:$0xff]  ;;  %v1958_v23 = vld [vmem:[%s353_s20 + $0x8] sm:$0xff] }
 0x1b0   : > { %2490 = vmatpush3.bf16.msra.mxu1 %v2828_v52  ;;  %2516 = vmatpush3.bf16.msra.mxu0 %v2829_v53  ;;  %v1774_v1 = vpack.c.bf16 %v1772_v62, %v1771_v61  ;;  %v1966_v16 = vmul.f32 %v2392_v20, %v1957_v19 }
 0x1b1   : > { %2491 = vmatprep.subr.bf16.mxu1 %v2830_v54  ;;  %2517 = vmatprep.subr.bf16.mxu0 %v2831_v57 }
 0x1b2   : > { %1935 = vmatprep.mubr.bf16.mxu0 %v1774_v1 }
 0x1b4   : > { %2492 = vmatpush3.bf16.msra.mxu1 %v2832_v3  ;;  %2518 = vmatpush3.bf16.msra.mxu0 %v2833_v4 }
 0x1b5   : > { %2493 = vmatprep.subr.bf16.mxu1 %v2834_v6  ;;  %2519 = vmatprep.subr.bf16.mxu0 %v2835_v7 }
 0x1b8   : > { %2494 = vmatpush3.bf16.msra.mxu1 %v2836_v17  ;;  %2520 = vmatpush3.bf16.msra.mxu0 %v2837_v18  ;;  %v2391_v18 = vld [vmem:[%s3457_s5] ss:$0 sm:$0xff] }
 0x1b9   : > { %2495 = vmatprep.subr.bf16.mxu1 %v2838_v21 }
 0x1bb   : > { %1936 = vmatmul.mubr.bf16.vlgmr.msra.gmra.mrb[12].mxu0 %v1773_v28  ;;  %v1967_v28 = vmul.f32 %v2392_v20, %v1958_v23 }
 0x1bc   : > { %2496 = vmatpush3.bf16.msra.mxu1 %v2839_v25 }
 0x1bd   : > { %2497 = vmatprep.subr.bf16.mxu1 %v2840_v29  ;;  %v2393_v29 = vld [vmem:[%s3459_s7] ss:$0 sm:$0xff] }
 0x1c0   : > { %2498 = vmatpush3.bf16.msra.mxu1 %v2841_v8 }
 0x1c3   : > { %1671 = vmatmul.mubr.bf16.vlgmr.msra.gmra.mrb[8].mxu1 %v1508_v37 }
 0x256   : > { %v2424_v41 = vpop.f32.mrb[0].mxu1 }
 0x257   : > { %v2425_v42 = vpop.f32.mrb[1].mxu1 }
 0x258   : > { %v2426_v43 = vadd.f32 %v2425_v42, %v2424_v41  ;;  %v2427_v45 = vpop.f32.mrb[2].mxu1 }
 0x259   : > { %v2428_v46 = vpop.f32.mrb[3].mxu1 }
 0x25a   : > { %v880_v47 = vadd.f32 %v2426_v43, %v879_v38  ;;  %v2429_v48 = vadd.f32 %v2428_v46, %v2427_v45 }
 0x25c   : > { %v883_v49 = vadd.f32 %v2429_v48, %v882_v31 }
 0x26e   : > { %v2477_v50 = vpop.f32.mrb[8].mxu0 }
 0x26f   : > { %v2478_v51 = vpop.f32.mrb[9].mxu0 }
 0x270   : > { %v2479_v52 = vadd.f32 %v2478_v51, %v2477_v50  ;;  %v2480_v53 = vpop.f32.mrb[10].mxu0 }
 0x271   : > { %v2481_v55 = vpop.f32.mrb[11].mxu0 }
 0x272   : > { %v2482_v56 = vadd.f32 %v2481_v55, %v2480_v53 }
 0x276   : > { %v2455_v54 = vpop.f32.mrb[4].mxu1 }
 0x277   : > { %v2456_v57 = vpop.f32.mrb[5].mxu1 }
 0x278   : > { %v2457_v58 = vadd.f32 %v2456_v57, %v2455_v54  ;;  %v2458_v59 = vpop.f32.mrb[6].mxu1 }
 0x279   : > { %v2459_v60 = vpop.f32.mrb[7].mxu1 }
 0x27a   : > { %v1149_v61 = vadd.f32 %v2457_v58, %v880_v47  ;;  %v2460_v62 = vadd.f32 %v2459_v60, %v2458_v59 }
 0x27c   : > { %v1150_v63 = vadd.f32 %v2460_v62, %v883_v49  ;;  %v1414_v0 = vadd.f32 %v2479_v52, %v1149_v61 }
 0x27e   : > { %v1415_v1 = vadd.f32 %v2482_v56, %v1150_v63 }
 0x28e   : > { %v2521_v3 = vpop.f32.mrb[12].mxu0 }
 0x28f   : > { %v2522_v4 = vpop.f32.mrb[13].mxu0 }
 0x290   : > { %v2523_v12 = vadd.f32 %v2522_v4, %v2521_v3  ;;  %v2524_v5 = vpop.f32.mrb[14].mxu0 }
 0x291   : > { %v2525_v44 = vpop.f32.mrb[15].mxu0 }
 0x292   : > { %v2526_v6 = vadd.f32 %v2525_v44, %v2524_v5 }
 0x296   : > { %v2499_v7 = vpop.f32.mrb[8].mxu1 }
 0x297   : > { %v2500_v9 = vpop.f32.mrb[9].mxu1 }
 0x298   : > { %v2501_v10 = vadd.f32 %v2500_v9, %v2499_v7  ;;  %v2502_v11 = vpop.f32.mrb[10].mxu1 }
 0x299   : > { %v2503_v14 = vpop.f32.mrb[11].mxu1 }
 0x29a   : > { %v1679_v15 = vadd.f32 %v2501_v10, %v1414_v0  ;;  %v2504_v17 = vadd.f32 %v2503_v14, %v2502_v11 }
 0x29c   : > { %v1944_v21 = vadd.f32 %v2523_v12, %v1679_v15  ;;  %v1680_v22 = vadd.f32 %v2504_v17, %v1415_v1 }
 0x29e   : > { %v1953_v24 = vadd.f32 %v2391_v18, %v1944_v21  ;;  %v1945_v25 = vadd.f32 %v2526_v6, %v1680_v22 }
 0x2a0   : > { %v1955_v26 = vmax.f32 %v1953_v24, 0.0  ;;  %v1954_v27 = vadd.f32 %v2391_v18, %v1945_v25 }
 0x2a2   : > { %v1968_v13 = vadd.f32 %v1966_v16, %v1955_v26  ;;  %v1956_v2 = vmax.f32 %v1954_v27, 0.0 }
 0x2a4   : > { %v1977_v32 = vadd.f32 %v2393_v29, %v1968_v13  ;;  %v1969_v33 = vadd.f32 %v1967_v28, %v1956_v2 }
 0x2a6   : > { %v1979_v8 = vmax.f32 %v1977_v32, 0.0  ;;  %v1978_v34 = vadd.f32 %v2393_v29, %v1969_v33 }
 0x2a8   : > { %1981 = vst [vmem:[%s363_s13] sm:$0xff] %v1979_v8  ;;  %v1980_v35 = vmax.f32 %v1978_v34, 0.0 }
 0x2aa   : > { %1982 = vst [vmem:[%s363_s13 + $0x8] sm:$0xff] %v1980_v35 }
 0x2ab PF: > { %s18_s29 = sadd.s32 1, %s2864_s29   ;;  %s3461_s27 = smov %s2860_s28 }
 0x2ac   : > { %p15_p5 = scmp.ge.s32.totalorder %s18_s29, 4   ;;  %s3462_s28 = smov %s3464_s30 }
 0x2ae   :  { %17 = sbr.rel (!%p15_p5) target bundleno = 2 (0x2), region = 130 }

// kernel: _lambda_.9
= control target key start
LH: loop header
LB: loop body
LE: loop exit
PB: predicated region body
PF: predicated region fallthrough
CT: control target
= control target key end

     0   :  { %s2964_s27 = smov 0   ;;  %s2966_s28 = smov 0   ;;  %s3503_s0 = inlined_call_operand.vmem [shape: f32[2,16,128], index: 0, kind: input, shape index: {}]   ;;  %s3504_s1 = inlined_call_operand.vmem [shape: f32[2,16,4], index: 1, kind: input, shape index: {}]   ;;  %s3505_s2 = inlined_call_operand.vmem [shape: bf16[128,32], index: 2, kind: input, shape index: {}]   ;;  %s3506_s3 = inlined_call_operand.vmem [shape: bf16[1280,128], index: 3, kind: input, shape index: {}]   ;;  %s3507_s4 = inlined_call_operand.vmem [shape: bf16[128,128], index: 4, kind: input, shape index: {}]   ;;  %s3508_s5 = inlined_call_operand.vmem [shape: f32[1,128], index: 5, kind: input, shape index: {}, may-alias: {5,7}]   ;;  %s3509_s6 = inlined_call_operand.vmem [shape: bf16[4,128], index: 6, kind: input, shape index: {}]   ;;  %s3510_s7 = inlined_call_operand.vmem [shape: f32[1,128], index: 7, kind: input, shape index: {}, may-alias: {5,7}]   ;;  %s3511_s8 = inlined_call_operand.vmem [shape: f32[2,16,128], index: 8, kind: output, shape index: {}]  }
   0x1   :  { %s2968_s29 = smov 0  }
   0x2 LB: > { %s30_s30 = sadd.s32 1, %s2908_s28  ;;  %p2248_p0 = scmp.ge.s32.totalorder %s2912_s29, 1  ;;  %s2912_s29 = sphi %s2968_s29, %s18_s29   ;;  %s2908_s28 = sphi %s2966_s28, %s3513_s28   ;;  %s2904_s27 = sphi %s2964_s27, %s3512_s27  }
   0x3   : > { %p32_p1 = scmp.ge.s32.totalorder %s30_s30, 2  ;;  %p293_p2 = scmp.lt.s32.totalorder %s2912_s29, 3 }
   0x5   : > { %s3515_s30 = smov (%p32_p1, %s30_s30), 0  ;;  %p294_p3 = pnand %p2248_p0, %p293_p2 }
   0x6   : > { %vm478_vm0 = vcmask (!%p294_p3), 261120   ;;  %v2914_v0 = vmov (!%p294_p3), 0.0   ;;  %v2794_v1 = vld [vmem:[%s3505_s2] sm:$0xff] (!%p294_p3)   ;;  %vm2915_vm1 = vmmov (!%p294_p3), 0   ;;  %p340_p4 = scmp.lt.s32.totalorder (!%p294_p3), %s2904_s27, 1  ;;  %v2795_v2 = vld [vmem:[%s3505_s2 + $0x8] sm:$0xff] (!%p294_p3)  }
   0x7   : > { %297 = sbr.rel (%p294_p3) target bundleno = 681 (0x2a9), region = 52  ;;  %2569 = vmatprep.subr.bf16.mxu0 (!%p294_p3), %v2914_v0  ;;  %480 = vst.msk [vmem:[#allocation2 + $0x8] sm:$0xff] (!%p294_p3), %vm478_vm0, %v2914_v0  ;;  %481 = vst.msk [vmem:[#allocation2 + $0x10] sm:$0xff] (!%p294_p3), %vm478_vm0, %v2914_v0  ;;  %2585 = vmatprep.mubr.msk.bf16.mxu0 (!%p294_p3), %vm2915_vm1, %v2914_v0  ;;  %v2796_v3 = vld [vmem:[%s3505_s2 + $0x10] sm:$0xff] (!%p294_p3)   ;;  %v2797_v4 = vld [vmem:[%s3505_s2 + $0x18] sm:$0xff] (!%p294_p3)   ;;  %s2916_s10 = smov (!%p294_p3), 64  }
   0x8   : > { %482 = vst.msk [vmem:[#allocation2 + $0x18] sm:$0xff] (!%p294_p3), %vm478_vm0, %v2914_v0  ;;  %483 = vst.msk [vmem:[#allocation2 + $0x30] sm:$0xff] (!%p294_p3), %vm478_vm0, %v2914_v0  ;;  %2570 = vmatpush3.bf16.msra.mxu0 (!%p294_p3), %v2794_v1  ;;  %v2798_v5 = vld [vmem:[%s3505_s2 + $0x20] sm:$0xff] (!%p294_p3)   ;;  %v2799_v6 = vld [vmem:[%s3505_s2 + $0x28] sm:$0xff] (!%p294_p3)   ;;  %s2917_s11 = smov (!%p294_p3), 32   ;;  %vm490_vm2 = vcmask (!%p294_p3), 1040384  }
   0x9   : > { %484 = vst.msk [vmem:[#allocation2 + $0x38] sm:$0xff] (!%p294_p3), %vm478_vm0, %v2914_v0  ;;  %485 = vst.msk [vmem:[#allocation2 + $0x40] sm:$0xff] (!%p294_p3), %vm478_vm0, %v2914_v0  ;;  %2571 = vmatprep.subr.bf16.mxu0 (!%p294_p3), %v2914_v0  ;;  %v2800_v7 = vld [vmem:[%s3505_s2 + $0x30] sm:$0xff] (!%p294_p3)   ;;  %v2801_v8 = vld [vmem:[%s3505_s2 + $0x38] sm:$0xff] (!%p294_p3)   ;;  %vm497_vm3 = vcmask (!%p294_p3), 1046528   ;;  %s2918_s25 = smov (!%p294_p3), 96  }
   0xa   : > { %v2802_v18 = vld [vmem:[%s3507_s4] sm:$0xff] (!%p294_p3)   ;;  %v2803_v21 = vld [vmem:[%s3507_s4 + $0x8] sm:$0xff] (!%p294_p3)   ;;  %v2810_v24 = vld [vmem:[%s3506_s3 + $0x50] sm:$0xff] (!%p294_p3)   ;;  %vm614_vm4 = vcmask (!%p294_p3), 523264   ;;  %vm617_vm5 = vcmask (!%p294_p3), 785408   ;;  %vm1972_vm6 = vcmask (!%p294_p3), 1041408  }
   0xb   : > { %v2804_v19 = vld [vmem:[%s3506_s3 + $0x40] sm:$0xff] (!%p294_p3)   ;;  %v2807_v22 = vld [vmem:[%s3506_s3 + $0x48] sm:$0xff] (!%p294_p3)   ;;  %v2806_v25 = vld [vmem:[%s3507_s4 + $0x10] sm:$0xff] (!%p294_p3)   ;;  %vm1968_vm7 = vcmask (!%p294_p3), 31744  }
   0xc   : > { %2572 = vmatpush3.bf16.msra.mxu0 (!%p294_p3), %v2795_v2  ;;  %v2805_v20 = vld [vmem:[%s3506_s3] sm:$0xff] (!%p294_p3)   ;;  %2448 = vmatprep.subr.bf16.mxu1 (!%p294_p3), %v2804_v19  ;;  %v2808_v23 = vld [vmem:[%s3506_s3 + $0x8] sm:$0xff] (!%p294_p3)   ;;  %v2811_v26 = vld [vmem:[%s3506_s3 + $0x10] sm:$0xff] (!%p294_p3)  }
   0xd   : > { %2573 = vmatprep.subr.bf16.mxu0 (!%p294_p3), %v2914_v0  ;;  %2449 = vmatpush3.bf16.msra.mxu1 (!%p294_p3), %v2805_v20  ;;  %v2813_v27 = vld [vmem:[%s3506_s3 + $0x58] sm:$0xff] (!%p294_p3)   ;;  %v2816_v30 = vld [vmem:[%s3506_s3 + $0x60] sm:$0xff] (!%p294_p3)   ;;  %v2819_v33 = vld [vmem:[%s3506_s3 + $0x68] sm:$0xff] (!%p294_p3)  }
   0xe   : > { %s3517_s27 = smov (!%p340_p4, %s2904_s27), 1  ;;  %v2267_v12 = vld [vmem:[#allocation2 + $0xf] sm:$0xff]  ;;  %2450 = vmatprep.subr.bf16.mxu1 %v2807_v22  ;;  %v2809_v28 = vld [vmem:[%s3507_s4 + $0x18] sm:$0xff]   ;;  %v2812_v31 = vld [vmem:[%s3507_s4 + $0x20] sm:$0xff]  }
   0xf   : > { %s3011_s17 = sshll.u32 %s3517_s27, 4  ;;  %v3043_v13 = vld [vmem:[#allocation2 + $0x17] sm:$0xff]  ;;  %v2265_v14 = vld [vmem:[#allocation2 + $0xe] sm:$0xff]  ;;  %v2817_v32 = vld [vmem:[%s3506_s3 + $0x20] sm:$0xff]  }
  0x10   : > { %2574 = vmatpush3.bf16.msra.mxu0 %v2796_v3  ;;  %s344_s26 = scalar_lea.vmem %s3503_s0, %s3011_s17  ;;  %v2649_v15 = vpack.i.bf16 %v3043_v13, %v2267_v12  ;;  %v3046_v16 = vld [vmem:[#allocation2 + $0x16] sm:$0xff]  ;;  %v2815_v34 = vld [vmem:[%s3507_s4 + $0x28] sm:$0xff]   ;;  %v2823_v45 = vld [vmem:[%s3506_s3 + $0x140] sm:$0xff]   ;;  %s353_s22 = scalar_lea.vmem %s3504_s1, %s3011_s17 }
  0x11   : > { %2575 = vmatprep.subr.bf16.mxu0 %v2914_v0  ;;  %v3033_v9 = vld [vmem:[%s344_s26] sm:$0xff]  ;;  %v3035_v10 = vld [vmem:[%s344_s26 + $0x8] sm:$0xff]  ;;  %v2644_v17 = vpack.i.bf16 %v3046_v16, %v2265_v14  ;;  %2451 = vmatpush3.bf16.msra.mxu1 %v2808_v23  ;;  %v2814_v29 = vld [vmem:[%s3506_s3 + $0x18] sm:$0xff]   ;;  %s363_s13 = scalar_lea.vmem %s3511_s8, %s3011_s17 }
  0x12   : > { %v372_v11 = vpack.c.bf16 %v3035_v10, %v3033_v9  ;;  %2650 = vrot.lane.b32.xlu1 %v2649_v15, %s2916_s10  ;;  %2452 = vmatprep.subr.bf16.mxu1 %v2810_v24  ;;  %v2820_v35 = vld [vmem:[%s3506_s3 + $0x28] sm:$0xff]   ;;  %v2818_v36 = vld [vmem:[%s3507_s4 + $0x30] sm:$0xff]   ;;  %v2821_v37 = vld [vmem:[%s3507_s4 + $0x38] sm:$0xff]   ;;  %v491_v38 = vrot.slane %v3033_v9, 7  ;;  %v492_v39 = vrot.slane %v3035_v10, 7  ;;  %v498_v42 = vrot.slane %v3033_v9, 1 }
  0x13   : > { %2645 = vrot.lane.b32.xlu0 %v2644_v17, %s2917_s11  ;;  %v499_v43 = vrot.slane %v3035_v10, 1  ;;  %v2822_v44 = vld [vmem:[%s3506_s3 + $0x70] sm:$0xff]   ;;  %v2825_v55 = vld [vmem:[%s3506_s3 + $0x100] sm:$0xff]   ;;  %v2826_v58 = vld [vmem:[%s3506_s3 + $0x78] sm:$0xff]  }
  0x14   : > { %2576 = vmatpush3.bf16.msra.mxu0 %v2797_v4  ;;  %v493_v40 = vsel %vm490_vm2, %v491_v38, %v492_v39  ;;  %v496_v41 = vsel %vm490_vm2, %v3033_v9, %v491_v38  ;;  %v2824_v46 = vld [vmem:[%s3506_s3 + $0x30] sm:$0xff]   ;;  %v2827_v59 = vld [vmem:[%s3506_s3 + $0x148] sm:$0xff]   ;;  %v2828_v60 = vld [vmem:[%s3506_s3 + $0x38] sm:$0xff]  }
  0x15   : > { %2577 = vmatprep.subr.bf16.mxu0 %v2914_v0  ;;  %2453 = vmatpush3.bf16.msra.mxu1 %v2811_v26  ;;  %v504_v47 = vmax.f32 %v496_v41, %v3033_v9  ;;  %v505_v48 = vmax.f32 %v493_v40, %v3035_v10  ;;  %v500_v49 = vsel %vm497_vm3, %v498_v42, %v499_v43  ;;  %v2829_v62 = vld [vmem:[%s3506_s3 + $0x108] sm:$0xff]   ;;  %v2275_v63 = vld [vmem:[#allocation2 + $0x13] sm:$0xff]  ;;  %v2830_v15 = vld [vmem:[%s3506_s3 + $0xc0] sm:$0xff]  }
  0x16   : > { %2454 = vmatprep.subr.bf16.mxu1 %v2813_v27  ;;  %v503_v50 = vsel %vm497_vm3, %v499_v43, %v3035_v10  ;;  %v2273_v1 = vld [vmem:[#allocation2 + $0x12] sm:$0xff]  ;;  %v2841_v27 = vld [vmem:[%s3506_s3 + $0x120] sm:$0xff]  }
  0x17   : > { %v506_v52 = vmax.f32 %v504_v47, %v500_v49  ;;  %v507_v53 = vmax.f32 %v505_v48, %v503_v50  ;;  %v2269_v4 = vld [vmem:[#allocation2 + $0x10] sm:$0xff]  ;;  %v2835_v19 = vld [vmem:[%s3506_s3 + $0x158] sm:$0xff]   ;;  %v2855_v47 = vld [vmem:[%s3506_s3 + $0x240] sm:$0xff]  }
  0x18   : > { %2578 = vmatpush3.bf16.msra.mxu0 %v2798_v5  ;;  %v2831_v17 = vld [vmem:[%s3506_s3 + $0x150] sm:$0xff]   ;;  %v2837_v22 = vld [vmem:[%s3506_s3 + $0x118] sm:$0xff]  }
  0x19   : > { %2579 = vmatprep.subr.bf16.mxu0 %v2914_v0  ;;  %2455 = vmatpush3.bf16.msra.mxu1 %v2814_v29  ;;  %v514_v57 = vpack.c.bf16 %v507_v53, %v506_v52  ;;  %v2849_v38 = vld [vmem:[%s3506_s3 + $0x130] sm:$0xff]   ;;  %v2851_v41 = vld [vmem:[%s3506_s3 + $0x178] sm:$0xff]  }
  0x1a   : > { %2456 = vmatprep.subr.bf16.mxu1 %v2816_v30  ;;  %v2843_v30 = vld [vmem:[%s3506_s3 + $0x168] sm:$0xff]   ;;  %v2410_v48 = vld [vmem:[#allocation2 + $0x3a] sm:$0xff]  ;;  %v2409_v52 = vld [vmem:[#allocation2 + $0x32] sm:$0xff] }
  0x1b   : > { %v2412_v49 = vld [vmem:[#allocation2 + $0x3b] sm:$0xff]  ;;  %v2411_v53 = vld [vmem:[#allocation2 + $0x33] sm:$0xff] }
  0x1c   : > { %2580 = vmatpush3.bf16.msra.mxu0 %v2799_v6 }
  0x1d   : > { %2581 = vmatprep.subr.bf16.mxu0 %v2914_v0  ;;  %2457 = vmatpush3.bf16.msra.mxu1 %v2817_v32 }
  0x1e   : > { %2458 = vmatprep.subr.bf16.mxu1 %v2819_v33 }
  0x20   : > { %2582 = vmatpush3.bf16.msra.mxu0 %v2800_v7  ;;  %v2270_v7 = vld [vmem:[#allocation2 + $0x18] sm:$0xff] }
  0x21   : > { %2583 = vmatprep.subr.bf16.mxu0 %v2914_v0  ;;  %2459 = vmatpush3.bf16.msra.mxu1 %v2820_v35  ;;  %v2669_v10 = vpack.i.bf16 %v2270_v7, %v2269_v4  ;;  %v2847_v35 = vld [vmem:[%s3506_s3 + $0x170] sm:$0xff]  }
  0x22   : > { %2460 = vmatprep.subr.bf16.mxu1 %v2822_v44  ;;  %v2853_v44 = vld [vmem:[%s3506_s3 + $0x138] sm:$0xff]   ;;  %v2374_v4 = vld [vmem:[#allocation2 + $0x30] sm:$0xff] }
  0x24   : > { %2584 = vmatpush3.bf16.msra.mxu0 %v2801_v8  ;;  %v2277_v8 = vld [vmem:[#allocation2 + $0x14] sm:$0xff] }
  0x25   : > { %2589 = vmatprep.subr.bf16.mxu0 %v2914_v0  ;;  %2461 = vmatpush3.bf16.msra.mxu1 %v2824_v46 }
  0x26   : > { %2462 = vmatprep.subr.bf16.mxu1 %v2826_v58 }
  0x27   : > { %2586 = vmatmul.mubr.bf16.vlgmr.msra.gmra.mrb[0].mxu0 %v372_v11 }
  0x28   : > { %2605 = vmatprep.mubr.msk.bf16.mxu0 %vm2915_vm1, %v2914_v0  ;;  %2590 = vmatpush3.bf16.msra.mxu0 %v2802_v18  ;;  %v2833_v18 = vld [vmem:[%s3506_s3 + $0x110] sm:$0xff]  }
  0x29   : > { %2591 = vmatprep.subr.bf16.mxu0 %v2914_v0  ;;  %2463 = vmatpush3.bf16.msra.mxu1 %v2828_v60 }
  0x2a   : > { %2479 = vmatprep.subr.bf16.mxu1 %v2830_v15  ;;  %v3228_v15 = vld [vmem:[#allocation2 + $0x15] sm:$0xff] }
  0x2c   : > { %2592 = vmatpush3.bf16.msra.mxu0 %v2803_v21 }
  0x2d   : > { %2593 = vmatprep.subr.bf16.mxu0 %v2914_v0 }
  0x30   : > { %2594 = vmatpush3.bf16.msra.mxu0 %v2806_v25  ;;  %v2839_v25 = vld [vmem:[%s3506_s3 + $0x160] sm:$0xff]  }
  0x31   : > { %2595 = vmatprep.subr.bf16.mxu0 %v2914_v0 }
  0x34   : > { %2596 = vmatpush3.bf16.msra.mxu0 %v2809_v28 }
  0x35   : > { %2597 = vmatprep.subr.bf16.mxu0 %v2914_v0 }
  0x38   : > { %2598 = vmatpush3.bf16.msra.mxu0 %v2812_v31 }
  0x39   : > { %2599 = vmatprep.subr.bf16.mxu0 %v2914_v0 }
  0x3c   : > { %2600 = vmatpush3.bf16.msra.mxu0 %v2815_v34 }
  0x3d   : > { %2601 = vmatprep.subr.bf16.mxu0 %v2914_v0 }
  0x40   : > { %2602 = vmatpush3.bf16.msra.mxu0 %v2818_v36 }
  0x41   : > { %2603 = vmatprep.subr.bf16.mxu0 %v2914_v0 }
  0x44   : > { %2604 = vmatpush3.bf16.msra.mxu0 %v2821_v37 }
  0x45   : > { %2501 = vmatprep.subr.bf16.mxu0 %v2823_v45 }
  0x47   : > { %2606 = vmatmul.mubr.bf16.vlgmr.msra.gmra.mrb[4].mxu0 %v514_v57 }
  0x48   : > { %2502 = vmatpush3.bf16.msra.mxu0 %v2825_v55  ;;  %v2739_v55 = vpack.i.bf16 %v2412_v49, %v2411_v53  ;;  %v2832_v49 = vld [vmem:[%s3506_s3 + $0x80] sm:$0xff]  }
  0x49   : > { %2503 = vmatprep.subr.bf16.mxu0 %v2827_v59 }
  0x4c   : > { %2504 = vmatpush3.bf16.msra.mxu0 %v2829_v62  ;;  %v2402_v62 = vld [vmem:[#allocation2 + $0x36] sm:$0xff] }
  0x4d   : > { %2505 = vmatprep.subr.bf16.mxu0 %v2831_v17 }
  0x50   : > { %2506 = vmatpush3.bf16.msra.mxu0 %v2833_v18  ;;  %v2263_v18 = vld [vmem:[#allocation2 + $0xd] sm:$0xff] }
  0x51   : > { %2507 = vmatprep.subr.bf16.mxu0 %v2835_v19 }
  0x54   : > { %2508 = vmatpush3.bf16.msra.mxu0 %v2837_v22 }
  0x55   : > { %2509 = vmatprep.subr.bf16.mxu0 %v2839_v25 }
  0x58   : > { %2510 = vmatpush3.bf16.msra.mxu0 %v2841_v27 }
  0x59   : > { %2511 = vmatprep.subr.bf16.mxu0 %v2843_v30 }
  0xfa   : > { %v471_v51 = vpop.f32.mrb[0].mxu0 }
  0xfb   : > { %486 = vst.msk [vmem:[#allocation2 + $0x20] sm:$0xff] %vm478_vm0, %v471_v51  ;;  %v2587_v54 = vpop.f32.mrb[1].mxu0 }
  0xfc   : > { %v474_v56 = vpop.f32.mrb[2].mxu0  ;;  %v2734_v54 = vpack.i.bf16 %v2410_v48, %v2409_v52 }
  0xfd   : > { %487 = vst.msk [vmem:[#allocation2 + $0x28] sm:$0xff] %vm478_vm0, %v474_v56  ;;  %v2588_v61 = vpop.f32.mrb[3].mxu0 }
 0x102   : > { %v2276_v2 = vld [vmem:[#allocation2 + $0x1b] sm:$0xff] }
 0x103   : > { %v2274_v3 = vld [vmem:[#allocation2 + $0x1a] sm:$0xff]  ;;  %v2659_v5 = vpack.i.bf16 %v2276_v2, %v2275_v63 }
 0x104   : > { %v2654_v6 = vpack.i.bf16 %v2274_v3, %v2273_v1  ;;  %v2278_v9 = vld [vmem:[#allocation2 + $0x1c] sm:$0xff]  ;;  %v2346_v28 = vld [vmem:[#allocation2 + $0x2a] sm:$0xff]  ;;  %v2382_v63 = vld [vmem:[#allocation2 + $0x34] sm:$0xff] }
 0x105   : > { %2660 = vrot.lane.b32.xlu1 %v2659_v5, %s2916_s10  ;;  %v2664_v11 = vpack.i.bf16 %v2278_v9, %v2277_v8  ;;  %v2306_v12 = vld [vmem:[#allocation2 + $0x1e] sm:$0xff]  ;;  %v2338_v33 = vld [vmem:[#allocation2 + $0x26] sm:$0xff]  ;;  %v2370_v56 = vld [vmem:[#allocation2 + $0x2e] sm:$0xff]  ;;  %v2744_v58 = vpack.i.bf16 %v2409_v52, %v2346_v28 }
 0x106   : > { %2655 = vrot.lane.b32.xlu0 %v2654_v6, %s2917_s11  ;;  %v3154_v14 = vld [vmem:[#allocation2 + $0x20] sm:$0xff]  ;;  %v2674_v20 = vpack.i.bf16 %v2306_v12, %v3046_v16  ;;  %v2709_v36 = vpack.i.bf16 %v2338_v33, %v2306_v12  ;;  %v2348_v40 = vld [vmem:[#allocation2 + $0x2b] sm:$0xff]  ;;  %v2749_v57 = vpack.i.bf16 %v2370_v56, %v2338_v33  ;;  %v2774_v1 = vpack.i.bf16 %v2402_v62, %v2370_v56  ;;  %v2406_v5 = vld [vmem:[#allocation2 + $0x38] sm:$0xff]  ;;  %v2646_v12 = vpop.permute.xlu0 %2645 }
 0x107   : > { %v2684_v21 = vpack.i.bf16 %v3154_v14, %v2270_v7  ;;  %v2308_v23 = vld [vmem:[#allocation2 + $0x1f] sm:$0xff]  ;;  %v2340_v39 = vld [vmem:[#allocation2 + $0x27] sm:$0xff]  ;;  %v2372_v59 = vld [vmem:[#allocation2 + $0x2f] sm:$0xff]  ;;  %v2754_v61 = vpack.i.bf16 %v2411_v53, %v2348_v40  ;;  %v2647_v17 = vunpack.i.l.bf16 %v2646_v12 }
 0x108   : > { %v2314_v24 = vld [vmem:[#allocation2 + $0x22] sm:$0xff]  ;;  %v2679_v16 = vpack.i.bf16 %v2308_v23, %v3043_v13  ;;  %v2719_v42 = vpack.i.bf16 %v2340_v39, %v2308_v23  ;;  %v2350_v46 = vld [vmem:[#allocation2 + $0x2c] sm:$0xff]  ;;  %v2759_v60 = vpack.i.bf16 %v2372_v59, %v2340_v39 }
 0x109   : > { %2670 = vrot.lane.b32.xlu1 %v2669_v10, %s2918_s25  ;;  %v2689_v26 = vpack.i.bf16 %v2314_v24, %v2274_v3  ;;  %v2316_v29 = vld [vmem:[#allocation2 + $0x23] sm:$0xff]  ;;  %v2704_v31 = vpack.i.bf16 %v2346_v28, %v2314_v24  ;;  %v2404_v3 = vld [vmem:[#allocation2 + $0x37] sm:$0xff] }
 0x10a   : > { %2665 = vrot.lane.b32.xlu0 %v2664_v11, %s2918_s25  ;;  %v2694_v32 = vpack.i.bf16 %v2316_v29, %v2276_v2  ;;  %v2845_v13 = vld [vmem:[%s3506_s3 + $0x128] sm:$0xff]   ;;  %v2714_v43 = vpack.i.bf16 %v2348_v40, %v2316_v29  ;;  %v2764_v2 = vpack.i.bf16 %v2382_v63, %v2350_v46  ;;  %v2414_v6 = vld [vmem:[#allocation2 + $0x3c] sm:$0xff]  ;;  %v2779_v7 = vpack.i.bf16 %v2404_v3, %v2372_v59  ;;  %v2651_v11 = vpop.permute.xlu1 %2650 }
 0x10b   : > { %v2318_v34 = vld [vmem:[#allocation2 + $0x24] sm:$0xff]  ;;  %2512 = vmatpush3.bf16.msra.mxu0 %v2845_v13  ;;  %v2784_v10 = vpack.i.bf16 %v2414_v6, %v2382_v63  ;;  %v2653_v22 = vunpack.i.h.bf16 %v2651_v11  ;;  %v2652_v25 = vunpack.i.l.bf16 %v2651_v11  ;;  %v2272_v28 = vld [vmem:[#allocation2 + $0x19] sm:$0xff]  ;;  %v612_v29 = vsel %vm478_vm0, %v2263_v18, %v2647_v17 }
 0x10c   : > { %v2699_v37 = vpack.i.bf16 %v2318_v34, %v2278_v9  ;;  %2513 = vmatprep.subr.bf16.mxu0 %v2847_v35  ;;  %v2342_v45 = vld [vmem:[#allocation2 + $0x28] sm:$0xff]  ;;  %v2724_v51 = vpack.i.bf16 %v2350_v46, %v2318_v34  ;;  %v2789_v9 = vpack.i.bf16 %v2406_v5, %v2374_v4  ;;  %v2844_v3 = vld [vmem:[%s3506_s3 + $0x98] sm:$0xff]  }
 0x10d   : > { %2675 = vrot.lane.b32.xlu1 %v2674_v20, %s2917_s11  ;;  %v2729_v50 = vpack.i.bf16 %v2342_v45, %v3154_v14  ;;  %v2769_v8 = vpack.i.bf16 %v2374_v4, %v2342_v45  ;;  %v2648_v14 = vunpack.i.h.bf16 %v2646_v12  ;;  %v615_v39 = vsel %vm614_vm4, %v612_v29, %v2652_v25  ;;  %v2836_v53 = vld [vmem:[%s3506_s3 + $0x88] sm:$0xff]  }
 0x10e   : > { %2685 = vrot.lane.b32.xlu0 %v2684_v21, %s2918_s25  ;;  %v2271_v21 = vld [vmem:[#allocation2 + $0x11] sm:$0xff]  ;;  %v2312_v63 = vld [vmem:[#allocation2 + $0x21] sm:$0xff] }
 0x10f   : > { %2514 = vmatpush3.bf16.msra.mxu0 %v2849_v38 }
 0x110   : > { %2515 = vmatprep.subr.bf16.mxu0 %v2851_v41 }
 0x111   : > { %2680 = vrot.lane.b32.xlu1 %v2679_v16, %s2916_s10  ;;  %v613_v16 = vsel %vm478_vm0, %v3228_v15, %v2648_v14 }
 0x112   : > { %2690 = vrot.lane.b32.xlu0 %v2689_v26, %s2917_s11  ;;  %v616_v40 = vsel %vm614_vm4, %v613_v16, %v2653_v22 }
 0x113   : > { %2516 = vmatpush3.bf16.msra.mxu0 %v2853_v44 }
 0x114   : > { %2545 = vmatprep.subr.bf16.mxu0 %v2855_v47 }
 0x115   : > { %2705 = vrot.lane.b32.xlu1 %v2704_v31, %s2917_s11 }
 0x116   : > { %2695 = vrot.lane.b32.xlu0 %v2694_v32, %s2916_s10 }
 0x119   : > { %2710 = vrot.lane.b32.xlu1 %v2709_v36, %s2917_s11 }
 0x11a   : > { %2700 = vrot.lane.b32.xlu0 %v2699_v37, %s2918_s25 }
 0x11d   : > { %2720 = vrot.lane.b32.xlu1 %v2719_v42, %s2916_s10 }
 0x11e   : > { %2715 = vrot.lane.b32.xlu0 %v2714_v43, %s2916_s10 }
 0x121   : > { %2730 = vrot.lane.b32.xlu1 %v2729_v50, %s2918_s25  ;;  %v2834_v50 = vld [vmem:[%s3506_s3 + $0xc8] sm:$0xff]  }
 0x122   : > { %2725 = vrot.lane.b32.xlu0 %v2724_v51, %s2918_s25 }
 0x125   : > { %2735 = vrot.lane.b32.xlu1 %v2734_v54, %s2917_s11  ;;  %v2838_v54 = vld [vmem:[%s3506_s3 + $0xd0] sm:$0xff]  }
 0x126   : > { %2740 = vrot.lane.b32.xlu0 %v2739_v55, %s2916_s10 }
 0x129   : > { %2750 = vrot.lane.b32.xlu1 %v2749_v57, %s2917_s11  ;;  %v2840_v57 = vld [vmem:[%s3506_s3 + $0x90] sm:$0xff]  }
 0x12a   : > { %2745 = vrot.lane.b32.xlu0 %v2744_v58, %s2917_s11 }
 0x12d   : > { %2760 = vrot.lane.b32.xlu1 %v2759_v60, %s2916_s10  ;;  %v2842_v60 = vld [vmem:[%s3506_s3 + $0xd8] sm:$0xff]  }
 0x12e   : > { %2755 = vrot.lane.b32.xlu0 %v2754_v61, %s2916_s10 }
 0x131   : > { %2775 = vrot.lane.b32.xlu1 %v2774_v1, %s2917_s11 }
 0x132   : > { %2765 = vrot.lane.b32.xlu0 %v2764_v2, %s2918_s25 }
 0x135   : > { %2780 = vrot.lane.b32.xlu1 %v2779_v7, %s2916_s10 }
 0x136   : > { %2770 = vrot.lane.b32.xlu0 %v2769_v8, %s2918_s25  ;;  %v2846_v8 = vld [vmem:[%s3506_s3 + $0xe0] sm:$0xff]  }
 0x139   : > { %2790 = vrot.lane.b32.xlu1 %v2789_v9, %s2918_s25 }
 0x13a   : > { %2785 = vrot.lane.b32.xlu0 %v2784_v10, %s2918_s25 }
 0x177   : > { %v2661_v19 = vpop.permute.xlu1 %2660 }
 0x178   : > { %v2656_v20 = vpop.permute.xlu0 %2655  ;;  %v2663_v26 = vunpack.i.h.bf16 %v2661_v19  ;;  %v2662_v27 = vunpack.i.l.bf16 %v2661_v19 }
 0x179   : > { %v2658_v23 = vunpack.i.h.bf16 %v2656_v20  ;;  %v2657_v24 = vunpack.i.l.bf16 %v2656_v20 }
 0x17b   : > { %v620_v30 = vsel %vm478_vm0, %v2271_v21, %v2657_v24  ;;  %v621_v31 = vsel %vm478_vm0, %v2272_v28, %v2658_v23  ;;  %v2671_v32 = vpop.permute.xlu1 %2670  ;;  %v2848_v23 = vld [vmem:[%s3506_s3 + $0xa0] sm:$0xff]   ;;  %v2850_v24 = vld [vmem:[%s3506_s3 + $0xe8] sm:$0xff]  }
 0x17c   : > { %v2666_v13 = vpop.permute.xlu0 %2665  ;;  %v2673_v33 = vunpack.i.h.bf16 %v2671_v32  ;;  %v2672_v34 = vunpack.i.l.bf16 %v2671_v32  ;;  %v622_v37 = vsel %vm614_vm4, %v620_v30, %v2662_v27  ;;  %v623_v38 = vsel %vm614_vm4, %v621_v31, %v2663_v26 }
 0x17d   : > { %v2668_v35 = vunpack.i.h.bf16 %v2666_v13  ;;  %v2667_v36 = vunpack.i.l.bf16 %v2666_v13  ;;  %v3289_v13 = vld [vmem:[#allocation2 + $0x29] sm:$0xff] }
 0x17e   : > { %v618_v43 = vsel %vm617_vm5, %v615_v39, %v2672_v34  ;;  %v619_v44 = vsel %vm617_vm5, %v616_v40, %v2673_v33  ;;  %v3291_v33 = vld [vmem:[#allocation2 + $0x25] sm:$0xff] }
 0x17f   : > { %v624_v41 = vsel %vm617_vm5, %v622_v37, %v2667_v36  ;;  %v625_v42 = vsel %vm617_vm5, %v623_v38, %v2668_v35  ;;  %v3243_v45 = vpop.permute.xlu1 %2675  ;;  %v626_v48 = vpack.c.bf16 %v619_v44, %v618_v43  ;;  %v2852_v40 = vld [vmem:[%s3506_s3 + $0xa8] sm:$0xff]  }
 0x180   : > { %v3245_v46 = vpop.permute.xlu0 %2685  ;;  %v627_v47 = vpack.c.bf16 %v625_v42, %v624_v41  ;;  %v2678_v29 = vunpack.i.h.bf16 %v3243_v45  ;;  %v2677_v30 = vunpack.i.l.bf16 %v3243_v45  ;;  %v2854_v45 = vld [vmem:[%s3506_s3 + $0xf0] sm:$0xff]  }
 0x182   : > { %788 = vmatprep.mubr.bf16.mxu1 %v627_v47 }
 0x183   : > { %789 = vmatmul.mubr.bf16.vlgmr.msra.gmra.mrb[0].mxu1 %v626_v48  ;;  %v3253_v51 = vpop.permute.xlu1 %2680 }
 0x184   : > { %2480 = vmatpush3.bf16.msra.mxu1 %v2832_v49  ;;  %v2691_v52 = vpop.permute.xlu0 %2690  ;;  %v2683_v31 = vunpack.i.h.bf16 %v3253_v51  ;;  %v2682_v32 = vunpack.i.l.bf16 %v3253_v51 }
 0x185   : > { %2481 = vmatprep.subr.bf16.mxu1 %v2834_v50  ;;  %v2693_v58 = vunpack.i.h.bf16 %v2691_v52  ;;  %v2692_v59 = vunpack.i.l.bf16 %v2691_v52 }
 0x187   : > { %v2706_v55 = vpop.permute.xlu1 %2705  ;;  %v972_v4 = vsel %vm478_vm0, %v2272_v28, %v2692_v59  ;;  %v973_v5 = vsel %vm478_vm0, %v2312_v63, %v2693_v58  ;;  %v2304_v28 = vld [vmem:[#allocation2 + $0x1d] sm:$0xff]  ;;  %v2856_v59 = vld [vmem:[%s3506_s3 + $0xb0] sm:$0xff]  }
 0x188   : > { %2482 = vmatpush3.bf16.msra.mxu1 %v2836_v53  ;;  %v2696_v56 = vpop.permute.xlu0 %2695  ;;  %v2708_v11 = vunpack.i.h.bf16 %v2706_v55  ;;  %v2707_v17 = vunpack.i.l.bf16 %v2706_v55 }
 0x189   : > { %2483 = vmatprep.subr.bf16.mxu1 %v2838_v54  ;;  %v2698_v61 = vunpack.i.h.bf16 %v2696_v56  ;;  %v2697_v62 = vunpack.i.l.bf16 %v2696_v56 }
 0x18a   : > { %v1237_v34 = vsel %vm478_vm0, %v2312_v63, %v2707_v17  ;;  %v1238_v35 = vsel %vm478_vm0, %v3289_v13, %v2708_v11  ;;  %v967_v63 = vsel %vm478_vm0, %v2304_v28, %v2678_v29  ;;  %v2864_v17 = vld [vmem:[%s3506_s3 + $0x180] sm:$0xff]   ;;  %v2869_v29 = vld [vmem:[%s3506_s3 + $0x218] sm:$0xff]  }
 0x18b   : > { %v2711_v1 = vpop.permute.xlu1 %2710  ;;  %v974_v9 = vsel %vm614_vm4, %v972_v4, %v2697_v62  ;;  %v975_v10 = vsel %vm614_vm4, %v973_v5, %v2698_v61  ;;  %v2858_v61 = vld [vmem:[%s3506_s3 + $0xf8] sm:$0xff]   ;;  %v2859_v62 = vld [vmem:[%s3506_s3 + $0x248] sm:$0xff]   ;;  %v2688_v4 = vunpack.i.h.bf16 %v3245_v46  ;;  %v2687_v5 = vunpack.i.l.bf16 %v3245_v46  ;;  %v2863_v46 = vld [vmem:[%s3506_s3 + $0x250] sm:$0xff]  }
 0x18c   : > { %2484 = vmatpush3.bf16.msra.mxu1 %v2840_v57  ;;  %v2701_v2 = vpop.permute.xlu0 %2700  ;;  %v2713_v18 = vunpack.i.h.bf16 %v2711_v1  ;;  %v2712_v19 = vunpack.i.l.bf16 %v2711_v1  ;;  %v966_v1 = vsel %vm478_vm0, %v3228_v15, %v2677_v30  ;;  %v2861_v15 = vld [vmem:[%s3506_s3 + $0x208] sm:$0xff]  }
 0x18d   : > { %v2703_v6 = vunpack.i.h.bf16 %v2701_v2  ;;  %v2702_v7 = vunpack.i.l.bf16 %v2701_v2  ;;  %2485 = vmatprep.subr.bf16.mxu1 %v2842_v60  ;;  %v2857_v60 = vld [vmem:[%s3506_s3 + $0x200] sm:$0xff]   ;;  %v968_v2 = vsel %vm614_vm4, %v966_v1, %v2682_v32 }
 0x18e   : > { %v1231_v36 = vsel %vm478_vm0, %v2304_v28, %v2712_v19  ;;  %v1232_v37 = vsel %vm478_vm0, %v3291_v33, %v2713_v18  ;;  %v2865_v18 = vld [vmem:[%s3506_s3 + $0x210] sm:$0xff]   ;;  %v2868_v28 = vld [vmem:[%s3506_s3 + $0x188] sm:$0xff]  }
 0x18f   : > { %v976_v12 = vsel %vm617_vm5, %v974_v9, %v2702_v7  ;;  %v977_v14 = vsel %vm617_vm5, %v975_v10, %v2703_v6  ;;  %v2721_v20 = vpop.permute.xlu1 %2720  ;;  %v2862_v9 = vld [vmem:[%s3506_s3 + $0x1c0] sm:$0xff]   ;;  %v970_v10 = vsel %vm617_vm5, %v968_v2, %v2687_v5 }
 0x190   : > { %2486 = vmatpush3.bf16.msra.mxu1 %v2844_v3  ;;  %v2716_v21 = vpop.permute.xlu0 %2715  ;;  %v979_v22 = vpack.c.bf16 %v977_v14, %v976_v12  ;;  %v2723_v25 = vunpack.i.h.bf16 %v2721_v20  ;;  %v2722_v16 = vunpack.i.l.bf16 %v2721_v20  ;;  %v969_v3 = vsel %vm614_vm4, %v967_v63, %v2683_v31 }
 0x191   : > { %2487 = vmatprep.subr.bf16.mxu1 %v2846_v8  ;;  %v2718_v26 = vunpack.i.h.bf16 %v2716_v21  ;;  %v2717_v27 = vunpack.i.l.bf16 %v2716_v21  ;;  %v2860_v8 = vld [vmem:[%s3506_s3 + $0xb8] sm:$0xff]   ;;  %v971_v11 = vsel %vm617_vm5, %v969_v3, %v2688_v4 }
 0x192   : > { %1140 = vmatprep.mubr.bf16.mxu1 %v979_v22  ;;  %v1233_v47 = vsel %vm614_vm4, %v1231_v36, %v2722_v16  ;;  %v1234_v48 = vsel %vm614_vm4, %v1232_v37, %v2723_v25  ;;  %v978_v21 = vpack.c.bf16 %v971_v11, %v970_v10  ;;  %v2866_v22 = vld [vmem:[%s3506_s3 + $0x1c8] sm:$0xff]   ;;  %v2871_v36 = vld [vmem:[%s3506_s3 + $0x260] sm:$0xff]  }
 0x193   : > { %v2731_v38 = vpop.permute.xlu1 %2730  ;;  %v1240_v49 = vsel %vm614_vm4, %v1238_v35, %v2718_v26  ;;  %v1239_v50 = vsel %vm614_vm4, %v1237_v34, %v2717_v27  ;;  %v2870_v35 = vld [vmem:[%s3506_s3 + $0x1d0] sm:$0xff]   ;;  %v2882_v11 = vld [vmem:[%s3506_s3 + $0x1e8] sm:$0xff]  }
 0x194   : > { %2488 = vmatpush3.bf16.msra.mxu1 %v2848_v23  ;;  %v2726_v39 = vpop.permute.xlu0 %2725  ;;  %v2733_v41 = vunpack.i.h.bf16 %v2731_v38  ;;  %v2732_v42 = vunpack.i.l.bf16 %v2731_v38  ;;  %v2867_v23 = vld [vmem:[%s3506_s3 + $0x258] sm:$0xff]  }
 0x195   : > { %v2728_v43 = vunpack.i.h.bf16 %v2726_v39  ;;  %v2727_v44 = vunpack.i.l.bf16 %v2726_v39  ;;  %2489 = vmatprep.subr.bf16.mxu1 %v2850_v24  ;;  %v2407_v24 = vld [vmem:[#allocation2 + $0x31] sm:$0xff] }
 0x196   : > { %v1235_v51 = vsel %vm617_vm5, %v1233_v47, %v2732_v42  ;;  %v1236_v52 = vsel %vm617_vm5, %v1234_v48, %v2733_v41  ;;  %v2408_v42 = vld [vmem:[#allocation2 + $0x39] sm:$0xff] }
 0x197   : > { %v1241_v53 = vsel %vm617_vm5, %v1239_v50, %v2727_v44  ;;  %v1242_v54 = vsel %vm617_vm5, %v1240_v49, %v2728_v43  ;;  %v1243_v55 = vpack.c.bf16 %v1236_v52, %v1235_v51  ;;  %v3313_v56 = vpop.permute.xlu1 %2735  ;;  %v2873_v47 = vld [vmem:[%s3506_s3 + $0x220] sm:$0xff]   ;;  %v2874_v49 = vld [vmem:[%s3506_s3 + $0x1d8] sm:$0xff]   ;;  %v2875_v50 = vld [vmem:[%s3506_s3 + $0x268] sm:$0xff]  }
 0x198   : > { %2490 = vmatpush3.bf16.msra.mxu1 %v2852_v40  ;;  %v3315_v57 = vpop.permute.xlu0 %2740  ;;  %v1244_v58 = vpack.c.bf16 %v1242_v54, %v1241_v53  ;;  %v2738_v39 = vunpack.i.h.bf16 %v3313_v56 }
 0x199   : > { %2491 = vmatprep.subr.bf16.mxu1 %v2854_v45  ;;  %v2872_v45 = vld [vmem:[%s3506_s3 + $0x190] sm:$0xff]   ;;  %v2743_v51 = vunpack.i.h.bf16 %v3315_v57  ;;  %v2742_v52 = vunpack.i.l.bf16 %v3315_v57  ;;  %v2878_v57 = vld [vmem:[%s3506_s3 + $0x1e0] sm:$0xff]  }
 0x19a   : > { %1405 = vmatprep.mubr.bf16.mxu0 %v1244_v58  ;;  %v1768_v53 = vsel %vm478_vm0, %v2408_v42, %v2738_v39  ;;  %v2877_v58 = vld [vmem:[%s3506_s3 + $0x228] sm:$0xff]   ;;  %v1960_v42 = vld [vmem:[%s3509_s6] sm:$0x3] }
 0x19b   : > { %1406 = vmatmul.mubr.bf16.vlgmr.msra.gmra.mrb[8].mxu0 %v1243_v55  ;;  %v3336_v6 = vpop.permute.xlu1 %2750 }
 0x19c   : > { %2492 = vmatpush3.bf16.msra.mxu1 %v2856_v59  ;;  %2546 = vmatpush3.bf16.msra.mxu0 %v2857_v60  ;;  %v2746_v7 = vpop.permute.xlu0 %2745 }
 0x19d   : > { %2493 = vmatprep.subr.bf16.mxu1 %v2858_v61  ;;  %2547 = vmatprep.subr.bf16.mxu0 %v2859_v62  ;;  %v2748_v19 = vunpack.i.h.bf16 %v2746_v7  ;;  %v2747_v20 = vunpack.i.l.bf16 %v2746_v7  ;;  %v2879_v61 = vld [vmem:[%s3506_s3 + $0x270] sm:$0xff]   ;;  %v1770_v62 = vsel %vm614_vm4, %v1768_v53, %v2743_v51 }
 0x19f   : > { %v3352_v12 = vpop.permute.xlu1 %2760  ;;  %v1503_v30 = vsel %vm478_vm0, %v2407_v24, %v2748_v19  ;;  %v1502_v31 = vsel %vm478_vm0, %v3289_v13, %v2747_v20  ;;  %v2737_v13 = vunpack.i.l.bf16 %v3313_v56  ;;  %v2876_v56 = vld [vmem:[%s3506_s3 + $0x198] sm:$0xff]   ;;  %v2368_v19 = vld [vmem:[#allocation2 + $0x2d] sm:$0xff] }
 0x1a0   : > { %2494 = vmatpush3.bf16.msra.mxu1 %v2860_v8  ;;  %2548 = vmatpush3.bf16.msra.mxu0 %v2861_v15  ;;  %v2756_v14 = vpop.permute.xlu0 %2755  ;;  %v2880_v8 = vld [vmem:[%s3506_s3 + $0x1a0] sm:$0xff]   ;;  %v2881_v15 = vld [vmem:[%s3506_s3 + $0x230] sm:$0xff]  }
 0x1a1   : > { %2523 = vmatprep.subr.bf16.mxu1 %v2862_v9  ;;  %2549 = vmatprep.subr.bf16.mxu0 %v2863_v46  ;;  %v2758_v25 = vunpack.i.h.bf16 %v2756_v14  ;;  %v2757_v16 = vunpack.i.l.bf16 %v2756_v14  ;;  %v1767_v54 = vsel %vm478_vm0, %v2407_v24, %v2737_v13  ;;  %v2400_v9 = vld [vmem:[#allocation2 + $0x35] sm:$0xff] }
 0x1a2   : > { %v1769_v63 = vsel %vm614_vm4, %v1767_v54, %v2742_v52  ;;  %v2883_v14 = vld [vmem:[%s3506_s3 + $0x278] sm:$0xff]  }
 0x1a3   : > { %1141 = vmatmul.mubr.bf16.vlgmr.msra.gmra.mrb[4].mxu1 %v978_v21  ;;  %v3366_v26 = vpop.permute.xlu1 %2775  ;;  %v1504_v37 = vsel %vm614_vm4, %v1502_v31, %v2757_v16  ;;  %v1505_v38 = vsel %vm614_vm4, %v1503_v30, %v2758_v25  ;;  %v2886_v16 = vld [vmem:[%s3506_s3 + $0x1f0] sm:$0xff]   ;;  %v2763_v31 = vunpack.i.h.bf16 %v3352_v12 }
 0x1a4   : > { %2524 = vmatpush3.bf16.msra.mxu1 %v2864_v17  ;;  %2550 = vmatpush3.bf16.msra.mxu0 %v2865_v18  ;;  %v2766_v27 = vpop.permute.xlu0 %2765  ;;  %v2778_v4 = vunpack.i.h.bf16 %v3366_v26  ;;  %v2777_v5 = vunpack.i.l.bf16 %v3366_v26  ;;  %v2887_v30 = vld [vmem:[%s3506_s3 + $0x1b0] sm:$0xff]  }
 0x1a5   : > { %v2768_v32 = vunpack.i.h.bf16 %v2766_v27  ;;  %v2767_v34 = vunpack.i.l.bf16 %v2766_v27  ;;  %2525 = vmatprep.subr.bf16.mxu1 %v2866_v22  ;;  %2551 = vmatprep.subr.bf16.mxu0 %v2867_v23  ;;  %v2884_v22 = vld [vmem:[%s3506_s3 + $0x1a8] sm:$0xff]   ;;  %v2885_v23 = vld [vmem:[%s3506_s3 + $0x238] sm:$0xff]  }
 0x1a6   : > { %v1762_v20 = vsel %vm478_vm0, %v2400_v9, %v2778_v4  ;;  %v1761_v21 = vsel %vm478_vm0, %v2368_v19, %v2777_v5 }
 0x1a7   : > { %v1506_v40 = vsel %vm617_vm5, %v1504_v37, %v2767_v34  ;;  %v1507_v41 = vsel %vm617_vm5, %v1505_v38, %v2768_v32  ;;  %v2781_v48 = vpop.permute.xlu1 %2780  ;;  %v2762_v32 = vunpack.i.l.bf16 %v3352_v12  ;;  %v2889_v12 = vld [vmem:[%s3506_s3 + $0x1b8] sm:$0xff]  }
 0x1a8   : > { %2526 = vmatpush3.bf16.msra.mxu1 %v2868_v28  ;;  %2552 = vmatpush3.bf16.msra.mxu0 %v2869_v29  ;;  %v3389_v43 = vpop.permute.xlu0 %2770  ;;  %v1509_v44 = vpack.c.bf16 %v1507_v41, %v1506_v40  ;;  %v2783_v46 = vunpack.i.h.bf16 %v2781_v48  ;;  %v2782_v10 = vunpack.i.l.bf16 %v2781_v48  ;;  %v2753_v28 = vunpack.i.h.bf16 %v3336_v6  ;;  %v879_v48 = vpop.f32.mrb[4].mxu0 }
 0x1a9   : > { %2527 = vmatprep.subr.bf16.mxu1 %v2870_v35  ;;  %2553 = vmatprep.subr.bf16.mxu0 %v2871_v36  ;;  %v2752_v29 = vunpack.i.l.bf16 %v3336_v6  ;;  %v2888_v35 = vld [vmem:[%s3506_s3 + $0x1f8] sm:$0xff]   ;;  %v2773_v36 = vunpack.i.h.bf16 %v3389_v43  ;;  %v2772_v6 = vunpack.i.l.bf16 %v3389_v43  ;;  %v1974_v43 = vsel %vm1972_vm6, %v1960_v42, 0 }
 0x1aa   : > { %1670 = vmatprep.mubr.bf16.mxu1 %v1509_v44  ;;  %v1763_v24 = vsel %vm614_vm4, %v1761_v21, %v2782_v10  ;;  %v1764_v25 = vsel %vm614_vm4, %v1762_v20, %v2783_v46  ;;  %v1497_v37 = vsel %vm478_vm0, %v2368_v19, %v2753_v28  ;;  %v1957_v44 = vld [vmem:[%s353_s22] sm:$0xff] }
 0x1ab   : > { %v2791_v1 = vpop.permute.xlu1 %2790  ;;  %v1496_v38 = vsel %vm478_vm0, %v3291_v33, %v2752_v29  ;;  %v1499_v13 = vsel %vm614_vm4, %v1497_v37, %v2763_v31 }
 0x1ac   : > { %2528 = vmatpush3.bf16.msra.mxu1 %v2872_v45  ;;  %2554 = vmatpush3.bf16.msra.mxu0 %v2873_v47  ;;  %v2786_v55 = vpop.permute.xlu0 %2785  ;;  %v2793_v17 = vunpack.i.h.bf16 %v2791_v1  ;;  %v2792_v18 = vunpack.i.l.bf16 %v2791_v1  ;;  %v1498_v39 = vsel %vm614_vm4, %v1496_v38, %v2762_v32  ;;  %v1501_v40 = vsel %vm617_vm5, %v1499_v13, %v2773_v36  ;;  %v1958_v45 = vld [vmem:[%s353_s22 + $0x8] sm:$0xff] }
 0x1ad   : > { %v2788_v59 = vunpack.i.h.bf16 %v2786_v55  ;;  %v2787_v60 = vunpack.i.l.bf16 %v2786_v55  ;;  %2529 = vmatprep.subr.bf16.mxu1 %v2874_v49  ;;  %2555 = vmatprep.subr.bf16.mxu0 %v2875_v50  ;;  %v1500_v41 = vsel %vm617_vm5, %v1498_v39, %v2772_v6  ;;  %v1959_v47 = vpack.c.bf16 %v1958_v45, %v1957_v44  ;;  %v2607_v49 = vpop.f32.mrb[5].mxu0 }
 0x1ae   : > { %v1765_v26 = vsel %vm617_vm5, %v1763_v24, %v2792_v18  ;;  %v1766_v27 = vsel %vm617_vm5, %v1764_v25, %v2793_v17  ;;  %v1508_v33 = vpack.c.bf16 %v1501_v40, %v1500_v41  ;;  %v882_v50 = vpop.f32.mrb[6].mxu0 }
 0x1af   : > { %v1771_v2 = vsel %vm617_vm5, %v1769_v63, %v2787_v60  ;;  %v1772_v3 = vsel %vm617_vm5, %v1770_v62, %v2788_v59  ;;  %v1773_v34 = vpack.c.bf16 %v1766_v27, %v1765_v26  ;;  %v2608_v51 = vpop.f32.mrb[7].mxu0  ;;  %v2431_v27 = vld [vmem:[%s3508_s5] ss:$0 sm:$0xff] }
 0x1b0   : > { %2530 = vmatpush3.bf16.msra.mxu1 %v2876_v56  ;;  %2556 = vmatpush3.bf16.msra.mxu0 %v2877_v58  ;;  %v1774_v7 = vpack.c.bf16 %v1772_v3, %v1771_v2 }
 0x1b1   : > { %2531 = vmatprep.subr.bf16.mxu1 %v2878_v57  ;;  %2557 = vmatprep.subr.bf16.mxu0 %v2879_v61 }
 0x1b2   : > { %1935 = vmatprep.mubr.bf16.mxu0 %v1774_v7 }
 0x1b4   : > { %2532 = vmatpush3.bf16.msra.mxu1 %v2880_v8  ;;  %2558 = vmatpush3.bf16.msra.mxu0 %v2881_v15 }
 0x1b5   : > { %2533 = vmatprep.subr.bf16.mxu1 %v2882_v11  ;;  %2559 = vmatprep.subr.bf16.mxu0 %v2883_v14 }
 0x1b8   : > { %2534 = vmatpush3.bf16.msra.mxu1 %v2884_v22  ;;  %2560 = vmatpush3.bf16.msra.mxu0 %v2885_v23 }
 0x1b9   : > { %2535 = vmatprep.subr.bf16.mxu1 %v2886_v16 }
 0x1bb   : > { %1936 = vmatmul.mubr.bf16.vlgmr.msra.gmra.mrb[12].mxu0 %v1773_v34 }
 0x1bc   : > { %2536 = vmatpush3.bf16.msra.mxu1 %v2887_v30  ;;  %v2432_v30 = vld [vmem:[%s3510_s7] ss:$0 sm:$0xff] }
 0x1bd   : > { %2537 = vmatprep.subr.bf16.mxu1 %v2888_v35 }
 0x1c0   : > { %2538 = vmatpush3.bf16.msra.mxu1 %v2889_v12 }
 0x1c1   : > { %2609 = vmatprep.subr.bf16.mxu1 %v2914_v0 }
 0x1c3   : > { %1671 = vmatmul.mubr.bf16.vlgmr.msra.gmra.mrb[8].mxu1 %v1508_v33 }
 0x1c4   : > { %2610 = vmatpush3.bf16.msra.mxu1 %v1974_v43  ;;  %2611 = vmatprep.mubr.msk.bf16.mxu1 %vm2915_vm1, %v2914_v0 }
 0x1cb   : > { %2612 = vmatmul.mubr.msk.bf16.vlgmr.msra.gmra.mrb[12].mxu1 %vm1968_vm7, %v1959_v47 }
 0x256   : > { %v2464_v52 = vpop.f32.mrb[0].mxu1 }
 0x257   : > { %v2465_v53 = vpop.f32.mrb[1].mxu1 }
 0x258   : > { %v2466_v54 = vadd.f32 %v2465_v53, %v2464_v52  ;;  %v2467_v55 = vpop.f32.mrb[2].mxu1 }
 0x259   : > { %v2468_v56 = vpop.f32.mrb[3].mxu1 }
 0x25a   : > { %v880_v58 = vadd.f32 %v2466_v54, %v879_v48  ;;  %v2469_v59 = vadd.f32 %v2468_v56, %v2467_v55 }
 0x25c   : > { %v883_v60 = vadd.f32 %v2469_v59, %v882_v50 }
 0x26e   : > { %v2517_v57 = vpop.f32.mrb[8].mxu0 }
 0x26f   : > { %v2518_v61 = vpop.f32.mrb[9].mxu0 }
 0x270   : > { %v2519_v0 = vadd.f32 %v2518_v61, %v2517_v57  ;;  %v2520_v62 = vpop.f32.mrb[10].mxu0 }
 0x271   : > { %v2521_v63 = vpop.f32.mrb[11].mxu0 }
 0x272   : > { %v2522_v1 = vadd.f32 %v2521_v63, %v2520_v62 }
 0x276   : > { %v2495_v2 = vpop.f32.mrb[4].mxu1 }
 0x277   : > { %v2496_v3 = vpop.f32.mrb[5].mxu1 }
 0x278   : > { %v2497_v4 = vadd.f32 %v2496_v3, %v2495_v2  ;;  %v2498_v5 = vpop.f32.mrb[6].mxu1 }
 0x279   : > { %v2499_v7 = vpop.f32.mrb[7].mxu1 }
 0x27a   : > { %v1149_v8 = vadd.f32 %v2497_v4, %v880_v58  ;;  %v2500_v15 = vadd.f32 %v2499_v7, %v2498_v5 }
 0x27c   : > { %v1150_v9 = vadd.f32 %v2500_v15, %v883_v60  ;;  %v1414_v46 = vadd.f32 %v2519_v0, %v1149_v8 }
 0x27e   : > { %v1415_v10 = vadd.f32 %v2522_v1, %v1150_v9 }
 0x28e   : > { %v2561_v11 = vpop.f32.mrb[12].mxu0 }
 0x28f   : > { %v2562_v14 = vpop.f32.mrb[13].mxu0 }
 0x290   : > { %v2563_v17 = vadd.f32 %v2562_v14, %v2561_v11  ;;  %v2564_v18 = vpop.f32.mrb[14].mxu0 }
 0x291   : > { %v2565_v19 = vpop.f32.mrb[15].mxu0 }
 0x292   : > { %v2566_v20 = vadd.f32 %v2565_v19, %v2564_v18 }
 0x296   : > { %v2539_v21 = vpop.f32.mrb[8].mxu1 }
 0x297   : > { %v2540_v22 = vpop.f32.mrb[9].mxu1 }
 0x298   : > { %v2541_v23 = vadd.f32 %v2540_v22, %v2539_v21  ;;  %v2542_v24 = vpop.f32.mrb[10].mxu1 }
 0x299   : > { %v2543_v25 = vpop.f32.mrb[11].mxu1 }
 0x29a   : > { %v1679_v16 = vadd.f32 %v2541_v23, %v1414_v46  ;;  %v2544_v26 = vadd.f32 %v2543_v25, %v2542_v24 }
 0x29c   : > { %v1944_v28 = vadd.f32 %v2563_v17, %v1679_v16  ;;  %v1680_v29 = vadd.f32 %v2544_v26, %v1415_v10 }
 0x29e   : > { %v1945_v31 = vadd.f32 %v2566_v20, %v1680_v29  ;;  %v1953_v32 = vadd.f32 %v2431_v27, %v1944_v28  ;;  %v2010_v34 = vpop.f32.mrb[12].mxu1 }
 0x29f   : > { %v2011_v35 = vadd.f32 %v2432_v30, %v2010_v34  ;;  %v2613_v36 = vpop.f32.mrb[13].mxu1 }
 0x2a0   : > { %v1955_v6 = vmax.f32 %v1953_v32, 0.0  ;;  %v1954_v37 = vadd.f32 %v2431_v27, %v1945_v31  ;;  %v2013_v38 = vpop.f32.mrb[14].mxu1 }
 0x2a1   : > { %v2014_v12 = vadd.f32 %v2432_v30, %v2013_v38  ;;  %v2614_v39 = vpop.f32.mrb[15].mxu1 }
 0x2a2   : > { %v2017_v13 = vadd.f32 %v2011_v35, %v1955_v6  ;;  %v1956_v40 = vmax.f32 %v1954_v37, 0.0 }
 0x2a4   : > { %v2019_v41 = vmax.f32 %v2017_v13, 0.0  ;;  %v2018_v42 = vadd.f32 %v2014_v12, %v1956_v40 }
 0x2a6   : > { %2021 = vst [vmem:[%s363_s13] sm:$0xff] %v2019_v41  ;;  %v2020_v33 = vmax.f32 %v2018_v42, 0.0 }
 0x2a8   : > { %2022 = vst [vmem:[%s363_s13 + $0x8] sm:$0xff] %v2020_v33 }
 0x2a9 PF: > { %s18_s29 = sadd.s32 1, %s2912_s29   ;;  %s3512_s27 = smov %s2908_s28 }
 0x2aa   : > { %p15_p5 = scmp.ge.s32.totalorder %s18_s29, 4   ;;  %s3513_s28 = smov %s3515_s30 }
 0x2ac   :  { %17 = sbr.rel (!%p15_p5) target bundleno = 2 (0x2), region = 130 }

// kernel: _lambda_.13
= control target key start
LH: loop header
LB: loop body
LE: loop exit
PB: predicated region body
PF: predicated region fallthrough
CT: control target
= control target key end

     0   :  { %v270_v3 = vmov 0.0|0.0   ;;  %vm271_vm0 = vmmov 0   ;;  %v272_v6 = vmov 0.0   ;;  %s372_s0 = inlined_call_operand.vmem [shape: f32[2,16,128], index: 0, kind: input, shape index: {}]   ;;  %s373_s1 = inlined_call_operand.vmem [shape: f32[128,6], index: 1, kind: input, shape index: {}]   ;;  %s374_s2 = inlined_call_operand.vmem [shape: f32[1,6], index: 2, kind: input, shape index: {}]   ;;  %s375_s3 = inlined_call_operand.hbm [shape: f32[2,6], index: 3, kind: output, shape index: {}]  }
   0x1   :  { %v36_v0 = vld [vmem:[%s373_s1] sm:$0xff]  ;;  %v37_v1 = vld [vmem:[%s373_s1 + $0x8] sm:$0xff]  ;;  %v38_v2 = vld [vmem:[%s373_s1 + $0x10] sm:$0xff]  ;;  %214 = vmatprep.subr.bf16.mxu0 %v270_v3  ;;  %211 = vmatprep.mubr.msk.f32.mxu0 %vm271_vm0, %v272_v6 }
   0x2   :  { %v215_v4 = vpack.c.bf16 %v37_v1, %v36_v0  ;;  %v39_v5 = vld [vmem:[%s373_s1 + $0x18] sm:$0xff]  ;;  %v40_v8 = vld [vmem:[%s373_s1 + $0x20] sm:$0xff]  ;;  %v41_v9 = vld [vmem:[%s373_s1 + $0x28] sm:$0xff] }
   0x3   :  { %v218_v7 = vpack.c.bf16 %v39_v5, %v38_v2  ;;  %v15_v10 = vld [vmem:[%s372_s0] sm:$0xff]  ;;  %v16_v11 = vld [vmem:[%s372_s0 + $0x8] sm:$0xff]  ;;  %v17_v12 = vld [vmem:[%s372_s0 + $0x10] sm:$0xff]  ;;  %v221_v15 = vpack.c.bf16 %v41_v9, %v40_v8 }
   0x4   :  { %216 = vmatpush3.bf16.msra.mxu0 %v215_v4  ;;  %v18_v13 = vld [vmem:[%s372_s0 + $0x18] sm:$0xff]  ;;  %v19_v14 = vadd.f32 %v16_v11, %v15_v10 }
   0x5   :  { %217 = vmatprep.subr.bf16.mxu0 %v270_v3  ;;  %v26_v16 = vadd.f32 %v18_v13, %v17_v12 }
   0x8   :  { %219 = vmatpush3.bf16.msra.mxu0 %v218_v7 }
   0x9   :  { %8 = vsyncpa [#allocation3], 0  ;;  %220 = vmatprep.subr.bf16.mxu0 %v270_v3  ;;  %v42_v17 = vld [vmem:[%s373_s1 + $0x30] sm:$0xff]  ;;  %v43_v18 = vld [vmem:[%s373_s1 + $0x38] sm:$0xff]  ;;  %v20_v19 = vrot.slane %v19_v14, 4  ;;  %v27_v20 = vrot.slane %v26_v16, 4 }
   0xa   :  { %v224_v22 = vpack.c.bf16 %v43_v18, %v42_v17  ;;  %v44_v24 = vld [vmem:[%s373_s1 + $0x40] sm:$0xff]  ;;  %v45_v25 = vld [vmem:[%s373_s1 + $0x48] sm:$0xff]  ;;  %v46_v31 = vld [vmem:[%s373_s1 + $0x50] sm:$0xff]  ;;  %vm61_vm1 = vcmask 1041409   ;;  %vm134_vm2 = vcmask 41984  }
   0xb   :  { %v21_v21 = vadd.f32 %v20_v19, %v19_v14  ;;  %v28_v23 = vadd.f32 %v27_v20, %v26_v16  ;;  %v227_v28 = vpack.c.bf16 %v45_v25, %v44_v24  ;;  %v47_v32 = vld [vmem:[%s373_s1 + $0x58] sm:$0xff]  ;;  %v48_v36 = vld [vmem:[%s373_s1 + $0x60] sm:$0xff]  ;;  %v49_v37 = vld [vmem:[%s373_s1 + $0x68] sm:$0xff] }
   0xc   :  { %222 = vmatpush3.bf16.msra.mxu0 %v221_v15  ;;  %v230_v33 = vpack.c.bf16 %v47_v32, %v46_v31  ;;  %v233_v38 = vpack.c.bf16 %v49_v37, %v48_v36  ;;  %v50_v41 = vld [vmem:[%s373_s1 + $0x70] sm:$0xff]  ;;  %v51_v42 = vld [vmem:[%s373_s1 + $0x78] sm:$0xff]  ;;  %v161_v47 = vld [vmem:[%s374_s2] ss:$0 sm:$0xff]  ;;  %s273_s1 = smov [#allocation2]  }
   0xd   :  { %223 = vmatprep.subr.bf16.mxu0 %v270_v3  ;;  %v22_v26 = vrot.slane %v21_v21, 2  ;;  %v29_v27 = vrot.slane %v28_v23, 2  ;;  %v236_v43 = vpack.c.bf16 %v51_v42, %v50_v41  ;;  %s153_s26 = sshll.u32 %s273_s1, 4  ;;  %s154_s26 = int_to_ptr.vmem [resolvable:$true] %s153_s26 }
   0xe   :  { %s246_s2 = scalar_lea.vmem %s154_s26, 32  ;;  %p251_p1 = scmp.lt.s32.totalorder %s154_s26, %s154_s26 }
   0xf   :  { %v23_v29 = vadd.f32 %v22_v26, %v21_v21  ;;  %v30_v30 = vadd.f32 %v29_v27, %v28_v23  ;;  %p247_p0 = scmp.ne.s32.totalorder %s154_s26, %s246_s2  ;;  %p252_p2 = scmp.lt.s32.totalorder %s246_s2, %s246_s2 }
  0x10   :  { %225 = vmatpush3.bf16.msra.mxu0 %v224_v22 }
  0x11   :  { %226 = vmatprep.subr.bf16.mxu0 %v270_v3  ;;  %v24_v34 = vrot.slane %v23_v29, 1  ;;  %v31_v35 = vrot.slane %v30_v30, 1  ;;  %p253_p3 = por %p252_p2, %p251_p1 }
  0x13   :  { %v25_v39 = vadd.f32 %v24_v34, %v23_v29  ;;  %v32_v40 = vadd.f32 %v31_v35, %v30_v30  ;;  %p254_p4 = pnand %p253_p3, %p247_p0 }
  0x14   :  { %228 = vmatpush3.bf16.msra.mxu0 %v227_v28 }
  0x15   :  { %229 = vmatprep.subr.bf16.mxu0 %v270_v3  ;;  %v34_v44 = vmul.f32 0.0625, %v25_v39  ;;  %v35_v45 = vmul.f32 0.0625, %v32_v40 }
  0x17   :  { %v62_v46 = vsel %vm61_vm1, %v35_v45, %v34_v44 }
  0x18   :  { %231 = vmatpush3.bf16.msra.mxu0 %v230_v33 }
  0x19   :  { %232 = vmatprep.subr.bf16.mxu0 %v270_v3 }
  0x1c   :  { %234 = vmatpush3.bf16.msra.mxu0 %v233_v38 }
  0x1d   :  { %235 = vmatprep.subr.bf16.mxu0 %v270_v3 }
  0x20   :  { %237 = vmatpush3.bf16.msra.mxu0 %v236_v43 }
  0x23   :  { %212 = vmatmul.mubr.f32.vlgmr.msra.gmra.mrb[0].mxu0 %v62_v46 }
  0xf6   :  { %v130_v48 = vpop.f32.mrb[0].mxu0 }
  0xf7   :  { %v131_v49 = vadd.f32 %v161_v47, %v130_v48  ;;  %v213_v50 = vpop.f32.mrb[1].mxu0 }
  0xf9   :  { %v135_v51 = vsel %vm134_vm2, %v131_v49, -inf }
  0xfa   :  { %136 = vmax.xlane.f32.xlu0 %v135_v51 }
 0x187   :  { %v137_v52 = vpop.xlane.xlu0 %136 }
 0x188   :  { %v138_v53 = vsub.f32 %v131_v49, %v137_v52 }
 0x18a   :  { %v139_v54 = vmul.f32 1.442695, %v138_v53 }
 0x18c   :  { %242 = vpow2.f32 %v139_v54 }
 0x196   :  { %v243_v55 = vpop.eup %242 }
 0x197   :  { %v141_v56 = vsel %vm134_vm2, %v243_v55, 0.0 }
 0x198   :  { %142 = vadd.xlane.f32.xlu0 %v141_v56 }
 0x225   :  { %v143_v57 = vpop.xlane.xlu0 %142 }
 0x226   :  { %244 = vrcp.f32 %v143_v57 }
 0x230   :  { %v245_v58 = vpop.eup %244 }
 0x231   :  { %v145_v59 = vmul.f32 %v245_v58, %v243_v55 }
 0x233   :  { %146 = vst.msk [vmem:[#allocation2] sm:$0x3] %vm134_vm2, %v145_v59 }
 0x234   :  { %257 = shalt.err (!%p254_p4)
}
 0x235   :  { %s258_s29 = scalar_lea.hbm %s375_s3, 32 }
 0x236   :  { %p259_p5 = scmp.ne.s32.totalorder %s375_s3, %s258_s29  ;;  %p262_p6 = scmp.lt.u32.totalorder %s258_s29, %s375_s3 }
 0x238   :  { %p264_p7 = pnand %p262_p6, %p259_p5 }
 0x23a   :  { %267 = shalt.err (!%p264_p7)
}
 0x23b   :  { %156 = dma.vmem_to_hbm [thread:$0]  %s154_s26, 32, %s375_s3, [#allocation3]  }
 0x23c   :  { %268 = dma.done.wait [#allocation3], 32  }
 0x23d   :  { %269 = vsyncadd [#allocation3], 4294967264 }
 0x23e   :  { %160 = vsyncpa [#allocation3], 1 }

</bundles_post_ra>
